<compile_context>
chip_gen: v7x
topology: tpu7x:2x2x1
jax: 0.10.0
libtpu: 0.0.40
codegen_flags: <defaults>
</compile_context>

<pallas_src>
import numpy as np
import jax
import jax.numpy as jnp
from jax import lax
from jax.experimental import pallas as pl
from jax.experimental.pallas import tpu as pltpu

N_WIRES = 7
DIM = 2 ** N_WIRES          # 128 -> exactly one lane group
N_LAYERS = 3
BATCH = 512                 # demo batch (2 grid steps at TB=256)
TB = 256                    # batch tile: >=256 keeps v6e/v7x MXU rows busy


# ----------------------------------------------------------------------------
# Pallas kernel: embedding -> apply circuit unitary -> PauliZ expectations
# ----------------------------------------------------------------------------
def qcircuit_kernel(ang_ref, ut_ref, zsign_ref, out_ref):
    tb, n_wires = ang_ref.shape
    dim = ut_ref.shape[0]

    # Hoisted transcendentals: one cos pass + one sin pass over (tb, n_wires).
    half = ang_ref[...] * 0.5
    c = jnp.cos(half)                                   # (tb, n_wires) f32  EUP
    sn = jnp.sin(half)                                  # (tb, n_wires) f32  EUP

    # Basis-state index along the lane axis (static bit pattern per wire).
    s = lax.broadcasted_iota(jnp.int32, (1, dim), 1)    # (1, dim)

    # AngleEmbedding (RY) product state, wire 0 = most-significant bit:
    #   psi_b[s] = prod_w (cos(x_bw/2) if bit_w(s)==0 else sin(x_bw/2))
    psi = None
    for w in range(n_wires):                            # static 7-iteration loop (VPU)
        bit = ((s >> (n_wires - 1 - w)) & 1).astype(jnp.float32)   # (1, dim)
        cw = c[:, w:w + 1]                                          # (tb, 1)
        sw = sn[:, w:w + 1]                                         # (tb, 1)
        factor = cw + bit * (sw - cw)                               # (tb, dim)
        psi = factor if psi is None else psi * factor

    # |phi_b> = U |psi_b>  (UT = U^T resident in VMEM) — MXU, bf16 in / f32 acc.
    phi = jnp.dot(psi.astype(jnp.bfloat16), ut_ref[...],
                  preferred_element_type=jnp.float32)               # (tb, dim) f32

    # <Z_w> = sum_s |phi_s|^2 * (+/-1); zsign is zero-padded to (dim, dim) so
    # the output block is lane-dense (unmasked full-lane stores).
    probs = phi * phi                                               # (tb, dim) f32 VPU
    out_ref[...] = jnp.dot(probs.astype(jnp.bfloat16), zsign_ref[...],
                           preferred_element_type=jnp.float32)


def run_qcircuit(angles, ut_bf16, zsign_bf16, *, tb=TB):
    """angles: (B, n_wires) f32; ut_bf16: (dim, dim) bf16 (= U^T);
    zsign_bf16: (dim, dim) bf16 (cols >= n_wires are zero). Returns (B, n_wires) f32."""
    B, n_wires = angles.shape
    dim = ut_bf16.shape[0]

    # Pad the batch so every grid step sees a full (tb, n_wires) tile.
    b_pad = ((B + tb - 1) // tb) * tb
    if b_pad != B:
        angles = jnp.pad(angles, ((0, b_pad - B), (0, 0)))
    grid = (b_pad // tb,)

    cost = pl.CostEstimate(
        flops=2 * 2 * b_pad * dim * dim,                 # two (tb,dim)x(dim,dim) matmuls
        transcendentals=2 * b_pad * n_wires,             # one sin + one cos per angle
        bytes_accessed=(b_pad * n_wires * 4              # angles in
                        + 2 * dim * dim * 2              # UT + zsign (bf16, resident)
                        + b_pad * dim * 4),              # lane-dense f32 output
    )

    out = pl.pallas_call(
        qcircuit_kernel,
        out_shape=jax.ShapeDtypeStruct((b_pad, dim), jnp.float32),
        grid_spec=pltpu.PrefetchScalarGridSpec(
            num_scalar_prefetch=0,
            grid=grid,
            in_specs=[
                pl.BlockSpec((tb, n_wires), lambda i: (i, 0)),   # per-tile angles
                pl.BlockSpec((dim, dim), lambda i: (0, 0)),      # UT: resident
                pl.BlockSpec((dim, dim), lambda i: (0, 0)),      # zsign: resident
            ],
            out_specs=pl.BlockSpec((tb, dim), lambda i: (i, 0)),
        ),
        compiler_params=pltpu.CompilerParams(
            dimension_semantics=("parallel",)),          # megacore / 2-TC sharding
        cost_estimate=cost,
    )(angles, ut_bf16, zsign_bf16)

    return out[:B, :n_wires]


# ----------------------------------------------------------------------------
# Plain-JAX parameter setup (glue): build the fixed circuit unitary & Z table
# ----------------------------------------------------------------------------
def _ry(theta):
    c, s = jnp.cos(theta / 2.0), jnp.sin(theta / 2.0)
    return jnp.array([[c, -s], [s, c]], jnp.float32)


def _kron_all(mats):
    out = mats[0]
    for m in mats[1:]:
        out = jnp.kron(out, m)
    return out


def _cnot_matrix(control, target, n_wires):
    dim = 2 ** n_wires
    j = jnp.arange(dim)
    ctrl_bit = (j >> (n_wires - 1 - control)) & 1
    i = j ^ (ctrl_bit << (n_wires - 1 - target))   # flip target bit iff control set
    return jnp.zeros((dim, dim), jnp.float32).at[i, j].set(1.0)


def build_circuit_unitary(weights, n_wires):
    """BasicEntanglerLayers(rotation=RY): per layer, RY on every wire then CNOT ring."""
    dim = 2 ** n_wires
    u = jnp.eye(dim, dtype=jnp.float32)
    for layer in range(weights.shape[0]):
        rot = _kron_all([_ry(weights[layer, w]) for w in range(n_wires)])
        u = rot @ u
        for w in range(n_wires):
            u = _cnot_matrix(w, (w + 1) % n_wires, n_wires) @ u
    return u


def build_zsign_padded(n_wires, dim):
    """(dim, dim) table; column w (< n_wires) = PauliZ eigenvalue of basis state,
    remaining columns zero (lane-dense output padding)."""
    s = np.arange(dim)
    z = np.zeros((dim, dim), np.float32)
    for w in range(n_wires):
        z[:, w] = 1.0 - 2.0 * ((s >> (n_wires - 1 - w)) & 1)
    return jnp.asarray(z)


# Reference (pure JAX, f32) forward, used to sanity-check the kernel.
def reference_forward(x_flat, ut_f32, zsign_f32, n_wires):
    B = x_flat.shape[0]
    dim = ut_f32.shape[0]
    s = np.arange(dim)
    psi = jnp.ones((B, dim), jnp.float32)
    for w in range(n_wires):
        bit = jnp.asarray((s >> (n_wires - 1 - w)) & 1)
        half = x_flat[:, w:w + 1] * 0.5
        psi = psi * jnp.where(bit == 1, jnp.sin(half), jnp.cos(half))
    phi = psi @ ut_f32
    return (phi * phi) @ zsign_f32


if __name__ == "__main__":
    key = jax.random.PRNGKey(0)
    k_x, k_w = jax.random.split(key)

    # NCHW-style input; DefaultReshaper flattens to (batch, n_wires).
    x = jax.random.uniform(k_x, (BATCH, N_WIRES, 1, 1), jnp.float32,
                           minval=0.0, maxval=np.pi)
    x_flat = x.reshape(x.shape[0], -1)                      # DefaultReshaper._flatten

    # qml.qnn.TorchLayer default init: uniform(0, 2*pi) over weight_shapes.
    weights = jax.random.uniform(k_w, (N_LAYERS, N_WIRES), jnp.float32,
                                 minval=0.0, maxval=2.0 * np.pi)

    u = build_circuit_unitary(weights, N_WIRES)             # (dim, dim) f32
    ut_f32 = jnp.asarray(u.T, jnp.float32)                  # psi @ U^T == U |psi>
    ut_bf16 = ut_f32.astype(jnp.bfloat16)                   # half-size resident tile
    zsign_pad = build_zsign_padded(N_WIRES, DIM)            # (dim, dim) f32
    zsign_bf16 = zsign_pad.astype(jnp.bfloat16)             # +/-1 and 0: exact in bf16

    out = run_qcircuit(x_flat, ut_bf16, zsign_bf16)
    out = jax.block_until_ready(out)

    ref = jax.block_until_ready(
        reference_forward(x_flat, ut_f32, zsign_pad[:, :N_WIRES], N_WIRES))

    # bf16 matmul operands (f32 accumulate) -> ~1e-3 level error on <Z> in [-1, 1].
    if not np.allclose(np.asarray(out), np.asarray(ref), atol=1e-2, rtol=1e-2):
        err = float(np.max(np.abs(np.asarray(out) - np.asarray(ref))))
        raise AssertionError(f"Pallas kernel mismatch vs reference (max err {err})")

    print("KERNEL_OK")
</pallas_src>

<mosaic_0001>
module attributes {stable_mosaic.version = 11 : i64} {
  func.func @qcircuit_kernel(%arg0: i32, %arg1: memref<256x7xf32, #tpu.memory_space<vmem>>, %arg2: memref<128x128xbf16, #tpu.memory_space<vmem>>, %arg3: memref<128x128xbf16, #tpu.memory_space<vmem>>, %arg4: memref<256x128xf32, #tpu.memory_space<vmem>>) attributes {dimension_semantics = [#tpu.dimension_semantics<parallel>], iteration_bounds = array<i64: 2>, scalar_prefetch = 0 : i64, scratch_operands = 0 : i64, tpu.core_type = #tpu.core_type<tc>, window_params = [{transform_indices = @transform_0, window_bounds = array<i64: 256, 7>}, {pipeline_mode = #tpu.pipeline_mode<synchronous>, transform_indices = @transform_1, window_bounds = array<i64: 128, 128>}, {pipeline_mode = #tpu.pipeline_mode<synchronous>, transform_indices = @transform_2, window_bounds = array<i64: 128, 128>}, {transform_indices = @transform_3, window_bounds = array<i64: 256, 128>}]} {
    %c0 = arith.constant 0 : index
    %c0_0 = arith.constant 0 : index
    %0 = vector.load %arg1[%c0, %c0_0] : memref<256x7xf32, #tpu.memory_space<vmem>>, vector<256x7xf32>
    %cst = arith.constant 5.000000e-01 : f32
    %1 = vector.broadcast %cst : f32 to vector<256x7xf32>
    %2 = arith.mulf %0, %1 : vector<256x7xf32>
    %3 = math.cos %2 : vector<256x7xf32>
    %4 = math.sin %2 : vector<256x7xf32>
    %5 = tpu.iota {dimensions = array<i32: 1>} : vector<1x128xi32>
    %c6_i32 = arith.constant 6 : i32
    %6 = vector.broadcast %c6_i32 : i32 to vector<1x128xi32>
    %7 = arith.shrsi %5, %6 : vector<1x128xi32>
    %c1_i32 = arith.constant 1 : i32
    %8 = vector.broadcast %c1_i32 : i32 to vector<1x128xi32>
    %9 = arith.andi %7, %8 : vector<1x128xi32>
    %10 = arith.sitofp %9 : vector<1x128xi32> to vector<1x128xf32>
    %11 = vector.extract_strided_slice %3 {offsets = [0, 0], sizes = [256, 1], strides = [1, 1]} : vector<256x7xf32> to vector<256x1xf32>
    %12 = vector.extract_strided_slice %4 {offsets = [0, 0], sizes = [256, 1], strides = [1, 1]} : vector<256x7xf32> to vector<256x1xf32>
    %13 = arith.subf %12, %11 : vector<256x1xf32>
    %14 = vector.broadcast %10 : vector<1x128xf32> to vector<256x128xf32>
    %15 = vector.broadcast %13 : vector<256x1xf32> to vector<256x128xf32>
    %16 = arith.mulf %14, %15 : vector<256x128xf32>
    %17 = vector.broadcast %11 : vector<256x1xf32> to vector<256x128xf32>
    %18 = arith.addf %17, %16 : vector<256x128xf32>
    %c5_i32 = arith.constant 5 : i32
    %19 = vector.broadcast %c5_i32 : i32 to vector<1x128xi32>
    %20 = arith.shrsi %5, %19 : vector<1x128xi32>
    %c1_i32_1 = arith.constant 1 : i32
    %21 = vector.broadcast %c1_i32_1 : i32 to vector<1x128xi32>
    %22 = arith.andi %20, %21 : vector<1x128xi32>
    %23 = arith.sitofp %22 : vector<1x128xi32> to vector<1x128xf32>
    %24 = vector.extract_strided_slice %3 {offsets = [0, 1], sizes = [256, 1], strides = [1, 1]} : vector<256x7xf32> to vector<256x1xf32>
    %25 = vector.extract_strided_slice %4 {offsets = [0, 1], sizes = [256, 1], strides = [1, 1]} : vector<256x7xf32> to vector<256x1xf32>
    %26 = arith.subf %25, %24 : vector<256x1xf32>
    %27 = vector.broadcast %23 : vector<1x128xf32> to vector<256x128xf32>
    %28 = vector.broadcast %26 : vector<256x1xf32> to vector<256x128xf32>
    %29 = arith.mulf %27, %28 : vector<256x128xf32>
    %30 = vector.broadcast %24 : vector<256x1xf32> to vector<256x128xf32>
    %31 = arith.addf %30, %29 : vector<256x128xf32>
    %32 = arith.mulf %18, %31 : vector<256x128xf32>
    %c4_i32 = arith.constant 4 : i32
    %33 = vector.broadcast %c4_i32 : i32 to vector<1x128xi32>
    %34 = arith.shrsi %5, %33 : vector<1x128xi32>
    %c1_i32_2 = arith.constant 1 : i32
    %35 = vector.broadcast %c1_i32_2 : i32 to vector<1x128xi32>
    %36 = arith.andi %34, %35 : vector<1x128xi32>
    %37 = arith.sitofp %36 : vector<1x128xi32> to vector<1x128xf32>
    %38 = vector.extract_strided_slice %3 {offsets = [0, 2], sizes = [256, 1], strides = [1, 1]} : vector<256x7xf32> to vector<256x1xf32>
    %39 = vector.extract_strided_slice %4 {offsets = [0, 2], sizes = [256, 1], strides = [1, 1]} : vector<256x7xf32> to vector<256x1xf32>
    %40 = arith.subf %39, %38 : vector<256x1xf32>
    %41 = vector.broadcast %37 : vector<1x128xf32> to vector<256x128xf32>
    %42 = vector.broadcast %40 : vector<256x1xf32> to vector<256x128xf32>
    %43 = arith.mulf %41, %42 : vector<256x128xf32>
    %44 = vector.broadcast %38 : vector<256x1xf32> to vector<256x128xf32>
    %45 = arith.addf %44, %43 : vector<256x128xf32>
    %46 = arith.mulf %32, %45 : vector<256x128xf32>
    %c3_i32 = arith.constant 3 : i32
    %47 = vector.broadcast %c3_i32 : i32 to vector<1x128xi32>
    %48 = arith.shrsi %5, %47 : vector<1x128xi32>
    %c1_i32_3 = arith.constant 1 : i32
    %49 = vector.broadcast %c1_i32_3 : i32 to vector<1x128xi32>
    %50 = arith.andi %48, %49 : vector<1x128xi32>
    %51 = arith.sitofp %50 : vector<1x128xi32> to vector<1x128xf32>
    %52 = vector.extract_strided_slice %3 {offsets = [0, 3], sizes = [256, 1], strides = [1, 1]} : vector<256x7xf32> to vector<256x1xf32>
    %53 = vector.extract_strided_slice %4 {offsets = [0, 3], sizes = [256, 1], strides = [1, 1]} : vector<256x7xf32> to vector<256x1xf32>
    %54 = arith.subf %53, %52 : vector<256x1xf32>
    %55 = vector.broadcast %51 : vector<1x128xf32> to vector<256x128xf32>
    %56 = vector.broadcast %54 : vector<256x1xf32> to vector<256x128xf32>
    %57 = arith.mulf %55, %56 : vector<256x128xf32>
    %58 = vector.broadcast %52 : vector<256x1xf32> to vector<256x128xf32>
    %59 = arith.addf %58, %57 : vector<256x128xf32>
    %60 = arith.mulf %46, %59 : vector<256x128xf32>
    %c2_i32 = arith.constant 2 : i32
    %61 = vector.broadcast %c2_i32 : i32 to vector<1x128xi32>
    %62 = arith.shrsi %5, %61 : vector<1x128xi32>
    %c1_i32_4 = arith.constant 1 : i32
    %63 = vector.broadcast %c1_i32_4 : i32 to vector<1x128xi32>
    %64 = arith.andi %62, %63 : vector<1x128xi32>
    %65 = arith.sitofp %64 : vector<1x128xi32> to vector<1x128xf32>
    %66 = vector.extract_strided_slice %3 {offsets = [0, 4], sizes = [256, 1], strides = [1, 1]} : vector<256x7xf32> to vector<256x1xf32>
    %67 = vector.extract_strided_slice %4 {offsets = [0, 4], sizes = [256, 1], strides = [1, 1]} : vector<256x7xf32> to vector<256x1xf32>
    %68 = arith.subf %67, %66 : vector<256x1xf32>
    %69 = vector.broadcast %65 : vector<1x128xf32> to vector<256x128xf32>
    %70 = vector.broadcast %68 : vector<256x1xf32> to vector<256x128xf32>
    %71 = arith.mulf %69, %70 : vector<256x128xf32>
    %72 = vector.broadcast %66 : vector<256x1xf32> to vector<256x128xf32>
    %73 = arith.addf %72, %71 : vector<256x128xf32>
    %74 = arith.mulf %60, %73 : vector<256x128xf32>
    %c1_i32_5 = arith.constant 1 : i32
    %75 = vector.broadcast %c1_i32_5 : i32 to vector<1x128xi32>
    %76 = arith.shrsi %5, %75 : vector<1x128xi32>
    %c1_i32_6 = arith.constant 1 : i32
    %77 = vector.broadcast %c1_i32_6 : i32 to vector<1x128xi32>
    %78 = arith.andi %76, %77 : vector<1x128xi32>
    %79 = arith.sitofp %78 : vector<1x128xi32> to vector<1x128xf32>
    %80 = vector.extract_strided_slice %3 {offsets = [0, 5], sizes = [256, 1], strides = [1, 1]} : vector<256x7xf32> to vector<256x1xf32>
    %81 = vector.extract_strided_slice %4 {offsets = [0, 5], sizes = [256, 1], strides = [1, 1]} : vector<256x7xf32> to vector<256x1xf32>
    %82 = arith.subf %81, %80 : vector<256x1xf32>
    %83 = vector.broadcast %79 : vector<1x128xf32> to vector<256x128xf32>
    %84 = vector.broadcast %82 : vector<256x1xf32> to vector<256x128xf32>
    %85 = arith.mulf %83, %84 : vector<256x128xf32>
    %86 = vector.broadcast %80 : vector<256x1xf32> to vector<256x128xf32>
    %87 = arith.addf %86, %85 : vector<256x128xf32>
    %88 = arith.mulf %74, %87 : vector<256x128xf32>
    %c0_i32 = arith.constant 0 : i32
    %89 = vector.broadcast %c0_i32 : i32 to vector<1x128xi32>
    %90 = arith.shrsi %5, %89 : vector<1x128xi32>
    %c1_i32_7 = arith.constant 1 : i32
    %91 = vector.broadcast %c1_i32_7 : i32 to vector<1x128xi32>
    %92 = arith.andi %90, %91 : vector<1x128xi32>
    %93 = arith.sitofp %92 : vector<1x128xi32> to vector<1x128xf32>
    %94 = vector.extract_strided_slice %3 {offsets = [0, 6], sizes = [256, 1], strides = [1, 1]} : vector<256x7xf32> to vector<256x1xf32>
    %95 = vector.extract_strided_slice %4 {offsets = [0, 6], sizes = [256, 1], strides = [1, 1]} : vector<256x7xf32> to vector<256x1xf32>
    %96 = arith.subf %95, %94 : vector<256x1xf32>
    %97 = vector.broadcast %93 : vector<1x128xf32> to vector<256x128xf32>
    %98 = vector.broadcast %96 : vector<256x1xf32> to vector<256x128xf32>
    %99 = arith.mulf %97, %98 : vector<256x128xf32>
    %100 = vector.broadcast %94 : vector<256x1xf32> to vector<256x128xf32>
    %101 = arith.addf %100, %99 : vector<256x128xf32>
    %102 = arith.mulf %88, %101 : vector<256x128xf32>
    %103 = arith.truncf %102 : vector<256x128xf32> to vector<256x128xbf16>
    %c0_8 = arith.constant 0 : index
    %c0_9 = arith.constant 0 : index
    %104 = vector.load %arg2[%c0_8, %c0_9] : memref<128x128xbf16, #tpu.memory_space<vmem>>, vector<128x128xbf16>
    %cst_10 = arith.constant dense<0.000000e+00> : vector<256x128xf32>
    %105 = tpu.matmul %103, %104, %cst_10 {dimension_numbers = #tpu.dot_dimension_numbers<[1], [0], [0], [1], [0, 0, 1, 1], [], []>} : vector<256x128xbf16>, vector<128x128xbf16>, vector<256x128xf32> -> vector<256x128xf32>
    %106 = arith.mulf %105, %105 : vector<256x128xf32>
    %107 = arith.truncf %106 : vector<256x128xf32> to vector<256x128xbf16>
    %c0_11 = arith.constant 0 : index
    %c0_12 = arith.constant 0 : index
    %108 = vector.load %arg3[%c0_11, %c0_12] : memref<128x128xbf16, #tpu.memory_space<vmem>>, vector<128x128xbf16>
    %cst_13 = arith.constant dense<0.000000e+00> : vector<256x128xf32>
    %109 = tpu.matmul %107, %108, %cst_13 {dimension_numbers = #tpu.dot_dimension_numbers<[1], [0], [0], [1], [0, 0, 1, 1], [], []>} : vector<256x128xbf16>, vector<128x128xbf16>, vector<256x128xf32> -> vector<256x128xf32>
    %c0_14 = arith.constant 0 : index
    %c0_15 = arith.constant 0 : index
    %110 = vector.load %arg4[%c0_14, %c0_15] : memref<256x128xf32, #tpu.memory_space<vmem>>, vector<256x128xf32>
    tpu.vector_store %arg4[%c0_14, %c0_15], %109 {strides = array<i32>} : memref<256x128xf32, #tpu.memory_space<vmem>>, vector<256x128xf32>,
    return
  }
  func.func @transform_0(%arg0: i32) -> (i32, i32) {
    %c0_i32 = arith.constant 0 : i32
    %c0_i32_0 = arith.constant 0 : i32
    return %arg0, %c0_i32 : i32, i32
  }
  func.func @transform_1(%arg0: i32) -> (i32, i32) {
    %c0_i32 = arith.constant 0 : i32
    %c0_i32_0 = arith.constant 0 : i32
    %c0_i32_1 = arith.constant 0 : i32
    return %c0_i32, %c0_i32_0 : i32, i32
  }
  func.func @transform_2(%arg0: i32) -> (i32, i32) {
    %c0_i32 = arith.constant 0 : i32
    %c0_i32_0 = arith.constant 0 : i32
    %c0_i32_1 = arith.constant 0 : i32
    return %c0_i32, %c0_i32_0 : i32, i32
  }
  func.func @transform_3(%arg0: i32) -> (i32, i32) {
    %c0_i32 = arith.constant 0 : i32
    %c0_i32_0 = arith.constant 0 : i32
    return %arg0, %c0_i32 : i32, i32
  }
}

</mosaic_0001>

<bundles_post_ra>
// kernel: tpu_custom_call.1
= control target key start
LH: loop header
LB: loop body
LE: loop exit
PB: predicated region body
PF: predicated region fallthrough
CT: control target
= control target key end

     0   :  { %8 = vsyncpa [#allocation3], 0  ;;  %s16610_s0 = inlined_call_operand.vmem [shape: f32[512,7], index: 0, kind: input, shape index: {}]   ;;  %s16611_s1 = inlined_call_operand.vmem [shape: bf16[128,128], index: 1, kind: input, shape index: {}]   ;;  %s16612_s2 = inlined_call_operand.vmem [shape: bf16[128,128], index: 2, kind: input, shape index: {}]   ;;  %s16613_s3 = inlined_call_operand.hbm [shape: f32[512,128], index: 3, kind: output, shape index: {}]  }
   0x1   :  { %10 = vsyncpa [#allocation3 + $0x1], 0  ;;  %s10943_s12 = smov 0   ;;  %s10945_s13 = smov 0  }
   0x2   :  { %s10947_s14 = smov 0   ;;  %s10949_s15 = smov 0  }
   0x3 LB: > { %s10964_s16 = sadd.s32 4294967295, %s10905_s15   ;;  %s10033_s17 = sadd.s32 4294967294, %s10905_s15   ;;  %s10905_s15 = sphi %s10949_s15, %s17711_s15   ;;  %s10901_s14 = sphi %s10947_s14, %s17710_s14   ;;  %s10897_s13 = sphi %s10945_s13, %s17709_s13   ;;  %s10893_s12 = sphi %s10943_s12, %s17708_s12  }
   0x4   : > { %s10968_s18 = sadd.s32 1, %s10905_s15   ;;  %s91_s19 = sadd.s32 1, %s10901_s14 }
   0x5   : > { %s88_s20 = ssub.s32 %s10905_s15, %s10968_s18  ;;  %p101_p0 = scmp.ne.s32.totalorder %s10901_s14, %s10897_s13 }
   0x6   : > { %p89_p1 = scmp.eq.s32.totalorder %s88_s20, 0  ;;  %p102_p2 = scmp.eq.s32.totalorder %s10964_s16, 1 }
   0x7   : > { %p107_p3 = scmp.ne.s32.totalorder %s10897_s13, %s10893_s12  ;;  %p108_p4 = scmp.eq.s32.totalorder %s10033_s17, 1 }
   0x8   : > { %s10979_s21 = scalar_select %p89_p1, %s10901_s14, %s91_s19  }
   0x9   : > { %p10981_p5 = por %p102_p2, %p101_p0  ;;  %p10985_p6 = por %p108_p4, %p107_p3 }
   0xa   : > { %p10036_p7 = scmp.ge.s32.totalorder %s10905_s15, 1  ;;  %p141_p8 = scmp.lt.s32.totalorder %s10905_s15, 3 }
   0xc   : > { %p142_p9 = pnand %p10036_p7, %p141_p8 }
   0xe   : > { %145 = sbr.rel (%p142_p9) target bundleno = 2401 (0x961), region = 32 }
  0x15   : > { %s10038_s24 = sshll.u32 %s10964_s16, 5  ;;  %v10907_v0 = vmov 0   ;;  %v16627_v34 = vmov 683565275   ;;  %v16620_v36 = vmov 2475754826  }
  0x16   : > { %10645 = vset.pattern.permute.xlu1 %v10907_v0  ;;  %10644 = vset.pattern.permute.xlu0 %v10907_v0  ;;  %p166_p10 = scmp.lt.s32.totalorder %s10038_s24, 63  ;;  %v16615_v38 = vmov 2131351028   ;;  %v16618_v40 = vmov 2102212464   ;;  %s10920_s7 = smov [#allocation2]  }
  0x17   : > { %v16623_v42 = vmov 920167782   ;;  %v16625_v49 = vmov 1326507024   ;;  %s10847_s8 = sshll.u32 %s10920_s7, 4  ;;  %s10848_s8 = int_to_ptr.vmem [resolvable:$false] %s10847_s8 }
  0x18   : > { %s17713_s24 = smov (!%p166_p10, %s10038_s24), 63  ;;  %s10849_s9 = scalar_lea.vmem %s10848_s8, 8192 }
  0x19   : > { %s10039_s25 = sshll.u32 %s17713_s24, 3 }
  0x1a   : > { %s10995_s28 = scalar_lea.vmem %s16610_s0, %s10039_s25  ;;  %s162_s25 = sand.u32 1, %s10897_s13  }
  0x1b   : > { %v174_v1 = vld [vmem:[%s10995_s28 + $0x8] sm:$0xff]  ;;  %v173_v2 = vld [vmem:[%s10995_s28] sm:$0xff]  ;;  %v176_v3 = vld [vmem:[%s10995_s28 + $0x18] sm:$0xff]  ;;  %s10037_s26 = sshll.u32 %s162_s25, 8 }
  0x1c   : > { %v11000_v4 = vmul.f32 0.5, %v174_v1  ;;  %v11002_v5 = vmul.f32 0.5, %v173_v2  ;;  %v11004_v6 = vmul.f32 0.5, %v176_v3  ;;  %s16524_s27 = scalar_lea.vmem [#allocation2], %s10037_s26 }
  0x1d   : > { %s9971_s29 = sshll.u32 %s16524_s27, 4  ;;  %s16562_s29 = int_to_ptr.vmem [resolvable:$true] %s9971_s29 }
  0x1e   : > { %v340_v7 = vand.u32 2147483647, %v11000_v4  ;;  %v343_v8 = vand.u32 2139095040, %v11000_v4  ;;  %v237_v9 = vand.u32 2147483647, %v11002_v5  ;;  %v240_v10 = vand.u32 2139095040, %v11002_v5  ;;  %p10850_p0 = scmp.lt.s32.totalorder %s16562_s29, %s10848_s8 }
  0x1f   : > { %v549_v15 = vand.u32 2139095040, %v11004_v6  ;;  %vm342_vm15 = vcmp.lt.s32.totalorder %v11000_v4, 0  ;;  %s10843_s6 = scalar_lea.vmem %s16562_s29, 4096 }
  0x20   : > { %v344_v11 = vshrl.u32 %v343_v8, 23  ;;  %v347_v12 = vand.u32 8388607, %v340_v7  ;;  %v241_v13 = vshrl.u32 %v240_v10, 23  ;;  %v244_v14 = vand.u32 8388607, %v237_v9  ;;  %p10844_p11 = scmp.ne.s32.totalorder %s16562_s29, %s10843_s6  ;;  %p10851_p1 = scmp.lt.s32.totalorder %s10849_s9, %s10843_s6 }
  0x21   : > { %v550_v18 = vshrl.u32 %v549_v15, 23 }
  0x22   : > { %v10044_v16 = vadd.s32 4294967169, %v344_v11  ;;  %v10040_v17 = vadd.s32 4294967169, %v241_v13  ;;  %v348_v19 = vor.u32 8388608, %v347_v12  ;;  %v245_v21 = vor.u32 8388608, %v244_v14  ;;  %p10845_p12 = pnand %p10844_p11, %p10981_p5  ;;  %p10852_p2 = por %p10851_p1, %p10850_p0 }
  0x23   : > { %v10052_v23 = vadd.s32 4294967169, %v550_v18 }
  0x24   : > { %v350_v20 = vadd.s32 1, %v10044_v16  ;;  %v247_v22 = vadd.s32 1, %v10040_v17  ;;  %v11015_v27 = vshll.u32 %v348_v19, 8  ;;  %v11019_v31 = vshll.u32 %v245_v21, 8  ;;  %p10846_p13 = pneg %p10845_p12 }
  0x25   : > { %v11021_v32 = vadd.s32 1, %v10052_v23 }
  0x26   : > { %vm351_vm0 = vcmp.gt.s32.totalorder %v350_v20, 0  ;;  %vm248_vm1 = vcmp.gt.s32.totalorder %v247_v22, 0  ;;  %p10853_p3 = pnand %p10852_p2, %p10846_p13 }
  0x27   : > { %v352_v24 = vsel %vm351_vm0, %v350_v20, 0  ;;  %v249_v28 = vsel %vm248_vm1, %v247_v22, 0  ;;  %vm557_vm6 = vcmp.gt.s32.totalorder %v11021_v32, 0 }
  0x28   : > { %v353_v25 = vshrl.u32 %v352_v24, 5  ;;  %v354_v26 = vand.u32 31, %v352_v24  ;;  %v11017_v29 = vshrl.u32 %v249_v28, 5  ;;  %v251_v30 = vand.u32 31, %v249_v28 }
  0x2a   : > { %v355_v33 = vsub.s32 32, %v354_v26  ;;  %v357_v35 = vshll.u32 %v16627_v34, %v354_v26  ;;  %v360_v37 = vshll.u32 %v16620_v36, %v354_v26  ;;  %v363_v39 = vshll.u32 %v16615_v38, %v354_v26 }
  0x2b   : > { %v366_v41 = vshll.u32 %v16618_v40, %v354_v26  ;;  %v369_v43 = vshll.u32 %v16623_v42, %v354_v26  ;;  %vm372_vm2 = vcmp.lt.s32.totalorder %v353_v25, 1  ;;  %vm373_vm3 = vcmp.lt.s32.totalorder %v353_v25, 2 }
  0x2c   : > { %v356_v44 = vshrl.u32 %v16627_v34, %v355_v33  ;;  %v358_v45 = vshrl.u32 %v16620_v36, %v355_v33  ;;  %v361_v46 = vshrl.u32 %v16615_v38, %v355_v33  ;;  %v364_v47 = vshrl.u32 %v16618_v40, %v355_v33 }
  0x2d   : > { %v367_v48 = vshrl.u32 %v16623_v42, %v355_v33  ;;  %v370_v50 = vshrl.u32 %v16625_v49, %v355_v33  ;;  %vm374_vm4 = vcmp.lt.s32.totalorder %v353_v25, 3  ;;  %vm375_vm5 = vcmp.lt.s32.totalorder %v353_v25, 4 }
  0x2e   : > { %v359_v51 = vor.u32 %v358_v45, %v357_v35  ;;  %v362_v52 = vor.u32 %v361_v46, %v360_v37  ;;  %v365_v53 = vor.u32 %v364_v47, %v363_v39  ;;  %v252_v54 = vsub.s32 32, %v251_v30 }
  0x2f   : > { %v368_v55 = vor.u32 %v367_v48, %v366_v41  ;;  %v371_v56 = vor.u32 %v370_v50, %v369_v43  ;;  %v254_v57 = vshll.u32 %v16627_v34, %v251_v30  ;;  %v257_v1 = vshll.u32 %v16620_v36, %v251_v30 }
  0x30   : > { %v376_v58 = vsel %vm372_vm2, %v356_v44, %v359_v51  ;;  %v377_v59 = vsel %vm375_vm5, %v365_v53, 2102212464  ;;  %v380_v60 = vsel %vm372_vm2, %v359_v51, %v362_v52  ;;  %v384_v61 = vsel %vm372_vm2, %v362_v52, %v365_v53  ;;  %v175_v51 = vld [vmem:[%s10995_s28 + $0x10] sm:$0xff] }
  0x31   : > { %v378_v62 = vsel %vm374_vm4, %v362_v52, %v377_v59  ;;  %v381_v63 = vsel %vm375_vm5, %v368_v55, 920167782  ;;  %v385_v0 = vsel %vm375_vm5, %v371_v56, 1326507024  ;;  %v253_v8 = vshrl.u32 %v16627_v34, %v252_v54 }
  0x32   : > { %v382_v2 = vsel %vm374_vm4, %v365_v53, %v381_v63  ;;  %v386_v3 = vsel %vm374_vm4, %v368_v55, %v385_v0  ;;  %v255_v10 = vshrl.u32 %v16620_v36, %v252_v54  ;;  %v379_v11 = vsel %vm373_vm3, %v376_v58, %v378_v62 }
  0x33   : > { %v383_v12 = vsel %vm373_vm3, %v380_v60, %v382_v2  ;;  %v387_v13 = vsel %vm373_vm3, %v384_v61, %v386_v3  ;;  %v258_v14 = vshrl.u32 %v16615_v38, %v252_v54  ;;  %v260_v21 = vshll.u32 %v16615_v38, %v251_v30 }
  0x34   : > { %v11050_v15 = vmul.u32.u64.low %v11015_v27, %v387_v13  ;;  %v11051_v16 = vmul.u32.u64.high %v11015_v27, %v387_v13, %v11050_v15  ;;  %v11054_v17 = vmul.u32.u64.low %v11015_v27, %v383_v12  ;;  %v11055_v18 = vmul.u32.u64.high %v11015_v27, %v383_v12, %v11054_v17 }
  0x35   : > { %v256_v19 = vor.u32 %v255_v10, %v254_v57  ;;  %v259_v20 = vor.u32 %v258_v14, %v257_v1  ;;  %v261_v22 = vshrl.u32 %v16618_v40, %v252_v54  ;;  %v263_v23 = vshll.u32 %v16618_v40, %v251_v30 }
  0x36   : > { %v264_v24 = vshrl.u32 %v16623_v42, %v252_v54  ;;  %v266_v25 = vshll.u32 %v16623_v42, %v251_v30  ;;  %v267_v26 = vshrl.u32 %v16625_v49, %v252_v54  ;;  %v395_v28 = vmul.u32 %v11015_v27, %v379_v11 }
  0x37   : > { %v262_v33 = vor.u32 %v261_v22, %v260_v21  ;;  %vm269_vm7 = vcmp.lt.s32.totalorder %v11017_v29, 1  ;;  %vm270_vm8 = vcmp.lt.s32.totalorder %v11017_v29, 2  ;;  %vm397_vm9 = vc.u32 %v11051_v16, %v11054_v17 }
  0x38   : > { %v398_v35 = vadd.s32 1, %v11055_v18  ;;  %v265_v37 = vor.u32 %v264_v24, %v263_v23  ;;  %vm271_vm10 = vcmp.lt.s32.totalorder %v11017_v29, 3  ;;  %v268_v39 = vor.u32 %v267_v26, %v266_v25 }
  0x39   : > { %vm272_vm11 = vcmp.lt.s32.totalorder %v11017_v29, 4  ;;  %v273_v30 = vsel %vm269_vm7, %v253_v8, %v256_v19  ;;  %v277_v41 = vsel %vm269_vm7, %v256_v19, %v259_v20  ;;  %v281_v45 = vsel %vm269_vm7, %v259_v20, %v262_v33  ;;  %v178_v8 = vld [vmem:[%s10995_s28 + $0x28] sm:$0xff] }
  0x3a   : > { %v399_v27 = vsel %vm397_vm9, %v398_v35, %v11055_v18  ;;  %v274_v43 = vsel %vm272_vm11, %v262_v33, 2102212464  ;;  %v278_v44 = vsel %vm272_vm11, %v265_v37, 920167782  ;;  %v282_v50 = vsel %vm272_vm11, %v268_v39, 1326507024 }
  0x3b   : > { %v400_v46 = vadd.s32 %v399_v27, %v395_v28  ;;  %v275_v47 = vsel %vm271_vm10, %v259_v20, %v274_v43  ;;  %v279_v48 = vsel %vm271_vm10, %v262_v33, %v278_v44  ;;  %v283_v54 = vsel %vm271_vm10, %v265_v37, %v282_v50 }
  0x3c   : > { %v276_v52 = vsel %vm270_vm8, %v273_v30, %v275_v47  ;;  %v280_v53 = vsel %vm270_vm8, %v277_v41, %v279_v48  ;;  %v558_v55 = vsel %vm557_vm6, %v11021_v32, 0  ;;  %v284_v57 = vsel %vm270_vm8, %v281_v45, %v283_v54 }
  0x3d   : > { %v401_v56 = vadd.s32 536870912, %v400_v46  ;;  %v11090_v58 = vmul.u32.u64.low %v11019_v31, %v280_v53  ;;  %v11091_v59 = vmul.u32.u64.high %v11019_v31, %v280_v53, %v11090_v58  ;;  %v11098_v62 = vmul.f32 0.5, %v175_v51 }
  0x3e   : > { %v11095_v60 = vmul.u32.u64.low %v11019_v31, %v284_v57  ;;  %v11096_v61 = vmul.u32.u64.high %v11019_v31, %v284_v57, %v11095_v60  ;;  %v560_v0 = vand.u32 31, %v558_v55  ;;  %v292_v32 = vmul.u32 %v11019_v31, %v276_v52 }
  0x3f   : > { %v11100_v63 = vshrl.u32 %v401_v56, 30  ;;  %v295_v29 = vadd.s32 1, %v11091_v59  ;;  %v546_v2 = vand.u32 2147483647, %v11004_v6  ;;  %v446_v3 = vand.u32 2139095040, %v11098_v62 }
  0x40   : > { %vm294_vm12 = vc.u32 %v11096_v61, %v11090_v58  ;;  %v561_v12 = vsub.s32 32, %v560_v0  ;;  %v443_v15 = vand.u32 2147483647, %v11098_v62  ;;  %v11117_v18 = vmul.f32 0.5, %v178_v8 }
  0x41   : > { %v403_v1 = vshll.u32 %v11100_v63, 30  ;;  %v296_v11 = vsel %vm294_vm12, %v295_v29, %v11091_v59  ;;  %v553_v14 = vand.u32 8388607, %v546_v2  ;;  %v11119_v20 = vshrl.u32 %v558_v55, 5 }
  0x42   : > { %v297_v13 = vadd.s32 %v296_v11, %v292_v32  ;;  %v563_v21 = vshll.u32 %v16627_v34, %v560_v0  ;;  %v447_v22 = vshrl.u32 %v446_v3, 23  ;;  %v564_v24 = vshrl.u32 %v16620_v36, %v561_v12 }
  0x43   : > { %v11110_v10 = vsub.s32 %v400_v46, %v403_v1  ;;  %v566_v25 = vshll.u32 %v16620_v36, %v560_v0  ;;  %v567_v26 = vshrl.u32 %v16615_v38, %v561_v12  ;;  %v569_v33 = vshll.u32 %v16615_v38, %v560_v0 }
  0x44   : > { %v298_v19 = vadd.s32 536870912, %v297_v13  ;;  %v570_v35 = vshrl.u32 %v16618_v40, %v561_v12  ;;  %v572_v37 = vshll.u32 %v16618_v40, %v560_v0  ;;  %v396_v39 = vadd.s32 %v11054_v17, %v11051_v16 }
  0x45   : > { %v406_v31 = vsub.s32 0, %v11110_v10  ;;  %v554_v41 = vor.u32 8388608, %v553_v14  ;;  %v573_v27 = vshrl.u32 %v16623_v42, %v561_v12  ;;  %vm578_vm13 = vcmp.lt.s32.totalorder %v11119_v20, 1 }
  0x46   : > { %v11126_v28 = vshrl.u32 %v298_v19, 30  ;;  %vm581_vm14 = vcmp.lt.s32.totalorder %v11119_v20, 4  ;;  %v10048_v44 = vadd.s32 4294967169, %v447_v22  ;;  %v575_v47 = vshll.u32 %v16623_v42, %v560_v0 }
  0x47   : > { %v10045_v23 = vmin.u32 %v406_v31, %v11110_v10  ;;  %v574_v46 = vor.u32 %v573_v27, %v572_v37  ;;  %v576_v48 = vshrl.u32 %v16625_v49, %v561_v12  ;;  %v565_v17 = vor.u32 %v564_v24, %v563_v21 }
  0x48   : > { %v300_v43 = vshll.u32 %v11126_v28, 30  ;;  %v568_v50 = vor.u32 %v567_v26, %v566_v25  ;;  %v571_v51 = vor.u32 %v570_v35, %v569_v33  ;;  %v562_v52 = vshrl.u32 %v16627_v34, %v561_v12 }
  0x49   : > { %v408_v30 = vclz %v10045_v23  ;;  %vm580_vm1 = vcmp.lt.s32.totalorder %v11119_v20, 3  ;;  %v587_v53 = vsel %vm581_vm14, %v574_v46, 920167782  ;;  %vm579_vm2 = vcmp.lt.s32.totalorder %v11119_v20, 2 }
  0x4a   : > { %v11140_v16 = vsub.s32 %v297_v13, %v300_v43  ;;  %v583_v56 = vsel %vm581_vm14, %v571_v51, 2102212464  ;;  %v577_v0 = vor.u32 %v576_v48, %v575_v47  ;;  %v426_v32 = vsub.s32 4, %v11100_v63 }
  0x4b   : > { %v10046_v45 = vadd.s32 4294967294, %v408_v30  ;;  %v586_v29 = vsel %vm578_vm13, %v565_v17, %v568_v50  ;;  %v588_v3 = vsel %vm580_vm1, %v571_v51, %v587_v53  ;;  %vm11159_vm3 = vcmp.le.f32.partialorder %v340_v7, 0.7853982 }
  0x4c   : > { %v303_v55 = vsub.s32 0, %v11140_v16  ;;  %v582_v12 = vsel %vm578_vm13, %v562_v52, %v565_v17  ;;  %v584_v13 = vsel %vm580_vm1, %v568_v50, %v583_v56  ;;  %v293_v31 = vadd.s32 %v11090_v58, %v11096_v61 }
  0x4d   : > { %vm10047_vm0 = vcmp.lt.s32.totalorder %v10046_v45, 0  ;;  %v590_v19 = vsel %vm578_vm13, %v568_v50, %v571_v51  ;;  %v594_v21 = vshll.u32 %v554_v41, 8  ;;  %vm239_vm4 = vcmp.lt.s32.totalorder %v11002_v5, 0 }
  0x4e   : > { %v411_v54 = vsel %vm10047_vm0, 0, %v10046_v45  ;;  %v10041_v1 = vmin.u32 %v303_v55, %v11140_v16  ;;  %v589_v23 = vsel %vm579_vm2, %v586_v29, %v588_v3  ;;  %v591_v24 = vsel %vm581_vm14, %v577_v0, 1326507024 }
  0x4f   : > { %v412_v57 = vsub.s32 32, %v411_v54  ;;  %v413_v59 = vshll.u32 %v11110_v10, %v411_v54  ;;  %v416_v60 = vsub.s32 4294967266, %v411_v54  ;;  %v427_v25 = vsel %vm342_vm15, %v426_v32, %v11100_v63 }
  0x50   : > { %v305_v14 = vclz %v10041_v1  ;;  %v323_v61 = vsub.s32 4, %v11126_v28  ;;  %v585_v26 = vsel %vm579_vm2, %v582_v12, %v584_v13  ;;  %v592_v37 = vsel %vm580_vm1, %v574_v46, %v591_v24 }
  0x51   : > { %v414_v11 = vshrl.u32 %v396_v39, %v412_v57  ;;  %v417_v10 = vadd.s32 127, %v416_v60  ;;  %v453_v39 = vadd.s32 1, %v10048_v44  ;;  %v593_v30 = vsel %vm579_vm2, %v590_v19, %v592_v37 }
  0x52   : > { %v10042_v58 = vadd.s32 4294967294, %v305_v14  ;;  %v11186_v41 = vmul.u32.u64.low %v594_v21, %v589_v23  ;;  %v11187_v27 = vmul.u32.u64.high %v594_v21, %v589_v23, %v11186_v41  ;;  %v601_v44 = vmul.u32 %v594_v21, %v585_v26 }
  0x53   : > { %v415_v7 = vor.u32 %v414_v11, %v413_v59  ;;  %v418_v22 = vshll.u32 %v417_v10, 23  ;;  %v11190_v45 = vmul.u32.u64.low %v594_v21, %v593_v30  ;;  %v11191_v47 = vmul.u32.u64.high %v594_v21, %v593_v30, %v11190_v45 }
  0x54   : > { %vm10043_vm5 = vcmp.lt.s32.totalorder %v10042_v58, 0  ;;  %vm454_vm6 = vcmp.gt.s32.totalorder %v453_v39, 0  ;;  %v11196_v20 = vand.u32 8388607, %v443_v15  ;;  %v429_v52 = vsel %vm11159_vm3, 0, %v427_v25 }
  0x55   : > { %v419_v33 = vor.u32 4788187, %v418_v22  ;;  %v422_v35 = vcvt.s32.f32 %v415_v7  ;;  %v308_v43 = vsel %vm10043_vm5, 0, %v10042_v58  ;;  %v455_v51 = vsel %vm454_vm6, %v453_v39, 0 }
  0x56   : > { %v309_v48 = vsub.s32 32, %v308_v43  ;;  %v310_v17 = vshll.u32 %v11140_v16, %v308_v43  ;;  %v313_v50 = vsub.s32 4294967266, %v308_v43  ;;  %v604_v55 = vadd.s32 1, %v11187_v27 }
  0x57   : > { %v420_v63 = vand.u32 2147483647, %v419_v33  ;;  %v3730_v57 = vadd.s32 3, %v429_v52  ;;  %vm603_vm7 = vc.u32 %v11191_v47, %v11186_v41  ;;  %v457_v16 = vand.u32 31, %v455_v51 }
  0x58   : > { %v311_v53 = vshrl.u32 %v293_v31, %v309_v48  ;;  %v314_v54 = vadd.s32 127, %v313_v50  ;;  %v324_v0 = vsel %vm239_vm4, %v323_v61, %v11126_v28  ;;  %v605_v32 = vsel %vm603_vm7, %v604_v55, %v11187_v27 }
  0x59   : > { %v423_v46 = vmul.f32 %v422_v35, %v420_v63  ;;  %v11209_v29 = vand.u32 3, %v429_v52  ;;  %vm11213_vm8 = vcmp.le.f32.partialorder %v237_v9, 0.7853982  ;;  %v606_v11 = vadd.s32 %v605_v32, %v601_v44 }
  0x5a   : > { %v312_v59 = vor.u32 %v311_v53, %v310_v17  ;;  %v315_v60 = vshll.u32 %v314_v54, 23  ;;  %v458_v13 = vsub.s32 32, %v457_v16  ;;  %v11220_v31 = vand.u32 3, %v3730_v57 }
  0x5b   : > { %v424_v56 = vxor.u32 2147483648, %v423_v46  ;;  %v326_v14 = vsel %vm11213_vm8, 0, %v324_v0  ;;  %v607_v19 = vadd.s32 536870912, %v606_v11  ;;  %v451_v7 = vor.u32 8388608, %v11196_v20 }
  0x5c   : > { %v316_v12 = vor.u32 4788187, %v315_v60  ;;  %v319_v28 = vcvt.s32.f32 %v312_v59  ;;  %v3626_v21 = vadd.s32 3, %v326_v14  ;;  %vm438_vm9 = vcmp.eq.s32.totalorder %v11209_v29, 2 }
  0x5d   : > { %v425_v1 = vsel %vm342_vm15, %v424_v56, %v423_v46  ;;  %v11226_v22 = vshrl.u32 %v607_v19, 30  ;;  %v11228_v8 = vshrl.u32 %v455_v51, 5  ;;  %v460_v23 = vshll.u32 %v16627_v34, %v457_v16 }
  0x5e   : > { %v428_v10 = vsel %vm11159_vm3, %v11000_v4, %v425_v1  ;;  %v317_v9 = vand.u32 2147483647, %v316_v12  ;;  %v469_v24 = vshll.u32 %v16618_v40, %v457_v16  ;;  %vm435_vm10 = vcmp.eq.s32.totalorder %v11209_v29, 0 }
  0x5f   : > { %10715 = vcosq.f32 %v428_v10  ;;  %v461_v58 = vshrl.u32 %v16620_v36, %v458_v13  ;;  %v463_v61 = vshll.u32 %v16620_v36, %v457_v16  ;;  %v470_v26 = vshrl.u32 %v16623_v42, %v458_v13 }
  0x60   : > { %10717 = vsinq.f32 %v428_v10  ;;  %v320_v25 = vmul.f32 %v319_v28, %v317_v9  ;;  %vm434_vm11 = vcmp.lt.s32.totalorder %v11209_v29, 2  ;;  %vm3732_vm12 = vcmp.lt.s32.totalorder %v11220_v31, 2 }
  0x61   : > { %v609_v33 = vshll.u32 %v11226_v22, 30  ;;  %v464_v35 = vshrl.u32 %v16615_v38, %v458_v13  ;;  %v466_v37 = vshll.u32 %v16615_v38, %v457_v16  ;;  %v467_v39 = vshrl.u32 %v16618_v40, %v458_v13 }
  0x62   : > { %vm432_vm13 = vweird.f32 %v11000_v4  ;;  %vm3733_vm14 = vcmp.eq.s32.totalorder %v11220_v31, 0  ;;  %vm3736_vm15 = vcmp.eq.s32.totalorder %v11220_v31, 2  ;;  %v321_v30 = vxor.u32 2147483648, %v320_v25 }
  0x63   : > { %v471_v27 = vor.u32 %v470_v26, %v469_v24  ;;  %v11245_v63 = vand.u32 3, %v326_v14  ;;  %v11247_v43 = vand.u32 3, %v3626_v21  ;;  %v11249_v45 = vsub.s32 %v606_v11, %v609_v33 }
  0x64   : > { %vm478_vm0 = vcmp.lt.s32.totalorder %v11228_v8, 4  ;;  %v322_v48 = vsel %vm239_vm4, %v321_v30, %v320_v25  ;;  %v462_v17 = vor.u32 %v461_v58, %v460_v23  ;;  %v472_v50 = vshll.u32 %v16623_v42, %v457_v16 }
  0x65   : > { %v473_v46 = vshrl.u32 %v16625_v49, %v458_v13  ;;  %v325_v44 = vsel %vm11213_vm8, %v11002_v5, %v322_v48  ;;  %v612_v20 = vsub.s32 0, %v11249_v45  ;;  %v465_v51 = vor.u32 %v464_v35, %v463_v61 }
  0x66   : > { %v468_v52 = vor.u32 %v467_v39, %v466_v37  ;;  %10719 = vcosq.f32 %v325_v44  ;;  %vm475_vm1 = vcmp.lt.s32.totalorder %v11228_v8, 1  ;;  %vm477_vm2 = vcmp.lt.s32.totalorder %v11228_v8, 3 }
  0x67   : > { %v484_v53 = vsel %vm478_vm0, %v471_v27, 920167782  ;;  %10721 = vsinq.f32 %v325_v44  ;;  %v602_v55 = vadd.s32 %v11186_v41, %v11191_v47  ;;  %v10053_v56 = vmin.u32 %v612_v20, %v11249_v45 }
  0x68   : > { %v11267_v57 = vshll.u32 %v451_v7, 8  ;;  %vm335_vm3 = vcmp.eq.s32.totalorder %v11245_v63, 2  ;;  %v459_v60 = vshrl.u32 %v16627_v34, %v458_v13  ;;  %v474_v0 = vor.u32 %v473_v46, %v472_v50 }
  0x69   : > { %v10716_v54 = vpop.eup %10715  ;;  %vm476_vm4 = vcmp.lt.s32.totalorder %v11228_v8, 2  ;;  %vm332_vm5 = vcmp.eq.s32.totalorder %v11245_v63, 0  ;;  %vm548_vm7 = vcmp.lt.s32.totalorder %v11004_v6, 0  ;;  %v614_v41 = vclz %v10053_v56 }
  0x6a   : > { %v10718_v16 = vpop.eup %10717  ;;  %v439_v59 = vxor.u32 2147483648, %v10716_v54  ;;  %v483_v47 = vsel %vm475_vm1, %v462_v17, %v465_v51  ;;  %v485_v1 = vsel %vm477_vm2, %v468_v52, %v484_v53  ;;  %vm331_vm8 = vcmp.lt.s32.totalorder %v11245_v63, 2 }
  0x6b   : > { %v436_v32 = vxor.u32 2147483648, %v10718_v16  ;;  %v632_v10 = vsub.s32 4, %v11226_v22  ;;  %v480_v12 = vsel %vm478_vm0, %v468_v52, 2102212464  ;;  %vm329_vm6 = vweird.f32 %v11002_v5 }
  0x6c   : > { %v440_v3 = vsel %vm438_vm9, %v439_v59, %v10718_v16  ;;  %v3738_v11 = vsel %vm3736_vm15, %v439_v59, %v10718_v16  ;;  %v10054_v14 = vadd.s32 4294967294, %v614_v41  ;;  %v487_v19 = vsel %vm475_vm1, %v465_v51, %v468_v52  ;;  %v177_v41 = vld [vmem:[%s10995_s28 + $0x20] sm:$0xff] }
  0x6d   : > { %v437_v28 = vsel %vm435_vm10, %v10716_v54, %v436_v32  ;;  %v3735_v13 = vsel %vm3733_vm14, %v10716_v54, %v436_v32  ;;  %v486_v7 = vsel %vm476_vm4, %v483_v47, %v485_v1  ;;  %v488_v23 = vsel %vm478_vm0, %v474_v0, 1326507024 }
  0x6e   : > { %v441_v9 = vsel %vm434_vm11, %v437_v28, %v440_v3  ;;  %v3739_v21 = vsel %vm3732_vm12, %v3735_v13, %v3738_v11  ;;  %vm10055_vm9 = vcmp.lt.s32.totalorder %v10054_v14, 0  ;;  %v489_v29 = vsel %vm477_vm2, %v471_v27, %v488_v23 }
  0x6f   : > { %v11304_v24 = vsel %vm432_vm13, nan, %v441_v9  ;;  %v11308_v25 = vsel %vm432_vm13, nan, %v3739_v21  ;;  %v617_v31 = vsel %vm10055_vm9, 0, %v10054_v14  ;;  %v479_v58 = vsel %vm475_vm1, %v459_v60, %v462_v17 }
  0x70   : > { %16771 = vst [vmem:[#allocation5_spill] sm:$0xff] %v11304_v24  ;;  %7097 = vperm.xlu1 %10645, %v11304_v24   ;;  %v481_v61 = vsel %vm477_vm2, %v465_v51, %v480_v12  ;;  %v490_v26 = vsel %vm476_vm4, %v487_v19, %v489_v29  ;;  %vm3632_vm10 = vcmp.eq.s32.totalorder %v11247_v43, 2  ;;  %v618_v4 = vsub.s32 32, %v617_v31  ;;  %v10720_v37 = vpop.eup %10719 }
  0x71   : > { %v619_v33 = vshll.u32 %v11249_v45, %v617_v31  ;;  %v622_v35 = vsub.s32 4294967266, %v617_v31  ;;  %v11322_v39 = vmul.u32.u64.low %v11267_v57, %v490_v26  ;;  %v11323_v30 = vmul.u32.u64.high %v11267_v57, %v490_v26, %v11322_v39  ;;  %v10722_v17 = vpop.eup %10721 }
  0x72   : > { %v11326_v27 = vmul.u32.u64.low %v11267_v57, %v486_v7  ;;  %v11327_v48 = vmul.u32.u64.high %v11267_v57, %v486_v7, %v11326_v27  ;;  %v336_v50 = vxor.u32 2147483648, %v10720_v37  ;;  %v620_v46 = vshrl.u32 %v602_v55, %v618_v4 }
  0x73   : > { %v623_v44 = vadd.s32 127, %v622_v35  ;;  %v482_v20 = vsel %vm476_vm4, %v479_v58, %v481_v61  ;;  %v333_v51 = vxor.u32 2147483648, %v10722_v17  ;;  %vm3628_vm11 = vcmp.lt.s32.totalorder %v11247_v43, 2 }
  0x74   : > { %v633_v45 = vsel %vm548_vm7, %v632_v10, %v11226_v22  ;;  %v755_v52 = vand.u32 2139095040, %v11117_v18  ;;  %v337_v53 = vsel %vm335_vm3, %v336_v50, %v10722_v17  ;;  %v3634_v54 = vsel %vm3632_vm10, %v336_v50, %v10722_v17 }
  0x75   : > { %v621_v55 = vor.u32 %v620_v46, %v619_v33  ;;  %v624_v56 = vshll.u32 %v623_v44, 23  ;;  %v334_v8 = vsel %vm332_vm5, %v10720_v37, %v333_v51  ;;  %vm16772_vm12 = vcmp.eq.s32.totalorder %v11247_v43, 0 }
  0x76   : > { %v3631_v16 = vsel %vm16772_vm12, %v10720_v37, %v333_v51  ;;  %v498_v59 = vmul.u32 %v11267_v57, %v482_v20  ;;  %vm500_vm13 = vc.u32 %v11323_v30, %v11326_v27  ;;  %v338_v22 = vsel %vm331_vm8, %v334_v8, %v337_v53 }
  0x77   : > { %v3635_v60 = vsel %vm3628_vm11, %v3631_v16, %v3634_v54  ;;  %v625_v0 = vor.u32 4788187, %v624_v56  ;;  %v628_v32 = vcvt.s32.f32 %v621_v55  ;;  %v11353_v47 = vsel %vm329_vm6, nan, %v338_v22 }
  0x78   : > { %16773 = vst [vmem:[#allocation6_spill] sm:$0xff] %v11353_v47  ;;  %v11357_v43 = vsel %vm329_vm6, nan, %v3635_v60  ;;  %v501_v57 = vadd.s32 1, %v11327_v48  ;;  %v756_v1 = vshrl.u32 %v755_v52, 23  ;;  %7092 = vperm.xlu0 %10644, %v11353_v47   ;;  %vm11363_vm14 = vcmp.le.f32.partialorder %v546_v2, 0.7853982 }
  0x79   : > { %v626_v3 = vand.u32 2147483647, %v625_v0  ;;  %v11368_v12 = vmul.f32 0.5, %v177_v41  ;;  %v635_v28 = vsel %vm11363_vm14, 0, %v633_v45  ;;  %v752_v14 = vand.u32 2147483647, %v11117_v18 }
  0x7a   : > { %v502_v11 = vsel %vm500_vm13, %v501_v57, %v11327_v48  ;;  %v10060_v10 = vadd.s32 4294967169, %v756_v1  ;;  %v3938_v19 = vadd.s32 3, %v635_v28  ;;  %v11373_v2 = vand.u32 3, %v635_v28 }
  0x7b   : > { %v629_v5 = vmul.f32 %v628_v32, %v626_v3  ;;  %v503_v13 = vadd.s32 %v502_v11, %v498_v59  ;;  %v652_v23 = vand.u32 2139095040, %v11368_v12  ;;  %v759_v58 = vand.u32 8388607, %v752_v14 }
  0x7c   : > { %v762_v9 = vadd.s32 1, %v10060_v10  ;;  %v11385_v4 = vand.u32 3, %v3938_v19  ;;  %vm644_vm0 = vcmp.eq.s32.totalorder %v11373_v2, 2  ;;  %vm641_vm1 = vcmp.eq.s32.totalorder %v11373_v2, 0 }
  0x7d   : > { %v630_v21 = vxor.u32 2147483648, %v629_v5  ;;  %v504_v7 = vadd.s32 536870912, %v503_v13  ;;  %v653_v39 = vshrl.u32 %v652_v23, 23  ;;  %v760_v17 = vor.u32 8388608, %v759_v58 }
  0x7e   : > { %vm763_vm15 = vcmp.gt.s32.totalorder %v762_v9, 0  ;;  %vm3941_vm2 = vcmp.eq.s32.totalorder %v11385_v4, 0  ;;  %vm640_vm3 = vcmp.lt.s32.totalorder %v11373_v2, 2  ;;  %vm3940_vm4 = vcmp.lt.s32.totalorder %v11385_v4, 2 }
  0x7f   : > { %v631_v29 = vsel %vm548_vm7, %v630_v21, %v629_v5  ;;  %v11378_v31 = vshrl.u32 %v504_v7, 30  ;;  %v764_v61 = vsel %vm763_vm15, %v762_v9, 0  ;;  %vm638_vm5 = vweird.f32 %v11004_v6 }
  0x80   : > { %v634_v26 = vsel %vm11363_vm14, %v11004_v6, %v631_v29  ;;  %v766_v33 = vand.u32 31, %v764_v61  ;;  %v11401_v52 = vshrl.u32 %v764_v61, 5  ;;  %vm3944_vm6 = vcmp.eq.s32.totalorder %v11385_v4, 2 }
  0x81   : > { %10723 = vcosq.f32 %v634_v26  ;;  %v506_v35 = vshll.u32 %v11378_v31, 30  ;;  %v499_v55 = vadd.s32 %v11326_v27, %v11323_v30  ;;  %v10056_v8 = vadd.s32 4294967169, %v653_v39 }
  0x82   : > { %10725 = vsinq.f32 %v634_v26  ;;  %v767_v37 = vsub.s32 32, %v766_v33  ;;  %v769_v50 = vshll.u32 %v16627_v34, %v766_v33  ;;  %v772_v44 = vshll.u32 %v16620_v36, %v766_v33 }
  0x83   : > { %v11389_v48 = vsub.s32 %v503_v13, %v506_v35  ;;  %v778_v51 = vshll.u32 %v16618_v40, %v766_v33  ;;  %v775_v53 = vshll.u32 %v16615_v38, %v766_v33  ;;  %v781_v22 = vshll.u32 %v16623_v42, %v766_v33 }
  0x84   : > { %v770_v46 = vshrl.u32 %v16620_v36, %v767_v37  ;;  %v773_v20 = vshrl.u32 %v16615_v38, %v767_v37  ;;  %v776_v54 = vshrl.u32 %v16618_v40, %v767_v37  ;;  %v779_v56 = vshrl.u32 %v16623_v42, %v767_v37 }
  0x85   : > { %v509_v45 = vsub.s32 0, %v11389_v48  ;;  %v768_v59 = vshrl.u32 %v16627_v34, %v767_v37  ;;  %v649_v60 = vand.u32 2147483647, %v11368_v12  ;;  %v782_v57 = vshrl.u32 %v16625_v49, %v767_v37 }
  0x86   : > { %v771_v0 = vor.u32 %v770_v46, %v769_v50  ;;  %v774_v32 = vor.u32 %v773_v20, %v772_v44  ;;  %v780_v41 = vor.u32 %v779_v56, %v778_v51  ;;  %v777_v3 = vor.u32 %v776_v54, %v775_v53 }
  0x87   : > { %v10049_v16 = vmin.u32 %v509_v45, %v11389_v48  ;;  %vm784_vm7 = vcmp.lt.s32.totalorder %v11401_v52, 1  ;;  %v11416_v30 = vshll.u32 %v760_v17, 8  ;;  %v529_v27 = vsub.s32 4, %v11378_v31 }
  0x88   : > { %vm785_vm8 = vcmp.lt.s32.totalorder %v11401_v52, 2  ;;  %vm786_vm9 = vcmp.lt.s32.totalorder %v11401_v52, 3  ;;  %v659_v63 = vadd.s32 1, %v10056_v8  ;;  %v783_v5 = vor.u32 %v782_v57, %v781_v22  ;;  %v180_v57 = vld [vmem:[%s10995_s28 + $0x38] sm:$0xff] }
  0x89   : > { %v511_v1 = vclz %v10049_v16  ;;  %vm787_vm10 = vcmp.lt.s32.totalorder %v11401_v52, 4  ;;  %v788_v28 = vsel %vm784_vm7, %v768_v59, %v771_v0  ;;  %vm445_vm11 = vcmp.lt.s32.totalorder %v11098_v62, 0 }
  0x8a   : > { %v789_v9 = vsel %vm787_vm10, %v777_v3, 2102212464  ;;  %v792_v21 = vsel %vm784_vm7, %v771_v0, %v774_v32  ;;  %v793_v7 = vsel %vm787_vm10, %v780_v41, 920167782  ;;  %v796_v58 = vsel %vm784_vm7, %v774_v32, %v777_v3 }
  0x8b   : > { %v10724_v11 = vpop.eup %10723  ;;  %v10050_v10 = vadd.s32 4294967294, %v511_v1  ;;  %v794_v29 = vsel %vm786_vm9, %v777_v3, %v793_v7  ;;  %v790_v35 = vsel %vm786_vm9, %v774_v32, %v789_v9  ;;  %v797_v2 = vsel %vm787_vm10, %v783_v5, 1326507024 }
  0x8c   : > { %v10726_v13 = vpop.eup %10725  ;;  %v645_v19 = vxor.u32 2147483648, %v10724_v11  ;;  %v795_v51 = vsel %vm785_vm8, %v792_v21, %v794_v29  ;;  %v791_v54 = vsel %vm785_vm8, %v788_v28, %v790_v35  ;;  %v798_v56 = vsel %vm786_vm9, %v780_v41, %v797_v2 }
  0x8d   : > { %v642_v23 = vxor.u32 2147483648, %v10726_v13  ;;  %vm10051_vm12 = vcmp.lt.s32.totalorder %v10050_v10, 0  ;;  %v656_v8 = vand.u32 8388607, %v649_v60  ;;  %v799_v6 = vsel %vm785_vm8, %v796_v58, %v798_v56 }
  0x8e   : > { %v646_v61 = vsel %vm644_vm0, %v645_v19, %v10726_v13  ;;  %v3946_v26 = vsel %vm3944_vm6, %v645_v19, %v10726_v13  ;;  %v514_v33 = vsel %vm10051_vm12, 0, %v10050_v10  ;;  %vm660_vm13 = vcmp.gt.s32.totalorder %v659_v63, 0 }
  0x8f   : > { %v643_v37 = vsel %vm641_vm1, %v10724_v11, %v642_v23  ;;  %v3943_v39 = vsel %vm3941_vm2, %v10724_v11, %v642_v23  ;;  %v515_v17 = vsub.s32 32, %v514_v33  ;;  %v516_v50 = vshll.u32 %v11389_v48, %v514_v33 }
  0x90   : > { %v647_v46 = vsel %vm640_vm3, %v643_v37, %v646_v61  ;;  %v3947_v44 = vsel %vm3940_vm4, %v3943_v39, %v3946_v26  ;;  %v519_v20 = vsub.s32 4294967266, %v514_v33  ;;  %v530_v41 = vsel %vm445_vm11, %v529_v27, %v11378_v31 }
  0x91   : > { %v11454_v45 = vsel %vm638_vm5, nan, %v647_v46  ;;  %v11458_v53 = vsel %vm638_vm5, nan, %v3947_v44  ;;  %v517_v48 = vshrl.u32 %v499_v55, %v515_v17  ;;  %v661_v1 = vsel %vm660_vm13, %v659_v63, 0 }
  0x92   : > { %16776 = vst [vmem:[#allocation7_spill] sm:$0xff] %v11454_v45  ;;  %7107 = vperm.xlu1 %10645, %v11454_v45   ;;  %v520_v4 = vadd.s32 127, %v519_v20  ;;  %v11472_v55 = vmul.u32.u64.low %v11416_v30, %v795_v51  ;;  %v11473_v59 = vmul.u32.u64.high %v11416_v30, %v795_v51, %v11472_v55  ;;  %v807_v11 = vmul.u32 %v11416_v30, %v791_v54 }
  0x93   : > { %v518_v16 = vor.u32 %v517_v48, %v516_v50  ;;  %v11477_v0 = vmul.u32.u64.low %v11416_v30, %v799_v6  ;;  %v11478_v32 = vmul.u32.u64.high %v11416_v30, %v799_v6, %v11477_v0  ;;  %v663_v10 = vand.u32 31, %v661_v1 }
  0x94   : > { %v521_v22 = vshll.u32 %v520_v4, 23  ;;  %vm11487_vm14 = vcmp.le.f32.partialorder %v443_v15, 0.7853982  ;;  %v810_v28 = vadd.s32 1, %v11473_v59  ;;  %v657_v13 = vor.u32 8388608, %v656_v8 }
  0x95   : > { %v525_v52 = vcvt.s32.f32 %v518_v16  ;;  %v11492_v19 = vmul.f32 0.5, %v180_v57  ;;  %v532_v31 = vsel %vm11487_vm14, 0, %v530_v41  ;;  %vm809_vm15 = vc.u32 %v11478_v32, %v11472_v55 }
  0x96   : > { %v522_v3 = vor.u32 4788187, %v521_v22  ;;  %v664_v30 = vsub.s32 32, %v663_v10  ;;  %v811_v27 = vsel %vm809_vm15, %v810_v28, %v11473_v59  ;;  %v11499_v63 = vshrl.u32 %v661_v1, 5 }
  0x97   : > { %v666_v15 = vshll.u32 %v16627_v34, %v663_v10  ;;  %v669_v21 = vshll.u32 %v16620_v36, %v663_v10  ;;  %v812_v23 = vadd.s32 %v811_v27, %v807_v11  ;;  %v672_v58 = vshll.u32 %v16615_v38, %v663_v10 }
  0x98   : > { %v523_v9 = vand.u32 2147483647, %v522_v3  ;;  %v667_v29 = vshrl.u32 %v16620_v36, %v664_v30  ;;  %v670_v61 = vshrl.u32 %v16615_v38, %v664_v30  ;;  %v673_v26 = vshrl.u32 %v16618_v40, %v664_v30 }
  0x99   : > { %v675_v33 = vshll.u32 %v16618_v40, %v663_v10  ;;  %v676_v35 = vshrl.u32 %v16623_v42, %v664_v30  ;;  %v3834_v39 = vadd.s32 3, %v532_v31  ;;  %v813_v17 = vadd.s32 536870912, %v812_v23 }
  0x9a   : > { %v526_v7 = vmul.f32 %v525_v52, %v523_v9  ;;  %v678_v50 = vshll.u32 %v16623_v42, %v663_v10  ;;  %v668_v46 = vor.u32 %v667_v29, %v666_v15  ;;  %v671_v44 = vor.u32 %v670_v61, %v669_v21  ;;  %v179_v10 = vld [vmem:[%s10995_s28 + $0x30] sm:$0xff] }
  0x9b   : > { %v677_v20 = vor.u32 %v676_v35, %v675_v33  ;;  %v679_v51 = vshrl.u32 %v16625_v49, %v664_v30  ;;  %v814_v2 = vshrl.u32 %v813_v17, 30  ;;  %v674_v4 = vor.u32 %v673_v26, %v672_v58 }
  0x9c   : > { %v527_v37 = vxor.u32 2147483648, %v526_v7  ;;  %vm681_vm0 = vcmp.lt.s32.totalorder %v11499_v63, 1  ;;  %v665_v56 = vshrl.u32 %v16627_v34, %v664_v30  ;;  %vm683_vm1 = vcmp.lt.s32.totalorder %v11499_v63, 3 }
  0x9d   : > { %vm684_vm2 = vcmp.lt.s32.totalorder %v11499_v63, 4  ;;  %v815_v8 = vshll.u32 %v814_v2, 30  ;;  %v680_v16 = vor.u32 %v679_v51, %v678_v50  ;;  %vm682_vm3 = vcmp.lt.s32.totalorder %v11499_v63, 2 }
  0x9e   : > { %v528_v48 = vsel %vm445_vm11, %v527_v37, %v526_v7  ;;  %v689_v6 = vsel %vm681_vm0, %v668_v46, %v671_v44  ;;  %v690_v59 = vsel %vm684_vm2, %v677_v20, 920167782  ;;  %v697_v22 = vshll.u32 %v657_v13, 8 }
  0x9f   : > { %v531_v54 = vsel %vm11487_vm14, %v11098_v62, %v528_v48  ;;  %v536_v0 = vand.u32 3, %v532_v31  ;;  %v11525_v57 = vsub.s32 %v812_v23, %v815_v8  ;;  %v686_v41 = vsel %vm684_vm2, %v674_v4, 2102212464 }
  0xa0   : > { %10727 = vcosq.f32 %v531_v54  ;;  %v691_v1 = vsel %vm683_vm1, %v674_v4, %v690_v59  ;;  %v3835_v3 = vand.u32 3, %v3834_v39  ;;  %vm754_vm4 = vcmp.lt.s32.totalorder %v11117_v18, 0 }
  0xa1   : > { %10729 = vsinq.f32 %v531_v54  ;;  %v692_v52 = vsel %vm682_vm3, %v689_v6, %v691_v1  ;;  %v961_v11 = vand.u32 2139095040, %v11492_v19  ;;  %v818_v5 = vsub.s32 0, %v11525_v57 }
  0xa2   : > { %v685_v28 = vsel %vm681_vm0, %v665_v56, %v668_v46  ;;  %v693_v13 = vsel %vm681_vm0, %v671_v44, %v674_v4  ;;  %v694_v9 = vsel %vm684_vm2, %v680_v16, 1326507024  ;;  %vm535_vm5 = vweird.f32 %v11098_v62 }
  0xa3   : > { %v687_v31 = vsel %vm683_vm1, %v671_v44, %v686_v41  ;;  %v695_v30 = vsel %vm683_vm1, %v677_v20, %v694_v9  ;;  %v11548_v27 = vmul.u32.u64.low %v697_v22, %v692_v52  ;;  %v11549_v15 = vmul.u32.u64.high %v697_v22, %v692_v52, %v11548_v27 }
  0xa4   : > { %vm537_vm6 = vcmp.lt.s32.totalorder %v536_v0, 2  ;;  %v10061_v21 = vmin.u32 %v818_v5, %v11525_v57  ;;  %v958_v7 = vand.u32 2147483647, %v11492_v19  ;;  %v11554_v23 = vmul.f32 0.5, %v179_v10 }
  0xa5   : > { %vm538_vm7 = vcmp.eq.s32.totalorder %v536_v0, 0  ;;  %v838_v29 = vsub.s32 4, %v814_v2  ;;  %v696_v58 = vsel %vm682_vm3, %v693_v13, %v695_v30  ;;  %v962_v61 = vshrl.u32 %v961_v11, 23 }
  0xa6   : > { %v820_v26 = vclz %v10061_v21  ;;  %v688_v33 = vsel %vm682_vm3, %v685_v28, %v687_v31  ;;  %v11560_v35 = vmul.u32.u64.low %v697_v22, %v696_v58  ;;  %v11561_v37 = vmul.u32.u64.high %v697_v22, %v696_v58, %v11560_v35 }
  0xa7   : > { %vm541_vm8 = vcmp.eq.s32.totalorder %v536_v0, 2  ;;  %vm3836_vm9 = vcmp.lt.s32.totalorder %v3835_v3, 2  ;;  %vm3837_vm10 = vcmp.eq.s32.totalorder %v3835_v3, 0  ;;  %v707_v39 = vadd.s32 1, %v11549_v15 }
  0xa8   : > { %vm3840_vm11 = vcmp.eq.s32.totalorder %v3835_v3, 2  ;;  %v808_v50 = vadd.s32 %v11472_v55, %v11478_v32  ;;  %v10062_v46 = vadd.s32 4294967294, %v820_v26  ;;  %v965_v44 = vand.u32 8388607, %v958_v7 }
  0xa9   : > { %v839_v51 = vsel %vm754_vm4, %v838_v29, %v814_v2  ;;  %v704_v48 = vmul.u32 %v697_v22, %v688_v33  ;;  %v10068_v4 = vadd.s32 4294967169, %v962_v61  ;;  %vm706_vm13 = vc.u32 %v11561_v37, %v11548_v27  ;;  %v182_v29 = vld [vmem:[%s10995_s28 + $0x48] sm:$0xff] }
  0xaa   : > { %v10728_v17 = vpop.eup %10727  ;;  %vm10063_vm12 = vcmp.lt.s32.totalorder %v10062_v46, 0  ;;  %v858_v56 = vand.u32 2139095040, %v11554_v23  ;;  %v708_v16 = vsel %vm706_vm13, %v707_v39, %v11549_v15  ;;  %vm11591_vm14 = vcmp.le.f32.partialorder %v752_v14, 0.7853982 }
  0xab   : > { %v10730_v20 = vpop.eup %10729  ;;  %v542_v63 = vxor.u32 2147483648, %v10728_v17  ;;  %v823_v8 = vsel %vm10063_vm12, 0, %v10062_v46  ;;  %v709_v11 = vadd.s32 %v708_v16, %v704_v48  ;;  %v968_v13 = vadd.s32 1, %v10068_v4 }
  0xac   : > { %v539_v54 = vxor.u32 2147483648, %v10730_v20  ;;  %v824_v2 = vsub.s32 32, %v823_v8  ;;  %v825_v22 = vshll.u32 %v11525_v57, %v823_v8  ;;  %v828_v52 = vsub.s32 4294967266, %v823_v8 }
  0xad   : > { %v543_v55 = vsel %vm541_vm8, %v542_v63, %v10730_v20  ;;  %v3842_v32 = vsel %vm3840_vm11, %v542_v63, %v10730_v20  ;;  %v710_v3 = vadd.s32 536870912, %v709_v11  ;;  %v841_v31 = vsel %vm11591_vm14, 0, %v839_v51 }
  0xae   : > { %v540_v6 = vsel %vm538_vm7, %v10728_v17, %v539_v54  ;;  %v3839_v59 = vsel %vm3837_vm10, %v10728_v17, %v539_v54  ;;  %v826_v28 = vshrl.u32 %v808_v50, %v824_v2  ;;  %v829_v57 = vadd.s32 127, %v828_v52 }
  0xaf   : > { %v544_v41 = vsel %vm537_vm6, %v540_v6, %v543_v55  ;;  %v3843_v1 = vsel %vm3836_vm9, %v3839_v59, %v3842_v32  ;;  %vm969_vm15 = vcmp.gt.s32.totalorder %v968_v13, 0  ;;  %v4146_v30 = vadd.s32 3, %v841_v31 }
  0xb0   : > { %v11582_v10 = vsel %vm535_vm5, nan, %v544_v41  ;;  %v11586_v5 = vsel %vm535_vm5, nan, %v3843_v1  ;;  %v827_v9 = vor.u32 %v826_v28, %v825_v22  ;;  %v830_v62 = vshll.u32 %v829_v57, 23 }
  0xb1   : > { %16779 = vst [vmem:[#allocation8_spill] sm:$0xff] %v11582_v10  ;;  %7102 = vperm.xlu0 %10644, %v11582_v10   ;;  %v11597_v15 = vshrl.u32 %v710_v3, 30  ;;  %v970_v21 = vsel %vm969_vm15, %v968_v13, 0  ;;  %v966_v58 = vor.u32 8388608, %v965_v44  ;;  %v859_v26 = vshrl.u32 %v858_v56, 23 }
  0xb2   : > { %v972_v61 = vand.u32 31, %v970_v21  ;;  %v831_v14 = vor.u32 4788187, %v830_v62  ;;  %v834_v33 = vcvt.s32.f32 %v827_v9  ;;  %v11601_v17 = vmul.f32 0.5, %v182_v29 }
  0xb3   : > { %v712_v35 = vshll.u32 %v11597_v15, 30  ;;  %v11603_v46 = vand.u32 3, %v841_v31  ;;  %v11605_v20 = vand.u32 3, %v4146_v30  ;;  %v11609_v51 = vshrl.u32 %v970_v21, 5 }
  0xb4   : > { %v973_v39 = vsub.s32 32, %v972_v61  ;;  %v832_v50 = vand.u32 2147483647, %v831_v14  ;;  %v11611_v48 = vshll.u32 %v966_v58, 8  ;;  %v855_v44 = vand.u32 2147483647, %v11554_v23 }
  0xb5   : > { %v11607_v63 = vsub.s32 %v709_v11, %v712_v35  ;;  %v10064_v4 = vadd.s32 4294967169, %v859_v26  ;;  %v975_v55 = vshll.u32 %v16627_v34, %v972_v61  ;;  %v978_v32 = vshll.u32 %v16620_v36, %v972_v61 }
  0xb6   : > { %v835_v54 = vmul.f32 %v834_v33, %v832_v50  ;;  %v976_v8 = vshrl.u32 %v16620_v36, %v973_v39  ;;  %v979_v16 = vshrl.u32 %v16615_v38, %v973_v39  ;;  %v984_v6 = vshll.u32 %v16618_v40, %v972_v61 }
  0xb7   : > { %v715_v56 = vsub.s32 0, %v11607_v63  ;;  %v985_v59 = vshrl.u32 %v16623_v42, %v973_v39  ;;  %v981_v41 = vshll.u32 %v16615_v38, %v972_v61  ;;  %v982_v1 = vshrl.u32 %v16618_v40, %v973_v39 }
  0xb8   : > { %v836_v2 = vxor.u32 2147483648, %v835_v54  ;;  %v705_v52 = vadd.s32 %v11548_v27, %v11561_v37  ;;  %v735_v11 = vsub.s32 4, %v11597_v15  ;;  %v974_v28 = vshrl.u32 %v16627_v34, %v973_v39 }
  0xb9   : > { %v10057_v22 = vmin.u32 %v715_v56, %v11607_v63  ;;  %v865_v13 = vadd.s32 1, %v10064_v4  ;;  %v987_v9 = vshll.u32 %v16623_v42, %v972_v61  ;;  %v988_v31 = vshrl.u32 %v16625_v49, %v973_v39 }
  0xba   : > { %v837_v57 = vsel %vm754_vm4, %v836_v2, %v835_v54  ;;  %v977_v30 = vor.u32 %v976_v8, %v975_v55  ;;  %v980_v21 = vor.u32 %v979_v16, %v978_v32  ;;  %v986_v27 = vor.u32 %v985_v59, %v984_v6 }
  0xbb   : > { %v717_v3 = vclz %v10057_v22  ;;  %v840_v62 = vsel %vm11591_vm14, %v11117_v18, %v837_v57  ;;  %vm651_vm0 = vcmp.lt.s32.totalorder %v11368_v12, 0  ;;  %v983_v29 = vor.u32 %v982_v1, %v981_v41 }
  0xbc   : > { %10731 = vcosq.f32 %v840_v62  ;;  %vm990_vm1 = vcmp.lt.s32.totalorder %v11609_v51, 1  ;;  %v989_v58 = vor.u32 %v988_v31, %v987_v9  ;;  %vm991_vm2 = vcmp.lt.s32.totalorder %v11609_v51, 2 }
  0xbd   : > { %v10058_v37 = vadd.s32 4294967294, %v717_v3  ;;  %10733 = vsinq.f32 %v840_v62  ;;  %vm993_vm3 = vcmp.lt.s32.totalorder %v11609_v51, 4  ;;  %vm850_vm4 = vcmp.eq.s32.totalorder %v11603_v46, 2 }
  0xbe   : > { %vm992_vm6 = vcmp.lt.s32.totalorder %v11609_v51, 3  ;;  %v994_v0 = vsel %vm990_vm1, %v974_v28, %v977_v30  ;;  %v995_v61 = vsel %vm993_vm3, %v983_v29, 2102212464  ;;  %vm847_vm7 = vcmp.eq.s32.totalorder %v11603_v46, 0 }
  0xbf   : > { %vm10059_vm5 = vcmp.lt.s32.totalorder %v10058_v37, 0  ;;  %vm11648_vm8 = vcmp.le.f32.partialorder %v649_v60, 0.7853982  ;;  %v996_v33 = vsel %vm992_vm6, %v980_v21, %v995_v61  ;;  %v998_v35 = vsel %vm990_vm1, %v977_v30, %v980_v21 }
  0xc0   : > { %v720_v14 = vsel %vm10059_vm5, 0, %v10058_v37  ;;  %v999_v39 = vsel %vm993_vm3, %v986_v27, 920167782  ;;  %vm846_vm9 = vcmp.lt.s32.totalorder %v11603_v46, 2  ;;  %v1002_v60 = vsel %vm990_vm1, %v980_v21, %v983_v29 }
  0xc1   : > { %v721_v50 = vsub.s32 32, %v720_v14  ;;  %v722_v4 = vshll.u32 %v11607_v63, %v720_v14  ;;  %v725_v54 = vsub.s32 4294967266, %v720_v14  ;;  %vm844_vm10 = vweird.f32 %v11117_v18 }
  0xc2   : > { %v997_v56 = vsel %vm991_vm2, %v994_v0, %v996_v33  ;;  %v1000_v55 = vsel %vm992_vm6, %v983_v29, %v999_v39  ;;  %v1003_v32 = vsel %vm993_vm3, %v989_v58, 1326507024  ;;  %vm866_vm11 = vcmp.gt.s32.totalorder %v865_v13, 0 }
  0xc3   : > { %v723_v8 = vshrl.u32 %v705_v52, %v721_v50  ;;  %v726_v16 = vadd.s32 127, %v725_v54  ;;  %v1001_v63 = vsel %vm991_vm2, %v998_v35, %v1000_v55  ;;  %v1004_v6 = vsel %vm992_vm6, %v986_v27, %v1003_v32 }
  0xc4   : > { %v1005_v59 = vsel %vm991_vm2, %v1002_v60, %v1004_v6  ;;  %v11676_v2 = vmul.u32.u64.low %v11611_v48, %v1001_v63  ;;  %v11677_v22 = vmul.u32.u64.high %v11611_v48, %v1001_v63, %v11676_v2  ;;  %v867_v41 = vsel %vm866_vm11, %v865_v13, 0 }
  0xc5   : > { %v724_v1 = vor.u32 %v723_v8, %v722_v4  ;;  %v727_v28 = vshll.u32 %v726_v16, 23  ;;  %v11681_v52 = vmul.u32.u64.low %v11611_v48, %v1005_v59  ;;  %v11682_v57 = vmul.u32.u64.high %v11611_v48, %v1005_v59, %v11681_v52 }
  0xc6   : > { %vm4148_vm12 = vcmp.lt.s32.totalorder %v11605_v20, 2  ;;  %vm4149_vm13 = vcmp.eq.s32.totalorder %v11605_v20, 0  ;;  %v736_v51 = vsel %vm651_vm0, %v735_v11, %v11597_v15  ;;  %v869_v3 = vand.u32 31, %v867_v41  ;;  %v10732_v9 = vpop.eup %10731 }
  0xc7   : > { %vm4152_vm14 = vcmp.eq.s32.totalorder %v11605_v20, 2  ;;  %v728_v31 = vor.u32 4788187, %v727_v28  ;;  %v731_v13 = vcvt.s32.f32 %v724_v1  ;;  %v1013_v62 = vmul.u32 %v11611_v48, %v997_v56  ;;  %v10734_v30 = vpop.eup %10733 }
  0xc8   : > { %v851_v21 = vxor.u32 2147483648, %v10732_v9  ;;  %v1016_v27 = vadd.s32 1, %v11677_v22  ;;  %v862_v37 = vand.u32 8388607, %v855_v44  ;;  %v870_v29 = vsub.s32 32, %v869_v3 }
  0xc9   : > { %v848_v58 = vxor.u32 2147483648, %v10734_v30  ;;  %v729_v0 = vand.u32 2147483647, %v728_v31  ;;  %v738_v15 = vsel %vm11648_vm8, 0, %v736_v51  ;;  %vm1015_vm15 = vc.u32 %v11682_v57, %v11676_v2 }
  0xca   : > { %v852_v11 = vsel %vm850_vm4, %v851_v21, %v10734_v30  ;;  %v4154_v48 = vsel %vm4152_vm14, %v851_v21, %v10734_v30  ;;  %v4042_v61 = vadd.s32 3, %v738_v15  ;;  %v1017_v14 = vsel %vm1015_vm15, %v1016_v27, %v11677_v22 }
  0xcb   : > { %v849_v33 = vsel %vm847_vm7, %v10732_v9, %v848_v58  ;;  %v4151_v35 = vsel %vm4149_vm13, %v10732_v9, %v848_v58  ;;  %v732_v39 = vmul.f32 %v731_v13, %v729_v0  ;;  %v1018_v50 = vadd.s32 %v1017_v14, %v1013_v62 }
  0xcc   : > { %v853_v4 = vsel %vm846_vm9, %v849_v33, %v852_v11  ;;  %v4155_v54 = vsel %vm4148_vm12, %v4151_v35, %v4154_v48  ;;  %v872_v60 = vshll.u32 %v16627_v34, %v869_v3  ;;  %v873_v56 = vshrl.u32 %v16620_v36, %v870_v29 }
  0xcd   : > { %v11713_v55 = vsel %vm844_vm10, nan, %v853_v4  ;;  %v11717_v32 = vsel %vm844_vm10, nan, %v4155_v54  ;;  %v733_v8 = vxor.u32 2147483648, %v732_v39  ;;  %v1019_v16 = vadd.s32 536870912, %v1018_v50 }
  0xce   : > { %16784 = vst [vmem:[#allocation9_spill] sm:$0xff] %v11713_v55  ;;  %7117 = vperm.xlu1 %10645, %v11713_v55   ;;  %v11720_v46 = vshrl.u32 %v867_v41, 5  ;;  %v875_v20 = vshll.u32 %v16620_v36, %v869_v3  ;;  %v876_v63 = vshrl.u32 %v16615_v38, %v870_v29  ;;  %v878_v6 = vshll.u32 %v16615_v38, %v869_v3 }
  0xcf   : > { %v734_v59 = vsel %vm651_vm0, %v733_v8, %v732_v39  ;;  %v1020_v22 = vshrl.u32 %v1019_v16, 30  ;;  %v879_v18 = vshrl.u32 %v16618_v40, %v870_v29  ;;  %v881_v1 = vshll.u32 %v16618_v40, %v869_v3 }
  0xd0   : > { %v737_v28 = vsel %vm11648_vm8, %v11368_v12, %v734_v59  ;;  %v863_v41 = vor.u32 8388608, %v862_v37  ;;  %v882_v52 = vshrl.u32 %v16623_v42, %v870_v29  ;;  %v884_v51 = vshll.u32 %v16623_v42, %v869_v3 }
  0xd1   : > { %10735 = vcosq.f32 %v737_v28  ;;  %v11734_v9 = vand.u32 3, %v738_v15  ;;  %v1021_v31 = vshll.u32 %v1020_v22, 30  ;;  %v874_v13 = vor.u32 %v873_v56, %v872_v60 }
  0xd2   : > { %10737 = vsinq.f32 %v737_v28  ;;  %v877_v62 = vor.u32 %v876_v63, %v875_v20  ;;  %v883_v30 = vor.u32 %v882_v52, %v881_v1  ;;  %v885_v21 = vshrl.u32 %v16625_v49, %v870_v29 }
  0xd3   : > { %v4043_v27 = vand.u32 3, %v4042_v61  ;;  %v11737_v58 = vsub.s32 %v1018_v50, %v1021_v31  ;;  %v880_v26 = vor.u32 %v879_v18, %v878_v6  ;;  %vm887_vm0 = vcmp.lt.s32.totalorder %v11720_v46, 1 }
  0xd4   : > { %vm960_vm1 = vcmp.lt.s32.totalorder %v11492_v19, 0  ;;  %v886_v37 = vor.u32 %v885_v21, %v884_v51  ;;  %vm890_vm2 = vcmp.lt.s32.totalorder %v11720_v46, 4  ;;  %v11742_v3 = vshll.u32 %v863_v41, 8 }
  0xd5   : > { %vm743_vm3 = vcmp.lt.s32.totalorder %v11734_v9, 2  ;;  %vm744_vm4 = vcmp.eq.s32.totalorder %v11734_v9, 0  ;;  %vm747_vm5 = vcmp.eq.s32.totalorder %v11734_v9, 2  ;;  %v1024_v0 = vsub.s32 0, %v11737_v58 }
  0xd6   : > { %vm889_vm6 = vcmp.lt.s32.totalorder %v11720_v46, 3  ;;  %vm741_vm7 = vweird.f32 %v11368_v12  ;;  %v871_v15 = vshrl.u32 %v16627_v34, %v870_v29  ;;  %vm888_vm8 = vcmp.lt.s32.totalorder %v11720_v46, 2  ;;  %v181_v12 = vld [vmem:[%s10995_s28 + $0x40] sm:$0xff] }
  0xd7   : > { %v895_v11 = vsel %vm887_vm0, %v874_v13, %v877_v62  ;;  %v896_v48 = vsel %vm890_vm2, %v883_v30, 920167782  ;;  %vm4044_vm9 = vcmp.lt.s32.totalorder %v4043_v27, 2  ;;  %v10069_v61 = vmin.u32 %v1024_v0, %v11737_v58 }
  0xd8   : > { %v892_v14 = vsel %vm890_vm2, %v880_v26, 2102212464  ;;  %v899_v33 = vsel %vm887_vm0, %v877_v62, %v880_v26  ;;  %vm4045_vm10 = vcmp.eq.s32.totalorder %v4043_v27, 0  ;;  %v897_v29 = vsel %vm889_vm6, %v880_v26, %v896_v48 }
  0xd9   : > { %v900_v35 = vsel %vm890_vm2, %v886_v37, 1326507024  ;;  %v1167_v39 = vand.u32 2139095040, %v11601_v17  ;;  %v1026_v50 = vclz %v10069_v61  ;;  %v1044_v4 = vsub.s32 4, %v1020_v22 }
  0xda   : > { %v898_v54 = vsel %vm888_vm8, %v895_v11, %v897_v29  ;;  %v901_v60 = vsel %vm889_vm6, %v883_v30, %v900_v35  ;;  %vm4048_vm11 = vcmp.eq.s32.totalorder %v4043_v27, 2  ;;  %v891_v56 = vsel %vm887_vm0, %v871_v15, %v874_v13 }
  0xdb   : > { %v893_v8 = vsel %vm889_vm6, %v877_v62, %v892_v14  ;;  %v902_v16 = vsel %vm888_vm8, %v899_v33, %v901_v60  ;;  %v10736_v20 = vpop.eup %10735  ;;  %v1014_v63 = vadd.s32 %v11676_v2, %v11682_v57  ;;  %v10070_v6 = vadd.s32 4294967294, %v1026_v50 }
  0xdc   : > { %v11779_v59 = vmul.u32.u64.low %v11742_v3, %v902_v16  ;;  %v11780_v18 = vmul.u32.u64.high %v11742_v3, %v902_v16, %v11779_v59  ;;  %v10738_v1 = vpop.eup %10737  ;;  %v748_v28 = vxor.u32 2147483648, %v10736_v20  ;;  %v1168_v51 = vshrl.u32 %v1167_v39, 23 }
  0xdd   : > { %v11783_v41 = vmul.u32.u64.low %v11742_v3, %v898_v54  ;;  %v11784_v52 = vmul.u32.u64.high %v11742_v3, %v898_v54, %v11783_v41  ;;  %v745_v31 = vxor.u32 2147483648, %v10738_v1  ;;  %vm10071_vm12 = vcmp.lt.s32.totalorder %v10070_v6, 0 }
  0xde   : > { %v1045_v13 = vsel %vm960_vm1, %v1044_v4, %v1020_v22  ;;  %v894_v2 = vsel %vm888_vm8, %v891_v56, %v893_v8  ;;  %v749_v57 = vsel %vm747_vm5, %v748_v28, %v10738_v1  ;;  %v4050_v62 = vsel %vm4048_vm11, %v748_v28, %v10738_v1 }
  0xdf   : > { %v1029_v30 = vsel %vm10071_vm12, 0, %v10070_v6  ;;  %v10076_v21 = vadd.s32 4294967169, %v1168_v51  ;;  %v746_v26 = vsel %vm744_vm4, %v10736_v20, %v745_v31  ;;  %v4047_v37 = vsel %vm4045_vm10, %v10736_v20, %v745_v31 }
  0xe0   : > { %v1030_v0 = vsub.s32 32, %v1029_v30  ;;  %v1031_v15 = vshll.u32 %v11737_v58, %v1029_v30  ;;  %v750_v46 = vsel %vm743_vm3, %v746_v26, %v749_v57  ;;  %v4051_v22 = vsel %vm4044_vm9, %v4047_v37, %v4050_v62 }
  0xe1   : > { %v1034_v11 = vsub.s32 4294967266, %v1029_v30  ;;  %v910_v48 = vmul.u32 %v11742_v3, %v894_v2  ;;  %v11804_v61 = vsel %vm741_vm7, nan, %v750_v46  ;;  %v11808_v14 = vsel %vm741_vm7, nan, %v4051_v22 }
  0xe2   : > { %16785 = vst [vmem:[#allocation10_spill] sm:$0xff] %v11804_v61  ;;  %v1032_v33 = vshrl.u32 %v1014_v63, %v1030_v0  ;;  %vm912_vm13 = vc.u32 %v11780_v18, %v11783_v41  ;;  %7112 = vperm.xlu0 %10644, %v11804_v61   ;;  %v913_v27 = vadd.s32 1, %v11784_v52  ;;  %vm11816_vm14 = vcmp.le.f32.partialorder %v958_v7, 0.7853982 }
  0xe3   : > { %v1035_v9 = vadd.s32 127, %v1034_v11  ;;  %v1174_v29 = vadd.s32 1, %v10076_v21  ;;  %v1047_v39 = vsel %vm11816_vm14, 0, %v1045_v13  ;;  %v1164_v60 = vand.u32 2147483647, %v11601_v17 }
  0xe4   : > { %v1033_v3 = vor.u32 %v1032_v33, %v1031_v15  ;;  %v914_v50 = vsel %vm912_vm13, %v913_v27, %v11784_v52  ;;  %v4354_v4 = vadd.s32 3, %v1047_v39  ;;  %v11825_v16 = vmul.f32 0.5, %v181_v12 }
  0xe5   : > { %v1036_v35 = vshll.u32 %v1035_v9, 23  ;;  %v915_v54 = vadd.s32 %v914_v50, %v910_v48  ;;  %vm1175_vm15 = vcmp.gt.s32.totalorder %v1174_v29, 0  ;;  %v11827_v59 = vand.u32 3, %v1047_v39 }
  0xe6   : > { %v1040_v8 = vcvt.s32.f32 %v1033_v3  ;;  %v1176_v7 = vsel %vm1175_vm15, %v1174_v29, 0  ;;  %v11831_v52 = vand.u32 3, %v4354_v4  ;;  %v1171_v31 = vand.u32 8388607, %v1164_v60 }
  0xe7   : > { %v1037_v56 = vor.u32 4788187, %v1036_v35  ;;  %v916_v20 = vadd.s32 536870912, %v915_v54  ;;  %v1178_v63 = vand.u32 31, %v1176_v7  ;;  %v1064_v13 = vand.u32 2139095040, %v11825_v16 }
  0xe8   : > { %v1177_v46 = vshrl.u32 %v1176_v7, 5  ;;  %v1172_v12 = vor.u32 8388608, %v1171_v31  ;;  %vm4360_vm2 = vcmp.eq.s32.totalorder %v11831_v52, 2  ;;  %vm1053_vm3 = vcmp.eq.s32.totalorder %v11827_v59, 0 }
  0xe9   : > { %v1038_v6 = vand.u32 2147483647, %v1037_v56  ;;  %v11829_v1 = vshrl.u32 %v916_v20, 30  ;;  %v1179_v28 = vsub.s32 32, %v1178_v63  ;;  %v1181_v57 = vshll.u32 %v16627_v34, %v1178_v63 }
  0xea   : > { %v1184_v62 = vshll.u32 %v16620_v36, %v1178_v63  ;;  %v1187_v30 = vshll.u32 %v16615_v38, %v1178_v63  ;;  %v1190_v22 = vshll.u32 %v16618_v40, %v1178_v63  ;;  %v1193_v33 = vshll.u32 %v16623_v42, %v1178_v63 }
  0xeb   : > { %v1041_v51 = vmul.f32 %v1040_v8, %v1038_v6  ;;  %v918_v2 = vshll.u32 %v11829_v1, 30  ;;  %v1182_v26 = vshrl.u32 %v16620_v36, %v1179_v28  ;;  %v1185_v37 = vshrl.u32 %v16615_v38, %v1179_v28 }
  0xec   : > { %v1188_v0 = vshrl.u32 %v16618_v40, %v1179_v28  ;;  %v1191_v11 = vshrl.u32 %v16623_v42, %v1179_v28  ;;  %v1194_v9 = vshrl.u32 %v16625_v49, %v1179_v28  ;;  %v1065_v27 = vshrl.u32 %v1064_v13, 23 }
  0xed   : > { %v1042_v21 = vxor.u32 2147483648, %v1041_v51  ;;  %v11843_v15 = vsub.s32 %v915_v54, %v918_v2  ;;  %v1180_v35 = vshrl.u32 %v16627_v34, %v1179_v28  ;;  %v1183_v39 = vor.u32 %v1182_v26, %v1181_v57 }
  0xee   : > { %v1186_v50 = vor.u32 %v1185_v37, %v1184_v62  ;;  %v1189_v4 = vor.u32 %v1188_v0, %v1187_v30  ;;  %v1192_v56 = vor.u32 %v1191_v11, %v1190_v22  ;;  %vm1196_vm0 = vcmp.lt.s32.totalorder %v1177_v46, 1 }
  0xef   : > { %v1043_v48 = vsel %vm960_vm1, %v1042_v21, %v1041_v51  ;;  %v921_v29 = vsub.s32 0, %v11843_v15  ;;  %vm1056_vm1 = vcmp.eq.s32.totalorder %v11827_v59, 2  ;;  %v1195_v58 = vor.u32 %v1194_v9, %v1193_v33 }
  0xf0   : > { %v1046_v3 = vsel %vm11816_vm14, %v11492_v19, %v1043_v48  ;;  %v10072_v8 = vadd.s32 4294967169, %v1065_v27  ;;  %vm4357_vm4 = vcmp.eq.s32.totalorder %v11831_v52, 0  ;;  %vm1198_vm5 = vcmp.lt.s32.totalorder %v1177_v46, 3 }
  0xf1   : > { %10739 = vcosq.f32 %v1046_v3  ;;  %v10065_v54 = vmin.u32 %v921_v29, %v11843_v15  ;;  %vm1199_vm6 = vcmp.lt.s32.totalorder %v1177_v46, 4  ;;  %v11861_v20 = vshll.u32 %v1172_v12, 8 }
  0xf2   : > { %10741 = vsinq.f32 %v1046_v3  ;;  %vm1052_vm7 = vcmp.lt.s32.totalorder %v11827_v59, 2  ;;  %vm4356_vm8 = vcmp.lt.s32.totalorder %v11831_v52, 2  ;;  %vm1197_vm9 = vcmp.lt.s32.totalorder %v1177_v46, 2 }
  0xf3   : > { %v923_v7 = vclz %v10065_v54  ;;  %v1200_v63 = vsel %vm1196_vm0, %v1180_v35, %v1183_v39  ;;  %v1201_v6 = vsel %vm1199_vm6, %v1189_v4, 2102212464  ;;  %v1204_v28 = vsel %vm1196_vm0, %v1183_v39, %v1186_v50 }
  0xf4   : > { %vm1050_vm10 = vweird.f32 %v11492_v19  ;;  %vm857_vm11 = vcmp.lt.s32.totalorder %v11554_v23, 0  ;;  %v1202_v31 = vsel %vm1198_vm5, %v1186_v50, %v1201_v6  ;;  %v1205_v13 = vsel %vm1199_vm6, %v1192_v56, 920167782 }
  0xf5   : > { %v10066_v51 = vadd.s32 4294967294, %v923_v7  ;;  %v1208_v2 = vsel %vm1196_vm0, %v1186_v50, %v1189_v4  ;;  %v911_v57 = vadd.s32 %v11783_v41, %v11780_v18  ;;  %v1206_v62 = vsel %vm1198_vm5, %v1189_v4, %v1205_v13 }
  0xf6   : > { %v1209_v30 = vsel %vm1199_vm6, %v1195_v58, 1326507024  ;;  %v1071_v21 = vadd.s32 1, %v10072_v8  ;;  %v1203_v26 = vsel %vm1197_vm9, %v1200_v63, %v1202_v31  ;;  %v1207_v37 = vsel %vm1197_vm9, %v1204_v28, %v1206_v62 }
  0xf7   : > { %vm10067_vm12 = vcmp.lt.s32.totalorder %v10066_v51, 0  ;;  %v1210_v0 = vsel %vm1198_vm5, %v1192_v56, %v1209_v30  ;;  %v11882_v48 = vmul.u32.u64.low %v11861_v20, %v1207_v37  ;;  %v11883_v33 = vmul.u32.u64.high %v11861_v20, %v1207_v37, %v11882_v48 }
  0xf8   : > { %v926_v22 = vsel %vm10067_vm12, 0, %v10066_v51  ;;  %v1211_v11 = vsel %vm1197_vm9, %v1208_v2, %v1210_v0  ;;  %vm1072_vm13 = vcmp.gt.s32.totalorder %v1071_v21, 0  ;;  %v941_v3 = vsub.s32 4, %v11829_v1 }
  0xf9   : > { %v927_v18 = vsub.s32 32, %v926_v22  ;;  %v928_v41 = vshll.u32 %v11843_v15, %v926_v22  ;;  %v931_v9 = vsub.s32 4294967266, %v926_v22  ;;  %v1073_v35 = vsel %vm1072_vm13, %v1071_v21, 0 }
  0xfa   : > { %v11889_v29 = vmul.u32.u64.low %v11861_v20, %v1211_v11  ;;  %v11890_v12 = vmul.u32.u64.high %v11861_v20, %v1211_v11, %v11889_v29  ;;  %v1061_v54 = vand.u32 2147483647, %v11825_v16  ;;  %v1219_v58 = vmul.u32 %v11861_v20, %v1203_v26 }
  0xfb   : > { %v10740_v27 = vpop.eup %10739  ;;  %v929_v50 = vshrl.u32 %v911_v57, %v927_v18  ;;  %v932_v4 = vadd.s32 127, %v931_v9  ;;  %v1222_v15 = vadd.s32 1, %v11883_v33  ;;  %v1075_v8 = vand.u32 31, %v1073_v35 }
  0xfc   : > { %v10742_v46 = vpop.eup %10741  ;;  %v1057_v39 = vxor.u32 2147483648, %v10740_v27  ;;  %v942_v20 = vsel %vm857_vm11, %v941_v3, %v11829_v1  ;;  %vm1221_vm14 = vc.u32 %v11890_v12, %v11882_v48  ;;  %vm11924_vm15 = vcmp.le.f32.partialorder %v855_v44, 0.7853982 }
  0xfd   : > { %v1054_v56 = vxor.u32 2147483648, %v10742_v46  ;;  %v930_v6 = vor.u32 %v929_v50, %v928_v41  ;;  %v933_v28 = vshll.u32 %v932_v4, 23  ;;  %v1223_v1 = vsel %vm1221_vm14, %v1222_v15, %v11883_v33 }
  0xfe   : > { %v1058_v7 = vsel %vm1056_vm1, %v1057_v39, %v10742_v46  ;;  %v4362_v63 = vsel %vm4360_vm2, %v1057_v39, %v10742_v46  ;;  %v1076_v26 = vsub.s32 32, %v1075_v8  ;;  %v1224_v37 = vadd.s32 %v1223_v1, %v1219_v58 }
  0xff   : > { %v1055_v51 = vsel %vm1053_vm3, %v10740_v27, %v1054_v56  ;;  %v4359_v31 = vsel %vm4357_vm4, %v10740_v27, %v1054_v56  ;;  %v934_v57 = vor.u32 4788187, %v933_v28  ;;  %v937_v62 = vcvt.s32.f32 %v930_v6 }
 0x100   : > { %v1059_v13 = vsel %vm1052_vm7, %v1055_v51, %v1058_v7  ;;  %v4363_v2 = vsel %vm4356_vm8, %v4359_v31, %v4362_v63  ;;  %v944_v0 = vsel %vm11924_vm15, 0, %v942_v20  ;;  %v1068_v19 = vand.u32 8388607, %v1061_v54  ;;  %v184_v31 = vld [vmem:[%s10995_s28 + $0x58] sm:$0xff] }
 0x101   : > { %v11914_v30 = vsel %vm1050_vm10, nan, %v1059_v13  ;;  %v11918_v21 = vsel %vm1050_vm10, nan, %v4363_v2  ;;  %v935_v52 = vand.u32 2147483647, %v934_v57  ;;  %v1078_v22 = vshll.u32 %v16627_v34, %v1075_v8 }
 0x102   : > { %16788 = vst [vmem:[#allocation11_spill] sm:$0xff] %v11914_v30  ;;  %7127 = vperm.xlu1 %10645, %v11914_v30   ;;  %v1079_v11 = vshrl.u32 %v16620_v36, %v1076_v26  ;;  %v1225_v18 = vadd.s32 536870912, %v1224_v37  ;;  %v1081_v41 = vshll.u32 %v16620_v36, %v1075_v8  ;;  %v1082_v44 = vshrl.u32 %v16615_v38, %v1076_v26 }
 0x103   : > { %v938_v33 = vmul.f32 %v937_v62, %v935_v52  ;;  %v1084_v9 = vshll.u32 %v16615_v38, %v1075_v8  ;;  %v1085_v27 = vshrl.u32 %v16618_v40, %v1076_v26  ;;  %v1087_v3 = vshll.u32 %v16618_v40, %v1075_v8 }
 0x104   : > { %v1088_v29 = vshrl.u32 %v16623_v42, %v1076_v26  ;;  %v11940_v39 = vshrl.u32 %v1225_v18, 30  ;;  %v1074_v50 = vshrl.u32 %v1073_v35, 5  ;;  %v1090_v4 = vshll.u32 %v16623_v42, %v1075_v8 }
 0x105   : > { %v939_v46 = vxor.u32 2147483648, %v938_v33  ;;  %v11943_v56 = vand.u32 3, %v944_v0  ;;  %v4250_v58 = vadd.s32 3, %v944_v0  ;;  %v1069_v15 = vor.u32 8388608, %v1068_v19 }
 0x106   : > { %v1091_v7 = vshrl.u32 %v16625_v49, %v1076_v26  ;;  %v1227_v6 = vshll.u32 %v11940_v39, 30  ;;  %v1080_v28 = vor.u32 %v1079_v11, %v1078_v22  ;;  %v1083_v51 = vor.u32 %v1082_v44, %v1081_v41 }
 0x107   : > { %v940_v63 = vsel %vm857_vm11, %v939_v46, %v938_v33  ;;  %v1086_v20 = vor.u32 %v1085_v27, %v1084_v9  ;;  %v1089_v8 = vor.u32 %v1088_v29, %v1087_v3  ;;  %vm1093_vm0 = vcmp.lt.s32.totalorder %v1074_v50, 1 }
 0x108   : > { %v943_v35 = vsel %vm11924_vm15, %v11554_v23, %v940_v63  ;;  %v1092_v13 = vor.u32 %v1091_v7, %v1090_v4  ;;  %v11953_v2 = vsub.s32 %v1224_v37, %v1227_v6  ;;  %vm1096_vm1 = vcmp.lt.s32.totalorder %v1074_v50, 4 }
 0x109   : > { %10743 = vcosq.f32 %v943_v35  ;;  %v4251_v57 = vand.u32 3, %v4250_v58  ;;  %v11955_v62 = vmul.f32 0.5, %v184_v31  ;;  %vm1166_vm2 = vcmp.lt.s32.totalorder %v11601_v17, 0 }
 0x10a   : > { %10745 = vsinq.f32 %v943_v35  ;;  %v1230_v1 = vsub.s32 0, %v11953_v2  ;;  %v1077_v52 = vshrl.u32 %v16627_v34, %v1076_v26  ;;  %vm1094_vm3 = vcmp.lt.s32.totalorder %v1074_v50, 2 }
 0x10b   : > { %vm1095_vm4 = vcmp.lt.s32.totalorder %v1074_v50, 3  ;;  %v1101_v59 = vsel %vm1093_vm0, %v1080_v28, %v1083_v51  ;;  %v1102_v0 = vsel %vm1096_vm1, %v1089_v8, 920167782  ;;  %v1105_v37 = vsel %vm1093_vm0, %v1083_v51, %v1086_v20 }
 0x10c   : > { %v1106_v19 = vsel %vm1096_vm1, %v1092_v13, 1326507024  ;;  %vm949_vm5 = vcmp.lt.s32.totalorder %v11943_v56, 2  ;;  %v10077_v22 = vmin.u32 %v1230_v1, %v11953_v2  ;;  %v1098_v11 = vsel %vm1096_vm1, %v1086_v20, 2102212464 }
 0x10d   : > { %v1109_v33 = vshll.u32 %v1069_v15, 8  ;;  %vm947_vm6 = vweird.f32 %v11554_v23  ;;  %vm950_vm7 = vcmp.eq.s32.totalorder %v11943_v56, 0  ;;  %vm953_vm8 = vcmp.eq.s32.totalorder %v11943_v56, 2 }
 0x10e   : > { %v1103_v26 = vsel %vm1095_vm4, %v1086_v20, %v1102_v0  ;;  %v1107_v18 = vsel %vm1095_vm4, %v1089_v8, %v1106_v19  ;;  %vm4252_vm9 = vcmp.lt.s32.totalorder %v4251_v57, 2  ;;  %v1232_v41 = vclz %v10077_v22 }
 0x10f   : > { %v1104_v44 = vsel %vm1094_vm3, %v1101_v59, %v1103_v26  ;;  %v1108_v9 = vsel %vm1094_vm3, %v1105_v37, %v1107_v18  ;;  %v1250_v27 = vsub.s32 4, %v11940_v39  ;;  %v1097_v3 = vsel %vm1093_vm0, %v1077_v52, %v1080_v28 }
 0x110   : > { %v1099_v29 = vsel %vm1095_vm4, %v1083_v51, %v1098_v11  ;;  %v1373_v46 = vand.u32 2139095040, %v11955_v62  ;;  %vm4253_vm10 = vcmp.eq.s32.totalorder %v4251_v57, 0  ;;  %vm11977_vm11 = vcmp.le.f32.partialorder %v1164_v60, 0.7853982 }
 0x111   : > { %v10078_v58 = vadd.s32 4294967294, %v1232_v41  ;;  %v11981_v15 = vmul.u32.u64.low %v1109_v33, %v1108_v9  ;;  %v11982_v7 = vmul.u32.u64.high %v1109_v33, %v1108_v9, %v11981_v15  ;;  %vm4256_vm12 = vcmp.eq.s32.totalorder %v4251_v57, 2 }
 0x112   : > { %v11984_v63 = vmul.u32.u64.low %v1109_v33, %v1104_v44  ;;  %v11985_v6 = vmul.u32.u64.high %v1109_v33, %v1104_v44, %v11984_v63  ;;  %v1374_v28 = vshrl.u32 %v1373_v46, 23  ;;  %v1220_v31 = vadd.s32 %v11882_v48, %v11890_v12 }
 0x113   : > { %v10744_v51 = vpop.eup %10743  ;;  %vm10079_vm13 = vcmp.lt.s32.totalorder %v10078_v58, 0  ;;  %v1100_v60 = vsel %vm1094_vm3, %v1097_v3, %v1099_v29  ;;  %v1370_v35 = vand.u32 2147483647, %v11955_v62  ;;  %v1251_v1 = vsel %vm1166_vm2, %v1250_v27, %v11940_v39 }
 0x114   : > { %v10746_v20 = vpop.eup %10745  ;;  %v954_v8 = vxor.u32 2147483648, %v10744_v51  ;;  %v1235_v13 = vsel %vm10079_vm13, 0, %v10078_v58  ;;  %v10084_v52 = vadd.s32 4294967169, %v1374_v28  ;;  %v1116_v50 = vmul.u32 %v1109_v33, %v1100_v60 }
 0x115   : > { %v951_v59 = vxor.u32 2147483648, %v10746_v20  ;;  %v1236_v0 = vsub.s32 32, %v1235_v13  ;;  %v1237_v37 = vshll.u32 %v11953_v2, %v1235_v13  ;;  %v1240_v19 = vsub.s32 4294967266, %v1235_v13 }
 0x116   : > { %v955_v48 = vsel %vm953_vm8, %v954_v8, %v10746_v20  ;;  %v4258_v12 = vsel %vm4256_vm12, %v954_v8, %v10746_v20  ;;  %vm1118_vm14 = vc.u32 %v11982_v7, %v11984_v63  ;;  %v1119_v41 = vadd.s32 1, %v11985_v6 }
 0x117   : > { %v952_v22 = vsel %vm950_vm7, %v10744_v51, %v951_v59  ;;  %v4255_v39 = vsel %vm4253_vm10, %v10744_v51, %v951_v59  ;;  %v1238_v11 = vshrl.u32 %v1220_v31, %v1236_v0  ;;  %v1241_v26 = vadd.s32 127, %v1240_v19 }
 0x118   : > { %v956_v2 = vsel %vm949_vm5, %v952_v22, %v955_v48  ;;  %v4259_v18 = vsel %vm4252_vm9, %v4255_v39, %v4258_v12  ;;  %v1380_v44 = vadd.s32 1, %v10084_v52  ;;  %v1253_v56 = vsel %vm11977_vm11, 0, %v1251_v1  ;;  %v183_v52 = vld [vmem:[%s10995_s28 + $0x50] sm:$0xff] }
 0x119   : > { %v12010_v33 = vsel %vm947_vm6, nan, %v956_v2  ;;  %v12014_v9 = vsel %vm947_vm6, nan, %v4259_v18  ;;  %v1239_v27 = vor.u32 %v1238_v11, %v1237_v37  ;;  %v1242_v3 = vshll.u32 %v1241_v26, 23 }
 0x11a   : > { %16793 = vst [vmem:[#allocation12_spill] sm:$0xff] %v12010_v33  ;;  %7122 = vperm.xlu0 %10644, %v12010_v33   ;;  %v1120_v57 = vsel %vm1118_vm14, %v1119_v41, %v11985_v6  ;;  %v1377_v29 = vand.u32 8388607, %v1370_v35  ;;  %vm1381_vm15 = vcmp.gt.s32.totalorder %v1380_v44, 0  ;;  %v12022_v60 = vand.u32 3, %v1253_v56 }
 0x11b   : > { %v1243_v46 = vor.u32 4788187, %v1242_v3  ;;  %v1246_v58 = vcvt.s32.f32 %v1239_v27  ;;  %v1121_v15 = vadd.s32 %v1120_v57, %v1116_v50  ;;  %v1382_v23 = vsel %vm1381_vm15, %v1380_v44, 0 }
 0x11c   : > { %v1384_v28 = vand.u32 31, %v1382_v23  ;;  %v4562_v13 = vadd.s32 3, %v1253_v56  ;;  %v1378_v6 = vor.u32 8388608, %v1377_v29  ;;  %v1383_v39 = vshrl.u32 %v1382_v23, 5 }
 0x11d   : > { %v1244_v51 = vand.u32 2147483647, %v1243_v46  ;;  %v1122_v31 = vadd.s32 536870912, %v1121_v15  ;;  %v12036_v2 = vmul.f32 0.5, %v183_v52  ;;  %vm1259_vm3 = vcmp.eq.s32.totalorder %v12022_v60, 0 }
 0x11e   : > { %v1385_v20 = vsub.s32 32, %v1384_v28  ;;  %v1387_v59 = vshll.u32 %v16627_v34, %v1384_v28  ;;  %v1390_v37 = vshll.u32 %v16620_v36, %v1384_v28  ;;  %v1396_v19 = vshll.u32 %v16618_v40, %v1384_v28 }
 0x11f   : > { %v1247_v8 = vmul.f32 %v1246_v58, %v1244_v51  ;;  %v12024_v1 = vshrl.u32 %v1122_v31, 30  ;;  %v1393_v11 = vshll.u32 %v16615_v38, %v1384_v28  ;;  %v1399_v44 = vshll.u32 %v16623_v42, %v1384_v28 }
 0x120   : > { %v1388_v0 = vshrl.u32 %v16620_v36, %v1385_v20  ;;  %v1391_v50 = vshrl.u32 %v16615_v38, %v1385_v20  ;;  %v1397_v22 = vshrl.u32 %v16623_v42, %v1385_v20  ;;  %v1394_v26 = vshrl.u32 %v16618_v40, %v1385_v20 }
 0x121   : > { %v1248_v48 = vxor.u32 2147483648, %v1247_v8  ;;  %v1124_v12 = vshll.u32 %v12024_v1, 30  ;;  %v1400_v27 = vshrl.u32 %v16625_v49, %v1385_v20  ;;  %v12047_v56 = vand.u32 3, %v4562_v13 }
 0x122   : > { %v1386_v57 = vshrl.u32 %v16627_v34, %v1385_v20  ;;  %v1389_v29 = vor.u32 %v1388_v0, %v1387_v59  ;;  %v1392_v58 = vor.u32 %v1391_v50, %v1390_v37  ;;  %v1398_v23 = vor.u32 %v1397_v22, %v1396_v19 }
 0x123   : > { %v1249_v18 = vsel %vm1166_vm2, %v1248_v48, %v1247_v8  ;;  %v12040_v41 = vsub.s32 %v1121_v15, %v1124_v12  ;;  %v1395_v15 = vor.u32 %v1394_v26, %v1393_v11  ;;  %vm1402_vm0 = vcmp.lt.s32.totalorder %v1383_v39, 1 }
 0x124   : > { %v1252_v3 = vsel %vm11977_vm11, %v11601_v17, %v1249_v18  ;;  %vm1405_vm1 = vcmp.lt.s32.totalorder %v1383_v39, 4  ;;  %vm1063_vm2 = vcmp.lt.s32.totalorder %v11825_v16, 0  ;;  %v1401_v4 = vor.u32 %v1400_v27, %v1399_v44 }
 0x125   : > { %10747 = vcosq.f32 %v1252_v3  ;;  %v1127_v46 = vsub.s32 0, %v12040_v41  ;;  %v12053_v51 = vshll.u32 %v1378_v6, 8  ;;  %v1270_v31 = vand.u32 2139095040, %v12036_v2 }
 0x126   : > { %10749 = vsinq.f32 %v1252_v3  ;;  %vm1403_vm4 = vcmp.lt.s32.totalorder %v1383_v39, 2  ;;  %vm1404_vm5 = vcmp.lt.s32.totalorder %v1383_v39, 3  ;;  %v1406_v20 = vsel %vm1402_vm0, %v1386_v57, %v1389_v29 }
 0x127   : > { %v10073_v28 = vmin.u32 %v1127_v46, %v12040_v41  ;;  %v1407_v8 = vsel %vm1405_vm1, %v1395_v15, 2102212464  ;;  %vm1258_vm6 = vcmp.lt.s32.totalorder %v12022_v60, 2  ;;  %v1410_v59 = vsel %vm1402_vm0, %v1389_v29, %v1392_v58 }
 0x128   : > { %v1408_v52 = vsel %vm1404_vm5, %v1392_v58, %v1407_v8  ;;  %v1411_v6 = vsel %vm1405_vm1, %v1398_v23, 920167782  ;;  %vm1256_vm7 = vweird.f32 %v11601_v17  ;;  %vm1262_vm8 = vcmp.eq.s32.totalorder %v12022_v60, 2 }
 0x129   : > { %v1129_v13 = vclz %v10073_v28  ;;  %vm4564_vm9 = vcmp.lt.s32.totalorder %v12047_v56, 2  ;;  %v1117_v0 = vadd.s32 %v11984_v63, %v11982_v7  ;;  %v1414_v37 = vsel %vm1402_vm0, %v1392_v58, %v1395_v15 }
 0x12a   : > { %v1147_v48 = vsub.s32 4, %v12024_v1  ;;  %v1412_v12 = vsel %vm1404_vm5, %v1395_v15, %v1411_v6  ;;  %v1415_v50 = vsel %vm1405_vm1, %v1401_v4, 1326507024  ;;  %v1409_v22 = vsel %vm1403_vm4, %v1406_v20, %v1408_v52 }
 0x12b   : > { %v10074_v19 = vadd.s32 4294967294, %v1129_v13  ;;  %v1413_v11 = vsel %vm1403_vm4, %v1410_v59, %v1412_v12  ;;  %v1416_v26 = vsel %vm1404_vm5, %v1398_v23, %v1415_v50  ;;  %v1271_v18 = vshrl.u32 %v1270_v31, 23 }
 0x12c   : > { %v1417_v44 = vsel %vm1403_vm4, %v1414_v37, %v1416_v26  ;;  %v12077_v7 = vmul.u32.u64.low %v12053_v51, %v1413_v11  ;;  %v12078_v63 = vmul.u32.u64.high %v12053_v51, %v1413_v11, %v12077_v7  ;;  %vm4568_vm11 = vcmp.eq.s32.totalorder %v12047_v56, 2 }
 0x12d   : > { %vm10075_vm10 = vcmp.lt.s32.totalorder %v10074_v19, 0  ;;  %v12082_v3 = vmul.u32.u64.low %v12053_v51, %v1417_v44  ;;  %v12083_v57 = vmul.u32.u64.high %v12053_v51, %v1417_v44, %v12082_v3  ;;  %v10080_v29 = vadd.s32 4294967169, %v1271_v18  ;;  %v186_v18 = vld [vmem:[%s10995_s28 + $0x68] sm:$0xff] }
 0x12e   : > { %v1132_v27 = vsel %vm10075_vm10, 0, %v10074_v19  ;;  %vm4565_vm12 = vcmp.eq.s32.totalorder %v12047_v56, 0  ;;  %v1148_v4 = vsel %vm1063_vm2, %v1147_v48, %v12024_v1  ;;  %v1425_v31 = vmul.u32 %v12053_v51, %v1409_v22 }
 0x12f   : > { %v10748_v46 = vpop.eup %10747  ;;  %v1133_v58 = vsub.s32 32, %v1132_v27  ;;  %v1134_v23 = vshll.u32 %v12040_v41, %v1132_v27  ;;  %v1137_v15 = vsub.s32 4294967266, %v1132_v27  ;;  %v1428_v52 = vadd.s32 1, %v12078_v63 }
 0x130   : > { %v10750_v39 = vpop.eup %10749  ;;  %v1263_v28 = vxor.u32 2147483648, %v10748_v46  ;;  %vm1427_vm13 = vc.u32 %v12083_v57, %v12077_v7  ;;  %v1277_v6 = vadd.s32 1, %v10080_v29  ;;  %vm12107_vm14 = vcmp.le.f32.partialorder %v1061_v54, 0.7853982 }
 0x131   : > { %v1260_v20 = vxor.u32 2147483648, %v10750_v39  ;;  %v1135_v8 = vshrl.u32 %v1117_v0, %v1133_v58  ;;  %v1138_v13 = vadd.s32 127, %v1137_v15  ;;  %v1429_v50 = vsel %vm1427_vm13, %v1428_v52, %v12078_v63 }
 0x132   : > { %v1264_v59 = vsel %vm1262_vm8, %v1263_v28, %v10750_v39  ;;  %v4570_v41 = vsel %vm4568_vm11, %v1263_v28, %v10750_v39  ;;  %v1150_v54 = vsel %vm12107_vm14, 0, %v1148_v4  ;;  %v1430_v56 = vadd.s32 %v1429_v50, %v1425_v31 }
 0x133   : > { %v1261_v1 = vsel %vm1259_vm3, %v10748_v46, %v1260_v20  ;;  %v4567_v51 = vsel %vm4565_vm12, %v10748_v46, %v1260_v20  ;;  %v1136_v37 = vor.u32 %v1135_v8, %v1134_v23  ;;  %v1139_v0 = vshll.u32 %v1138_v13, 23 }
 0x134   : > { %v1265_v19 = vsel %vm1258_vm6, %v1261_v1, %v1264_v59  ;;  %v4571_v48 = vsel %vm4564_vm9, %v4567_v51, %v4570_v41  ;;  %vm1278_vm15 = vcmp.gt.s32.totalorder %v1277_v6, 0  ;;  %v4458_v63 = vadd.s32 3, %v1150_v54 }
 0x135   : > { %v12114_v22 = vsel %vm1256_vm7, nan, %v1265_v19  ;;  %v12118_v11 = vsel %vm1256_vm7, nan, %v4571_v48  ;;  %v1140_v60 = vor.u32 4788187, %v1139_v0  ;;  %v1143_v26 = vcvt.s32.f32 %v1136_v37 }
 0x136   : > { %16796 = vst [vmem:[#allocation13_spill] sm:$0xff] %v12114_v22  ;;  %7137 = vperm.xlu1 %10645, %v12114_v22   ;;  %v1267_v27 = vand.u32 2147483647, %v12036_v2  ;;  %v1279_v3 = vsel %vm1278_vm15, %v1277_v6, 0  ;;  %v1431_v29 = vadd.s32 536870912, %v1430_v56  ;;  %v12125_v58 = vand.u32 3, %v1150_v54 }
 0x137   : > { %v1141_v44 = vand.u32 2147483647, %v1140_v60  ;;  %v1281_v46 = vand.u32 31, %v1279_v3  ;;  %v12129_v39 = vmul.f32 0.5, %v186_v18  ;;  %v12131_v4 = vand.u32 3, %v4458_v63 }
 0x138   : > { %v12127_v23 = vshrl.u32 %v1431_v29, 30  ;;  %v1274_v31 = vand.u32 8388607, %v1267_v27  ;;  %v12135_v20 = vshrl.u32 %v1279_v3, 5  ;;  %vm1159_vm0 = vcmp.eq.s32.totalorder %v12125_v58, 2 }
 0x139   : > { %v1144_v17 = vmul.f32 %v1143_v26, %v1141_v44  ;;  %v1282_v15 = vsub.s32 32, %v1281_v46  ;;  %v1284_v13 = vshll.u32 %v16627_v34, %v1281_v46  ;;  %v1287_v52 = vshll.u32 %v16620_v36, %v1281_v46 }
 0x13a   : > { %v1433_v8 = vshll.u32 %v12127_v23, 30  ;;  %v1290_v59 = vshll.u32 %v16615_v38, %v1281_v46  ;;  %v1293_v51 = vshll.u32 %v16618_v40, %v1281_v46  ;;  %v1296_v50 = vshll.u32 %v16623_v42, %v1281_v46 }
 0x13b   : > { %v1145_v28 = vxor.u32 2147483648, %v1144_v17  ;;  %v1285_v6 = vshrl.u32 %v16620_v36, %v1282_v15  ;;  %v1288_v1 = vshrl.u32 %v16615_v38, %v1282_v15  ;;  %v1291_v19 = vshrl.u32 %v16618_v40, %v1282_v15 }
 0x13c   : > { %v12149_v0 = vsub.s32 %v1430_v56, %v1433_v8  ;;  %v1294_v48 = vshrl.u32 %v16623_v42, %v1282_v15  ;;  %v1579_v60 = vand.u32 2139095040, %v12129_v39  ;;  %v1283_v54 = vshrl.u32 %v16627_v34, %v1282_v15 }
 0x13d   : > { %v1146_v41 = vsel %vm1063_vm2, %v1145_v28, %v1144_v17  ;;  %v1576_v18 = vand.u32 2147483647, %v12129_v39  ;;  %vm4464_vm1 = vcmp.eq.s32.totalorder %v12131_v4, 2  ;;  %v1275_v12 = vor.u32 8388608, %v1274_v31 }
 0x13e   : > { %v1149_v37 = vsel %vm12107_vm14, %v11825_v16, %v1146_v41  ;;  %v1436_v26 = vsub.s32 0, %v12149_v0  ;;  %v1286_v56 = vor.u32 %v1285_v6, %v1284_v13  ;;  %v1289_v44 = vor.u32 %v1288_v1, %v1287_v52 }
 0x13f   : > { %10751 = vcosq.f32 %v1149_v37  ;;  %v1297_v63 = vshrl.u32 %v16625_v49, %v1282_v15  ;;  %vm1156_vm2 = vcmp.eq.s32.totalorder %v12125_v58, 0  ;;  %vm4461_vm3 = vcmp.eq.s32.totalorder %v12131_v4, 0 }
 0x140   : > { %10753 = vsinq.f32 %v1149_v37  ;;  %v10085_v3 = vmin.u32 %v1436_v26, %v12149_v0  ;;  %v1292_v29 = vor.u32 %v1291_v19, %v1290_v59  ;;  %v1295_v46 = vor.u32 %v1294_v48, %v1293_v51 }
 0x141   : > { %vm1299_vm4 = vcmp.lt.s32.totalorder %v12135_v20, 1  ;;  %vm1155_vm5 = vcmp.lt.s32.totalorder %v12125_v58, 2  ;;  %vm4460_vm6 = vcmp.lt.s32.totalorder %v12131_v4, 2  ;;  %v1426_v17 = vadd.s32 %v12077_v7, %v12083_v57 }
 0x142   : > { %v1298_v28 = vor.u32 %v1297_v63, %v1296_v50  ;;  %vm1302_vm7 = vcmp.lt.s32.totalorder %v12135_v20, 4  ;;  %v1580_v15 = vshrl.u32 %v1579_v60, 23  ;;  %vm1153_vm8 = vweird.f32 %v11825_v16 }
 0x143   : > { %v1438_v31 = vclz %v10085_v3  ;;  %vm1301_vm9 = vcmp.lt.s32.totalorder %v12135_v20, 3  ;;  %v1303_v8 = vsel %vm1299_vm4, %v1283_v54, %v1286_v56  ;;  %v1304_v13 = vsel %vm1302_vm7, %v1292_v29, 2102212464 }
 0x144   : > { %vm1300_vm10 = vcmp.lt.s32.totalorder %v12135_v20, 2  ;;  %v1305_v7 = vsel %vm1301_vm9, %v1289_v44, %v1304_v13  ;;  %v1307_v57 = vsel %vm1299_vm4, %v1286_v56, %v1289_v44  ;;  %v1315_v52 = vshll.u32 %v1275_v12, 8 }
 0x145   : > { %vm1372_vm11 = vcmp.lt.s32.totalorder %v11955_v62, 0  ;;  %v10086_v59 = vadd.s32 4294967294, %v1438_v31  ;;  %v1306_v41 = vsel %vm1300_vm10, %v1303_v8, %v1305_v7  ;;  %v1308_v6 = vsel %vm1302_vm7, %v1295_v46, 920167782 }
 0x146   : > { %v1311_v1 = vsel %vm1299_vm4, %v1289_v44, %v1292_v29  ;;  %v1456_v51 = vsub.s32 4, %v12127_v23  ;;  %v1309_v37 = vsel %vm1301_vm9, %v1292_v29, %v1308_v6  ;;  %v1312_v19 = vsel %vm1302_vm7, %v1298_v28, 1326507024 }
 0x147   : > { %v10092_v48 = vadd.s32 4294967169, %v1580_v15  ;;  %vm10087_vm12 = vcmp.lt.s32.totalorder %v10086_v59, 0  ;;  %v1310_v50 = vsel %vm1300_vm10, %v1307_v57, %v1309_v37  ;;  %v1313_v60 = vsel %vm1301_vm9, %v1295_v46, %v1312_v19 }
 0x148   : > { %v1322_v26 = vmul.u32 %v1315_v52, %v1306_v41  ;;  %v1441_v12 = vsel %vm10087_vm12, 0, %v10086_v59  ;;  %v1314_v56 = vsel %vm1300_vm10, %v1311_v1, %v1313_v60  ;;  %v1457_v60 = vsel %vm1372_vm11, %v1456_v51, %v12127_v23  ;;  %v185_v51 = vld [vmem:[%s10995_s28 + $0x60] sm:$0xff] }
 0x149   : > { %v10752_v54 = vpop.eup %10751  ;;  %v12199_v44 = vmul.u32.u64.low %v1315_v52, %v1310_v50  ;;  %v12200_v63 = vmul.u32.u64.high %v1315_v52, %v1310_v50, %v12199_v44  ;;  %v1442_v28 = vsub.s32 32, %v1441_v12  ;;  %v1443_v15 = vshll.u32 %v12149_v0, %v1441_v12 }
 0x14a   : > { %v10754_v3 = vpop.eup %10753  ;;  %v1160_v29 = vxor.u32 2147483648, %v10752_v54  ;;  %v1446_v31 = vsub.s32 4294967266, %v1441_v12  ;;  %v12204_v13 = vmul.u32.u64.low %v1315_v52, %v1314_v56  ;;  %v12205_v7 = vmul.u32.u64.high %v1315_v52, %v1314_v56, %v12204_v13 }
 0x14b   : > { %v1157_v8 = vxor.u32 2147483648, %v10754_v3  ;;  %v1586_v46 = vadd.s32 1, %v10092_v48  ;;  %v1444_v59 = vshrl.u32 %v1426_v17, %v1442_v28  ;;  %v1325_v1 = vadd.s32 1, %v12200_v63 }
 0x14c   : > { %v1161_v57 = vsel %vm1159_vm0, %v1160_v29, %v10754_v3  ;;  %v4466_v20 = vsel %vm4464_vm1, %v1160_v29, %v10754_v3  ;;  %v1447_v41 = vadd.s32 127, %v1446_v31  ;;  %vm1324_vm14 = vc.u32 %v12205_v7, %v12199_v44 }
 0x14d   : > { %v1158_v6 = vsel %vm1156_vm2, %v10752_v54, %v1157_v8  ;;  %v4463_v0 = vsel %vm4461_vm3, %v10752_v54, %v1157_v8  ;;  %vm1587_vm13 = vcmp.gt.s32.totalorder %v1586_v46, 0  ;;  %v1445_v19 = vor.u32 %v1444_v59, %v1443_v15 }
 0x14e   : > { %v1162_v52 = vsel %vm1155_vm5, %v1158_v6, %v1161_v57  ;;  %v4467_v37 = vsel %vm4460_vm6, %v4463_v0, %v4466_v20  ;;  %v1448_v48 = vshll.u32 %v1447_v41, 23  ;;  %v1326_v54 = vsel %vm1324_vm14, %v1325_v1, %v12200_v63 }
 0x14f   : > { %v12222_v17 = vsel %vm1153_vm8, nan, %v1162_v52  ;;  %v12226_v50 = vsel %vm1153_vm8, nan, %v4467_v37  ;;  %v1452_v4 = vcvt.s32.f32 %v1445_v19  ;;  %vm12237_vm15 = vcmp.le.f32.partialorder %v1370_v35, 0.7853982 }
 0x150   : > { %16797 = vst [vmem:[#allocation14_spill] sm:$0xff] %v12222_v17  ;;  %7132 = vperm.xlu0 %10644, %v12222_v17   ;;  %v1449_v58 = vor.u32 4788187, %v1448_v48  ;;  %v1327_v16 = vadd.s32 %v1326_v54, %v1322_v26  ;;  %v1583_v56 = vand.u32 8388607, %v1576_v18  ;;  %v1588_v23 = vsel %vm1587_vm13, %v1586_v46, 0 }
 0x151   : > { %v1459_v29 = vsel %vm12237_vm15, 0, %v1457_v60  ;;  %v1590_v28 = vand.u32 31, %v1588_v23  ;;  %v12247_v8 = vmul.f32 0.5, %v185_v51  ;;  %v1589_v19 = vshrl.u32 %v1588_v23, 5 }
 0x152   : > { %v1450_v3 = vand.u32 2147483647, %v1449_v58  ;;  %v1328_v15 = vadd.s32 536870912, %v1327_v16  ;;  %v12249_v35 = vand.u32 3, %v1459_v29  ;;  %v4770_v13 = vadd.s32 3, %v1459_v29 }
 0x153   : > { %v1591_v31 = vsub.s32 32, %v1590_v28  ;;  %v1584_v57 = vor.u32 8388608, %v1583_v56  ;;  %v1593_v46 = vshll.u32 %v16627_v34, %v1590_v28  ;;  %v1596_v41 = vshll.u32 %v16620_v36, %v1590_v28 }
 0x154   : > { %v1453_v63 = vmul.f32 %v1452_v4, %v1450_v3  ;;  %v12251_v26 = vshrl.u32 %v1328_v15, 30  ;;  %v1602_v1 = vshll.u32 %v16618_v40, %v1590_v28  ;;  %v1599_v48 = vshll.u32 %v16615_v38, %v1590_v28 }
 0x155   : > { %v1594_v59 = vshrl.u32 %v16620_v36, %v1591_v31  ;;  %v1597_v0 = vshrl.u32 %v16615_v38, %v1591_v31  ;;  %v1603_v52 = vshrl.u32 %v16623_v42, %v1591_v31  ;;  %v1600_v60 = vshrl.u32 %v16618_v40, %v1591_v31 }
 0x156   : > { %v1454_v20 = vxor.u32 2147483648, %v1453_v63  ;;  %v1330_v6 = vshll.u32 %v12251_v26, 30  ;;  %v1605_v54 = vshll.u32 %v16623_v42, %v1590_v28  ;;  %v1606_v56 = vshrl.u32 %v16625_v49, %v1591_v31 }
 0x157   : > { %v1592_v51 = vshrl.u32 %v16627_v34, %v1591_v31  ;;  %v1595_v3 = vor.u32 %v1594_v59, %v1593_v46  ;;  %v16614_v23 = vand.u32 2147483647, %v12247_v8  ;;  %v1598_v15 = vor.u32 %v1597_v0, %v1596_v41 }
 0x158   : > { %v1455_v37 = vsel %vm1372_vm11, %v1454_v20, %v1453_v63  ;;  %v12267_v4 = vsub.s32 %v1327_v16, %v1330_v6  ;;  %v1604_v63 = vor.u32 %v1603_v52, %v1602_v1  ;;  %v4771_v20 = vand.u32 3, %v4770_v13 }
 0x159   : > { %v1458_v58 = vsel %vm12237_vm15, %v11955_v62, %v1455_v37  ;;  %v1601_v12 = vor.u32 %v1600_v60, %v1599_v48  ;;  %vm1608_vm0 = vcmp.lt.s32.totalorder %v1589_v19, 1  ;;  %vm1611_vm1 = vcmp.lt.s32.totalorder %v1589_v19, 4 }
 0x15a   : > { %10755 = vcosq.f32 %v1458_v58  ;;  %v1333_v29 = vsub.s32 0, %v12267_v4  ;;  %vm1465_vm2 = vcmp.eq.s32.totalorder %v12249_v35, 0  ;;  %v1607_v28 = vor.u32 %v1606_v56, %v1605_v54 }
 0x15b   : > { %10757 = vsinq.f32 %v1458_v58  ;;  %v12276_v6 = vshll.u32 %v1584_v57, 8  ;;  %v1476_v31 = vand.u32 2139095040, %v12247_v8  ;;  %vm1464_vm3 = vcmp.lt.s32.totalorder %v12249_v35, 2 }
 0x15c   : > { %v10081_v16 = vmin.u32 %v1333_v29, %v12267_v4  ;;  %vm1609_vm4 = vcmp.lt.s32.totalorder %v1589_v19, 2  ;;  %vm1610_vm5 = vcmp.lt.s32.totalorder %v1589_v19, 3  ;;  %v1612_v46 = vsel %vm1608_vm0, %v1592_v51, %v1595_v3 }
 0x15d   : > { %v1613_v13 = vsel %vm1611_vm1, %v1601_v12, 2102212464  ;;  %vm1462_vm6 = vweird.f32 %v11955_v62  ;;  %v1616_v0 = vsel %vm1608_vm0, %v1595_v3, %v1598_v15  ;;  %v1617_v57 = vsel %vm1611_vm1, %v1604_v63, 920167782 }
 0x15e   : > { %v1335_v59 = vclz %v10081_v16  ;;  %v1614_v41 = vsel %vm1610_vm5, %v1598_v15, %v1613_v13  ;;  %vm1468_vm7 = vcmp.eq.s32.totalorder %v12249_v35, 2  ;;  %vm4773_vm8 = vcmp.eq.s32.totalorder %v4771_v20, 0 }
 0x15f   : > { %vm4776_vm9 = vcmp.eq.s32.totalorder %v4771_v20, 2  ;;  %v1620_v1 = vsel %vm1608_vm0, %v1598_v15, %v1601_v12  ;;  %v1323_v52 = vadd.s32 %v12199_v44, %v12205_v7  ;;  %v1618_v48 = vsel %vm1610_vm5, %v1601_v12, %v1617_v57 }
 0x160   : > { %v10082_v37 = vadd.s32 4294967294, %v1335_v59  ;;  %v1621_v60 = vsel %vm1611_vm1, %v1607_v28, 1326507024  ;;  %vm1269_vm10 = vcmp.lt.s32.totalorder %v12036_v2, 0  ;;  %v1615_v58 = vsel %vm1609_vm4, %v1612_v46, %v1614_v41 }
 0x161   : > { %v1619_v54 = vsel %vm1609_vm4, %v1616_v0, %v1618_v48  ;;  %v1622_v56 = vsel %vm1610_vm5, %v1604_v63, %v1621_v60  ;;  %v1477_v51 = vshrl.u32 %v1476_v31, 23  ;;  %vm4772_vm12 = vcmp.lt.s32.totalorder %v4771_v20, 2 }
 0x162   : > { %vm10083_vm11 = vcmp.lt.s32.totalorder %v10082_v37, 0  ;;  %v1623_v3 = vsel %vm1609_vm4, %v1620_v1, %v1622_v56  ;;  %v12298_v29 = vmul.u32.u64.low %v12276_v6, %v1619_v54  ;;  %v12299_v44 = vmul.u32.u64.high %v12276_v6, %v1619_v54, %v12298_v29 }
 0x163   : > { %v1338_v15 = vsel %vm10083_vm11, 0, %v10082_v37  ;;  %v12303_v12 = vmul.u32.u64.low %v12276_v6, %v1623_v3  ;;  %v12304_v16 = vmul.u32.u64.high %v12276_v6, %v1623_v3, %v12303_v12  ;;  %v10088_v28 = vadd.s32 4294967169, %v1477_v51 }
 0x164   : > { %v10756_v7 = vpop.eup %10755  ;;  %v1339_v59 = vsub.s32 32, %v1338_v15  ;;  %v1340_v63 = vshll.u32 %v12267_v4, %v1338_v15  ;;  %v1343_v31 = vsub.s32 4294967266, %v1338_v15  ;;  %v1353_v41 = vsub.s32 4, %v12251_v26 }
 0x165   : > { %v10758_v46 = vpop.eup %10757  ;;  %v1469_v13 = vxor.u32 2147483648, %v10756_v7  ;;  %v1483_v0 = vadd.s32 1, %v10088_v28  ;;  %v1631_v4 = vmul.u32 %v12276_v6, %v1615_v58  ;;  %vm1633_vm13 = vc.u32 %v12304_v16, %v12298_v29 }
 0x166   : > { %v1466_v19 = vxor.u32 2147483648, %v10758_v46  ;;  %v1341_v37 = vshrl.u32 %v1323_v52, %v1339_v59  ;;  %v1344_v48 = vadd.s32 127, %v1343_v31  ;;  %v1634_v20 = vadd.s32 1, %v12299_v44 }
 0x167   : > { %v1470_v57 = vsel %vm1468_vm7, %v1469_v13, %v10758_v46  ;;  %v4778_v1 = vsel %vm4776_vm9, %v1469_v13, %v10758_v46  ;;  %vm1484_vm14 = vcmp.gt.s32.totalorder %v1483_v0, 0  ;;  %v1354_v35 = vsel %vm1269_vm10, %v1353_v41, %v12251_v26 }
 0x168   : > { %v1467_v60 = vsel %vm1465_vm2, %v10756_v7, %v1466_v19  ;;  %v4775_v54 = vsel %vm4773_vm8, %v10756_v7, %v1466_v19  ;;  %v1342_v3 = vor.u32 %v1341_v37, %v1340_v63  ;;  %v1345_v15 = vshll.u32 %v1344_v48, 23 }
 0x169   : > { %v1471_v56 = vsel %vm1464_vm3, %v1467_v60, %v1470_v57  ;;  %v4779_v51 = vsel %vm4772_vm12, %v4775_v54, %v4778_v1  ;;  %v1485_v7 = vsel %vm1484_vm14, %v1483_v0, 0  ;;  %v1635_v28 = vsel %vm1633_vm13, %v1634_v20, %v12299_v44  ;;  %v188_v60 = vld [vmem:[%s10995_s28 + $0x78] sm:$0xff] }
 0x16a   : > { %v12321_v52 = vsel %vm1462_vm6, nan, %v1471_v56  ;;  %v12325_v12 = vsel %vm1462_vm6, nan, %v4779_v51  ;;  %v1346_v6 = vor.u32 4788187, %v1345_v15  ;;  %v1349_v58 = vcvt.s32.f32 %v1342_v3 }
 0x16b   : > { %16800 = vst [vmem:[#allocation15_spill] sm:$0xff] %v12321_v52  ;;  %7147 = vperm.xlu1 %10645, %v12321_v52   ;;  %v1487_v46 = vand.u32 31, %v1485_v7  ;;  %vm12335_vm15 = vcmp.le.f32.partialorder %v1267_v27, 0.7853982  ;;  %v1636_v59 = vadd.s32 %v1635_v28, %v1631_v4  ;;  %v1480_v31 = vand.u32 8388607, %v16614_v23 }
 0x16c   : > { %v1347_v13 = vand.u32 2147483647, %v1346_v6  ;;  %v1356_v63 = vsel %vm12335_vm15, 0, %v1354_v35  ;;  %v1486_v56 = vshrl.u32 %v1485_v7, 5  ;;  %vm1578_vm2 = vcmp.lt.s32.totalorder %v12129_v39, 0 }
 0x16d   : > { %v1488_v26 = vsub.s32 32, %v1487_v46  ;;  %v1490_v19 = vshll.u32 %v16627_v34, %v1487_v46  ;;  %v1637_v41 = vadd.s32 536870912, %v1636_v59  ;;  %v1493_v0 = vshll.u32 %v16620_v36, %v1487_v46 }
 0x16e   : > { %v1350_v44 = vmul.f32 %v1349_v58, %v1347_v13  ;;  %v1496_v27 = vshll.u32 %v16615_v38, %v1487_v46  ;;  %v1499_v48 = vshll.u32 %v16618_v40, %v1487_v46  ;;  %v12354_v3 = vand.u32 3, %v1356_v63 }
 0x16f   : > { %v1491_v57 = vshrl.u32 %v16620_v36, %v1488_v26  ;;  %v1494_v1 = vshrl.u32 %v16615_v38, %v1488_v26  ;;  %v1497_v37 = vshrl.u32 %v16618_v40, %v1488_v26  ;;  %v12351_v4 = vshrl.u32 %v1637_v41, 30 }
 0x170   : > { %v1351_v54 = vxor.u32 2147483648, %v1350_v44  ;;  %v1500_v51 = vshrl.u32 %v16623_v42, %v1488_v26  ;;  %v1481_v15 = vor.u32 8388608, %v1480_v31  ;;  %v1502_v20 = vshll.u32 %v16623_v42, %v1487_v46 }
 0x171   : > { %v1503_v6 = vshrl.u32 %v16625_v49, %v1488_v26  ;;  %v1639_v35 = vshll.u32 %v12351_v4, 30  ;;  %v1492_v28 = vor.u32 %v1491_v57, %v1490_v19  ;;  %v12361_v13 = vmul.f32 0.5, %v188_v60 }
 0x172   : > { %v1352_v58 = vsel %vm1269_vm10, %v1351_v54, %v1350_v44  ;;  %v1495_v41 = vor.u32 %v1494_v1, %v1493_v0  ;;  %v1498_v23 = vor.u32 %v1497_v37, %v1496_v27  ;;  %v1501_v38 = vor.u32 %v1500_v51, %v1499_v48 }
 0x173   : > { %v1355_v7 = vsel %vm12335_vm15, %v12036_v2, %v1352_v58  ;;  %v12366_v31 = vsub.s32 %v1636_v59, %v1639_v35  ;;  %vm1505_vm0 = vcmp.lt.s32.totalorder %v1486_v56, 1  ;;  %vm1508_vm1 = vcmp.lt.s32.totalorder %v1486_v56, 4 }
 0x174   : > { %10759 = vcosq.f32 %v1355_v7  ;;  %v4666_v46 = vadd.s32 3, %v1356_v63  ;;  %v1504_v44 = vor.u32 %v1503_v6, %v1502_v20  ;;  %vm1507_vm3 = vcmp.lt.s32.totalorder %v1486_v56, 3 }
 0x175   : > { %10761 = vsinq.f32 %v1355_v7  ;;  %v1642_v19 = vsub.s32 0, %v12366_v31  ;;  %v12370_v57 = vshll.u32 %v1481_v15, 8  ;;  %v1489_v62 = vshrl.u32 %v16627_v34, %v1488_v26 }
 0x176   : > { %vm1506_vm4 = vcmp.lt.s32.totalorder %v1486_v56, 2  ;;  %v1513_v0 = vsel %vm1505_vm0, %v1492_v28, %v1495_v41  ;;  %v1514_v59 = vsel %vm1508_vm1, %v1501_v38, 920167782  ;;  %vm1361_vm5 = vcmp.lt.s32.totalorder %v12354_v3, 2 }
 0x177   : > { %v10093_v27 = vmin.u32 %v1642_v19, %v12366_v31  ;;  %v1510_v63 = vsel %vm1508_vm1, %v1498_v23, 2102212464  ;;  %v1517_v1 = vsel %vm1505_vm0, %v1495_v41, %v1498_v23  ;;  %v1785_v37 = vand.u32 2139095040, %v12361_v13 }
 0x178   : > { %vm1359_vm6 = vweird.f32 %v12036_v2  ;;  %vm1362_vm7 = vcmp.eq.s32.totalorder %v12354_v3, 0  ;;  %v4667_v26 = vand.u32 3, %v4666_v46  ;;  %v1515_v48 = vsel %vm1507_vm3, %v1498_v23, %v1514_v59  ;;  %v187_v2 = vld [vmem:[%s10995_s28 + $0x70] sm:$0xff] }
 0x179   : > { %v1518_v60 = vsel %vm1508_vm1, %v1504_v44, 1326507024  ;;  %vm1365_vm8 = vcmp.eq.s32.totalorder %v12354_v3, 2  ;;  %v1644_v54 = vclz %v10093_v27  ;;  %v1516_v51 = vsel %vm1506_vm4, %v1513_v0, %v1515_v48 }
 0x17a   : > { %v1519_v15 = vsel %vm1507_vm3, %v1501_v38, %v1518_v60  ;;  %v1662_v20 = vsub.s32 4, %v12351_v4  ;;  %v1509_v6 = vsel %vm1505_vm0, %v1489_v62, %v1492_v28  ;;  %v1511_v58 = vsel %vm1507_vm3, %v1495_v41, %v1510_v63 }
 0x17b   : > { %v1520_v35 = vsel %vm1506_vm4, %v1517_v1, %v1519_v15  ;;  %vm12393_vm9 = vcmp.le.f32.partialorder %v1576_v18, 0.7853982  ;;  %v10094_v7 = vadd.s32 4294967294, %v1644_v54  ;;  %v1786_v38 = vshrl.u32 %v1785_v37, 23 }
 0x17c   : > { %v12398_v46 = vmul.u32.u64.low %v12370_v57, %v1520_v35  ;;  %v12399_v44 = vmul.u32.u64.high %v12370_v57, %v1520_v35, %v12398_v46  ;;  %vm4668_vm10 = vcmp.lt.s32.totalorder %v4667_v26, 2  ;;  %vm4669_vm11 = vcmp.eq.s32.totalorder %v4667_v26, 0 }
 0x17d   : > { %v12402_v28 = vmul.u32.u64.low %v12370_v57, %v1516_v51  ;;  %v12403_v19 = vmul.u32.u64.high %v12370_v57, %v1516_v51, %v12402_v28  ;;  %vm4672_vm12 = vcmp.eq.s32.totalorder %v4667_v26, 2  ;;  %v1632_v18 = vadd.s32 %v12298_v29, %v12304_v16 }
 0x17e   : > { %v10760_v41 = vpop.eup %10759  ;;  %vm10095_vm13 = vcmp.lt.s32.totalorder %v10094_v7, 0  ;;  %v1512_v62 = vsel %vm1506_vm4, %v1509_v6, %v1511_v58  ;;  %v1663_v63 = vsel %vm1578_vm2, %v1662_v20, %v12351_v4  ;;  %v10100_v1 = vadd.s32 4294967169, %v1786_v38 }
 0x17f   : > { %v10762_v0 = vpop.eup %10761  ;;  %v1366_v59 = vxor.u32 2147483648, %v10760_v41  ;;  %v1647_v27 = vsel %vm10095_vm13, 0, %v10094_v7  ;;  %v1528_v16 = vmul.u32 %v12370_v57, %v1512_v62  ;;  %vm1530_vm14 = vc.u32 %v12399_v44, %v12402_v28 }
 0x180   : > { %v1363_v37 = vxor.u32 2147483648, %v10762_v0  ;;  %v1648_v48 = vsub.s32 32, %v1647_v27  ;;  %v1649_v60 = vshll.u32 %v12366_v31, %v1647_v27  ;;  %v1652_v54 = vsub.s32 4294967266, %v1647_v27 }
 0x181   : > { %v1367_v51 = vsel %vm1365_vm8, %v1366_v59, %v10762_v0  ;;  %v4674_v29 = vsel %vm4672_vm12, %v1366_v59, %v10762_v0  ;;  %v1531_v58 = vadd.s32 1, %v12403_v19  ;;  %v1792_v35 = vadd.s32 1, %v10100_v1 }
 0x182   : > { %v1364_v56 = vsel %vm1362_vm7, %v10760_v41, %v1363_v37  ;;  %v4671_v4 = vsel %vm4669_vm11, %v10760_v41, %v1363_v37  ;;  %v1650_v15 = vshrl.u32 %v1632_v18, %v1648_v48  ;;  %v1653_v20 = vadd.s32 127, %v1652_v54 }
 0x183   : > { %v1368_v31 = vsel %vm1361_vm5, %v1364_v56, %v1367_v51  ;;  %v4675_v6 = vsel %vm4668_vm10, %v4671_v4, %v4674_v29  ;;  %v1665_v3 = vsel %vm12393_vm9, 0, %v1663_v63  ;;  %v1532_v26 = vsel %vm1530_vm14, %v1531_v58, %v12403_v19 }
 0x184   : > { %v12428_v57 = vsel %vm1359_vm6, nan, %v1368_v31  ;;  %v12432_v7 = vsel %vm1359_vm6, nan, %v4675_v6  ;;  %v1651_v46 = vor.u32 %v1650_v15, %v1649_v60  ;;  %v1654_v38 = vshll.u32 %v1653_v20, 23 }
 0x185   : > { %16805 = vst [vmem:[#allocation16_spill] sm:$0xff] %v12428_v57  ;;  %7142 = vperm.xlu0 %10644, %v12428_v57   ;;  %v16617_v41 = vand.u32 2147483647, %v12361_v13  ;;  %vm1793_vm15 = vcmp.gt.s32.totalorder %v1792_v35, 0  ;;  %v1533_v0 = vadd.s32 %v1532_v26, %v1528_v16  ;;  %v12440_v48 = vand.u32 3, %v1665_v3 }
 0x186   : > { %v1655_v18 = vor.u32 4788187, %v1654_v38  ;;  %v1658_v62 = vcvt.s32.f32 %v1651_v46  ;;  %v1794_v59 = vsel %vm1793_vm15, %v1792_v35, 0  ;;  %v4978_v51 = vadd.s32 3, %v1665_v3 }
 0x187   : > { %v1796_v27 = vand.u32 31, %v1794_v59  ;;  %v1534_v37 = vadd.s32 536870912, %v1533_v0  ;;  %v1789_v60 = vand.u32 8388607, %v16617_v41  ;;  %v12446_v29 = vmul.f32 0.5, %v187_v2 }
 0x188   : > { %v1656_v1 = vand.u32 2147483647, %v1655_v18  ;;  %v16806_v6 = vmov 2131351028   ;;  %v1795_v38 = vshrl.u32 %v1794_v59, 5  ;;  %v12466_v41 = vand.u32 3, %v4978_v51 }
 0x189   : > { %v1797_v54 = vsub.s32 32, %v1796_v27  ;;  %v12444_v19 = vshrl.u32 %v1534_v37, 30  ;;  %v1799_v56 = vshll.u32 %v16627_v34, %v1796_v27  ;;  %v1802_v4 = vshll.u32 %v16620_v36, %v1796_v27 }
 0x18a   : > { %v1659_v63 = vmul.f32 %v1658_v62, %v1656_v1  ;;  %v1808_v15 = vshll.u32 %v16618_v40, %v1796_v27  ;;  %v1790_v46 = vor.u32 8388608, %v1789_v60  ;;  %v1805_v3 = vshll.u32 %v16806_v6, %v1796_v27 }
 0x18b   : > { %v1800_v16 = vshrl.u32 %v16620_v36, %v1797_v54  ;;  %v1536_v31 = vshll.u32 %v12444_v19, 30  ;;  %v1803_v58 = vshrl.u32 %v16806_v6, %v1797_v54  ;;  %v1809_v35 = vshrl.u32 %v16623_v42, %v1797_v54 }
 0x18c   : > { %v1660_v20 = vxor.u32 2147483648, %v1659_v63  ;;  %v1806_v26 = vshrl.u32 %v16618_v40, %v1797_v54  ;;  %v1811_v2 = vshll.u32 %v16623_v42, %v1796_v27  ;;  %v1812_v1 = vshrl.u32 %v16625_v49, %v1797_v54 }
 0x18d   : > { %v12459_v62 = vsub.s32 %v1533_v0, %v1536_v31  ;;  %v1798_v59 = vshrl.u32 %v16627_v34, %v1797_v54  ;;  %v1801_v60 = vor.u32 %v1800_v16, %v1799_v56  ;;  %v1804_v36 = vor.u32 %v1803_v58, %v1802_v4 }
 0x18e   : > { %v1661_v18 = vsel %vm1578_vm2, %v1660_v20, %v1659_v63  ;;  %v1810_v63 = vor.u32 %v1809_v35, %v1808_v15  ;;  %v1807_v0 = vor.u32 %v1806_v26, %v1805_v3  ;;  %vm1814_vm0 = vcmp.lt.s32.totalorder %v1795_v38, 1 }
 0x18f   : > { %v1664_v37 = vsel %vm12393_vm9, %v12129_v39, %v1661_v18  ;;  %v1539_v40 = vsub.s32 0, %v12459_v62  ;;  %vm1817_vm1 = vcmp.lt.s32.totalorder %v1795_v38, 4  ;;  %vm1475_vm2 = vcmp.lt.s32.totalorder %v12247_v8, 0 }
 0x190   : > { %10763 = vcosq.f32 %v1664_v37  ;;  %v1813_v23 = vor.u32 %v1812_v1, %v1811_v2  ;;  %v12472_v20 = vshll.u32 %v1790_v46, 8  ;;  %v1682_v51 = vand.u32 2139095040, %v12446_v29 }
 0x191   : > { %10765 = vsinq.f32 %v1664_v37  ;;  %v10089_v27 = vmin.u32 %v1539_v40, %v12459_v62  ;;  %vm1671_vm3 = vcmp.eq.s32.totalorder %v12440_v48, 0  ;;  %vm1815_vm4 = vcmp.lt.s32.totalorder %v1795_v38, 2 }
 0x192   : > { %vm1816_vm5 = vcmp.lt.s32.totalorder %v1795_v38, 3  ;;  %v1818_v54 = vsel %vm1814_vm0, %v1798_v59, %v1801_v60  ;;  %v1819_v56 = vsel %vm1817_vm1, %v1807_v0, 2102212464  ;;  %vm1670_vm6 = vcmp.lt.s32.totalorder %v12440_v48, 2 }
 0x193   : > { %v1541_v16 = vclz %v10089_v27  ;;  %v1820_v4 = vsel %vm1816_vm5, %v1804_v36, %v1819_v56  ;;  %v1822_v40 = vsel %vm1814_vm0, %v1801_v60, %v1804_v36  ;;  %v1823_v15 = vsel %vm1817_vm1, %v1810_v63, 920167782 }
 0x194   : > { %vm1668_vm7 = vweird.f32 %v12129_v39  ;;  %vm1674_vm8 = vcmp.eq.s32.totalorder %v12440_v48, 2  ;;  %vm4980_vm9 = vcmp.lt.s32.totalorder %v12466_v41, 2  ;;  %v1529_v31 = vadd.s32 %v12402_v28, %v12399_v44 }
 0x195   : > { %v1826_v58 = vsel %vm1814_vm0, %v1804_v36, %v1807_v0  ;;  %v10090_v35 = vadd.s32 4294967294, %v1541_v16  ;;  %v1559_v46 = vsub.s32 4, %v12444_v19  ;;  %v1824_v3 = vsel %vm1816_vm5, %v1807_v0, %v1823_v15 }
 0x196   : > { %v1827_v26 = vsel %vm1817_vm1, %v1813_v23, 1326507024  ;;  %v1821_v18 = vsel %vm1815_vm4, %v1818_v54, %v1820_v4  ;;  %v1825_v2 = vsel %vm1815_vm4, %v1822_v40, %v1824_v3  ;;  %v1683_v37 = vshrl.u32 %v1682_v51, 23 }
 0x197   : > { %v1828_v1 = vsel %vm1816_vm5, %v1810_v63, %v1827_v26  ;;  %vm10091_vm10 = vcmp.lt.s32.totalorder %v10090_v35, 0  ;;  %v12496_v44 = vmul.u32.u64.low %v12472_v20, %v1825_v2  ;;  %v12497_v36 = vmul.u32.u64.high %v12472_v20, %v1825_v2, %v12496_v44 }
 0x198   : > { %v1829_v59 = vsel %vm1815_vm4, %v1826_v58, %v1828_v1  ;;  %v1544_v28 = vsel %vm10091_vm10, 0, %v10090_v35  ;;  %v10096_v27 = vadd.s32 4294967169, %v1683_v37  ;;  %vm4984_vm11 = vcmp.eq.s32.totalorder %v12466_v41, 2 }
 0x199   : > { %v12501_v60 = vmul.u32.u64.low %v12472_v20, %v1829_v59  ;;  %v12502_v0 = vmul.u32.u64.high %v12472_v20, %v1829_v59, %v12501_v60  ;;  %v1545_v54 = vsub.s32 32, %v1544_v28  ;;  %v1546_v63 = vshll.u32 %v12459_v62, %v1544_v28 }
 0x19a   : > { %v10764_v23 = vpop.eup %10763  ;;  %v1549_v51 = vsub.s32 4294967266, %v1544_v28  ;;  %vm4981_vm12 = vcmp.eq.s32.totalorder %v12466_v41, 0  ;;  %v1560_v16 = vsel %vm1475_vm2, %v1559_v46, %v12444_v19  ;;  %v1837_v4 = vmul.u32 %v12472_v20, %v1821_v18 }
 0x19b   : > { %v10766_v38 = vpop.eup %10765  ;;  %v1675_v56 = vxor.u32 2147483648, %v10764_v23  ;;  %v1547_v15 = vshrl.u32 %v1529_v31, %v1545_v54  ;;  %v1840_v35 = vadd.s32 1, %v12497_v36  ;;  %vm1839_vm13 = vc.u32 %v12502_v0, %v12496_v44  ;;  %v190_v54 = vld [vmem:[%s10995_s28 + $0x88] sm:$0xff] }
 0x19c   : > { %v1672_v40 = vxor.u32 2147483648, %v10766_v38  ;;  %v1550_v58 = vadd.s32 127, %v1549_v51  ;;  %v1689_v26 = vadd.s32 1, %v10096_v27  ;;  %v16807_v1 = vand.u32 2147483647, %v12247_v8 }
 0x19d   : > { %v1676_v3 = vsel %vm1674_vm8, %v1675_v56, %v10766_v38  ;;  %v4986_v62 = vsel %vm4984_vm11, %v1675_v56, %v10766_v38  ;;  %v1548_v46 = vor.u32 %v1547_v15, %v1546_v63  ;;  %v1841_v59 = vsel %vm1839_vm13, %v1840_v35, %v12497_v36 }
 0x19e   : > { %v1673_v19 = vsel %vm1671_vm3, %v10764_v23, %v1672_v40  ;;  %v4983_v20 = vsel %vm4981_vm12, %v10764_v23, %v1672_v40  ;;  %v1551_v31 = vshll.u32 %v1550_v58, 23  ;;  %vm12526_vm14 = vcmp.le.f32.partialorder %v16807_v1, 0.7853982 }
 0x19f   : > { %v1677_v18 = vsel %vm1670_vm6, %v1673_v19, %v1676_v3  ;;  %v4987_v2 = vsel %vm4980_vm9, %v4983_v20, %v4986_v62  ;;  %v1555_v27 = vcvt.s32.f32 %v1548_v46  ;;  %v1562_v41 = vsel %vm12526_vm14, 0, %v1560_v16 }
 0x1a0   : > { %v12533_v28 = vsel %vm1668_vm7, nan, %v1677_v18  ;;  %v12537_v60 = vsel %vm1668_vm7, nan, %v4987_v2  ;;  %v1552_v48 = vor.u32 4788187, %v1551_v31  ;;  %v1842_v23 = vadd.s32 %v1841_v59, %v1837_v4 }
 0x1a1   : > { %16810 = vst [vmem:[#allocation17_spill] sm:$0xff] %v12533_v28  ;;  %7157 = vperm.xlu1 %10645, %v12533_v28   ;;  %vm1690_vm15 = vcmp.gt.s32.totalorder %v1689_v26, 0  ;;  %v4874_v36 = vadd.s32 3, %v1562_v41  ;;  %v16622_v51 = vand.u32 2147483647, %v12446_v29  ;;  %v12544_v15 = vand.u32 3, %v1562_v41 }
 0x1a2   : > { %v1553_v63 = vand.u32 2147483647, %v1552_v48  ;;  %v1691_v38 = vsel %vm1690_vm15, %v1689_v26, 0  ;;  %v1843_v56 = vadd.s32 536870912, %v1842_v23  ;;  %v12548_v3 = vmul.f32 0.5, %v190_v54 }
 0x1a3   : > { %v1693_v40 = vand.u32 31, %v1691_v38  ;;  %v12550_v16 = vand.u32 3, %v4874_v36  ;;  %v1686_v4 = vand.u32 8388607, %v16622_v51  ;;  %v12554_v19 = vshrl.u32 %v1691_v38, 5 }
 0x1a4   : > { %v1556_v39 = vmul.f32 %v1555_v27, %v1553_v63  ;;  %v12546_v58 = vshrl.u32 %v1843_v56, 30  ;;  %v16811_v46 = vmov 2475754826   ;;  %v16812_v48 = vmov 2102212464  }
 0x1a5   : > { %v1694_v35 = vsub.s32 32, %v1693_v40  ;;  %v1696_v20 = vshll.u32 %v16627_v34, %v1693_v40  ;;  %v1699_v31 = vshll.u32 %v16811_v46, %v1693_v40  ;;  %v1702_v18 = vshll.u32 %v16806_v6, %v1693_v40 }
 0x1a6   : > { %v1557_v62 = vxor.u32 2147483648, %v1556_v39  ;;  %v1845_v26 = vshll.u32 %v12546_v58, 30  ;;  %v1705_v27 = vshll.u32 %v16812_v48, %v1693_v40  ;;  %v1708_v38 = vshll.u32 %v16623_v42, %v1693_v40 }
 0x1a7   : > { %v1697_v1 = vshrl.u32 %v16811_v46, %v1694_v35  ;;  %v1700_v59 = vshrl.u32 %v16806_v6, %v1694_v35  ;;  %v1703_v63 = vshrl.u32 %v16812_v48, %v1694_v35  ;;  %v1706_v36 = vshrl.u32 %v16623_v42, %v1694_v35 }
 0x1a8   : > { %v1558_v2 = vsel %vm1475_vm2, %v1557_v62, %v1556_v39  ;;  %v12568_v54 = vsub.s32 %v1842_v23, %v1845_v26  ;;  %v1991_v56 = vand.u32 2139095040, %v12548_v3  ;;  %v1695_v62 = vshrl.u32 %v16627_v34, %v1694_v35 }
 0x1a9   : > { %v1561_v41 = vsel %vm12526_vm14, %v12247_v8, %v1558_v2  ;;  %v16629_v51 = vand.u32 2147483647, %v12548_v3  ;;  %vm1571_vm0 = vcmp.eq.s32.totalorder %v12544_v15, 2  ;;  %vm4880_vm1 = vcmp.eq.s32.totalorder %v12550_v16, 2 }
 0x1aa   : > { %10767 = vcosq.f32 %v1561_v41  ;;  %v1848_v39 = vsub.s32 0, %v12568_v54  ;;  %v1687_v37 = vor.u32 8388608, %v1686_v4  ;;  %v1698_v23 = vor.u32 %v1697_v1, %v1696_v20 }
 0x1ab   : > { %10769 = vsinq.f32 %v1561_v41  ;;  %v1701_v26 = vor.u32 %v1700_v59, %v1699_v31  ;;  %v1709_v2 = vshrl.u32 %v16625_v49, %v1694_v35  ;;  %vm1568_vm2 = vcmp.eq.s32.totalorder %v12544_v15, 0 }
 0x1ac   : > { %vm4877_vm3 = vcmp.eq.s32.totalorder %v12550_v16, 0  ;;  %v10101_v40 = vmin.u32 %v1848_v39, %v12568_v54  ;;  %v1704_v41 = vor.u32 %v1703_v63, %v1702_v18  ;;  %v1707_v42 = vor.u32 %v1706_v36, %v1705_v27 }
 0x1ad   : > { %vm1711_vm4 = vcmp.lt.s32.totalorder %v12554_v19, 1  ;;  %vm1567_vm5 = vcmp.lt.s32.totalorder %v12544_v15, 2  ;;  %vm4876_vm6 = vcmp.lt.s32.totalorder %v12550_v16, 2  ;;  %v1838_v4 = vadd.s32 %v12496_v44, %v12502_v0 }
 0x1ae   : > { %v1710_v20 = vor.u32 %v1709_v2, %v1708_v38  ;;  %vm1714_vm7 = vcmp.lt.s32.totalorder %v12554_v19, 4  ;;  %v1992_v35 = vshrl.u32 %v1991_v56, 23  ;;  %vm1565_vm8 = vweird.f32 %v12247_v8 }
 0x1af   : > { %v1850_v31 = vclz %v10101_v40  ;;  %vm1713_vm9 = vcmp.lt.s32.totalorder %v12554_v19, 3  ;;  %v1715_v18 = vsel %vm1711_vm4, %v1695_v62, %v1698_v23  ;;  %v1716_v1 = vsel %vm1714_vm7, %v1704_v41, 2102212464 }
 0x1b0   : > { %vm1712_vm10 = vcmp.lt.s32.totalorder %v12554_v19, 2  ;;  %v1717_v44 = vsel %vm1713_vm9, %v1701_v26, %v1716_v1  ;;  %v1719_v0 = vsel %vm1711_vm4, %v1698_v23, %v1701_v26  ;;  %v1727_v59 = vshll.u32 %v1687_v37, 8 }
 0x1b1   : > { %v10102_v27 = vadd.s32 4294967294, %v1850_v31  ;;  %v1718_v63 = vsel %vm1712_vm10, %v1715_v18, %v1717_v44  ;;  %v1720_v36 = vsel %vm1714_vm7, %v1707_v42, 920167782  ;;  %v1723_v38 = vsel %vm1711_vm4, %v1701_v26, %v1704_v41 }
 0x1b2   : > { %v1868_v56 = vsub.s32 4, %v12546_v58  ;;  %v1721_v39 = vsel %vm1713_vm9, %v1704_v41, %v1720_v36  ;;  %v1724_v62 = vsel %vm1714_vm7, %v1710_v20, 1326507024  ;;  %v10108_v23 = vadd.s32 4294967169, %v1992_v35 }
 0x1b3   : > { %vm10103_vm11 = vcmp.lt.s32.totalorder %v10102_v27, 0  ;;  %v1722_v37 = vsel %vm1712_vm10, %v1719_v0, %v1721_v39  ;;  %v1725_v2 = vsel %vm1713_vm9, %v1707_v42, %v1724_v62  ;;  %v1734_v40 = vmul.u32 %v1727_v59, %v1718_v63 }
 0x1b4   : > { %v10768_v31 = vpop.eup %10767  ;;  %v1853_v18 = vsel %vm10103_vm11, 0, %v10102_v27  ;;  %v1726_v26 = vsel %vm1712_vm10, %v1723_v38, %v1725_v2  ;;  %v12617_v1 = vmul.u32.u64.low %v1727_v59, %v1722_v37  ;;  %v12618_v44 = vmul.u32.u64.high %v1727_v59, %v1722_v37, %v12617_v1 }
 0x1b5   : > { %v10770_v41 = vpop.eup %10769  ;;  %v1572_v20 = vxor.u32 2147483648, %v10768_v31  ;;  %v1854_v35 = vsub.s32 32, %v1853_v18  ;;  %v1855_v36 = vshll.u32 %v12568_v54, %v1853_v18  ;;  %v1858_v49 = vsub.s32 4294967266, %v1853_v18 }
 0x1b6   : > { %v1569_v0 = vxor.u32 2147483648, %v10770_v41  ;;  %v12622_v39 = vmul.u32.u64.low %v1727_v59, %v1726_v26  ;;  %v12623_v34 = vmul.u32.u64.high %v1727_v59, %v1726_v26, %v12622_v39  ;;  %v1998_v42 = vadd.s32 1, %v10108_v23 }
 0x1b7   : > { %v1573_v27 = vsel %vm1571_vm0, %v1572_v20, %v10770_v41  ;;  %v4882_v19 = vsel %vm4880_vm1, %v1572_v20, %v10770_v41  ;;  %v1856_v63 = vshrl.u32 %v1838_v4, %v1854_v35  ;;  %v1859_v38 = vadd.s32 127, %v1858_v49  ;;  %v189_v39 = vld [vmem:[%s10995_s28 + $0x80] sm:$0xff] }
 0x1b8   : > { %v1570_v62 = vsel %vm1568_vm2, %v10768_v31, %v1569_v0  ;;  %v4879_v54 = vsel %vm4877_vm3, %v10768_v31, %v1569_v0  ;;  %v1737_v37 = vadd.s32 1, %v12618_v44  ;;  %vm1999_vm12 = vcmp.gt.s32.totalorder %v1998_v42, 0 }
 0x1b9   : > { %v1574_v59 = vsel %vm1567_vm5, %v1570_v62, %v1573_v27  ;;  %v4883_v23 = vsel %vm4876_vm6, %v4879_v54, %v4882_v19  ;;  %v1857_v2 = vor.u32 %v1856_v63, %v1855_v36  ;;  %v1860_v18 = vshll.u32 %v1859_v38, 23 }
 0x1ba   : > { %v12640_v49 = vsub.f32 %v11308_v25, %v11304_v24  ;;  %v12644_v4 = vsel %vm1565_vm8, nan, %v1574_v59  ;;  %v12648_v31 = vsel %vm1565_vm8, nan, %v4883_v23  ;;  %vm1736_vm13 = vc.u32 %v12623_v34, %v12617_v1 }
 0x1bb   : > { %16814 = vst [vmem:[#allocation19_spill] sm:$0xff] %v12644_v4  ;;  %v12654_v15 = vsub.f32 %v11357_v43, %v11353_v47  ;;  %7152 = vperm.xlu0 %10644, %v12644_v4   ;;  %v1861_v25 = vor.u32 4788187, %v1860_v18  ;;  %v1864_v16 = vcvt.s32.f32 %v1857_v2  ;;  %v1738_v26 = vsel %vm1736_vm13, %v1737_v37, %v12618_v44 }
 0x1bc   : > { %16813 = vst [vmem:[#allocation18_spill] sm:$0xff] %v12640_v49  ;;  %vm1784_vm14 = vcmp.lt.s32.totalorder %v12361_v13, 0  ;;  %v1739_v41 = vadd.s32 %v1738_v26, %v1734_v40  ;;  %v1995_v8 = vand.u32 8388607, %v16629_v51  ;;  %v2000_v20 = vsel %vm1999_vm12, %v1998_v42, 0 }
 0x1bd   : > { %v12664_v35 = vsub.f32 %v11458_v53, %v11454_v45  ;;  %v1862_v43 = vand.u32 2147483647, %v1861_v25  ;;  %v1869_v36 = vsel %vm1784_vm14, %v1868_v56, %v12546_v58  ;;  %v2002_v0 = vand.u32 31, %v2000_v20 }
 0x1be   : > { %v12672_v44 = vsub.f32 %v11586_v5, %v11582_v10  ;;  %v12676_v40 = vsub.f32 %v11717_v32, %v11713_v55  ;;  %v12680_v42 = vsub.f32 %v11808_v14, %v11804_v61  ;;  %v1740_v53 = vadd.s32 536870912, %v1739_v41 }
 0x1bf   : > { %v12684_v27 = vsub.f32 %v11918_v21, %v11914_v30  ;;  %v16817_v58 = vand.u32 2147483647, %v12361_v13  ;;  %v1865_v5 = vmul.f32 %v1864_v16, %v1862_v43  ;;  %v2003_v19 = vsub.s32 32, %v2002_v0 }
 0x1c0   : > { %16815 = vst [vmem:[#allocation20_spill] sm:$0xff] %v12676_v40  ;;  %v12694_v63 = vshrl.u32 %v1740_v53, 30  ;;  %v1996_v14 = vor.u32 8388608, %v1995_v8  ;;  %v12696_v38 = vmul.f32 0.5, %v189_v39  ;;  %v16820_v54 = vmov 683565275  }
 0x1c1   : > { %16816 = vst [vmem:[#allocation21_spill] sm:$0xff] %v12684_v27  ;;  %vm12688_vm15 = vcmp.le.f32.partialorder %v16817_v58, 0.7853982  ;;  %v1866_v62 = vxor.u32 2147483648, %v1865_v5  ;;  %v2005_v21 = vshll.u32 %v16820_v54, %v2002_v0  ;;  %v2006_v37 = vshrl.u32 %v16811_v46, %v2003_v19 }
 0x1c2   : > { %v1871_v32 = vsel %vm12688_vm15, 0, %v1869_v36  ;;  %v2008_v59 = vshll.u32 %v16811_v46, %v2002_v0  ;;  %v1742_v23 = vshll.u32 %v12694_v63, 30  ;;  %v2009_v2 = vshrl.u32 %v16806_v6, %v2003_v19 }
 0x1c3   : > { %v2014_v18 = vshll.u32 %v16812_v48, %v2002_v0  ;;  %v16821_v25 = vmov 920167782   ;;  %v1867_v26 = vsel %vm1784_vm14, %v1866_v62, %v1865_v5  ;;  %v2001_v8 = vshrl.u32 %v2000_v20, 5 }
 0x1c4   : > { %v2015_v16 = vshrl.u32 %v16821_v25, %v2003_v19  ;;  %v2011_v43 = vshll.u32 %v16806_v6, %v2002_v0  ;;  %v2012_v36 = vshrl.u32 %v16812_v48, %v2003_v19  ;;  %v1870_v39 = vsel %vm12688_vm15, %v12361_v13, %v1867_v26 }
 0x1c5   : > { %v12712_v53 = vsub.s32 %v1739_v41, %v1742_v23  ;;  %v2017_v58 = vshll.u32 %v16821_v25, %v2002_v0  ;;  %v16822_v51 = vmov 1326507024   ;;  %v12718_v55 = vsub.f32 %v12118_v11, %v12114_v22 }
 0x1c6   : > { %v2018_v30 = vshrl.u32 %v16822_v51, %v2003_v19  ;;  %10771 = vcosq.f32 %v1870_v39  ;;  %v2004_v20 = vshrl.u32 %v16820_v54, %v2003_v19  ;;  %v2007_v5 = vor.u32 %v2006_v37, %v2005_v21 }
 0x1c7   : > { %16823 = vst [vmem:[#allocation22_spill] sm:$0xff] %v12718_v55  ;;  %10773 = vsinq.f32 %v1870_v39  ;;  %v1745_v62 = vsub.s32 0, %v12712_v53  ;;  %v2010_v45 = vor.u32 %v2009_v2, %v2008_v59  ;;  %v2016_v56 = vor.u32 %v2015_v16, %v2014_v18 }
 0x1c8   : > { %v1875_v26 = vand.u32 3, %v1871_v32  ;;  %v2013_v41 = vor.u32 %v2012_v36, %v2011_v43  ;;  %vm2020_vm0 = vcmp.lt.s32.totalorder %v2001_v8, 1  ;;  %vm2023_vm1 = vcmp.lt.s32.totalorder %v2001_v8, 4 }
 0x1c9   : > { %v10097_v0 = vmin.u32 %v1745_v62, %v12712_v53  ;;  %v2019_v23 = vor.u32 %v2018_v30, %v2017_v58  ;;  %v12723_v24 = vshll.u32 %v1996_v14, 8  ;;  %v1888_v11 = vand.u32 2139095040, %v12696_v38 }
 0x1ca   : > { %vm2021_vm2 = vcmp.lt.s32.totalorder %v2001_v8, 2  ;;  %vm2022_vm3 = vcmp.lt.s32.totalorder %v2001_v8, 3  ;;  %v2024_v19 = vsel %vm2020_vm0, %v2004_v20, %v2007_v5  ;;  %v2025_v21 = vsel %vm2023_vm1, %v2013_v41, 2102212464 }
 0x1cb   : > { %v1747_v37 = vclz %v10097_v0  ;;  %v2026_v59 = vsel %vm2022_vm3, %v2010_v45, %v2025_v21  ;;  %v2028_v2 = vsel %vm2020_vm0, %v2007_v5, %v2010_v45  ;;  %v2029_v18 = vsel %vm2023_vm1, %v2016_v56, 920167782 }
 0x1cc   : > { %vm1877_vm4 = vcmp.eq.s32.totalorder %v1875_v26, 0  ;;  %vm1880_vm5 = vcmp.eq.s32.totalorder %v1875_v26, 2  ;;  %v5186_v30 = vadd.s32 3, %v1871_v32  ;;  %v2032_v14 = vsel %vm2020_vm0, %v2010_v45, %v2013_v41 }
 0x1cd   : > { %v1735_v16 = vadd.s32 %v12617_v1, %v12623_v34  ;;  %v10098_v43 = vadd.s32 4294967294, %v1747_v37  ;;  %v2030_v36 = vsel %vm2022_vm3, %v2013_v41, %v2029_v18  ;;  %v2033_v39 = vsel %vm2023_vm1, %v2019_v23, 1326507024 }
 0x1ce   : > { %v2027_v58 = vsel %vm2021_vm2, %v2024_v19, %v2026_v59  ;;  %v2031_v20 = vsel %vm2021_vm2, %v2028_v2, %v2030_v36  ;;  %v2034_v5 = vsel %vm2022_vm3, %v2016_v56, %v2033_v39  ;;  %v1889_v62 = vshrl.u32 %v1888_v11, 23 }
 0x1cf   : > { %vm10099_vm6 = vcmp.lt.s32.totalorder %v10098_v43, 0  ;;  %v2035_v32 = vsel %vm2021_vm2, %v2032_v14, %v2034_v5  ;;  %v12741_v45 = vmul.u32.u64.low %v12723_v24, %v2031_v20  ;;  %v12742_v0 = vmul.u32.u64.high %v12723_v24, %v2031_v20, %v12741_v45 }
 0x1d0   : > { %v12745_v34 = vpop.eup %10771  ;;  %v1750_v1 = vsel %vm10099_vm6, 0, %v10098_v43  ;;  %v12748_v41 = vmul.u32.u64.low %v12723_v24, %v2035_v32  ;;  %v12749_v23 = vmul.u32.u64.high %v12723_v24, %v2035_v32, %v12748_v41  ;;  %v10104_v19 = vadd.s32 4294967169, %v1889_v62 }
 0x1d1   : > { %v12751_v21 = vpop.eup %10773  ;;  %v16639_v56 = vxor.u32 2147483648, %v12745_v34  ;;  %v1751_v11 = vsub.s32 32, %v1750_v1  ;;  %v1752_v8 = vshll.u32 %v12712_v53, %v1750_v1  ;;  %v1755_v37 = vsub.s32 4294967266, %v1750_v1 }
 0x1d2   : > { %v12757_v59 = vsub.f32 %v12325_v12, %v12321_v52  ;;  %vm1876_vm7 = vcmp.lt.s32.totalorder %v1875_v26, 2  ;;  %v16640_v2 = vxor.u32 2147483648, %v12751_v21  ;;  %v1895_v18 = vadd.s32 1, %v10104_v19 }
 0x1d3   : > { %vm1874_vm8 = vweird.f32 %v12361_v13  ;;  %v1882_v14 = vsel %vm1880_vm5, %v16639_v56, %v12751_v21  ;;  %v1753_v43 = vshrl.u32 %v1735_v16, %v1751_v11  ;;  %v1756_v36 = vadd.s32 127, %v1755_v37 }
 0x1d4   : > { %16824 = vst [vmem:[#allocation23_spill] sm:$0xff] %v12757_v59  ;;  %v1879_v53 = vsel %vm1877_vm4, %v12745_v34, %v16640_v2  ;;  %v12769_v12 = vand.u32 3, %v5186_v30  ;;  %v2043_v39 = vmul.u32 %v12723_v24, %v2027_v58  ;;  %v16638_v20 = vand.u32 2147483647, %v12696_v38 }
 0x1d5   : > { %v1883_v5 = vsel %vm1876_vm7, %v1879_v53, %v1882_v14  ;;  %v1754_v62 = vor.u32 %v1753_v43, %v1752_v8  ;;  %v1757_v32 = vshll.u32 %v1756_v36, 23  ;;  %vm2045_vm9 = vc.u32 %v12749_v23, %v12741_v45 }
 0x1d6   : > { %v12777_v16 = vsel %vm1874_vm8, nan, %v1883_v5  ;;  %v1765_v1 = vsub.s32 4, %v12694_v63  ;;  %v2046_v26 = vadd.s32 1, %v12742_v0  ;;  %vm1896_vm10 = vcmp.gt.s32.totalorder %v1895_v18, 0 }
 0x1d7   : > { %16825 = vst [vmem:[#allocation24_spill] sm:$0xff] %v12777_v16  ;;  %7167 = vperm.xlu1 %10645, %v12777_v16   ;;  %vm1681_vm11 = vcmp.lt.s32.totalorder %v12446_v29, 0  ;;  %v1758_v24 = vor.u32 4788187, %v1757_v32  ;;  %v1761_v30 = vcvt.s32.f32 %v1754_v62  ;;  %v1897_v58 = vsel %vm1896_vm10, %v1895_v18, 0 }
 0x1d8   : > { %v12785_v41 = vsub.f32 %v12537_v60, %v12533_v28  ;;  %v16827_v19 = vand.u32 2147483647, %v12446_v29  ;;  %v2047_v8 = vsel %vm2045_vm9, %v2046_v26, %v12742_v0  ;;  %v1899_v37 = vand.u32 31, %v1897_v58 }
 0x1d9   : > { %vm5189_vm13 = vcmp.eq.s32.totalorder %v12769_v12, 0  ;;  %vm5192_vm14 = vcmp.eq.s32.totalorder %v12769_v12, 2  ;;  %v1759_v14 = vand.u32 2147483647, %v1758_v24  ;;  %v2048_v18 = vadd.s32 %v2047_v8, %v2043_v39  ;;  %v192_v24 = vld [vmem:[%s10995_s28 + $0x98] sm:$0xff] }
 0x1da   : > { %16826 = vst [vmem:[#allocation25_spill] sm:$0xff] %v12785_v41  ;;  %vm12789_vm12 = vcmp.le.f32.partialorder %v16827_v19, 0.7853982  ;;  %v1766_v60 = vsel %vm1681_vm11, %v1765_v1, %v12694_v63  ;;  %v1892_v43 = vand.u32 8388607, %v16638_v20  ;;  %v1900_v36 = vsub.s32 32, %v1899_v37 }
 0x1db   : > { %v1902_v53 = vshll.u32 %v16820_v54, %v1899_v37  ;;  %v1762_v5 = vmul.f32 %v1761_v30, %v1759_v14  ;;  %6910 = vperm.xlu1 %10645, %v12672_v44   ;;  %v2049_v0 = vadd.s32 536870912, %v2048_v18  ;;  %v1905_v62 = vshll.u32 %v16811_v46, %v1899_v37 }
 0x1dc   : > { %v1908_v32 = vshll.u32 %v16806_v6, %v1899_v37  ;;  %v1903_v39 = vshrl.u32 %v16811_v46, %v1900_v36  ;;  %v1906_v26 = vshrl.u32 %v16806_v6, %v1900_v36  ;;  %v1909_v63 = vshrl.u32 %v16812_v48, %v1900_v36 }
 0x1dd   : > { %v1911_v1 = vshll.u32 %v16812_v48, %v1899_v37  ;;  %vm5188_vm15 = vcmp.lt.s32.totalorder %v12769_v12, 2  ;;  %v1763_v19 = vxor.u32 2147483648, %v1762_v5  ;;  %v12811_v30 = vshrl.u32 %v2049_v0, 30 }
 0x1de   : > { %v12813_v8 = vshrl.u32 %v1897_v58, 5  ;;  %v1912_v14 = vshrl.u32 %v16821_v25, %v1900_v36  ;;  %v1768_v20 = vsel %vm12789_vm12, 0, %v1766_v60  ;;  %v1893_v56 = vor.u32 8388608, %v1892_v43 }
 0x1df   : > { %v1914_v2 = vshll.u32 %v16821_v25, %v1899_v37  ;;  %v1915_v28 = vshrl.u32 %v16822_v51, %v1900_v36  ;;  %v1764_v52 = vsel %vm1681_vm11, %v1763_v19, %v1762_v5  ;;  %6915 = vperm.xlu1 %10645, %v12664_v35   ;;  %v2051_v0 = vshll.u32 %v12811_v30, 30 }
 0x1e0   : > { %v1904_v22 = vor.u32 %v1903_v39, %v1902_v53  ;;  %v12824_v58 = vmul.f32 0.5, %v192_v24  ;;  %v1767_v61 = vsel %vm12789_vm12, %v12446_v29, %v1764_v52  ;;  %v1907_v60 = vor.u32 %v1906_v26, %v1905_v62 }
 0x1e1   : > { %v1910_v43 = vor.u32 %v1909_v63, %v1908_v32  ;;  %v1913_v10 = vor.u32 %v1912_v14, %v1911_v1  ;;  %10775 = vcosq.f32 %v1767_v61  ;;  %v12829_v37 = vsub.s32 %v2048_v18, %v2051_v0 }
 0x1e2   : > { %vm1917_vm0 = vcmp.lt.s32.totalorder %v12813_v8, 1  ;;  %vm1920_vm1 = vcmp.lt.s32.totalorder %v12813_v8, 4  ;;  %10777 = vsinq.f32 %v1767_v61  ;;  %v12833_v5 = vand.u32 3, %v1768_v20 }
 0x1e3   : > { %vm1990_vm2 = vcmp.lt.s32.totalorder %v12548_v3, 0  ;;  %v1916_v53 = vor.u32 %v1915_v28, %v1914_v2  ;;  %v12836_v39 = vshll.u32 %v1893_v56, 8  ;;  %v16830_v52 = vxor.u32 2147483648, %v12751_v21  ;;  %6925 = vperm.xlu1 %10645, %v12676_v40  }
 0x1e4   : > { %v16831_v18 = vxor.u32 2147483648, %v12745_v34  ;;  %v2054_v61 = vsub.s32 0, %v12829_v37  ;;  %vm1919_vm3 = vcmp.lt.s32.totalorder %v12813_v8, 3  ;;  %v1901_v28 = vshrl.u32 %v16820_v54, %v1900_v36 }
 0x1e5   : > { %v5191_v11 = vsel %vm5189_vm13, %v12745_v34, %v16830_v52  ;;  %vm1918_vm4 = vcmp.lt.s32.totalorder %v12813_v8, 2  ;;  %v1925_v56 = vsel %vm1917_vm0, %v1904_v22, %v1907_v60  ;;  %v1926_v2 = vsel %vm1920_vm1, %v1913_v10, 920167782 }
 0x1e6   : > { %v5194_v62 = vsel %vm5192_vm14, %v16831_v18, %v12751_v21  ;;  %v16832_v34 = vand.u32 2147483647, %v12548_v3  ;;  %v10109_v32 = vmin.u32 %v2054_v61, %v12829_v37  ;;  %v1922_v26 = vsel %vm1920_vm1, %v1910_v43, 2102212464 }
 0x1e7   : > { %v1929_v36 = vsel %vm1917_vm0, %v1907_v60, %v1910_v43  ;;  %v2197_v63 = vand.u32 2139095040, %v12824_v58  ;;  %vm1771_vm6 = vweird.f32 %v12446_v29  ;;  %vm1773_vm7 = vcmp.lt.s32.totalorder %v12833_v5, 2  ;;  %6935 = vperm.xlu1 %10645, %v12684_v27  }
 0x1e8   : > { %vm12859_vm5 = vcmp.le.f32.partialorder %v16832_v34, 0.7853982  ;;  %v5082_v1 = vadd.s32 3, %v1768_v20  ;;  %v1927_v24 = vsel %vm1919_vm3, %v1910_v43, %v1926_v2  ;;  %v1930_v19 = vsel %vm1920_vm1, %v1916_v53, 1326507024 }
 0x1e9   : > { %v2056_v14 = vclz %v10109_v32  ;;  %v2074_v0 = vsub.s32 4, %v12811_v30  ;;  %v1928_v52 = vsel %vm1918_vm4, %v1925_v56, %v1927_v24  ;;  %v1931_v18 = vsel %vm1919_vm3, %v1913_v10, %v1930_v19 }
 0x1ea   : > { %v5195_v20 = vsel %vm5188_vm15, %v5191_v11, %v5194_v62  ;;  %v1921_v43 = vsel %vm1917_vm0, %v1901_v28, %v1904_v22  ;;  %v1923_v53 = vsel %vm1919_vm3, %v1907_v60, %v1922_v26  ;;  %v1932_v61 = vsel %vm1918_vm4, %v1929_v36, %v1931_v18 }
 0x1eb   : > { %v10110_v2 = vadd.s32 4294967294, %v2056_v14  ;;  %v12890_v34 = vmul.u32.u64.low %v12836_v39, %v1932_v61  ;;  %v12891_v32 = vmul.u32.u64.high %v12836_v39, %v1932_v61, %v12890_v34  ;;  %v2198_v56 = vshrl.u32 %v2197_v63, 23  ;;  %v12900_v22 = vpop.eup %10775  ;;  %6945 = vperm.xlu1 %10645, %v12718_v55  }
 0x1ec   : > { %vm1774_vm9 = vcmp.eq.s32.totalorder %v12833_v5, 0  ;;  %vm1777_vm10 = vcmp.eq.s32.totalorder %v12833_v5, 2  ;;  %v12896_v10 = vmul.u32.u64.low %v12836_v39, %v1928_v52  ;;  %v12897_v12 = vmul.u32.u64.high %v12836_v39, %v1928_v52, %v12896_v10  ;;  %v12910_v28 = vpop.eup %10777 }
 0x1ed   : > { %v2044_v60 = vadd.s32 %v12741_v45, %v12749_v23  ;;  %vm10111_vm11 = vcmp.lt.s32.totalorder %v10110_v2, 0  ;;  %v2075_v11 = vsel %vm1990_vm2, %v2074_v0, %v12811_v30  ;;  %v1924_v62 = vsel %vm1918_vm4, %v1921_v43, %v1923_v53 }
 0x1ee   : > { %v5196_v26 = vsel %vm1874_vm8, nan, %v5195_v20  ;;  %v1778_v36 = vxor.u32 2147483648, %v12900_v22  ;;  %v2059_v63 = vsel %vm10111_vm11, 0, %v10110_v2  ;;  %v10116_v24 = vadd.s32 4294967169, %v2198_v56 }
 0x1ef   : > { %v16652_v19 = vxor.u32 2147483648, %v12910_v28  ;;  %v2060_v45 = vsub.s32 32, %v2059_v63  ;;  %v2061_v23 = vshll.u32 %v12829_v37, %v2059_v63  ;;  %v2064_v14 = vsub.s32 4294967266, %v2059_v63  ;;  %6955 = vperm.xlu1 %10645, %v12757_v59  }
 0x1f0   : > { %v1779_v30 = vsel %vm1777_vm10, %v1778_v36, %v12910_v28  ;;  %v2077_v13 = vsel %vm12859_vm5, 0, %v2075_v11  ;;  %v1940_v8 = vmul.u32 %v12836_v39, %v1924_v62  ;;  %v16651_v0 = vand.u32 2147483647, %v12824_v58 }
 0x1f1   : > { %v1776_v37 = vsel %vm1774_vm9, %v12900_v22, %v16652_v19  ;;  %v2062_v52 = vshrl.u32 %v2044_v60, %v2060_v45  ;;  %v2065_v18 = vadd.s32 127, %v2064_v14  ;;  %vm1942_vm8 = vc.u32 %v12891_v32, %v12896_v10  ;;  %v191_v14 = vld [vmem:[%s10995_s28 + $0x90] sm:$0xff] }
 0x1f2   : > { %v1780_v20 = vsel %vm1773_vm7, %v1776_v37, %v1779_v30  ;;  %v12936_v43 = vand.u32 3, %v5082_v1  ;;  %v1943_v39 = vadd.s32 1, %v12897_v12  ;;  %v2204_v53 = vadd.s32 1, %v10116_v24 }
 0x1f3   : > { %v12940_v61 = vsub.f32 %v5196_v26, %v12777_v16  ;;  %v12944_v2 = vsel %vm1771_vm6, nan, %v1780_v20  ;;  %v2063_v34 = vor.u32 %v2062_v52, %v2061_v23  ;;  %v2066_v56 = vshll.u32 %v2065_v18, 23  ;;  %6965 = vperm.xlu1 %10645, %v12785_v41  }
 0x1f4   : > { %16836 = vst [vmem:[#allocation27_spill] sm:$0xff] %v12944_v2  ;;  %7162 = vperm.xlu0 %10644, %v12944_v2   ;;  %v5394_v60 = vadd.s32 3, %v2077_v13  ;;  %v1944_v5 = vsel %vm1942_vm8, %v1943_v39, %v12897_v12  ;;  %v2201_v1 = vand.u32 8388607, %v16651_v0  ;;  %vm2205_vm12 = vcmp.gt.s32.totalorder %v2204_v53, 0 }
 0x1f5   : > { %16835 = vst [vmem:[#allocation26_spill] sm:$0xff] %v12940_v61  ;;  %v2067_v11 = vor.u32 4788187, %v2066_v56  ;;  %v2070_v62 = vcvt.s32.f32 %v2063_v34  ;;  %v1945_v26 = vadd.s32 %v1944_v5, %v1940_v8  ;;  %v2206_v63 = vsel %vm2205_vm12, %v2204_v53, 0 }
 0x1f6   : > { %v12953_v24 = vsub.f32 %v12014_v9, %v12010_v33  ;;  %v12957_v45 = vsub.f32 %v12226_v50, %v12222_v17  ;;  %v12961_v12 = vsub.f32 %v12432_v7, %v12428_v57  ;;  %v2208_v23 = vand.u32 31, %v2206_v63 }
 0x1f7   : > { %v12966_v30 = vsub.f32 %v12648_v31, %v12644_v4  ;;  %vm5085_vm13 = vcmp.eq.s32.totalorder %v12936_v43, 0  ;;  %v2068_v8 = vand.u32 2147483647, %v2067_v11  ;;  %v1946_v37 = vadd.s32 536870912, %v1945_v26  ;;  %6975 = vperm.xlu1 %10645, %v12940_v61  }
 0x1f8   : > { %vm5088_vm14 = vcmp.eq.s32.totalorder %v12936_v43, 2  ;;  %6900 = vperm.xlu0 %10644, %v12654_v15   ;;  %v12971_v9 = vand.u32 3, %v2077_v13  ;;  %v12973_v50 = vand.u32 3, %v5394_v60  ;;  %v2209_v7 = vsub.s32 32, %v2208_v23 }
 0x1f9   : > { %vm5084_vm15 = vcmp.lt.s32.totalorder %v12936_v43, 2  ;;  %v2071_v52 = vmul.f32 %v2070_v62, %v2068_v8  ;;  %v12977_v31 = vshrl.u32 %v1946_v37, 30  ;;  %v2202_v18 = vor.u32 8388608, %v2201_v1 }
 0x1fa   : > { %v12979_v20 = vmul.f32 0.5, %v191_v14  ;;  %v2211_v39 = vshll.u32 %v16820_v54, %v2208_v23  ;;  %v2212_v53 = vshrl.u32 %v16811_v46, %v2209_v7  ;;  %v2214_v13 = vshll.u32 %v16811_v46, %v2208_v23 }
 0x1fb   : > { %v2220_v34 = vshll.u32 %v16812_v48, %v2208_v23  ;;  %v2072_v56 = vxor.u32 2147483648, %v2071_v52  ;;  %v1948_v60 = vshll.u32 %v12977_v31, 30  ;;  %v2215_v5 = vshrl.u32 %v16806_v6, %v2209_v7 }
 0x1fc   : > { %v2221_v11 = vshrl.u32 %v16821_v25, %v2209_v7  ;;  %v5090_v1 = vsel %vm5088_vm14, %v1778_v36, %v12910_v28  ;;  %6905 = vperm.xlu0 %10644, %v12640_v49   ;;  %v2207_v62 = vshrl.u32 %v2206_v63, 5  ;;  %v2217_v14 = vshll.u32 %v16806_v6, %v2208_v23 }
 0x1fd   : > { %v2218_v8 = vshrl.u32 %v16812_v48, %v2209_v7  ;;  %v2073_v37 = vsel %vm1990_vm2, %v2072_v56, %v2071_v52  ;;  %v12998_v0 = vsub.s32 %v1945_v26, %v1948_v60  ;;  %v2223_v19 = vshll.u32 %v16821_v25, %v2208_v23 }
 0x1fe   : > { %v2224_v16 = vshrl.u32 %v16822_v51, %v2209_v7  ;;  %v16837_v4 = vxor.u32 2147483648, %v12910_v28  ;;  %v2076_v63 = vsel %vm12859_vm5, %v12548_v3, %v2073_v37  ;;  %v2210_v57 = vshrl.u32 %v16820_v54, %v2209_v7 }
 0x1ff   : > { %v2213_v17 = vor.u32 %v2212_v53, %v2211_v39  ;;  %10779 = vcosq.f32 %v2076_v63  ;;  %v1951_v26 = vsub.s32 0, %v12998_v0  ;;  %v2216_v52 = vor.u32 %v2215_v5, %v2214_v13 }
 0x200   : > { %v5087_v36 = vsel %vm5085_vm13, %v12900_v22, %v16837_v4  ;;  %v2222_v23 = vor.u32 %v2221_v11, %v2220_v34  ;;  %6920 = vperm.xlu0 %10644, %v12680_v42   ;;  %10781 = vsinq.f32 %v2076_v63  ;;  %v2219_v28 = vor.u32 %v2218_v8, %v2217_v14 }
 0x201   : > { %vm2226_vm0 = vcmp.lt.s32.totalorder %v2207_v62, 1  ;;  %vm2229_vm1 = vcmp.lt.s32.totalorder %v2207_v62, 4  ;;  %vm2086_vm2 = vcmp.eq.s32.totalorder %v12971_v9, 2  ;;  %vm1887_vm3 = vcmp.lt.s32.totalorder %v12696_v38, 0 }
 0x202   : > { %v10105_v4 = vmin.u32 %v1951_v26, %v12998_v0  ;;  %v2225_v21 = vor.u32 %v2224_v16, %v2223_v19  ;;  %v13016_v22 = vshll.u32 %v2202_v18, 8  ;;  %v2094_v7 = vand.u32 2139095040, %v12979_v20 }
 0x203   : > { %vm2083_vm4 = vcmp.eq.s32.totalorder %v12971_v9, 0  ;;  %vm2227_vm5 = vcmp.lt.s32.totalorder %v2207_v62, 2  ;;  %vm2228_vm7 = vcmp.lt.s32.totalorder %v2207_v62, 3  ;;  %v2230_v39 = vsel %vm2226_vm0, %v2210_v57, %v2213_v17 }
 0x204   : > { %v2231_v53 = vsel %vm2229_vm1, %v2219_v28, 2102212464  ;;  %vm2082_vm9 = vcmp.lt.s32.totalorder %v12971_v9, 2  ;;  %vm5396_vm10 = vcmp.lt.s32.totalorder %v12973_v50, 2  ;;  %v1953_v13 = vclz %v10105_v4  ;;  %6930 = vperm.xlu0 %10644, %v12953_v24  }
 0x205   : > { %v2232_v34 = vsel %vm2228_vm7, %v2216_v52, %v2231_v53  ;;  %v2234_v16 = vsel %vm2226_vm0, %v2213_v17, %v2216_v52  ;;  %v2235_v19 = vsel %vm2229_vm1, %v2222_v23, 920167782  ;;  %v5091_v18 = vsel %vm5084_vm15, %v5087_v36, %v5090_v1 }
 0x206   : > { %vm2080_vm11 = vweird.f32 %v12548_v3  ;;  %vm5397_vm8 = vcmp.eq.s32.totalorder %v12973_v50, 0  ;;  %v1941_v57 = vadd.s32 %v12896_v10, %v12891_v32  ;;  %v2238_v56 = vsel %vm2226_vm0, %v2216_v52, %v2219_v28 }
 0x207   : > { %v16838_v60 = vand.u32 2147483647, %v12696_v38  ;;  %v10106_v5 = vadd.s32 4294967294, %v1953_v13  ;;  %v1971_v43 = vsub.s32 4, %v12977_v31  ;;  %v2236_v11 = vsel %vm2228_vm7, %v2219_v28, %v2235_v19 }
 0x208   : > { %v2239_v1 = vsel %vm2229_vm1, %v2225_v21, 1326507024  ;;  %v2233_v14 = vsel %vm2227_vm5, %v2230_v39, %v2232_v34  ;;  %v2237_v8 = vsel %vm2227_vm5, %v2234_v16, %v2236_v11  ;;  %v2095_v10 = vshrl.u32 %v2094_v7, 23  ;;  %6940 = vperm.xlu0 %10644, %v12957_v45  }
 0x209   : > { %vm13037_vm12 = vcmp.le.f32.partialorder %v16838_v60, 0.7853982  ;;  %v2240_v32 = vsel %vm2228_vm7, %v2222_v23, %v2239_v1  ;;  %vm10107_vm13 = vcmp.lt.s32.totalorder %v10106_v5, 0  ;;  %v10780_v21 = vpop.eup %10779  ;;  %vm5400_vm14 = vcmp.eq.s32.totalorder %v12973_v50, 2 }
 0x20a   : > { %v2241_v37 = vsel %vm2227_vm5, %v2238_v56, %v2240_v32  ;;  %v13049_v36 = vmul.u32.u64.low %v13016_v22, %v2237_v8  ;;  %v13050_v63 = vmul.u32.u64.high %v13016_v22, %v2237_v8, %v13049_v36  ;;  %v1956_v26 = vsel %vm10107_vm13, 0, %v10106_v5  ;;  %v10782_v39 = vpop.eup %10781 }
 0x20b   : > { %v13055_v52 = vmul.u32.u64.low %v13016_v22, %v2241_v37  ;;  %v13056_v28 = vmul.u32.u64.high %v13016_v22, %v2241_v37, %v13055_v52  ;;  %v10112_v4 = vadd.s32 4294967169, %v2095_v10  ;;  %v1957_v23 = vsub.s32 32, %v1956_v26 }
 0x20c   : > { %v1958_v62 = vshll.u32 %v12998_v0, %v1956_v26  ;;  %v1961_v7 = vsub.s32 4294967266, %v1956_v26  ;;  %v5092_v53 = vsel %vm1771_vm6, nan, %v5091_v18  ;;  %v2087_v13 = vxor.u32 2147483648, %v10780_v21  ;;  %6950 = vperm.xlu0 %10644, %v12961_v12  }
 0x20d   : > { %v1972_v34 = vsel %vm1887_vm3, %v1971_v43, %v12977_v31  ;;  %v2249_v16 = vmul.u32 %v13016_v22, %v2233_v14  ;;  %v2084_v19 = vxor.u32 2147483648, %v10782_v39  ;;  %v1959_v56 = vshrl.u32 %v1941_v57, %v1957_v23 }
 0x20e   : > { %v1962_v60 = vadd.s32 127, %v1961_v7  ;;  %v2252_v5 = vadd.s32 1, %v13050_v63  ;;  %v2088_v0 = vsel %vm2086_vm2, %v2087_v13, %v10782_v39  ;;  %v5402_v29 = vsel %vm5400_vm14, %v2087_v13, %v10782_v39 }
 0x20f   : > { %vm2251_vm6 = vc.u32 %v13056_v28, %v13049_v36  ;;  %v2101_v18 = vadd.s32 1, %v10112_v4  ;;  %v2085_v31 = vsel %vm2083_vm4, %v10780_v21, %v2084_v19  ;;  %v5399_v22 = vsel %vm5397_vm8, %v10780_v21, %v2084_v19 }
 0x210   : > { %v1960_v57 = vor.u32 %v1959_v56, %v1958_v62  ;;  %v1963_v43 = vshll.u32 %v1962_v60, 23  ;;  %v2089_v11 = vsel %vm2082_vm9, %v2085_v31, %v2088_v0  ;;  %v5403_v1 = vsel %vm5396_vm10, %v5399_v22, %v5402_v29  ;;  %6960 = vperm.xlu0 %10644, %v12966_v30  }
 0x211   : > { %v1974_v14 = vsel %vm13037_vm12, 0, %v1972_v34  ;;  %v2253_v8 = vsel %vm2251_vm6, %v2252_v5, %v13050_v63  ;;  %v13087_v32 = vsel %vm2080_vm11, nan, %v2089_v11  ;;  %v5404_v10 = vsel %vm2080_vm11, nan, %v5403_v1  ;;  %v194_v63 = vld [vmem:[%s10995_s28 + $0xa8] sm:$0xff] }
 0x212   : > { %v1964_v37 = vor.u32 4788187, %v1963_v43  ;;  %v1967_v26 = vcvt.s32.f32 %v1960_v57  ;;  %v13092_v9 = vsub.f32 %v5092_v53, %v12944_v2  ;;  %v13096_v50 = vsub.f32 %v5404_v10, %v13087_v32 }
 0x213   : > { %v2254_v52 = vadd.s32 %v2253_v8, %v2249_v16  ;;  %vm2102_vm15 = vcmp.gt.s32.totalorder %v2101_v18, 0  ;;  %v5290_v21 = vadd.s32 3, %v1974_v14  ;;  %v16662_v23 = vand.u32 2147483647, %v12979_v20 }
 0x214   : > { %16841 = vst [vmem:[#allocation28_spill] sm:$0xff] %v13096_v50  ;;  %v1965_v4 = vand.u32 2147483647, %v1964_v37  ;;  %v2103_v62 = vsel %vm2102_vm15, %v2101_v18, 0  ;;  %6985 = vperm.xlu1 %10645, %v13096_v50   ;;  %6970 = vperm.xlu0 %10644, %v13092_v9   ;;  %v13102_v53 = vand.u32 3, %v1974_v14  ;;  %v13106_v16 = vmul.f32 0.5, %v194_v63 }
 0x215   : > { %v2255_v3 = vadd.s32 536870912, %v2254_v52  ;;  %v2105_v7 = vand.u32 31, %v2103_v62  ;;  %v13108_v56 = vand.u32 3, %v5290_v21  ;;  %v2098_v60 = vand.u32 8388607, %v16662_v23 }
 0x216   : > { %v1968_v39 = vmul.f32 %v1967_v26, %v1965_v4  ;;  %v13112_v5 = vshrl.u32 %v2103_v62, 5  ;;  %v2403_v26 = vand.u32 2139095040, %v13106_v16  ;;  %v16661_v21 = vand.u32 2147483647, %v13106_v16 }
 0x217   : > { %v13104_v13 = vshrl.u32 %v2255_v3, 30  ;;  %v2106_v34 = vsub.s32 32, %v2105_v7  ;;  %v2108_v29 = vshll.u32 %v16820_v54, %v2105_v7  ;;  %v2111_v18 = vshll.u32 %v16811_v46, %v2105_v7 }
 0x218   : > { %v1969_v19 = vxor.u32 2147483648, %v1968_v39  ;;  %v2114_v31 = vshll.u32 %v16806_v6, %v2105_v7  ;;  %v2117_v11 = vshll.u32 %v16812_v48, %v2105_v7  ;;  %v2120_v37 = vshll.u32 %v16821_v25, %v2105_v7 }
 0x219   : > { %v2257_v0 = vshll.u32 %v13104_v13, 30  ;;  %v2109_v57 = vshrl.u32 %v16811_v46, %v2106_v34  ;;  %v2112_v43 = vshrl.u32 %v16806_v6, %v2106_v34  ;;  %v2115_v8 = vshrl.u32 %v16812_v48, %v2106_v34 }
 0x21a   : > { %v1970_v22 = vsel %vm1887_vm3, %v1969_v19, %v1968_v39  ;;  %v2118_v10 = vshrl.u32 %v16821_v25, %v2106_v34  ;;  %v2107_v4 = vshrl.u32 %v16820_v54, %v2106_v34  ;;  %vm1983_vm0 = vcmp.eq.s32.totalorder %v13102_v53, 2 }
 0x21b   : > { %v1973_v1 = vsel %vm13037_vm12, %v12696_v38, %v1970_v22  ;;  %v13126_v14 = vsub.s32 %v2254_v52, %v2257_v0  ;;  %vm5296_vm1 = vcmp.eq.s32.totalorder %v13108_v56, 2  ;;  %v2099_v17 = vor.u32 8388608, %v2098_v60 }
 0x21c   : > { %10783 = vcosq.f32 %v1973_v1  ;;  %v2110_v52 = vor.u32 %v2109_v57, %v2108_v29  ;;  %v2113_v62 = vor.u32 %v2112_v43, %v2111_v18  ;;  %v2121_v3 = vshrl.u32 %v16822_v51, %v2106_v34 }
 0x21d   : > { %10785 = vsinq.f32 %v1973_v1  ;;  %v2260_v63 = vsub.s32 0, %v13126_v14  ;;  %vm1980_vm2 = vcmp.eq.s32.totalorder %v13102_v53, 0  ;;  %vm5293_vm3 = vcmp.eq.s32.totalorder %v13108_v56, 0 }
 0x21e   : > { %v2116_v39 = vor.u32 %v2115_v8, %v2114_v31  ;;  %v2119_v19 = vor.u32 %v2118_v10, %v2117_v11  ;;  %vm2123_vm4 = vcmp.lt.s32.totalorder %v13112_v5, 1  ;;  %vm1979_vm5 = vcmp.lt.s32.totalorder %v13102_v53, 2 }
 0x21f   : > { %v10117_v7 = vmin.u32 %v2260_v63, %v13126_v14  ;;  %vm5292_vm7 = vcmp.lt.s32.totalorder %v13108_v56, 2  ;;  %v2250_v60 = vadd.s32 %v13049_v36, %v13056_v28  ;;  %v2122_v0 = vor.u32 %v2121_v3, %v2120_v37 }
 0x220   : > { %vm2126_vm9 = vcmp.lt.s32.totalorder %v13112_v5, 4  ;;  %v2404_v34 = vshrl.u32 %v2403_v26, 23  ;;  %vm1977_vm10 = vweird.f32 %v12696_v38  ;;  %vm2125_vm11 = vcmp.lt.s32.totalorder %v13112_v5, 3 }
 0x221   : > { %v2262_v29 = vclz %v10117_v7  ;;  %v2127_v18 = vsel %vm2123_vm4, %v2107_v4, %v2110_v52  ;;  %v2128_v31 = vsel %vm2126_vm9, %v2116_v39, 2102212464  ;;  %vm2124_vm8 = vcmp.lt.s32.totalorder %v13112_v5, 2 }
 0x222   : > { %v2129_v36 = vsel %vm2125_vm11, %v2113_v62, %v2128_v31  ;;  %v2131_v28 = vsel %vm2123_vm4, %v2110_v52, %v2113_v62  ;;  %v2139_v22 = vshll.u32 %v2099_v17, 8  ;;  %vm2196_vm12 = vcmp.lt.s32.totalorder %v12824_v58, 0 }
 0x223   : > { %v10118_v57 = vadd.s32 4294967294, %v2262_v29  ;;  %v2130_v43 = vsel %vm2124_vm8, %v2127_v18, %v2129_v36  ;;  %v2132_v11 = vsel %vm2126_vm9, %v2119_v19, 920167782  ;;  %v2135_v1 = vsel %vm2123_vm4, %v2113_v62, %v2116_v39 }
 0x224   : > { %v2280_v8 = vsub.s32 4, %v13104_v13  ;;  %v2133_v10 = vsel %vm2125_vm11, %v2116_v39, %v2132_v11  ;;  %v2136_v37 = vsel %vm2126_vm9, %v2122_v0, 1326507024  ;;  %v10124_v26 = vadd.s32 4294967169, %v2404_v34 }
 0x225   : > { %vm10119_vm13 = vcmp.lt.s32.totalorder %v10118_v57, 0  ;;  %v2134_v63 = vsel %vm2124_vm8, %v2131_v28, %v2133_v10  ;;  %v2137_v4 = vsel %vm2125_vm11, %v2119_v19, %v2136_v37  ;;  %v2146_v17 = vmul.u32 %v2139_v22, %v2130_v43 }
 0x226   : > { %v10784_v52 = vpop.eup %10783  ;;  %v2265_v3 = vsel %vm10119_vm13, 0, %v10118_v57  ;;  %v2138_v62 = vsel %vm2124_vm8, %v2135_v1, %v2137_v4  ;;  %v13176_v7 = vmul.u32.u64.low %v2139_v22, %v2134_v63  ;;  %v13177_v29 = vmul.u32.u64.high %v2139_v22, %v2134_v63, %v13176_v7 }
 0x227   : > { %v10786_v39 = vpop.eup %10785  ;;  %v1984_v0 = vxor.u32 2147483648, %v10784_v52  ;;  %v2266_v34 = vsub.s32 32, %v2265_v3  ;;  %v2267_v18 = vshll.u32 %v13126_v14, %v2265_v3  ;;  %v2270_v31 = vsub.s32 4294967266, %v2265_v3 }
 0x228   : > { %v1981_v36 = vxor.u32 2147483648, %v10786_v39  ;;  %v13181_v28 = vmul.u32.u64.low %v2139_v22, %v2138_v62  ;;  %v13182_v11 = vmul.u32.u64.high %v2139_v22, %v2138_v62, %v13181_v28  ;;  %v2410_v19 = vadd.s32 1, %v10124_v26 }
 0x229   : > { %v1985_v57 = vsel %vm1983_vm0, %v1984_v0, %v10786_v39  ;;  %v5298_v5 = vsel %vm5296_vm1, %v1984_v0, %v10786_v39  ;;  %v2268_v43 = vshrl.u32 %v2250_v60, %v2266_v34  ;;  %v2271_v1 = vadd.s32 127, %v2270_v31 }
 0x22a   : > { %v1982_v10 = vsel %vm1980_vm2, %v10784_v52, %v1981_v36  ;;  %v5295_v14 = vsel %vm5293_vm3, %v10784_v52, %v1981_v36  ;;  %v2149_v37 = vadd.s32 1, %v13177_v29  ;;  %vm2411_vm14 = vcmp.gt.s32.totalorder %v2410_v19, 0 }
 0x22b   : > { %v1986_v22 = vsel %vm1979_vm5, %v1982_v10, %v1985_v57  ;;  %v5299_v26 = vsel %vm5292_vm7, %v5295_v14, %v5298_v5  ;;  %v2269_v63 = vor.u32 %v2268_v43, %v2267_v18  ;;  %v2272_v4 = vshll.u32 %v2271_v1, 23  ;;  %v193_v18 = vld [vmem:[%s10995_s28 + $0xa0] sm:$0xff] }
 0x22c   : > { %v13199_v60 = vsel %vm1977_vm10, nan, %v1986_v22  ;;  %v5300_v3 = vsel %vm1977_vm10, nan, %v5299_v26  ;;  %v2281_v52 = vsel %vm2196_vm12, %v2280_v8, %v13104_v13  ;;  %vm2148_vm6 = vc.u32 %v13182_v11, %v13176_v7 }
 0x22d   : > { %16842 = vst [vmem:[#allocation29_spill] sm:$0xff] %v13199_v60  ;;  %v13209_v53 = vsub.f32 %v5300_v3, %v13199_v60  ;;  %v2273_v56 = vor.u32 4788187, %v2272_v4  ;;  %v2276_v62 = vcvt.s32.f32 %v2269_v63  ;;  %v2150_v39 = vsel %vm2148_vm6, %v2149_v37, %v13177_v29 }
 0x22e   : > { %v16844_v0 = vand.u32 2147483647, %v12824_v58  ;;  %v2151_v38 = vadd.s32 %v2150_v39, %v2146_v17  ;;  %v2407_v13 = vand.u32 8388607, %v16661_v21  ;;  %v2412_v8 = vsel %vm2411_vm14, %v2410_v19, 0 }
 0x22f   : > { %16843 = vst [vmem:[#allocation30_spill] sm:$0xff] %v13209_v53  ;;  %6980 = vperm.xlu0 %10644, %v13209_v53   ;;  %v2274_v31 = vand.u32 2147483647, %v2273_v56  ;;  %v2414_v29 = vand.u32 31, %v2412_v8  ;;  %v13225_v43 = vmul.f32 0.5, %v193_v18  ;;  %vm2093_vm4 = vcmp.lt.s32.totalorder %v12979_v20, 0 }
 0x230   : > { %vm13214_vm15 = vcmp.le.f32.partialorder %v16844_v0, 0.7853982  ;;  %v2152_v28 = vadd.s32 536870912, %v2151_v38  ;;  %v2408_v14 = vor.u32 8388608, %v2407_v13  ;;  %vm2286_vm10 = vweird.f32 %v12824_v58 }
 0x231   : > { %v2283_v36 = vsel %vm13214_vm15, 0, %v2281_v52  ;;  %v2277_v57 = vmul.f32 %v2276_v62, %v2274_v31  ;;  %v2415_v5 = vsub.s32 32, %v2414_v29  ;;  %v2417_v37 = vshll.u32 %v16820_v54, %v2414_v29 }
 0x232   : > { %v13227_v1 = vand.u32 3, %v2283_v36  ;;  %v5602_v17 = vadd.s32 3, %v2283_v36  ;;  %v13229_v10 = vshrl.u32 %v2152_v28, 30  ;;  %v2420_v26 = vshll.u32 %v16811_v46, %v2414_v29 }
 0x233   : > { %v2278_v19 = vxor.u32 2147483648, %v2277_v57  ;;  %v2418_v22 = vshrl.u32 %v16811_v46, %v2415_v5  ;;  %v2421_v4 = vshrl.u32 %v16806_v6, %v2415_v5  ;;  %v2426_v3 = vshll.u32 %v16812_v48, %v2414_v29 }
 0x234   : > { %v2154_v63 = vshll.u32 %v13229_v10, 30  ;;  %v2427_v52 = vshrl.u32 %v16821_v25, %v2415_v5  ;;  %v2413_v62 = vshrl.u32 %v2412_v8, 5  ;;  %v2423_v39 = vshll.u32 %v16806_v6, %v2414_v29 }
 0x235   : > { %v2279_v56 = vsel %vm2196_vm12, %v2278_v19, %v2277_v57  ;;  %v2424_v0 = vshrl.u32 %v16812_v48, %v2415_v5  ;;  %v2429_v31 = vshll.u32 %v16821_v25, %v2414_v29  ;;  %v2430_v36 = vshrl.u32 %v16822_v51, %v2415_v5 }
 0x236   : > { %v2282_v13 = vsel %vm13214_vm15, %v12824_v58, %v2279_v56  ;;  %v13245_v18 = vsub.s32 %v2151_v38, %v2154_v63  ;;  %v2416_v28 = vshrl.u32 %v16820_v54, %v2415_v5  ;;  %v2419_v21 = vor.u32 %v2418_v22, %v2417_v37 }
 0x237   : > { %10787 = vcosq.f32 %v2282_v13  ;;  %v16663_v8 = vand.u32 2147483647, %v13225_v43  ;;  %v2422_v19 = vor.u32 %v2421_v4, %v2420_v26  ;;  %v2428_v23 = vor.u32 %v2427_v52, %v2426_v3 }
 0x238   : > { %10789 = vsinq.f32 %v2282_v13  ;;  %v2157_v57 = vsub.s32 0, %v13245_v18  ;;  %vm2292_vm0 = vcmp.eq.s32.totalorder %v13227_v1, 2  ;;  %v5603_v34 = vand.u32 3, %v5602_v17 }
 0x239   : > { %v2425_v38 = vor.u32 %v2424_v0, %v2423_v39  ;;  %vm2432_vm1 = vcmp.lt.s32.totalorder %v2413_v62, 1  ;;  %vm2435_vm2 = vcmp.lt.s32.totalorder %v2413_v62, 4  ;;  %vm2289_vm3 = vcmp.eq.s32.totalorder %v13227_v1, 0 }
 0x23a   : > { %v10113_v29 = vmin.u32 %v2157_v57, %v13245_v18  ;;  %v2431_v5 = vor.u32 %v2430_v36, %v2429_v31  ;;  %v13256_v37 = vshll.u32 %v2408_v14, 8  ;;  %v2300_v22 = vand.u32 2139095040, %v13225_v43 }
 0x23b   : > { %vm2288_vm5 = vcmp.lt.s32.totalorder %v13227_v1, 2  ;;  %vm2433_vm7 = vcmp.lt.s32.totalorder %v2413_v62, 2  ;;  %vm2434_vm9 = vcmp.lt.s32.totalorder %v2413_v62, 3  ;;  %v2436_v17 = vsel %vm2432_vm1, %v2416_v28, %v2419_v21 }
 0x23c   : > { %v2437_v26 = vsel %vm2435_vm2, %v2425_v38, 2102212464  ;;  %v2159_v63 = vclz %v10113_v29  ;;  %v2440_v3 = vsel %vm2432_vm1, %v2419_v21, %v2422_v19  ;;  %v2441_v14 = vsel %vm2435_vm2, %v2428_v23, 920167782 }
 0x23d   : > { %v2438_v4 = vsel %vm2434_vm9, %v2422_v19, %v2437_v26  ;;  %vm5605_vm11 = vcmp.eq.s32.totalorder %v5603_v34, 0  ;;  %vm5608_vm8 = vcmp.eq.s32.totalorder %v5603_v34, 2  ;;  %v2147_v52 = vadd.s32 %v13176_v7, %v13182_v11 }
 0x23e   : > { %v2444_v56 = vsel %vm2432_vm1, %v2422_v19, %v2425_v38  ;;  %v10114_v39 = vadd.s32 4294967294, %v2159_v63  ;;  %v2177_v0 = vsub.s32 4, %v13229_v10  ;;  %v2442_v13 = vsel %vm2434_vm9, %v2425_v38, %v2441_v14 }
 0x23f   : > { %v2445_v31 = vsel %vm2435_vm2, %v2431_v5, 1326507024  ;;  %v2439_v36 = vsel %vm2433_vm7, %v2436_v17, %v2438_v4  ;;  %v2443_v21 = vsel %vm2433_vm7, %v2440_v3, %v2442_v13  ;;  %v2301_v57 = vshrl.u32 %v2300_v22, 23 }
 0x240   : > { %v2446_v28 = vsel %vm2434_vm9, %v2428_v23, %v2445_v31  ;;  %vm10115_vm12 = vcmp.lt.s32.totalorder %v10114_v39, 0  ;;  %v13277_v7 = vmul.u32.u64.low %v13256_v37, %v2443_v21  ;;  %v13278_v11 = vmul.u32.u64.high %v13256_v37, %v2443_v21, %v13277_v7 }
 0x241   : > { %v2447_v29 = vsel %vm2433_vm7, %v2444_v56, %v2446_v28  ;;  %v10788_v19 = vpop.eup %10787  ;;  %v2162_v26 = vsel %vm10115_vm12, 0, %v10114_v39  ;;  %v10120_v17 = vadd.s32 4294967169, %v2301_v57  ;;  %vm5604_vm13 = vcmp.lt.s32.totalorder %v5603_v34, 2 }
 0x242   : > { %v13282_v38 = vmul.u32.u64.low %v13256_v37, %v2447_v29  ;;  %v13283_v5 = vmul.u32.u64.high %v13256_v37, %v2447_v29, %v13282_v38  ;;  %v10790_v63 = vpop.eup %10789  ;;  %v2293_v4 = vxor.u32 2147483648, %v10788_v19  ;;  %v2163_v3 = vsub.s32 32, %v2162_v26 }
 0x243   : > { %v2164_v23 = vshll.u32 %v13245_v18, %v2162_v26  ;;  %v2167_v22 = vsub.s32 4294967266, %v2162_v26  ;;  %v2290_v62 = vxor.u32 2147483648, %v10790_v63  ;;  %v2178_v14 = vsel %vm2093_vm4, %v2177_v0, %v13229_v10 }
 0x244   : > { %v2307_v56 = vadd.s32 1, %v10120_v17  ;;  %v2294_v39 = vsel %vm2292_vm0, %v2293_v4, %v10790_v63  ;;  %v5610_v13 = vsel %vm5608_vm8, %v2293_v4, %v10790_v63  ;;  %v2165_v31 = vshrl.u32 %v2147_v52, %v2163_v3 }
 0x245   : > { %v2168_v21 = vadd.s32 127, %v2167_v22  ;;  %v2291_v28 = vsel %vm2289_vm3, %v10788_v19, %v2290_v62  ;;  %v5607_v18 = vsel %vm5605_vm11, %v10788_v19, %v2290_v62  ;;  %v2455_v57 = vmul.u32 %v13256_v37, %v2439_v36 }
 0x246   : > { %vm2457_vm14 = vc.u32 %v13283_v5, %v13277_v7  ;;  %v2295_v10 = vsel %vm2288_vm5, %v2291_v28, %v2294_v39  ;;  %v5611_v0 = vsel %vm5604_vm13, %v5607_v18, %v5610_v13  ;;  %v2166_v29 = vor.u32 %v2165_v31, %v2164_v23 }
 0x247   : > { %v2169_v26 = vshll.u32 %v2168_v21, 23  ;;  %v13302_v52 = vsel %vm2286_vm10, nan, %v2295_v10  ;;  %v5612_v38 = vsel %vm2286_vm10, nan, %v5611_v0  ;;  %v2458_v34 = vadd.s32 1, %v13278_v11  ;;  %v196_v10 = vld [vmem:[%s10995_s28 + $0xb8] sm:$0xff] }
 0x248   : > { %16847 = vst [vmem:[#allocation31_spill] sm:$0xff] %v13302_v52  ;;  %vm2308_vm6 = vcmp.gt.s32.totalorder %v2307_v56, 0  ;;  %v13308_v37 = vsub.f32 %v5612_v38, %v13302_v52  ;;  %v2173_v19 = vcvt.s32.f32 %v2166_v29  ;;  %v16849_v4 = vand.u32 2147483647, %v12979_v20 }
 0x249   : > { %v2170_v36 = vor.u32 4788187, %v2169_v26  ;;  %v2309_v1 = vsel %vm2308_vm6, %v2307_v56, 0  ;;  %v2459_v17 = vsel %vm2457_vm14, %v2458_v34, %v13278_v11  ;;  %v2304_v62 = vand.u32 8388607, %v16663_v8 }
 0x24a   : > { %16848 = vst [vmem:[#allocation32_spill] sm:$0xff] %v13308_v37  ;;  %v2311_v63 = vand.u32 31, %v2309_v1  ;;  %6995 = vperm.xlu1 %10645, %v13308_v37   ;;  %vm13314_vm15 = vcmp.le.f32.partialorder %v16849_v4, 0.7853982  ;;  %v2460_v23 = vadd.s32 %v2459_v17, %v2455_v57  ;;  %v2310_v26 = vshrl.u32 %v2309_v1, 5 }
 0x24b   : > { %v2171_v3 = vand.u32 2147483647, %v2170_v36  ;;  %v2180_v22 = vsel %vm13314_vm15, 0, %v2178_v14  ;;  %v2305_v36 = vor.u32 8388608, %v2304_v62  ;;  %v13340_v2 = vmul.f32 0.5, %v196_v10 }
 0x24c   : > { %v2312_v56 = vsub.s32 32, %v2311_v63  ;;  %v2314_v11 = vshll.u32 %v16820_v54, %v2311_v63  ;;  %v2461_v13 = vadd.s32 536870912, %v2460_v23  ;;  %v2317_v31 = vshll.u32 %v16811_v46, %v2311_v63 }
 0x24d   : > { %v2174_v39 = vmul.f32 %v2173_v19, %v2171_v3  ;;  %v2320_v21 = vshll.u32 %v16806_v6, %v2311_v63  ;;  %v2323_v14 = vshll.u32 %v16812_v48, %v2311_v63  ;;  %v13333_v34 = vand.u32 3, %v2180_v22 }
 0x24e   : > { %v2315_v28 = vshrl.u32 %v16811_v46, %v2312_v56  ;;  %v2318_v18 = vshrl.u32 %v16806_v6, %v2312_v56  ;;  %v2321_v57 = vshrl.u32 %v16812_v48, %v2312_v56  ;;  %v13330_v29 = vshrl.u32 %v2461_v13, 30 }
 0x24f   : > { %v2175_v0 = vxor.u32 2147483648, %v2174_v39  ;;  %v2324_v38 = vshrl.u32 %v16821_v25, %v2312_v56  ;;  %v2326_v19 = vshll.u32 %v16821_v25, %v2311_v63  ;;  %v2327_v17 = vshrl.u32 %v16822_v51, %v2312_v56 }
 0x250   : > { %v2463_v3 = vshll.u32 %v13330_v29, 30  ;;  %v2316_v8 = vor.u32 %v2315_v28, %v2314_v11  ;;  %v2319_v13 = vor.u32 %v2318_v18, %v2317_v31  ;;  %v2322_v33 = vor.u32 %v2321_v57, %v2320_v21 }
 0x251   : > { %v2176_v4 = vsel %vm2093_vm4, %v2175_v0, %v2174_v39  ;;  %v2325_v47 = vor.u32 %v2324_v38, %v2323_v14  ;;  %vm2329_vm0 = vcmp.lt.s32.totalorder %v2310_v26, 1  ;;  %vm2332_vm1 = vcmp.lt.s32.totalorder %v2310_v26, 4 }
 0x252   : > { %v2179_v1 = vsel %vm13314_vm15, %v12979_v20, %v2176_v4  ;;  %v13345_v62 = vsub.s32 %v2460_v23, %v2463_v3  ;;  %v5498_v63 = vadd.s32 3, %v2180_v22  ;;  %v2328_v39 = vor.u32 %v2327_v17, %v2326_v19 }
 0x253   : > { %10791 = vcosq.f32 %v2179_v1  ;;  %vm2402_vm2 = vcmp.lt.s32.totalorder %v13106_v16, 0  ;;  %vm2331_vm3 = vcmp.lt.s32.totalorder %v2310_v26, 3  ;;  %v13349_v28 = vshll.u32 %v2305_v36, 8 }
 0x254   : > { %10793 = vsinq.f32 %v2179_v1  ;;  %v2466_v11 = vsub.s32 0, %v13345_v62  ;;  %v2313_v58 = vshrl.u32 %v16820_v54, %v2312_v56  ;;  %vm2330_vm4 = vcmp.lt.s32.totalorder %v2310_v26, 2 }
 0x255   : > { %v2337_v31 = vsel %vm2329_vm0, %v2316_v8, %v2319_v13  ;;  %v2338_v23 = vsel %vm2332_vm1, %v2325_v47, 920167782  ;;  %vm2185_vm5 = vcmp.lt.s32.totalorder %v13333_v34, 2  ;;  %v2334_v22 = vsel %vm2332_vm1, %v2322_v33, 2102212464 }
 0x256   : > { %v10125_v21 = vmin.u32 %v2466_v11, %v13345_v62  ;;  %v2341_v18 = vsel %vm2329_vm0, %v2319_v13, %v2322_v33  ;;  %v2609_v57 = vand.u32 2139095040, %v13340_v2  ;;  %vm2183_vm7 = vweird.f32 %v12979_v20 }
 0x257   : > { %vm2186_vm9 = vcmp.eq.s32.totalorder %v13333_v34, 0  ;;  %v5499_v56 = vand.u32 3, %v5498_v63  ;;  %v2339_v14 = vsel %vm2331_vm3, %v2322_v33, %v2338_v23  ;;  %v2342_v10 = vsel %vm2332_vm1, %v2328_v39, 1326507024 }
 0x258   : > { %vm2189_vm10 = vcmp.eq.s32.totalorder %v13333_v34, 2  ;;  %v2468_v0 = vclz %v10125_v21  ;;  %v2340_v38 = vsel %vm2330_vm4, %v2337_v31, %v2339_v14  ;;  %v2343_v36 = vsel %vm2331_vm3, %v2325_v47, %v2342_v10 }
 0x259   : > { %v2486_v19 = vsub.s32 4, %v13330_v29  ;;  %v2333_v17 = vsel %vm2329_vm0, %v2313_v58, %v2316_v8  ;;  %v2335_v4 = vsel %vm2331_vm3, %v2319_v13, %v2334_v22  ;;  %v2344_v3 = vsel %vm2330_vm4, %v2341_v18, %v2343_v36 }
 0x25a   : > { %v10126_v1 = vadd.s32 4294967294, %v2468_v0  ;;  %v13371_v33 = vmul.u32.u64.low %v13349_v28, %v2344_v3  ;;  %v13372_v63 = vmul.u32.u64.high %v13349_v28, %v2344_v3, %v13371_v33  ;;  %v2610_v39 = vshrl.u32 %v2609_v57, 23 }
 0x25b   : > { %vm5500_vm11 = vcmp.lt.s32.totalorder %v5499_v56, 2  ;;  %vm5501_vm8 = vcmp.eq.s32.totalorder %v5499_v56, 0  ;;  %v13375_v11 = vmul.u32.u64.low %v13349_v28, %v2340_v38  ;;  %v13376_v31 = vmul.u32.u64.high %v13349_v28, %v2340_v38, %v13375_v11 }
 0x25c   : > { %vm5504_vm12 = vcmp.eq.s32.totalorder %v5499_v56, 2  ;;  %v16852_v8 = vand.u32 2147483647, %v13106_v16  ;;  %v2456_v58 = vadd.s32 %v13277_v7, %v13283_v5  ;;  %vm10127_vm14 = vcmp.lt.s32.totalorder %v10126_v1, 0 }
 0x25d   : > { %v10792_v47 = vpop.eup %10791  ;;  %v2336_v23 = vsel %vm2330_vm4, %v2333_v17, %v2335_v4  ;;  %v2471_v18 = vsel %vm10127_vm14, 0, %v10126_v1  ;;  %v2487_v57 = vsel %vm2402_vm2, %v2486_v19, %v13330_v29  ;;  %v10132_v14 = vadd.s32 4294967169, %v2610_v39 }
 0x25e   : > { %vm13381_vm13 = vcmp.le.f32.partialorder %v16852_v8, 0.7853982  ;;  %v10794_v21 = vpop.eup %10793  ;;  %v2190_v22 = vxor.u32 2147483648, %v10792_v47  ;;  %v2472_v0 = vsub.s32 32, %v2471_v18  ;;  %v2473_v38 = vshll.u32 %v13345_v62, %v2471_v18 }
 0x25f   : > { %v2187_v10 = vxor.u32 2147483648, %v10794_v21  ;;  %v2476_v36 = vsub.s32 4294967266, %v2471_v18  ;;  %v2352_v5 = vmul.u32 %v13349_v28, %v2336_v23  ;;  %vm2354_vm6 = vc.u32 %v13372_v63, %v13375_v11 }
 0x260   : > { %v2191_v3 = vsel %vm2189_vm10, %v2190_v22, %v10794_v21  ;;  %v5506_v7 = vsel %vm5504_vm12, %v2190_v22, %v10794_v21  ;;  %v2474_v19 = vshrl.u32 %v2456_v58, %v2472_v0  ;;  %v2355_v1 = vadd.s32 1, %v13376_v31 }
 0x261   : > { %v2188_v26 = vsel %vm2186_vm9, %v10792_v47, %v2187_v10  ;;  %v5503_v29 = vsel %vm5501_vm8, %v10792_v47, %v2187_v10  ;;  %v2477_v17 = vadd.s32 127, %v2476_v36  ;;  %v2616_v33 = vadd.s32 1, %v10132_v14  ;;  %v195_v10 = vld [vmem:[%s10995_s28 + $0xb0] sm:$0xff] }
 0x262   : > { %v2192_v62 = vsel %vm2185_vm5, %v2188_v26, %v2191_v3  ;;  %v5507_v4 = vsel %vm5500_vm11, %v5503_v29, %v5506_v7  ;;  %v2475_v8 = vor.u32 %v2474_v19, %v2473_v38  ;;  %v2356_v34 = vsel %vm2354_vm6, %v2355_v1, %v13376_v31 }
 0x263   : > { %v13407_v28 = vsel %vm2183_vm7, nan, %v2192_v62  ;;  %v5508_v39 = vsel %vm2183_vm7, nan, %v5507_v4  ;;  %v2478_v47 = vshll.u32 %v2477_v17, 23  ;;  %v16670_v56 = vand.u32 2147483647, %v13340_v2 }
 0x264   : > { %16855 = vst [vmem:[#allocation33_spill] sm:$0xff] %v13407_v28  ;;  %v13412_v58 = vsub.f32 %v5508_v39, %v13407_v28  ;;  %vm2617_vm15 = vcmp.gt.s32.totalorder %v2616_v33, 0  ;;  %v2482_v21 = vcvt.s32.f32 %v2475_v8  ;;  %v2357_v22 = vadd.s32 %v2356_v34, %v2352_v5 }
 0x265   : > { %v2479_v23 = vor.u32 4788187, %v2478_v47  ;;  %v2618_v18 = vsel %vm2617_vm15, %v2616_v33, 0  ;;  %v2489_v20 = vsel %vm13381_vm13, 0, %v2487_v57  ;;  %v2613_v31 = vand.u32 8388607, %v16670_v56 }
 0x266   : > { %16856 = vst [vmem:[#allocation34_spill] sm:$0xff] %v13412_v58  ;;  %6990 = vperm.xlu0 %10644, %v13412_v58   ;;  %v2620_v14 = vand.u32 31, %v2618_v18  ;;  %v2358_v38 = vadd.s32 536870912, %v2357_v22  ;;  %v13420_v36 = vand.u32 3, %v2489_v20  ;;  %v5810_v26 = vadd.s32 3, %v2489_v20 }
 0x267   : > { %v2480_v0 = vand.u32 2147483647, %v2479_v23  ;;  %v13426_v5 = vmul.f32 0.5, %v195_v10  ;;  %v2614_v8 = vor.u32 8388608, %v2613_v31  ;;  %v2619_v47 = vshrl.u32 %v2618_v18, 5 }
 0x268   : > { %v2621_v3 = vsub.s32 32, %v2620_v14  ;;  %v13424_v29 = vshrl.u32 %v2358_v38, 30  ;;  %v2623_v19 = vshll.u32 %v16820_v54, %v2620_v14  ;;  %v2626_v17 = vshll.u32 %v16811_v46, %v2620_v14 }
 0x269   : > { %v2483_v7 = vmul.f32 %v2482_v21, %v2480_v0  ;;  %v2632_v62 = vshll.u32 %v16812_v48, %v2620_v14  ;;  %v2629_v34 = vshll.u32 %v16806_v6, %v2620_v14  ;;  %v2635_v10 = vshll.u32 %v16821_v25, %v2620_v14 }
 0x26a   : > { %v2624_v57 = vshrl.u32 %v16811_v46, %v2621_v3  ;;  %v2360_v1 = vshll.u32 %v13424_v29, 30  ;;  %v2627_v33 = vshrl.u32 %v16806_v6, %v2621_v3  ;;  %v2633_v39 = vshrl.u32 %v16821_v25, %v2621_v3 }
 0x26b   : > { %v2484_v4 = vxor.u32 2147483648, %v2483_v7  ;;  %v2630_v23 = vshrl.u32 %v16812_v48, %v2621_v3  ;;  %v2636_v0 = vshrl.u32 %v16822_v51, %v2621_v3  ;;  %v13446_v56 = vand.u32 3, %v5810_v26 }
 0x26c   : > { %v13439_v20 = vsub.s32 %v2357_v22, %v2360_v1  ;;  %v2622_v18 = vshrl.u32 %v16820_v54, %v2621_v3  ;;  %v2625_v31 = vor.u32 %v2624_v57, %v2623_v19  ;;  %v2628_v50 = vor.u32 %v2627_v33, %v2626_v17 }
 0x26d   : > { %v2485_v21 = vsel %vm2402_vm2, %v2484_v4, %v2483_v7  ;;  %v2634_v7 = vor.u32 %v2633_v39, %v2632_v62  ;;  %v2631_v22 = vor.u32 %v2630_v23, %v2629_v34  ;;  %vm2638_vm0 = vcmp.lt.s32.totalorder %v2619_v47, 1 }
 0x26e   : > { %v2488_v38 = vsel %vm13381_vm13, %v13106_v16, %v2485_v21  ;;  %v2363_v37 = vsub.s32 0, %v13439_v20  ;;  %vm2641_vm1 = vcmp.lt.s32.totalorder %v2619_v47, 4  ;;  %vm2299_vm2 = vcmp.lt.s32.totalorder %v13225_v43, 0 }
 0x26f   : > { %10795 = vcosq.f32 %v2488_v38  ;;  %v2637_v13 = vor.u32 %v2636_v0, %v2635_v10  ;;  %v13452_v4 = vshll.u32 %v2614_v8, 8  ;;  %v2506_v26 = vand.u32 2139095040, %v13426_v5 }
 0x270   : > { %10797 = vsinq.f32 %v2488_v38  ;;  %v10121_v14 = vmin.u32 %v2363_v37, %v13439_v20  ;;  %vm2495_vm3 = vcmp.eq.s32.totalorder %v13420_v36, 0  ;;  %vm2639_vm4 = vcmp.lt.s32.totalorder %v2619_v47, 2 }
 0x271   : > { %vm2640_vm5 = vcmp.lt.s32.totalorder %v2619_v47, 3  ;;  %v2642_v3 = vsel %vm2638_vm0, %v2622_v18, %v2625_v31  ;;  %v2643_v19 = vsel %vm2641_vm1, %v2631_v22, 2102212464  ;;  %vm2494_vm7 = vcmp.lt.s32.totalorder %v13420_v36, 2 }
 0x272   : > { %v2365_v57 = vclz %v10121_v14  ;;  %v2644_v17 = vsel %vm2640_vm5, %v2628_v50, %v2643_v19  ;;  %v2646_v37 = vsel %vm2638_vm0, %v2625_v31, %v2628_v50  ;;  %v2647_v62 = vsel %vm2641_vm1, %v2634_v7, 920167782 }
 0x273   : > { %vm2492_vm9 = vweird.f32 %v13106_v16  ;;  %vm2498_vm10 = vcmp.eq.s32.totalorder %v13420_v36, 2  ;;  %vm5812_vm11 = vcmp.lt.s32.totalorder %v13446_v56, 2  ;;  %v2353_v1 = vadd.s32 %v13375_v11, %v13372_v63 }
 0x274   : > { %v2650_v33 = vsel %vm2638_vm0, %v2628_v50, %v2631_v22  ;;  %v16857_v39 = vand.u32 2147483647, %v13225_v43  ;;  %v10122_v34 = vadd.s32 4294967294, %v2365_v57  ;;  %v2383_v23 = vsub.s32 4, %v13424_v29 }
 0x275   : > { %v2648_v21 = vsel %vm2640_vm5, %v2631_v22, %v2647_v62  ;;  %v2651_v10 = vsel %vm2641_vm1, %v2637_v13, 1326507024  ;;  %v2645_v0 = vsel %vm2639_vm4, %v2642_v3, %v2644_v17  ;;  %v2507_v50 = vshrl.u32 %v2506_v26, 23 }
 0x276   : > { %vm13470_vm8 = vcmp.le.f32.partialorder %v16857_v39, 0.7853982  ;;  %v2649_v38 = vsel %vm2639_vm4, %v2646_v37, %v2648_v21  ;;  %v2652_v63 = vsel %vm2640_vm5, %v2634_v7, %v2651_v10  ;;  %vm10123_vm12 = vcmp.lt.s32.totalorder %v10122_v34, 0 }
 0x277   : > { %v2653_v11 = vsel %vm2639_vm4, %v2650_v33, %v2652_v63  ;;  %v13482_v18 = vmul.u32.u64.low %v13452_v4, %v2649_v38  ;;  %v13483_v31 = vmul.u32.u64.high %v13452_v4, %v2649_v38, %v13482_v18  ;;  %v2368_v14 = vsel %vm10123_vm12, 0, %v10122_v34 }
 0x278   : > { %v13487_v22 = vmul.u32.u64.low %v13452_v4, %v2653_v11  ;;  %v13488_v19 = vmul.u32.u64.high %v13452_v4, %v2653_v11, %v13487_v22  ;;  %v10128_v13 = vadd.s32 4294967169, %v2507_v50  ;;  %vm5816_vm13 = vcmp.eq.s32.totalorder %v13446_v56, 2 }
 0x279   : > { %v10796_v3 = vpop.eup %10795  ;;  %v2369_v57 = vsub.s32 32, %v2368_v14  ;;  %v2370_v7 = vshll.u32 %v13439_v20, %v2368_v14  ;;  %v2373_v26 = vsub.s32 4294967266, %v2368_v14  ;;  %vm5813_vm14 = vcmp.eq.s32.totalorder %v13446_v56, 0  ;;  %v198_v56 = vld [vmem:[%s10995_s28 + $0xc8] sm:$0xff] }
 0x27a   : > { %v10798_v47 = vpop.eup %10797  ;;  %v2499_v17 = vxor.u32 2147483648, %v10796_v3  ;;  %v2384_v37 = vsel %vm2299_vm2, %v2383_v23, %v13424_v29  ;;  %v2661_v62 = vmul.u32 %v13452_v4, %v2645_v0  ;;  %v2664_v21 = vadd.s32 1, %v13483_v31 }
 0x27b   : > { %v2496_v33 = vxor.u32 2147483648, %v10798_v47  ;;  %v2371_v39 = vshrl.u32 %v2353_v1, %v2369_v57  ;;  %v2374_v34 = vadd.s32 127, %v2373_v26  ;;  %vm2663_vm6 = vc.u32 %v13488_v19, %v13482_v18 }
 0x27c   : > { %v2500_v10 = vsel %vm2498_vm10, %v2499_v17, %v10798_v47  ;;  %v5818_v20 = vsel %vm5816_vm13, %v2499_v17, %v10798_v47  ;;  %v2513_v38 = vadd.s32 1, %v10128_v13  ;;  %v2386_v50 = vsel %vm13470_vm8, 0, %v2384_v37 }
 0x27d   : > { %v2497_v29 = vsel %vm2495_vm3, %v10796_v3, %v2496_v33  ;;  %v5815_v4 = vsel %vm5813_vm14, %v10796_v3, %v2496_v33  ;;  %v2372_v23 = vor.u32 %v2371_v39, %v2370_v7  ;;  %v2375_v1 = vshll.u32 %v2374_v34, 23 }
 0x27e   : > { %v2501_v0 = vsel %vm2494_vm7, %v2497_v29, %v2500_v10  ;;  %v5819_v63 = vsel %vm5812_vm11, %v5815_v4, %v5818_v20  ;;  %v2665_v11 = vsel %vm2663_vm6, %v2664_v21, %v13483_v31  ;;  %vm2514_vm15 = vcmp.gt.s32.totalorder %v2513_v38, 0 }
 0x27f   : > { %v13515_v14 = vsel %vm2492_vm9, nan, %v2501_v0  ;;  %v5820_v22 = vsel %vm2492_vm9, nan, %v5819_v63  ;;  %v2376_v13 = vor.u32 4788187, %v2375_v1  ;;  %v2379_v3 = vcvt.s32.f32 %v2372_v23 }
 0x280   : > { %16860 = vst [vmem:[#allocation35_spill] sm:$0xff] %v13515_v14  ;;  %v13520_v36 = vsub.f32 %v5820_v22, %v13515_v14  ;;  %v2666_v57 = vadd.s32 %v2665_v11, %v2661_v62  ;;  %v5706_v26 = vadd.s32 3, %v2386_v50  ;;  %v16675_v47 = vand.u32 2147483647, %v13426_v5 }
 0x281   : > { %v2377_v7 = vand.u32 2147483647, %v2376_v13  ;;  %v2515_v31 = vsel %vm2514_vm15, %v2513_v38, 0  ;;  %v13525_v16 = vand.u32 3, %v2386_v50  ;;  %v13529_v21 = vmul.f32 0.5, %v198_v56 }
 0x282   : > { %16861 = vst [vmem:[#allocation36_spill] sm:$0xff] %v13520_v36  ;;  %7005 = vperm.xlu1 %10645, %v13520_v36   ;;  %v2667_v17 = vadd.s32 536870912, %v2666_v57  ;;  %v2517_v37 = vand.u32 31, %v2515_v31  ;;  %v13531_v10 = vand.u32 3, %v5706_v26  ;;  %v2510_v20 = vand.u32 8388607, %v16675_v47 }
 0x283   : > { %v2380_v33 = vmul.f32 %v2379_v3, %v2377_v7  ;;  %v13535_v29 = vshrl.u32 %v2515_v31, 5  ;;  %v2815_v26 = vand.u32 2139095040, %v13529_v21  ;;  %vm2395_vm0 = vcmp.eq.s32.totalorder %v13525_v16, 2 }
 0x284   : > { %v13527_v39 = vshrl.u32 %v2667_v17, 30  ;;  %v2518_v34 = vsub.s32 32, %v2517_v37  ;;  %v2520_v4 = vshll.u32 %v16820_v54, %v2517_v37  ;;  %v2523_v23 = vshll.u32 %v16811_v46, %v2517_v37 }
 0x285   : > { %v2381_v62 = vxor.u32 2147483648, %v2380_v33  ;;  %v2526_v1 = vshll.u32 %v16806_v6, %v2517_v37  ;;  %v2529_v11 = vshll.u32 %v16812_v48, %v2517_v37  ;;  %v2532_v7 = vshll.u32 %v16821_v25, %v2517_v37 }
 0x286   : > { %v2669_v38 = vshll.u32 %v13527_v39, 30  ;;  %v2521_v63 = vshrl.u32 %v16811_v46, %v2518_v34  ;;  %v2524_v50 = vshrl.u32 %v16806_v6, %v2518_v34  ;;  %v2527_v3 = vshrl.u32 %v16812_v48, %v2518_v34 }
 0x287   : > { %v2382_v0 = vsel %vm2299_vm2, %v2381_v62, %v2380_v33  ;;  %v2530_v56 = vshrl.u32 %v16821_v25, %v2518_v34  ;;  %v2519_v17 = vshrl.u32 %v16820_v54, %v2518_v34  ;;  %vm5712_vm1 = vcmp.eq.s32.totalorder %v13531_v10, 2 }
 0x288   : > { %v2385_v22 = vsel %vm13470_vm8, %v13225_v43, %v2382_v0  ;;  %v13549_v13 = vsub.s32 %v2666_v57, %v2669_v38  ;;  %v2511_v8 = vor.u32 8388608, %v2510_v20  ;;  %v2522_v57 = vor.u32 %v2521_v63, %v2520_v4 }
 0x289   : > { %10799 = vcosq.f32 %v2385_v22  ;;  %v2525_v62 = vor.u32 %v2524_v50, %v2523_v23  ;;  %v2533_v38 = vshrl.u32 %v16822_v51, %v2518_v34  ;;  %vm2392_vm2 = vcmp.eq.s32.totalorder %v13525_v16, 0 }
 0x28a   : > { %10801 = vsinq.f32 %v2385_v22  ;;  %v2672_v31 = vsub.s32 0, %v13549_v13  ;;  %vm5709_vm3 = vcmp.eq.s32.totalorder %v13531_v10, 0  ;;  %v2528_v0 = vor.u32 %v2527_v3, %v2526_v1 }
 0x28b   : > { %v2531_v22 = vor.u32 %v2530_v56, %v2529_v11  ;;  %vm2535_vm4 = vcmp.lt.s32.totalorder %v13535_v29, 1  ;;  %vm2391_vm5 = vcmp.lt.s32.totalorder %v13525_v16, 2  ;;  %vm5708_vm7 = vcmp.lt.s32.totalorder %v13531_v10, 2 }
 0x28c   : > { %v10133_v37 = vmin.u32 %v2672_v31, %v13549_v13  ;;  %v2662_v20 = vadd.s32 %v13482_v18, %v13488_v19  ;;  %v2534_v4 = vor.u32 %v2533_v38, %v2532_v7  ;;  %vm2538_vm9 = vcmp.lt.s32.totalorder %v13535_v29, 4 }
 0x28d   : > { %v2816_v34 = vshrl.u32 %v2815_v26, 23  ;;  %vm2389_vm10 = vweird.f32 %v13225_v43  ;;  %vm2537_vm11 = vcmp.lt.s32.totalorder %v13535_v29, 3  ;;  %v2539_v1 = vsel %vm2535_vm4, %v2519_v17, %v2522_v57 }
 0x28e   : > { %v2674_v23 = vclz %v10133_v37  ;;  %v2540_v63 = vsel %vm2538_vm9, %v2528_v0, 2102212464  ;;  %vm2536_vm8 = vcmp.lt.s32.totalorder %v13535_v29, 2  ;;  %v2543_v19 = vsel %vm2535_vm4, %v2522_v57, %v2525_v62 }
 0x28f   : > { %v2541_v18 = vsel %vm2537_vm11, %v2525_v62, %v2540_v63  ;;  %v2551_v50 = vshll.u32 %v2511_v8, 8  ;;  %vm2608_vm12 = vcmp.lt.s32.totalorder %v13340_v2, 0  ;;  %v2544_v56 = vsel %vm2538_vm9, %v2531_v22, 920167782 }
 0x290   : > { %v10134_v11 = vadd.s32 4294967294, %v2674_v23  ;;  %v2542_v3 = vsel %vm2536_vm8, %v2539_v1, %v2541_v18  ;;  %v2547_v7 = vsel %vm2535_vm4, %v2525_v62, %v2528_v0  ;;  %v2692_v26 = vsub.s32 4, %v13527_v39 }
 0x291   : > { %v2545_v31 = vsel %vm2537_vm11, %v2528_v0, %v2544_v56  ;;  %v2548_v17 = vsel %vm2538_vm9, %v2534_v4, 1326507024  ;;  %v10140_v8 = vadd.s32 4294967169, %v2816_v34  ;;  %v2558_v37 = vmul.u32 %v2551_v50, %v2542_v3 }
 0x292   : > { %vm10135_vm13 = vcmp.lt.s32.totalorder %v10134_v11, 0  ;;  %v2546_v57 = vsel %vm2536_vm8, %v2543_v19, %v2545_v31  ;;  %v2549_v38 = vsel %vm2537_vm11, %v2531_v22, %v2548_v17  ;;  %vm2505_vm4 = vcmp.lt.s32.totalorder %v13426_v5, 0 }
 0x293   : > { %v10800_v23 = vpop.eup %10799  ;;  %v2677_v1 = vsel %vm10135_vm13, 0, %v10134_v11  ;;  %v2550_v62 = vsel %vm2536_vm8, %v2547_v7, %v2549_v38  ;;  %v13599_v63 = vmul.u32.u64.low %v2551_v50, %v2546_v57  ;;  %v13600_v18 = vmul.u32.u64.high %v2551_v50, %v2546_v57, %v13599_v63 }
 0x294   : > { %v10802_v0 = vpop.eup %10801  ;;  %v2396_v4 = vxor.u32 2147483648, %v10800_v23  ;;  %v2678_v34 = vsub.s32 32, %v2677_v1  ;;  %v2679_v56 = vshll.u32 %v13549_v13, %v2677_v1  ;;  %v2682_v47 = vsub.s32 4294967266, %v2677_v1 }
 0x295   : > { %v2393_v19 = vxor.u32 2147483648, %v10802_v0  ;;  %v13604_v31 = vmul.u32.u64.low %v2551_v50, %v2550_v62  ;;  %v13605_v33 = vmul.u32.u64.high %v2551_v50, %v2550_v62, %v13604_v31  ;;  %v2822_v22 = vadd.s32 1, %v10140_v8 }
 0x296   : > { %v2397_v11 = vsel %vm2395_vm0, %v2396_v4, %v10802_v0  ;;  %v5714_v29 = vsel %vm5712_vm1, %v2396_v4, %v10802_v0  ;;  %v2680_v3 = vshrl.u32 %v2662_v20, %v2678_v34  ;;  %v2683_v7 = vadd.s32 127, %v2682_v47 }
 0x297   : > { %v2394_v17 = vsel %vm2392_vm2, %v10800_v23, %v2393_v19  ;;  %v5711_v13 = vsel %vm5709_vm3, %v10800_v23, %v2393_v19  ;;  %v2561_v57 = vadd.s32 1, %v13600_v18  ;;  %vm2823_vm14 = vcmp.gt.s32.totalorder %v2822_v22, 0  ;;  %v197_v19 = vld [vmem:[%s10995_s28 + $0xc0] sm:$0xff] }
 0x298   : > { %v2398_v50 = vsel %vm2391_vm5, %v2394_v17, %v2397_v11  ;;  %v5715_v8 = vsel %vm5708_vm7, %v5711_v13, %v5714_v29  ;;  %v2681_v38 = vor.u32 %v2680_v3, %v2679_v56  ;;  %v2684_v1 = vshll.u32 %v2683_v7, 23 }
 0x299   : > { %v13622_v47 = vsel %vm2389_vm10, nan, %v2398_v50  ;;  %v5716_v20 = vsel %vm2389_vm10, nan, %v5715_v8  ;;  %v2693_v23 = vsel %vm2608_vm12, %v2692_v26, %v13527_v39  ;;  %vm2560_vm6 = vc.u32 %v13605_v33, %v13599_v63 }
 0x29a   : > { %16862 = vst [vmem:[#allocation37_spill] sm:$0xff] %v13622_v47  ;;  %v13632_v16 = vsub.f32 %v5716_v20, %v13622_v47  ;;  %v2685_v10 = vor.u32 4788187, %v2684_v1  ;;  %v2688_v62 = vcvt.s32.f32 %v2681_v38  ;;  %v2562_v0 = vsel %vm2560_vm6, %v2561_v57, %v13600_v18 }
 0x29b   : > { %v16864_v4 = vand.u32 2147483647, %v13340_v2  ;;  %v2563_v43 = vadd.s32 %v2562_v0, %v2558_v37  ;;  %v16867_v56 = vand.u32 2147483647, %v13529_v21  ;;  %v2824_v26 = vsel %vm2823_vm14, %v2822_v22, 0 }
 0x29c   : > { %16863 = vst [vmem:[#allocation38_spill] sm:$0xff] %v13632_v16  ;;  %7000 = vperm.xlu0 %10644, %v13632_v16   ;;  %v2686_v31 = vand.u32 2147483647, %v2685_v10  ;;  %v2826_v18 = vand.u32 31, %v2824_v26  ;;  %v13648_v17 = vmul.f32 0.5, %v197_v19  ;;  %vm2698_vm10 = vweird.f32 %v13340_v2 }
 0x29d   : > { %vm13637_vm15 = vcmp.le.f32.partialorder %v16864_v4, 0.7853982  ;;  %v2819_v39 = vand.u32 8388607, %v16867_v56  ;;  %v2564_v29 = vadd.s32 536870912, %v2563_v43  ;;  %v2825_v4 = vshrl.u32 %v2824_v26, 5 }
 0x29e   : > { %v2695_v11 = vsel %vm13637_vm15, 0, %v2693_v23  ;;  %v2689_v3 = vmul.f32 %v2688_v62, %v2686_v31  ;;  %v2827_v7 = vsub.s32 32, %v2826_v18  ;;  %v2829_v8 = vshll.u32 %v16820_v54, %v2826_v18 }
 0x29f   : > { %v13650_v13 = vand.u32 3, %v2695_v11  ;;  %v6018_v37 = vadd.s32 3, %v2695_v11  ;;  %v13652_v57 = vshrl.u32 %v2564_v29, 30  ;;  %v2820_v50 = vor.u32 8388608, %v2819_v39 }
 0x2a0   : > { %v2690_v22 = vxor.u32 2147483648, %v2689_v3  ;;  %v2830_v38 = vshrl.u32 %v16811_v46, %v2827_v7  ;;  %v2832_v1 = vshll.u32 %v16811_v46, %v2826_v18  ;;  %v2833_v23 = vshrl.u32 %v16806_v6, %v2827_v7 }
 0x2a1   : > { %v2566_v20 = vshll.u32 %v13652_v57, 30  ;;  %v2838_v10 = vshll.u32 %v16812_v48, %v2826_v18  ;;  %v2839_v62 = vshrl.u32 %v16821_v25, %v2827_v7  ;;  %v2835_v56 = vshll.u32 %v16806_v6, %v2826_v18 }
 0x2a2   : > { %v2691_v0 = vsel %vm2608_vm12, %v2690_v22, %v2689_v3  ;;  %v2836_v39 = vshrl.u32 %v16812_v48, %v2827_v7  ;;  %v2841_v11 = vshll.u32 %v16821_v25, %v2826_v18  ;;  %v2842_v29 = vshrl.u32 %v16822_v51, %v2827_v7 }
 0x2a3   : > { %v2694_v19 = vsel %vm13637_vm15, %v13340_v2, %v2691_v0  ;;  %v13668_v31 = vsub.s32 %v2563_v43, %v2566_v20  ;;  %v2828_v36 = vshrl.u32 %v16820_v54, %v2827_v7  ;;  %v2831_v61 = vor.u32 %v2830_v38, %v2829_v8 }
 0x2a4   : > { %10803 = vcosq.f32 %v2694_v19  ;;  %v16682_v26 = vand.u32 2147483647, %v13648_v17  ;;  %v2834_v22 = vor.u32 %v2833_v23, %v2832_v1  ;;  %v2840_v41 = vor.u32 %v2839_v62, %v2838_v10 }
 0x2a5   : > { %10805 = vsinq.f32 %v2694_v19  ;;  %v2569_v3 = vsub.s32 0, %v13668_v31  ;;  %vm2704_vm0 = vcmp.eq.s32.totalorder %v13650_v13, 2  ;;  %v6019_v34 = vand.u32 3, %v6018_v37 }
 0x2a6   : > { %v2837_v43 = vor.u32 %v2836_v39, %v2835_v56  ;;  %vm2844_vm1 = vcmp.lt.s32.totalorder %v2825_v4, 1  ;;  %vm2847_vm2 = vcmp.lt.s32.totalorder %v2825_v4, 4  ;;  %vm2701_vm3 = vcmp.eq.s32.totalorder %v13650_v13, 0 }
 0x2a7   : > { %v10129_v18 = vmin.u32 %v2569_v3, %v13668_v31  ;;  %v2843_v7 = vor.u32 %v2842_v29, %v2841_v11  ;;  %v13679_v8 = vshll.u32 %v2820_v50, 8  ;;  %v2712_v38 = vand.u32 2139095040, %v13648_v17 }
 0x2a8   : > { %vm2700_vm5 = vcmp.lt.s32.totalorder %v13650_v13, 2  ;;  %vm2845_vm7 = vcmp.lt.s32.totalorder %v2825_v4, 2  ;;  %vm2846_vm9 = vcmp.lt.s32.totalorder %v2825_v4, 3  ;;  %v2848_v37 = vsel %vm2844_vm1, %v2828_v36, %v2831_v61 }
 0x2a9   : > { %v2849_v1 = vsel %vm2847_vm2, %v2837_v43, 2102212464  ;;  %v2571_v20 = vclz %v10129_v18  ;;  %v2852_v10 = vsel %vm2844_vm1, %v2831_v61, %v2834_v22  ;;  %v2853_v50 = vsel %vm2847_vm2, %v2840_v41, 920167782 }
 0x2aa   : > { %v2850_v23 = vsel %vm2846_vm9, %v2834_v22, %v2849_v1  ;;  %vm6021_vm11 = vcmp.eq.s32.totalorder %v6019_v34, 0  ;;  %vm6024_vm8 = vcmp.eq.s32.totalorder %v6019_v34, 2  ;;  %v2559_v62 = vadd.s32 %v13599_v63, %v13605_v33 }
 0x2ab   : > { %v2856_v0 = vsel %vm2844_vm1, %v2834_v22, %v2837_v43  ;;  %v10130_v56 = vadd.s32 4294967294, %v2571_v20  ;;  %v2589_v36 = vsub.s32 4, %v13652_v57  ;;  %v2854_v39 = vsel %vm2846_vm9, %v2837_v43, %v2853_v50 }
 0x2ac   : > { %v2857_v19 = vsel %vm2847_vm2, %v2843_v7, 1326507024  ;;  %v2851_v11 = vsel %vm2845_vm7, %v2848_v37, %v2850_v23  ;;  %v2855_v61 = vsel %vm2845_vm7, %v2852_v10, %v2854_v39  ;;  %v2713_v3 = vshrl.u32 %v2712_v38, 23 }
 0x2ad   : > { %v2858_v29 = vsel %vm2846_vm9, %v2840_v41, %v2857_v19  ;;  %vm10131_vm12 = vcmp.lt.s32.totalorder %v10130_v56, 0  ;;  %v13700_v33 = vmul.u32.u64.low %v13679_v8, %v2855_v61  ;;  %v13701_v63 = vmul.u32.u64.high %v13679_v8, %v2855_v61, %v13700_v33 }
 0x2ae   : > { %v2859_v18 = vsel %vm2845_vm7, %v2856_v0, %v2858_v29  ;;  %v10804_v22 = vpop.eup %10803  ;;  %v2574_v1 = vsel %vm10131_vm12, 0, %v10130_v56  ;;  %v10136_v37 = vadd.s32 4294967169, %v2713_v3  ;;  %vm6020_vm13 = vcmp.lt.s32.totalorder %v6019_v34, 2 }
 0x2af   : > { %v13705_v43 = vmul.u32.u64.low %v13679_v8, %v2859_v18  ;;  %v13706_v7 = vmul.u32.u64.high %v13679_v8, %v2859_v18, %v13705_v43  ;;  %v10806_v20 = vpop.eup %10805  ;;  %v2705_v23 = vxor.u32 2147483648, %v10804_v22  ;;  %v2575_v10 = vsub.s32 32, %v2574_v1 }
 0x2b0   : > { %v2576_v41 = vshll.u32 %v13668_v31, %v2574_v1  ;;  %v2579_v38 = vsub.s32 4294967266, %v2574_v1  ;;  %v2702_v4 = vxor.u32 2147483648, %v10806_v20  ;;  %v2590_v50 = vsel %vm2505_vm4, %v2589_v36, %v13652_v57 }
 0x2b1   : > { %v2719_v0 = vadd.s32 1, %v10136_v37  ;;  %v2706_v56 = vsel %vm2704_vm0, %v2705_v23, %v10806_v20  ;;  %v6026_v39 = vsel %vm6024_vm8, %v2705_v23, %v10806_v20  ;;  %v2577_v19 = vshrl.u32 %v2559_v62, %v2575_v10 }
 0x2b2   : > { %v2580_v61 = vadd.s32 127, %v2579_v38  ;;  %v2703_v29 = vsel %vm2701_vm3, %v10804_v22, %v2702_v4  ;;  %v6023_v31 = vsel %vm6021_vm11, %v10804_v22, %v2702_v4  ;;  %v2867_v3 = vmul.u32 %v13679_v8, %v2851_v11 }
 0x2b3   : > { %vm2869_vm14 = vc.u32 %v13706_v7, %v13700_v33  ;;  %v2707_v57 = vsel %vm2700_vm5, %v2703_v29, %v2706_v56  ;;  %v6027_v36 = vsel %vm6020_vm13, %v6023_v31, %v6026_v39  ;;  %v2578_v18 = vor.u32 %v2577_v19, %v2576_v41 }
 0x2b4   : > { %v2581_v1 = vshll.u32 %v2580_v61, 23  ;;  %v13725_v62 = vsel %vm2698_vm10, nan, %v2707_v57  ;;  %v6028_v43 = vsel %vm2698_vm10, nan, %v6027_v36  ;;  %v2870_v34 = vadd.s32 1, %v13701_v63  ;;  %v200_v57 = vld [vmem:[%s10995_s28 + $0xd8] sm:$0xff] }
 0x2b5   : > { %16868 = vst [vmem:[#allocation39_spill] sm:$0xff] %v13725_v62  ;;  %vm2720_vm6 = vcmp.gt.s32.totalorder %v2719_v0, 0  ;;  %v13731_v8 = vsub.f32 %v6028_v43, %v13725_v62  ;;  %v2585_v22 = vcvt.s32.f32 %v2578_v18  ;;  %v16870_v23 = vand.u32 2147483647, %v13426_v5 }
 0x2b6   : > { %v2582_v11 = vor.u32 4788187, %v2581_v1  ;;  %v2721_v13 = vsel %vm2720_vm6, %v2719_v0, 0  ;;  %v2871_v37 = vsel %vm2869_vm14, %v2870_v34, %v13701_v63  ;;  %v2716_v4 = vand.u32 8388607, %v16682_v26 }
 0x2b7   : > { %16869 = vst [vmem:[#allocation40_spill] sm:$0xff] %v13731_v8  ;;  %v2723_v20 = vand.u32 31, %v2721_v13  ;;  %7015 = vperm.xlu1 %10645, %v13731_v8   ;;  %vm13737_vm15 = vcmp.le.f32.partialorder %v16870_v23, 0.7853982  ;;  %v2872_v41 = vadd.s32 %v2871_v37, %v2867_v3  ;;  %v2722_v1 = vshrl.u32 %v2721_v13, 5 }
 0x2b8   : > { %v2583_v10 = vand.u32 2147483647, %v2582_v11  ;;  %v2592_v38 = vsel %vm13737_vm15, 0, %v2590_v50  ;;  %v2717_v11 = vor.u32 8388608, %v2716_v4  ;;  %v13763_v8 = vmul.f32 0.5, %v200_v57 }
 0x2b9   : > { %v2724_v0 = vsub.s32 32, %v2723_v20  ;;  %v2726_v63 = vshll.u32 %v16820_v54, %v2723_v20  ;;  %v2873_v39 = vadd.s32 536870912, %v2872_v41  ;;  %v2729_v19 = vshll.u32 %v16811_v46, %v2723_v20 }
 0x2ba   : > { %v2586_v56 = vmul.f32 %v2585_v22, %v2583_v10  ;;  %v2732_v61 = vshll.u32 %v16806_v6, %v2723_v20  ;;  %v2735_v50 = vshll.u32 %v16812_v48, %v2723_v20  ;;  %v13756_v34 = vand.u32 3, %v2592_v38 }
 0x2bb   : > { %v2727_v29 = vshrl.u32 %v16811_v46, %v2724_v0  ;;  %v2730_v31 = vshrl.u32 %v16806_v6, %v2724_v0  ;;  %v2733_v3 = vshrl.u32 %v16812_v48, %v2724_v0  ;;  %v13753_v18 = vshrl.u32 %v2873_v39, 30 }
 0x2bc   : > { %v2587_v36 = vxor.u32 2147483648, %v2586_v56  ;;  %v2736_v43 = vshrl.u32 %v16821_v25, %v2724_v0  ;;  %v2738_v22 = vshll.u32 %v16821_v25, %v2723_v20  ;;  %v2739_v37 = vshrl.u32 %v16822_v51, %v2724_v0 }
 0x2bd   : > { %v2875_v10 = vshll.u32 %v13753_v18, 30  ;;  %v2728_v26 = vor.u32 %v2727_v29, %v2726_v63  ;;  %v2731_v39 = vor.u32 %v2730_v31, %v2729_v19  ;;  %v2734_v59 = vor.u32 %v2733_v3, %v2732_v61 }
 0x2be   : > { %v2588_v23 = vsel %vm2505_vm4, %v2587_v36, %v2586_v56  ;;  %v2737_v55 = vor.u32 %v2736_v43, %v2735_v50  ;;  %vm2741_vm0 = vcmp.lt.s32.totalorder %v2722_v1, 1  ;;  %vm2744_vm1 = vcmp.lt.s32.totalorder %v2722_v1, 4 }
 0x2bf   : > { %v2591_v13 = vsel %vm13737_vm15, %v13426_v5, %v2588_v23  ;;  %v13768_v4 = vsub.s32 %v2872_v41, %v2875_v10  ;;  %v5914_v20 = vadd.s32 3, %v2592_v38  ;;  %v2740_v56 = vor.u32 %v2739_v37, %v2738_v22 }
 0x2c0   : > { %10807 = vcosq.f32 %v2591_v13  ;;  %vm2814_vm2 = vcmp.lt.s32.totalorder %v13529_v21, 0  ;;  %vm2743_vm3 = vcmp.lt.s32.totalorder %v2722_v1, 3  ;;  %v13772_v29 = vshll.u32 %v2717_v11, 8 }
 0x2c1   : > { %10809 = vsinq.f32 %v2591_v13  ;;  %v2878_v63 = vsub.s32 0, %v13768_v4  ;;  %v2725_v2 = vshrl.u32 %v16820_v54, %v2724_v0  ;;  %vm2742_vm4 = vcmp.lt.s32.totalorder %v2722_v1, 2 }
 0x2c2   : > { %v2749_v19 = vsel %vm2741_vm0, %v2728_v26, %v2731_v39  ;;  %v2750_v41 = vsel %vm2744_vm1, %v2737_v55, 920167782  ;;  %vm2597_vm5 = vcmp.lt.s32.totalorder %v13756_v34, 2  ;;  %v2746_v38 = vsel %vm2744_vm1, %v2734_v59, 2102212464 }
 0x2c3   : > { %v10141_v61 = vmin.u32 %v2878_v63, %v13768_v4  ;;  %v2753_v31 = vsel %vm2741_vm0, %v2731_v39, %v2734_v59  ;;  %v3021_v3 = vand.u32 2139095040, %v13763_v8  ;;  %vm2595_vm7 = vweird.f32 %v13426_v5 }
 0x2c4   : > { %vm2598_vm9 = vcmp.eq.s32.totalorder %v13756_v34, 0  ;;  %v5915_v0 = vand.u32 3, %v5914_v20  ;;  %v2751_v50 = vsel %vm2743_vm3, %v2734_v59, %v2750_v41  ;;  %v2754_v57 = vsel %vm2744_vm1, %v2740_v56, 1326507024 }
 0x2c5   : > { %vm2601_vm10 = vcmp.eq.s32.totalorder %v13756_v34, 2  ;;  %v2880_v36 = vclz %v10141_v61  ;;  %v2752_v43 = vsel %vm2742_vm4, %v2749_v19, %v2751_v50  ;;  %v2755_v11 = vsel %vm2743_vm3, %v2737_v55, %v2754_v57 }
 0x2c6   : > { %v2898_v22 = vsub.s32 4, %v13753_v18  ;;  %v2745_v37 = vsel %vm2741_vm0, %v2725_v2, %v2728_v26  ;;  %v2747_v23 = vsel %vm2743_vm3, %v2731_v39, %v2746_v38  ;;  %v2756_v10 = vsel %vm2742_vm4, %v2753_v31, %v2755_v11 }
 0x2c7   : > { %v10142_v13 = vadd.s32 4294967294, %v2880_v36  ;;  %v13794_v59 = vmul.u32.u64.low %v13772_v29, %v2756_v10  ;;  %v13795_v20 = vmul.u32.u64.high %v13772_v29, %v2756_v10, %v13794_v59  ;;  %v3022_v56 = vshrl.u32 %v3021_v3, 23 }
 0x2c8   : > { %vm5916_vm11 = vcmp.lt.s32.totalorder %v5915_v0, 2  ;;  %vm5917_vm8 = vcmp.eq.s32.totalorder %v5915_v0, 0  ;;  %v13798_v63 = vmul.u32.u64.low %v13772_v29, %v2752_v43  ;;  %v13799_v19 = vmul.u32.u64.high %v13772_v29, %v2752_v43, %v13798_v63 }
 0x2c9   : > { %vm5920_vm12 = vcmp.eq.s32.totalorder %v5915_v0, 2  ;;  %v16873_v26 = vand.u32 2147483647, %v13529_v21  ;;  %v2868_v2 = vadd.s32 %v13700_v33, %v13706_v7  ;;  %vm10143_vm14 = vcmp.lt.s32.totalorder %v10142_v13, 0 }
 0x2ca   : > { %v10808_v55 = vpop.eup %10807  ;;  %v2748_v41 = vsel %vm2742_vm4, %v2745_v37, %v2747_v23  ;;  %v2883_v31 = vsel %vm10143_vm14, 0, %v10142_v13  ;;  %v2899_v3 = vsel %vm2814_vm2, %v2898_v22, %v13753_v18  ;;  %v10148_v50 = vadd.s32 4294967169, %v3022_v56 }
 0x2cb   : > { %vm13804_vm13 = vcmp.le.f32.partialorder %v16873_v26, 0.7853982  ;;  %v10810_v61 = vpop.eup %10809  ;;  %v2602_v38 = vxor.u32 2147483648, %v10808_v55  ;;  %v2884_v36 = vsub.s32 32, %v2883_v31  ;;  %v2885_v43 = vshll.u32 %v13768_v4, %v2883_v31 }
 0x2cc   : > { %v2599_v57 = vxor.u32 2147483648, %v10810_v61  ;;  %v2888_v11 = vsub.s32 4294967266, %v2883_v31  ;;  %v2764_v7 = vmul.u32 %v13772_v29, %v2748_v41  ;;  %vm2766_vm6 = vc.u32 %v13795_v20, %v13798_v63 }
 0x2cd   : > { %v2603_v10 = vsel %vm2601_vm10, %v2602_v38, %v10810_v61  ;;  %v5922_v33 = vsel %vm5920_vm12, %v2602_v38, %v10810_v61  ;;  %v2886_v22 = vshrl.u32 %v2868_v2, %v2884_v36  ;;  %v2767_v13 = vadd.s32 1, %v13799_v19 }
 0x2ce   : > { %v2600_v1 = vsel %vm2598_vm9, %v10808_v55, %v2599_v57  ;;  %v5919_v18 = vsel %vm5917_vm8, %v10808_v55, %v2599_v57  ;;  %v2889_v37 = vadd.s32 127, %v2888_v11  ;;  %v3028_v59 = vadd.s32 1, %v10148_v50  ;;  %v199_v57 = vld [vmem:[%s10995_s28 + $0xd0] sm:$0xff] }
 0x2cf   : > { %v2604_v4 = vsel %vm2597_vm5, %v2600_v1, %v2603_v10  ;;  %v5923_v23 = vsel %vm5916_vm11, %v5919_v18, %v5922_v33  ;;  %v2887_v26 = vor.u32 %v2886_v22, %v2885_v43  ;;  %v2768_v34 = vsel %vm2766_vm6, %v2767_v13, %v13799_v19 }
 0x2d0   : > { %v13830_v29 = vsel %vm2595_vm7, nan, %v2604_v4  ;;  %v5924_v56 = vsel %vm2595_vm7, nan, %v5923_v23  ;;  %v2890_v55 = vshll.u32 %v2889_v37, 23  ;;  %v16689_v0 = vand.u32 2147483647, %v13763_v8 }
 0x2d1   : > { %16876 = vst [vmem:[#allocation41_spill] sm:$0xff] %v13830_v29  ;;  %v13835_v2 = vsub.f32 %v5924_v56, %v13830_v29  ;;  %vm3029_vm15 = vcmp.gt.s32.totalorder %v3028_v59, 0  ;;  %v2894_v61 = vcvt.s32.f32 %v2887_v26  ;;  %v2769_v38 = vadd.s32 %v2768_v34, %v2764_v7 }
 0x2d2   : > { %v2891_v41 = vor.u32 4788187, %v2890_v55  ;;  %v3030_v31 = vsel %vm3029_vm15, %v3028_v59, 0  ;;  %v2901_v5 = vsel %vm13804_vm13, 0, %v2899_v3  ;;  %v3025_v19 = vand.u32 8388607, %v16689_v0 }
 0x2d3   : > { %16877 = vst [vmem:[#allocation42_spill] sm:$0xff] %v13835_v2  ;;  %7010 = vperm.xlu0 %10644, %v13835_v2   ;;  %v3032_v50 = vand.u32 31, %v3030_v31  ;;  %v2770_v43 = vadd.s32 536870912, %v2769_v38  ;;  %v13843_v11 = vand.u32 3, %v2901_v5  ;;  %v6226_v1 = vadd.s32 3, %v2901_v5 }
 0x2d4   : > { %v2892_v36 = vand.u32 2147483647, %v2891_v41  ;;  %v13849_v7 = vmul.f32 0.5, %v199_v57  ;;  %v3026_v26 = vor.u32 8388608, %v3025_v19  ;;  %v3031_v55 = vshrl.u32 %v3030_v31, 5 }
 0x2d5   : > { %v3033_v10 = vsub.s32 32, %v3032_v50  ;;  %v13847_v18 = vshrl.u32 %v2770_v43, 30  ;;  %v3035_v22 = vshll.u32 %v16820_v54, %v3032_v50  ;;  %v3038_v37 = vshll.u32 %v16811_v46, %v3032_v50 }
 0x2d6   : > { %v2895_v33 = vmul.f32 %v2894_v61, %v2892_v36  ;;  %v3044_v4 = vshll.u32 %v16812_v48, %v3032_v50  ;;  %v3041_v34 = vshll.u32 %v16806_v6, %v3032_v50  ;;  %v3047_v57 = vshll.u32 %v16821_v25, %v3032_v50 }
 0x2d7   : > { %v3036_v3 = vshrl.u32 %v16811_v46, %v3033_v10  ;;  %v2772_v13 = vshll.u32 %v13847_v18, 30  ;;  %v3039_v59 = vshrl.u32 %v16806_v6, %v3033_v10  ;;  %v3045_v56 = vshrl.u32 %v16821_v25, %v3033_v10 }
 0x2d8   : > { %v2896_v23 = vxor.u32 2147483648, %v2895_v33  ;;  %v3042_v41 = vshrl.u32 %v16812_v48, %v3033_v10  ;;  %v3048_v36 = vshrl.u32 %v16822_v51, %v3033_v10  ;;  %v13869_v0 = vand.u32 3, %v6226_v1 }
 0x2d9   : > { %v13862_v5 = vsub.s32 %v2769_v38, %v2772_v13  ;;  %v3034_v31 = vshrl.u32 %v16820_v54, %v3033_v10  ;;  %v3037_v19 = vor.u32 %v3036_v3, %v3035_v22  ;;  %v3040_v16 = vor.u32 %v3039_v59, %v3038_v37 }
 0x2da   : > { %v2897_v61 = vsel %vm2814_vm2, %v2896_v23, %v2895_v33  ;;  %v3046_v33 = vor.u32 %v3045_v56, %v3044_v4  ;;  %v3043_v38 = vor.u32 %v3042_v41, %v3041_v34  ;;  %vm3050_vm0 = vcmp.lt.s32.totalorder %v3031_v55, 1 }
 0x2db   : > { %v2900_v43 = vsel %vm13804_vm13, %v13529_v21, %v2897_v61  ;;  %v2775_v2 = vsub.s32 0, %v13862_v5  ;;  %vm3053_vm1 = vcmp.lt.s32.totalorder %v3031_v55, 4  ;;  %vm2711_vm2 = vcmp.lt.s32.totalorder %v13648_v17, 0 }
 0x2dc   : > { %10811 = vcosq.f32 %v2900_v43  ;;  %v3049_v39 = vor.u32 %v3048_v36, %v3047_v57  ;;  %v13875_v23 = vshll.u32 %v3026_v26, 8  ;;  %v2918_v1 = vand.u32 2139095040, %v13849_v7 }
 0x2dd   : > { %10813 = vsinq.f32 %v2900_v43  ;;  %v10137_v50 = vmin.u32 %v2775_v2, %v13862_v5  ;;  %vm2907_vm3 = vcmp.eq.s32.totalorder %v13843_v11, 0  ;;  %vm3051_vm4 = vcmp.lt.s32.totalorder %v3031_v55, 2 }
 0x2de   : > { %vm3052_vm5 = vcmp.lt.s32.totalorder %v3031_v55, 3  ;;  %v3054_v10 = vsel %vm3050_vm0, %v3034_v31, %v3037_v19  ;;  %v3055_v22 = vsel %vm3053_vm1, %v3043_v38, 2102212464  ;;  %vm2906_vm7 = vcmp.lt.s32.totalorder %v13843_v11, 2 }
 0x2df   : > { %v2777_v3 = vclz %v10137_v50  ;;  %v3056_v37 = vsel %vm3052_vm5, %v3040_v16, %v3055_v22  ;;  %v3058_v2 = vsel %vm3050_vm0, %v3037_v19, %v3040_v16  ;;  %v3059_v4 = vsel %vm3053_vm1, %v3046_v33, 920167782 }
 0x2e0   : > { %vm2904_vm9 = vweird.f32 %v13529_v21  ;;  %vm2910_vm10 = vcmp.eq.s32.totalorder %v13843_v11, 2  ;;  %vm6228_vm11 = vcmp.lt.s32.totalorder %v13869_v0, 2  ;;  %v2765_v13 = vadd.s32 %v13798_v63, %v13795_v20 }
 0x2e1   : > { %v3062_v59 = vsel %vm3050_vm0, %v3040_v16, %v3043_v38  ;;  %v16878_v56 = vand.u32 2147483647, %v13648_v17  ;;  %v10138_v34 = vadd.s32 4294967294, %v2777_v3  ;;  %v2795_v41 = vsub.s32 4, %v13847_v18 }
 0x2e2   : > { %v3060_v61 = vsel %vm3052_vm5, %v3043_v38, %v3059_v4  ;;  %v3063_v57 = vsel %vm3053_vm1, %v3049_v39, 1326507024  ;;  %v3057_v36 = vsel %vm3051_vm4, %v3054_v10, %v3056_v37  ;;  %v2919_v16 = vshrl.u32 %v2918_v1, 23 }
 0x2e3   : > { %vm13893_vm8 = vcmp.le.f32.partialorder %v16878_v56, 0.7853982  ;;  %v3061_v43 = vsel %vm3051_vm4, %v3058_v2, %v3060_v61  ;;  %v3064_v20 = vsel %vm3052_vm5, %v3046_v33, %v3063_v57  ;;  %vm10139_vm12 = vcmp.lt.s32.totalorder %v10138_v34, 0 }
 0x2e4   : > { %v3065_v63 = vsel %vm3051_vm4, %v3062_v59, %v3064_v20  ;;  %v13905_v31 = vmul.u32.u64.low %v13875_v23, %v3061_v43  ;;  %v13906_v19 = vmul.u32.u64.high %v13875_v23, %v3061_v43, %v13905_v31  ;;  %v2780_v50 = vsel %vm10139_vm12, 0, %v10138_v34 }
 0x2e5   : > { %v13910_v38 = vmul.u32.u64.low %v13875_v23, %v3065_v63  ;;  %v13911_v22 = vmul.u32.u64.high %v13875_v23, %v3065_v63, %v13910_v38  ;;  %v10144_v39 = vadd.s32 4294967169, %v2919_v16  ;;  %vm6232_vm13 = vcmp.eq.s32.totalorder %v13869_v0, 2 }
 0x2e6   : > { %v10812_v10 = vpop.eup %10811  ;;  %v2781_v3 = vsub.s32 32, %v2780_v50  ;;  %v2782_v33 = vshll.u32 %v13862_v5, %v2780_v50  ;;  %v2785_v1 = vsub.s32 4294967266, %v2780_v50  ;;  %vm6229_vm14 = vcmp.eq.s32.totalorder %v13869_v0, 0  ;;  %v202_v0 = vld [vmem:[%s10995_s28 + $0xe8] sm:$0xff] }
 0x2e7   : > { %v10814_v55 = vpop.eup %10813  ;;  %v2911_v37 = vxor.u32 2147483648, %v10812_v10  ;;  %v2796_v2 = vsel %vm2711_vm2, %v2795_v41, %v13847_v18  ;;  %v3073_v4 = vmul.u32 %v13875_v23, %v3057_v36  ;;  %v3076_v61 = vadd.s32 1, %v13906_v19 }
 0x2e8   : > { %v2908_v59 = vxor.u32 2147483648, %v10814_v55  ;;  %v2783_v56 = vshrl.u32 %v2765_v13, %v2781_v3  ;;  %v2786_v34 = vadd.s32 127, %v2785_v1  ;;  %vm3075_vm6 = vc.u32 %v13911_v22, %v13905_v31 }
 0x2e9   : > { %v2912_v57 = vsel %vm2910_vm10, %v2911_v37, %v10814_v55  ;;  %v6234_v5 = vsel %vm6232_vm13, %v2911_v37, %v10814_v55  ;;  %v2925_v43 = vadd.s32 1, %v10144_v39  ;;  %v2798_v16 = vsel %vm13893_vm8, 0, %v2796_v2 }
 0x2ea   : > { %v2909_v18 = vsel %vm2907_vm3, %v10812_v10, %v2908_v59  ;;  %v6231_v23 = vsel %vm6229_vm14, %v10812_v10, %v2908_v59  ;;  %v2784_v41 = vor.u32 %v2783_v56, %v2782_v33  ;;  %v2787_v13 = vshll.u32 %v2786_v34, 23 }
 0x2eb   : > { %v2913_v36 = vsel %vm2906_vm7, %v2909_v18, %v2912_v57  ;;  %v6235_v20 = vsel %vm6228_vm11, %v6231_v23, %v6234_v5  ;;  %v3077_v63 = vsel %vm3075_vm6, %v3076_v61, %v13906_v19  ;;  %vm2926_vm15 = vcmp.gt.s32.totalorder %v2925_v43, 0 }
 0x2ec   : > { %v13938_v50 = vsel %vm2904_vm9, nan, %v2913_v36  ;;  %v6236_v38 = vsel %vm2904_vm9, nan, %v6235_v20  ;;  %v2788_v39 = vor.u32 4788187, %v2787_v13  ;;  %v2791_v10 = vcvt.s32.f32 %v2784_v41 }
 0x2ed   : > { %16881 = vst [vmem:[#allocation43_spill] sm:$0xff] %v13938_v50  ;;  %v13943_v11 = vsub.f32 %v6236_v38, %v13938_v50  ;;  %v3078_v3 = vadd.s32 %v3077_v63, %v3073_v4  ;;  %v6122_v1 = vadd.s32 3, %v2798_v16  ;;  %v16694_v55 = vand.u32 2147483647, %v13849_v7 }
 0x2ee   : > { %v2789_v33 = vand.u32 2147483647, %v2788_v39  ;;  %v2927_v19 = vsel %vm2926_vm15, %v2925_v43, 0  ;;  %v13948_v21 = vand.u32 3, %v2798_v16  ;;  %v13952_v61 = vmul.f32 0.5, %v202_v0 }
 0x2ef   : > { %16882 = vst [vmem:[#allocation44_spill] sm:$0xff] %v13943_v11  ;;  %7025 = vperm.xlu1 %10645, %v13943_v11   ;;  %v3079_v37 = vadd.s32 536870912, %v3078_v3  ;;  %v2929_v2 = vand.u32 31, %v2927_v19  ;;  %v13954_v57 = vand.u32 3, %v6122_v1  ;;  %v2922_v5 = vand.u32 8388607, %v16694_v55 }
 0x2f0   : > { %v2792_v59 = vmul.f32 %v2791_v10, %v2789_v33  ;;  %v13958_v18 = vshrl.u32 %v2927_v19, 5  ;;  %v3227_v1 = vand.u32 2139095040, %v13952_v61  ;;  %vm2807_vm0 = vcmp.eq.s32.totalorder %v13948_v21, 2 }
 0x2f1   : > { %v13950_v56 = vshrl.u32 %v3079_v37, 30  ;;  %v2930_v34 = vsub.s32 32, %v2929_v2  ;;  %v2932_v23 = vshll.u32 %v16820_v54, %v2929_v2  ;;  %v2935_v41 = vshll.u32 %v16811_v46, %v2929_v2 }
 0x2f2   : > { %v2793_v4 = vxor.u32 2147483648, %v2792_v59  ;;  %v2938_v13 = vshll.u32 %v16806_v6, %v2929_v2  ;;  %v2941_v63 = vshll.u32 %v16812_v48, %v2929_v2  ;;  %v2944_v33 = vshll.u32 %v16821_v25, %v2929_v2 }
 0x2f3   : > { %v3081_v43 = vshll.u32 %v13950_v56, 30  ;;  %v2933_v20 = vshrl.u32 %v16811_v46, %v2930_v34  ;;  %v2936_v16 = vshrl.u32 %v16806_v6, %v2930_v34  ;;  %v2939_v10 = vshrl.u32 %v16812_v48, %v2930_v34 }
 0x2f4   : > { %v2794_v36 = vsel %vm2711_vm2, %v2793_v4, %v2792_v59  ;;  %v2942_v0 = vshrl.u32 %v16821_v25, %v2930_v34  ;;  %v2931_v37 = vshrl.u32 %v16820_v54, %v2930_v34  ;;  %vm6128_vm1 = vcmp.eq.s32.totalorder %v13954_v57, 2 }
 0x2f5   : > { %v2797_v38 = vsel %vm13893_vm8, %v13648_v17, %v2794_v36  ;;  %v13972_v39 = vsub.s32 %v3078_v3, %v3081_v43  ;;  %v2923_v26 = vor.u32 8388608, %v2922_v5  ;;  %v2934_v3 = vor.u32 %v2933_v20, %v2932_v23 }
 0x2f6   : > { %10815 = vcosq.f32 %v2797_v38  ;;  %v2937_v4 = vor.u32 %v2936_v16, %v2935_v41  ;;  %v2945_v43 = vshrl.u32 %v16822_v51, %v2930_v34  ;;  %vm2804_vm2 = vcmp.eq.s32.totalorder %v13948_v21, 0 }
 0x2f7   : > { %10817 = vsinq.f32 %v2797_v38  ;;  %v3084_v19 = vsub.s32 0, %v13972_v39  ;;  %vm6125_vm3 = vcmp.eq.s32.totalorder %v13954_v57, 0  ;;  %v2940_v36 = vor.u32 %v2939_v10, %v2938_v13 }
 0x2f8   : > { %v2943_v38 = vor.u32 %v2942_v0, %v2941_v63  ;;  %vm2947_vm4 = vcmp.lt.s32.totalorder %v13958_v18, 1  ;;  %vm2803_vm5 = vcmp.lt.s32.totalorder %v13948_v21, 2  ;;  %vm6124_vm7 = vcmp.lt.s32.totalorder %v13954_v57, 2 }
 0x2f9   : > { %v10149_v2 = vmin.u32 %v3084_v19, %v13972_v39  ;;  %v3074_v5 = vadd.s32 %v13905_v31, %v13911_v22  ;;  %v2946_v23 = vor.u32 %v2945_v43, %v2944_v33  ;;  %vm2950_vm9 = vcmp.lt.s32.totalorder %v13958_v18, 4 }
 0x2fa   : > { %v3228_v34 = vshrl.u32 %v3227_v1, 23  ;;  %vm2801_vm10 = vweird.f32 %v13648_v17  ;;  %vm2949_vm11 = vcmp.lt.s32.totalorder %v13958_v18, 3  ;;  %v2951_v13 = vsel %vm2947_vm4, %v2931_v37, %v2934_v3 }
 0x2fb   : > { %v3086_v41 = vclz %v10149_v2  ;;  %v2952_v20 = vsel %vm2950_vm9, %v2940_v36, 2102212464  ;;  %vm2948_vm8 = vcmp.lt.s32.totalorder %v13958_v18, 2  ;;  %v2955_v22 = vsel %vm2947_vm4, %v2934_v3, %v2937_v4 }
 0x2fc   : > { %v2953_v31 = vsel %vm2949_vm11, %v2937_v4, %v2952_v20  ;;  %v2963_v16 = vshll.u32 %v2923_v26, 8  ;;  %vm3020_vm12 = vcmp.lt.s32.totalorder %v13763_v8, 0  ;;  %v2956_v0 = vsel %vm2950_vm9, %v2943_v38, 920167782 }
 0x2fd   : > { %v10150_v63 = vadd.s32 4294967294, %v3086_v41  ;;  %v2954_v10 = vsel %vm2948_vm8, %v2951_v13, %v2953_v31  ;;  %v2959_v33 = vsel %vm2947_vm4, %v2937_v4, %v2940_v36  ;;  %v3104_v1 = vsub.s32 4, %v13950_v56 }
 0x2fe   : > { %v2957_v19 = vsel %vm2949_vm11, %v2940_v36, %v2956_v0  ;;  %v2960_v37 = vsel %vm2950_vm9, %v2946_v23, 1326507024  ;;  %v10156_v26 = vadd.s32 4294967169, %v3228_v34  ;;  %v2970_v2 = vmul.u32 %v2963_v16, %v2954_v10 }
 0x2ff   : > { %vm10151_vm13 = vcmp.lt.s32.totalorder %v10150_v63, 0  ;;  %v2958_v3 = vsel %vm2948_vm8, %v2955_v22, %v2957_v19  ;;  %v2961_v43 = vsel %vm2949_vm11, %v2943_v38, %v2960_v37  ;;  %vm2917_vm4 = vcmp.lt.s32.totalorder %v13849_v7, 0 }
 0x300   : > { %v10816_v41 = vpop.eup %10815  ;;  %v3089_v13 = vsel %vm10151_vm13, 0, %v10150_v63  ;;  %v2962_v4 = vsel %vm2948_vm8, %v2959_v33, %v2961_v43  ;;  %v14022_v20 = vmul.u32.u64.low %v2963_v16, %v2958_v3  ;;  %v14023_v31 = vmul.u32.u64.high %v2963_v16, %v2958_v3, %v14022_v20 }
 0x301   : > { %v10818_v36 = vpop.eup %10817  ;;  %v2808_v23 = vxor.u32 2147483648, %v10816_v41  ;;  %v3090_v34 = vsub.s32 32, %v3089_v13  ;;  %v3091_v0 = vshll.u32 %v13972_v39, %v3089_v13  ;;  %v3094_v55 = vsub.s32 4294967266, %v3089_v13 }
 0x302   : > { %v2805_v22 = vxor.u32 2147483648, %v10818_v36  ;;  %v14027_v19 = vmul.u32.u64.low %v2963_v16, %v2962_v4  ;;  %v14028_v59 = vmul.u32.u64.high %v2963_v16, %v2962_v4, %v14027_v19  ;;  %v3234_v38 = vadd.s32 1, %v10156_v26 }
 0x303   : > { %v2809_v63 = vsel %vm2807_vm0, %v2808_v23, %v10818_v36  ;;  %v6130_v18 = vsel %vm6128_vm1, %v2808_v23, %v10818_v36  ;;  %v3092_v10 = vshrl.u32 %v3074_v5, %v3090_v34  ;;  %v3095_v33 = vadd.s32 127, %v3094_v55 }
 0x304   : > { %v2806_v37 = vsel %vm2804_vm2, %v10816_v41, %v2805_v22  ;;  %v6127_v39 = vsel %vm6125_vm3, %v10816_v41, %v2805_v22  ;;  %v2973_v3 = vadd.s32 1, %v14023_v31  ;;  %vm3235_vm14 = vcmp.gt.s32.totalorder %v3234_v38, 0  ;;  %v201_v22 = vld [vmem:[%s10995_s28 + $0xe0] sm:$0xff] }
 0x305   : > { %v2810_v16 = vsel %vm2803_vm5, %v2806_v37, %v2809_v63  ;;  %v6131_v26 = vsel %vm6124_vm7, %v6127_v39, %v6130_v18  ;;  %v3093_v43 = vor.u32 %v3092_v10, %v3091_v0  ;;  %v3096_v13 = vshll.u32 %v3095_v33, 23 }
 0x306   : > { %v14045_v55 = vsel %vm2801_vm10, nan, %v2810_v16  ;;  %v6132_v5 = vsel %vm2801_vm10, nan, %v6131_v26  ;;  %v3105_v41 = vsel %vm3020_vm12, %v3104_v1, %v13950_v56  ;;  %vm2972_vm6 = vc.u32 %v14028_v59, %v14022_v20 }
 0x307   : > { %16883 = vst [vmem:[#allocation45_spill] sm:$0xff] %v14045_v55  ;;  %v14055_v21 = vsub.f32 %v6132_v5, %v14045_v55  ;;  %v3097_v57 = vor.u32 4788187, %v3096_v13  ;;  %v3100_v4 = vcvt.s32.f32 %v3093_v43  ;;  %v2974_v36 = vsel %vm2972_vm6, %v2973_v3, %v14023_v31 }
 0x308   : > { %v16885_v23 = vand.u32 2147483647, %v13763_v8  ;;  %v2975_v17 = vadd.s32 %v2974_v36, %v2970_v2  ;;  %v16888_v0 = vand.u32 2147483647, %v13952_v61  ;;  %v3236_v1 = vsel %vm3235_vm14, %v3234_v38, 0 }
 0x309   : > { %16884 = vst [vmem:[#allocation46_spill] sm:$0xff] %v14055_v21  ;;  %7020 = vperm.xlu0 %10644, %v14055_v21   ;;  %v3098_v19 = vand.u32 2147483647, %v3097_v57  ;;  %v3238_v31 = vand.u32 31, %v3236_v1  ;;  %v14071_v37 = vmul.f32 0.5, %v201_v22  ;;  %vm3110_vm10 = vweird.f32 %v13763_v8 }
 0x30a   : > { %vm14060_vm15 = vcmp.le.f32.partialorder %v16885_v23, 0.7853982  ;;  %v3231_v56 = vand.u32 8388607, %v16888_v0  ;;  %v2976_v18 = vadd.s32 536870912, %v2975_v17  ;;  %v3237_v23 = vshrl.u32 %v3236_v1, 5 }
 0x30b   : > { %v3107_v63 = vsel %vm14060_vm15, 0, %v3105_v41  ;;  %v3101_v10 = vmul.f32 %v3100_v4, %v3098_v19  ;;  %v3239_v33 = vsub.s32 32, %v3238_v31  ;;  %v3241_v26 = vshll.u32 %v16820_v54, %v3238_v31 }
 0x30c   : > { %v14073_v39 = vand.u32 3, %v3107_v63  ;;  %v6434_v2 = vadd.s32 3, %v3107_v63  ;;  %v14075_v3 = vshrl.u32 %v2976_v18, 30  ;;  %v3232_v16 = vor.u32 8388608, %v3231_v56 }
 0x30d   : > { %v3102_v38 = vxor.u32 2147483648, %v3101_v10  ;;  %v3242_v43 = vshrl.u32 %v16811_v46, %v3239_v33  ;;  %v3244_v13 = vshll.u32 %v16811_v46, %v3238_v31  ;;  %v3245_v41 = vshrl.u32 %v16806_v6, %v3239_v33 }
 0x30e   : > { %v2978_v5 = vshll.u32 %v14075_v3, 30  ;;  %v3250_v57 = vshll.u32 %v16812_v48, %v3238_v31  ;;  %v3251_v4 = vshrl.u32 %v16821_v25, %v3239_v33  ;;  %v3247_v0 = vshll.u32 %v16806_v6, %v3238_v31 }
 0x30f   : > { %v3103_v36 = vsel %vm3020_vm12, %v3102_v38, %v3101_v10  ;;  %v3248_v56 = vshrl.u32 %v16812_v48, %v3239_v33  ;;  %v3253_v63 = vshll.u32 %v16821_v25, %v3238_v31  ;;  %v3254_v18 = vshrl.u32 %v16822_v51, %v3239_v33 }
 0x310   : > { %v3106_v22 = vsel %vm14060_vm15, %v13763_v8, %v3103_v36  ;;  %v14091_v19 = vsub.s32 %v2975_v17, %v2978_v5  ;;  %v3240_v11 = vshrl.u32 %v16820_v54, %v3239_v33  ;;  %v3243_v21 = vor.u32 %v3242_v43, %v3241_v26 }
 0x311   : > { %10819 = vcosq.f32 %v3106_v22  ;;  %v16701_v1 = vand.u32 2147483647, %v14071_v37  ;;  %v3246_v38 = vor.u32 %v3245_v41, %v3244_v13  ;;  %v3252_v27 = vor.u32 %v3251_v4, %v3250_v57 }
 0x312   : > { %10821 = vsinq.f32 %v3106_v22  ;;  %v2981_v10 = vsub.s32 0, %v14091_v19  ;;  %vm3116_vm0 = vcmp.eq.s32.totalorder %v14073_v39, 2  ;;  %v6435_v34 = vand.u32 3, %v6434_v2 }
 0x313   : > { %v3249_v17 = vor.u32 %v3248_v56, %v3247_v0  ;;  %vm3256_vm1 = vcmp.lt.s32.totalorder %v3237_v23, 1  ;;  %vm3259_vm2 = vcmp.lt.s32.totalorder %v3237_v23, 4  ;;  %vm3113_vm3 = vcmp.eq.s32.totalorder %v14073_v39, 0 }
 0x314   : > { %v10145_v31 = vmin.u32 %v2981_v10, %v14091_v19  ;;  %v3255_v33 = vor.u32 %v3254_v18, %v3253_v63  ;;  %v14102_v26 = vshll.u32 %v3232_v16, 8  ;;  %v3124_v43 = vand.u32 2139095040, %v14071_v37 }
 0x315   : > { %vm3112_vm5 = vcmp.lt.s32.totalorder %v14073_v39, 2  ;;  %vm3257_vm7 = vcmp.lt.s32.totalorder %v3237_v23, 2  ;;  %vm3258_vm9 = vcmp.lt.s32.totalorder %v3237_v23, 3  ;;  %v3260_v2 = vsel %vm3256_vm1, %v3240_v11, %v3243_v21 }
 0x316   : > { %v3261_v13 = vsel %vm3259_vm2, %v3249_v17, 2102212464  ;;  %v2983_v5 = vclz %v10145_v31  ;;  %v3264_v57 = vsel %vm3256_vm1, %v3243_v21, %v3246_v38  ;;  %v3265_v16 = vsel %vm3259_vm2, %v3252_v27, 920167782 }
 0x317   : > { %v3262_v41 = vsel %vm3258_vm9, %v3246_v38, %v3261_v13  ;;  %vm6437_vm11 = vcmp.eq.s32.totalorder %v6435_v34, 0  ;;  %vm6440_vm8 = vcmp.eq.s32.totalorder %v6435_v34, 2  ;;  %v2971_v4 = vadd.s32 %v14022_v20, %v14028_v59 }
 0x318   : > { %v3268_v36 = vsel %vm3256_vm1, %v3246_v38, %v3249_v17  ;;  %v10146_v0 = vadd.s32 4294967294, %v2983_v5  ;;  %v3001_v11 = vsub.s32 4, %v14075_v3  ;;  %v3266_v56 = vsel %vm3258_vm9, %v3249_v17, %v3265_v16 }
 0x319   : > { %v3269_v22 = vsel %vm3259_vm2, %v3255_v33, 1326507024  ;;  %v3263_v63 = vsel %vm3257_vm7, %v3260_v2, %v3262_v41  ;;  %v3267_v21 = vsel %vm3257_vm7, %v3264_v57, %v3266_v56  ;;  %v3125_v10 = vshrl.u32 %v3124_v43, 23 }
 0x31a   : > { %v3270_v18 = vsel %vm3258_vm9, %v3252_v27, %v3269_v22  ;;  %vm10147_vm12 = vcmp.lt.s32.totalorder %v10146_v0, 0  ;;  %v14123_v59 = vmul.u32.u64.low %v14102_v26, %v3267_v21  ;;  %v14124_v20 = vmul.u32.u64.high %v14102_v26, %v3267_v21, %v14123_v59 }
 0x31b   : > { %v3271_v31 = vsel %vm3257_vm7, %v3268_v36, %v3270_v18  ;;  %v10820_v38 = vpop.eup %10819  ;;  %v2986_v13 = vsel %vm10147_vm12, 0, %v10146_v0  ;;  %v10152_v2 = vadd.s32 4294967169, %v3125_v10  ;;  %vm6436_vm13 = vcmp.lt.s32.totalorder %v6435_v34, 2 }
 0x31c   : > { %v14128_v17 = vmul.u32.u64.low %v14102_v26, %v3271_v31  ;;  %v14129_v33 = vmul.u32.u64.high %v14102_v26, %v3271_v31, %v14128_v17  ;;  %v10822_v5 = vpop.eup %10821  ;;  %v3117_v41 = vxor.u32 2147483648, %v10820_v38  ;;  %v2987_v57 = vsub.s32 32, %v2986_v13 }
 0x31d   : > { %v2988_v27 = vshll.u32 %v14091_v19, %v2986_v13  ;;  %v2991_v43 = vsub.s32 4294967266, %v2986_v13  ;;  %v3114_v23 = vxor.u32 2147483648, %v10822_v5  ;;  %v3002_v16 = vsel %vm2917_vm4, %v3001_v11, %v14075_v3 }
 0x31e   : > { %v3131_v36 = vadd.s32 1, %v10152_v2  ;;  %v3118_v0 = vsel %vm3116_vm0, %v3117_v41, %v10822_v5  ;;  %v6442_v56 = vsel %vm6440_vm8, %v3117_v41, %v10822_v5  ;;  %v2989_v22 = vshrl.u32 %v2971_v4, %v2987_v57 }
 0x31f   : > { %v2992_v21 = vadd.s32 127, %v2991_v43  ;;  %v3115_v18 = vsel %vm3113_vm3, %v10820_v38, %v3114_v23  ;;  %v6439_v19 = vsel %vm6437_vm11, %v10820_v38, %v3114_v23  ;;  %v3279_v10 = vmul.u32 %v14102_v26, %v3263_v63 }
 0x320   : > { %vm3281_vm14 = vc.u32 %v14129_v33, %v14123_v59  ;;  %v3119_v3 = vsel %vm3112_vm5, %v3115_v18, %v3118_v0  ;;  %v6443_v11 = vsel %vm6436_vm13, %v6439_v19, %v6442_v56  ;;  %v2990_v31 = vor.u32 %v2989_v22, %v2988_v27 }
 0x321   : > { %v2993_v13 = vshll.u32 %v2992_v21, 23  ;;  %v14148_v4 = vsel %vm3110_vm10, nan, %v3119_v3  ;;  %v6444_v17 = vsel %vm3110_vm10, nan, %v6443_v11  ;;  %v3282_v34 = vadd.s32 1, %v14124_v20  ;;  %v204_v3 = vld [vmem:[%s10995_s28 + $0xf8] sm:$0xff] }
 0x322   : > { %16889 = vst [vmem:[#allocation47_spill] sm:$0xff] %v14148_v4  ;;  %vm3132_vm6 = vcmp.gt.s32.totalorder %v3131_v36, 0  ;;  %v14154_v26 = vsub.f32 %v6444_v17, %v14148_v4  ;;  %v2997_v38 = vcvt.s32.f32 %v2990_v31  ;;  %v16891_v41 = vand.u32 2147483647, %v13849_v7 }
 0x323   : > { %v2994_v63 = vor.u32 4788187, %v2993_v13  ;;  %v3133_v39 = vsel %vm3132_vm6, %v3131_v36, 0  ;;  %v3283_v2 = vsel %vm3281_vm14, %v3282_v34, %v14124_v20  ;;  %v3128_v23 = vand.u32 8388607, %v16701_v1 }
 0x324   : > { %16890 = vst [vmem:[#allocation48_spill] sm:$0xff] %v14154_v26  ;;  %v3135_v5 = vand.u32 31, %v3133_v39  ;;  %7035 = vperm.xlu1 %10645, %v14154_v26   ;;  %vm14160_vm15 = vcmp.le.f32.partialorder %v16891_v41, 0.7853982  ;;  %v3284_v27 = vadd.s32 %v3283_v2, %v3279_v10  ;;  %v3134_v13 = vshrl.u32 %v3133_v39, 5 }
 0x325   : > { %v2995_v57 = vand.u32 2147483647, %v2994_v63  ;;  %v3004_v43 = vsel %vm14160_vm15, 0, %v3002_v16  ;;  %v3129_v63 = vor.u32 8388608, %v3128_v23  ;;  %v14186_v26 = vmul.f32 0.5, %v204_v3 }
 0x326   : > { %v3136_v36 = vsub.s32 32, %v3135_v5  ;;  %v3138_v20 = vshll.u32 %v16820_v54, %v3135_v5  ;;  %v3285_v56 = vadd.s32 536870912, %v3284_v27  ;;  %v3141_v22 = vshll.u32 %v16811_v46, %v3135_v5 }
 0x327   : > { %v2998_v0 = vmul.f32 %v2997_v38, %v2995_v57  ;;  %v3144_v21 = vshll.u32 %v16806_v6, %v3135_v5  ;;  %v3147_v16 = vshll.u32 %v16812_v48, %v3135_v5  ;;  %v14179_v34 = vand.u32 3, %v3004_v43 }
 0x328   : > { %v3139_v18 = vshrl.u32 %v16811_v46, %v3136_v36  ;;  %v3142_v19 = vshrl.u32 %v16806_v6, %v3136_v36  ;;  %v3145_v10 = vshrl.u32 %v16812_v48, %v3136_v36  ;;  %v14176_v31 = vshrl.u32 %v3285_v56, 30 }
 0x329   : > { %v2999_v11 = vxor.u32 2147483648, %v2998_v0  ;;  %v3148_v17 = vshrl.u32 %v16821_v25, %v3136_v36  ;;  %v3150_v38 = vshll.u32 %v16821_v25, %v3135_v5  ;;  %v3151_v2 = vshrl.u32 %v16822_v51, %v3136_v36 }
 0x32a   : > { %v3287_v57 = vshll.u32 %v14176_v31, 30  ;;  %v3140_v1 = vor.u32 %v3139_v18, %v3138_v20  ;;  %v3143_v56 = vor.u32 %v3142_v19, %v3141_v22  ;;  %v3146_v58 = vor.u32 %v3145_v10, %v3144_v21 }
 0x32b   : > { %v3000_v41 = vsel %vm2917_vm4, %v2999_v11, %v2998_v0  ;;  %v3149_v40 = vor.u32 %v3148_v17, %v3147_v16  ;;  %vm3153_vm0 = vcmp.lt.s32.totalorder %v3134_v13, 1  ;;  %vm3156_vm1 = vcmp.lt.s32.totalorder %v3134_v13, 4 }
 0x32c   : > { %v3003_v39 = vsel %vm14160_vm15, %v13849_v7, %v3000_v41  ;;  %v14191_v23 = vsub.s32 %v3284_v27, %v3287_v57  ;;  %v6330_v5 = vadd.s32 3, %v3004_v43  ;;  %v3152_v0 = vor.u32 %v3151_v2, %v3150_v38 }
 0x32d   : > { %10823 = vcosq.f32 %v3003_v39  ;;  %vm3226_vm2 = vcmp.lt.s32.totalorder %v13952_v61, 0  ;;  %vm3155_vm3 = vcmp.lt.s32.totalorder %v3134_v13, 3  ;;  %v14195_v18 = vshll.u32 %v3129_v63, 8 }
 0x32e   : > { %10825 = vsinq.f32 %v3003_v39  ;;  %v3290_v20 = vsub.s32 0, %v14191_v23  ;;  %v3137_v8 = vshrl.u32 %v16820_v54, %v3136_v36  ;;  %vm3154_vm4 = vcmp.lt.s32.totalorder %v3134_v13, 2 }
 0x32f   : > { %v3161_v22 = vsel %vm3153_vm0, %v3140_v1, %v3143_v56  ;;  %v3162_v27 = vsel %vm3156_vm1, %v3149_v40, 920167782  ;;  %vm3009_vm5 = vcmp.lt.s32.totalorder %v14179_v34, 2  ;;  %v3158_v43 = vsel %vm3156_vm1, %v3146_v58, 2102212464 }
 0x330   : > { %v10157_v21 = vmin.u32 %v3290_v20, %v14191_v23  ;;  %v3165_v19 = vsel %vm3153_vm0, %v3143_v56, %v3146_v58  ;;  %v3433_v10 = vand.u32 2139095040, %v14186_v26  ;;  %vm3007_vm7 = vweird.f32 %v13849_v7 }
 0x331   : > { %vm3010_vm9 = vcmp.eq.s32.totalorder %v14179_v34, 0  ;;  %v6331_v36 = vand.u32 3, %v6330_v5  ;;  %v3163_v16 = vsel %vm3155_vm3, %v3146_v58, %v3162_v27  ;;  %v3166_v3 = vsel %vm3156_vm1, %v3152_v0, 1326507024 }
 0x332   : > { %vm3013_vm10 = vcmp.eq.s32.totalorder %v14179_v34, 2  ;;  %v3292_v11 = vclz %v10157_v21  ;;  %v3164_v17 = vsel %vm3154_vm4, %v3161_v22, %v3163_v16  ;;  %v3167_v63 = vsel %vm3155_vm3, %v3149_v40, %v3166_v3 }
 0x333   : > { %v3310_v38 = vsub.s32 4, %v14176_v31  ;;  %v3157_v2 = vsel %vm3153_vm0, %v3137_v8, %v3140_v1  ;;  %v3159_v41 = vsel %vm3155_vm3, %v3143_v56, %v3158_v43  ;;  %v3168_v57 = vsel %vm3154_vm4, %v3165_v19, %v3167_v63 }
 0x334   : > { %v10158_v39 = vadd.s32 4294967294, %v3292_v11  ;;  %v14217_v58 = vmul.u32.u64.low %v14195_v18, %v3168_v57  ;;  %v14218_v5 = vmul.u32.u64.high %v14195_v18, %v3168_v57, %v14217_v58  ;;  %v3434_v0 = vshrl.u32 %v3433_v10, 23 }
 0x335   : > { %vm6332_vm11 = vcmp.lt.s32.totalorder %v6331_v36, 2  ;;  %vm6333_vm8 = vcmp.eq.s32.totalorder %v6331_v36, 0  ;;  %v14221_v20 = vmul.u32.u64.low %v14195_v18, %v3164_v17  ;;  %v14222_v22 = vmul.u32.u64.high %v14195_v18, %v3164_v17, %v14221_v20 }
 0x336   : > { %vm6336_vm12 = vcmp.eq.s32.totalorder %v6331_v36, 2  ;;  %v16894_v1 = vand.u32 2147483647, %v13952_v61  ;;  %v3280_v8 = vadd.s32 %v14123_v59, %v14129_v33  ;;  %vm10159_vm14 = vcmp.lt.s32.totalorder %v10158_v39, 0 }
 0x337   : > { %v10824_v40 = vpop.eup %10823  ;;  %v3160_v27 = vsel %vm3154_vm4, %v3157_v2, %v3159_v41  ;;  %v3295_v19 = vsel %vm10159_vm14, 0, %v10158_v39  ;;  %v3311_v10 = vsel %vm3226_vm2, %v3310_v38, %v14176_v31  ;;  %v10164_v16 = vadd.s32 4294967169, %v3434_v0 }
 0x338   : > { %vm14227_vm13 = vcmp.le.f32.partialorder %v16894_v1, 0.7853982  ;;  %v10826_v21 = vpop.eup %10825  ;;  %v3014_v43 = vxor.u32 2147483648, %v10824_v40  ;;  %v3296_v11 = vsub.s32 32, %v3295_v19  ;;  %v3297_v17 = vshll.u32 %v14191_v23, %v3295_v19 }
 0x339   : > { %v3011_v3 = vxor.u32 2147483648, %v10826_v21  ;;  %v3300_v63 = vsub.s32 4294967266, %v3295_v19  ;;  %v3176_v33 = vmul.u32 %v14195_v18, %v3160_v27  ;;  %vm3178_vm6 = vc.u32 %v14218_v5, %v14221_v20 }
 0x33a   : > { %v3015_v57 = vsel %vm3013_vm10, %v3014_v43, %v10826_v21  ;;  %v6338_v59 = vsel %vm6336_vm12, %v3014_v43, %v10826_v21  ;;  %v3298_v38 = vshrl.u32 %v3280_v8, %v3296_v11  ;;  %v3179_v39 = vadd.s32 1, %v14222_v22 }
 0x33b   : > { %v3012_v13 = vsel %vm3010_vm9, %v10824_v40, %v3011_v3  ;;  %v6335_v31 = vsel %vm6333_vm8, %v10824_v40, %v3011_v3  ;;  %v3301_v2 = vadd.s32 127, %v3300_v63  ;;  %v3440_v58 = vadd.s32 1, %v10164_v16  ;;  %v203_v3 = vld [vmem:[%s10995_s28 + $0xf0] sm:$0xff]  ;;  %s10317_s28 = sshll.u32 %s10964_s16, 12  ;;  %s16569_s16 = scalar_lea.sflag [#allocation3], %s162_s25 }
 0x33c   : > { %v3016_v23 = vsel %vm3009_vm5, %v3012_v13, %v3015_v57  ;;  %v6339_v41 = vsel %vm6332_vm11, %v6335_v31, %v6338_v59  ;;  %v3299_v1 = vor.u32 %v3298_v38, %v3297_v17  ;;  %v3180_v34 = vsel %vm3178_vm6, %v3179_v39, %v14222_v22  ;;  %s16560_s5 = scalar_lea.hbm %s16613_s3, %s10317_s28 }
 0x33d   : > { %v14253_v18 = vsel %vm3007_vm7, nan, %v3016_v23  ;;  %v6340_v0 = vsel %vm3007_vm7, nan, %v6339_v41  ;;  %v3302_v40 = vshll.u32 %v3301_v2, 23  ;;  %v16708_v36 = vand.u32 2147483647, %v14186_v26 }
 0x33e   : > { %16897 = vst [vmem:[#allocation49_spill] sm:$0xff] %v14253_v18  ;;  %v14258_v8 = vsub.f32 %v6340_v0, %v14253_v18  ;;  %vm3441_vm15 = vcmp.gt.s32.totalorder %v3440_v58, 0  ;;  %v3306_v21 = vcvt.s32.f32 %v3299_v1  ;;  %v3181_v43 = vadd.s32 %v3180_v34, %v3176_v33 }
 0x33f   : > { %v3303_v27 = vor.u32 4788187, %v3302_v40  ;;  %v3442_v19 = vsel %vm3441_vm15, %v3440_v58, 0  ;;  %v3313_v7 = vsel %vm14227_vm13, 0, %v3311_v10  ;;  %v3437_v22 = vand.u32 8388607, %v16708_v36 }
 0x340   : > { %16898 = vst [vmem:[#allocation50_spill] sm:$0xff] %v14258_v8  ;;  %7030 = vperm.xlu0 %10644, %v14258_v8   ;;  %v3444_v16 = vand.u32 31, %v3442_v19  ;;  %v3182_v17 = vadd.s32 536870912, %v3181_v43  ;;  %v14266_v63 = vand.u32 3, %v3313_v7  ;;  %v6642_v13 = vadd.s32 3, %v3313_v7 }
 0x341   : > { %v3304_v11 = vand.u32 2147483647, %v3303_v27  ;;  %v14272_v33 = vmul.f32 0.5, %v203_v3  ;;  %v3438_v1 = vor.u32 8388608, %v3437_v22  ;;  %v3443_v40 = vshrl.u32 %v3442_v19, 5 }
 0x342   : > { %v3445_v57 = vsub.s32 32, %v3444_v16  ;;  %v14270_v31 = vshrl.u32 %v3182_v17, 30  ;;  %v3447_v38 = vshll.u32 %v16820_v54, %v3444_v16  ;;  %v3450_v2 = vshll.u32 %v16811_v46, %v3444_v16 }
 0x343   : > { %v3307_v59 = vmul.f32 %v3306_v21, %v3304_v11  ;;  %v3456_v23 = vshll.u32 %v16812_v48, %v3444_v16  ;;  %v3453_v34 = vshll.u32 %v16806_v6, %v3444_v16  ;;  %v3459_v3 = vshll.u32 %v16821_v25, %v3444_v16 }
 0x344   : > { %v3448_v10 = vshrl.u32 %v16811_v46, %v3445_v57  ;;  %v3184_v39 = vshll.u32 %v14270_v31, 30  ;;  %v3451_v58 = vshrl.u32 %v16806_v6, %v3445_v57  ;;  %v3457_v0 = vshrl.u32 %v16821_v25, %v3445_v57 }
 0x345   : > { %v3308_v41 = vxor.u32 2147483648, %v3307_v59  ;;  %v3454_v27 = vshrl.u32 %v16812_v48, %v3445_v57  ;;  %v3460_v11 = vshrl.u32 %v16822_v51, %v3445_v57  ;;  %v14292_v36 = vand.u32 3, %v6642_v13 }
 0x346   : > { %v14285_v7 = vsub.s32 %v3181_v43, %v3184_v39  ;;  %v3446_v19 = vshrl.u32 %v16820_v54, %v3445_v57  ;;  %v3449_v22 = vor.u32 %v3448_v10, %v3447_v38  ;;  %v3452_v53 = vor.u32 %v3451_v58, %v3450_v2 }
 0x347   : > { %v3309_v21 = vsel %vm3226_vm2, %v3308_v41, %v3307_v59  ;;  %v3458_v59 = vor.u32 %v3457_v0, %v3456_v23  ;;  %v3455_v43 = vor.u32 %v3454_v27, %v3453_v34  ;;  %vm3462_vm0 = vcmp.lt.s32.totalorder %v3443_v40, 1 }
 0x348   : > { %v3312_v17 = vsel %vm14227_vm13, %v13952_v61, %v3309_v21  ;;  %v3187_v8 = vsub.s32 0, %v14285_v7  ;;  %vm3465_vm1 = vcmp.lt.s32.totalorder %v3443_v40, 4  ;;  %v3461_v41 = vor.u32 %v3460_v11, %v3459_v3 }
 0x349   : > { %10827 = vcosq.f32 %v3312_v17  ;;  %v14297_v39 = vshll.u32 %v3438_v1, 8  ;;  %v3330_v56 = vand.u32 2139095040, %v14272_v33  ;;  %vm3463_vm2 = vcmp.lt.s32.totalorder %v3443_v40, 2 }
 0x34a   : > { %10829 = vsinq.f32 %v3312_v17  ;;  %v10153_v16 = vmin.u32 %v3187_v8, %v14285_v7  ;;  %vm3464_vm3 = vcmp.lt.s32.totalorder %v3443_v40, 3  ;;  %v3466_v57 = vsel %vm3462_vm0, %v3446_v19, %v3449_v22 }
 0x34b   : > { %v3467_v13 = vsel %vm3465_vm1, %v3455_v43, 2102212464  ;;  %vm3318_vm4 = vcmp.lt.s32.totalorder %v14266_v63, 2  ;;  %v3470_v2 = vsel %vm3462_vm0, %v3449_v22, %v3452_v53  ;;  %v3471_v8 = vsel %vm3465_vm1, %v3458_v59, 920167782 }
 0x34c   : > { %v3189_v38 = vclz %v10153_v16  ;;  %v3468_v10 = vsel %vm3464_vm3, %v3452_v53, %v3467_v13  ;;  %vm3316_vm5 = vweird.f32 %v13952_v61  ;;  %vm3319_vm7 = vcmp.eq.s32.totalorder %v14266_v63, 0 }
 0x34d   : > { %vm3322_vm9 = vcmp.eq.s32.totalorder %v14266_v63, 2  ;;  %vm6644_vm10 = vcmp.lt.s32.totalorder %v14292_v36, 2  ;;  %v3474_v23 = vsel %vm3462_vm0, %v3452_v53, %v3455_v43  ;;  %vm3123_vm11 = vcmp.lt.s32.totalorder %v14071_v37, 0 }
 0x34e   : > { %v3177_v58 = vadd.s32 %v14221_v20, %v14218_v5  ;;  %v10154_v0 = vadd.s32 4294967294, %v3189_v38  ;;  %v3472_v1 = vsel %vm3464_vm3, %v3455_v43, %v3471_v8  ;;  %v3475_v34 = vsel %vm3465_vm1, %v3461_v41, 1326507024 }
 0x34f   : > { %v3469_v27 = vsel %vm3463_vm2, %v3466_v57, %v3468_v10  ;;  %v3473_v21 = vsel %vm3463_vm2, %v3470_v2, %v3472_v1  ;;  %v3476_v3 = vsel %vm3464_vm3, %v3458_v59, %v3475_v34  ;;  %v3331_v11 = vshrl.u32 %v3330_v56, 23 }
 0x350   : > { %vm10155_vm8 = vcmp.lt.s32.totalorder %v10154_v0, 0  ;;  %v3477_v53 = vsel %vm3463_vm2, %v3474_v23, %v3476_v3  ;;  %v14321_v17 = vmul.u32.u64.low %v14297_v39, %v3473_v21  ;;  %v14322_v19 = vmul.u32.u64.high %v14297_v39, %v3473_v21, %v14321_v17 }
 0x351   : > { %v3192_v5 = vsel %vm10155_vm8, 0, %v10154_v0  ;;  %v14326_v20 = vmul.u32.u64.low %v14297_v39, %v3477_v53  ;;  %v14327_v22 = vmul.u32.u64.high %v14297_v39, %v3477_v53, %v14326_v20  ;;  %v10160_v43 = vadd.s32 4294967169, %v3331_v11 }
 0x352   : > { %vm6648_vm12 = vcmp.eq.s32.totalorder %v14292_v36, 2  ;;  %v3193_v41 = vsub.s32 32, %v3192_v5  ;;  %v3194_v59 = vshll.u32 %v14285_v7, %v3192_v5  ;;  %v3197_v56 = vsub.s32 4294967266, %v3192_v5 }
 0x353   : > { %v10828_v16 = vpop.eup %10827  ;;  %vm6645_vm13 = vcmp.eq.s32.totalorder %v14292_v36, 0  ;;  %v3207_v13 = vsub.s32 4, %v14270_v31  ;;  %v3485_v38 = vmul.u32 %v14297_v39, %v3469_v27  ;;  %v3488_v23 = vadd.s32 1, %v14322_v19 }
 0x354   : > { %v10830_v40 = vpop.eup %10829  ;;  %v3323_v57 = vxor.u32 2147483648, %v10828_v16  ;;  %v3195_v2 = vshrl.u32 %v3177_v58, %v3193_v41  ;;  %v3198_v8 = vadd.s32 127, %v3197_v56  ;;  %vm3487_vm14 = vc.u32 %v14327_v22, %v14321_v17 }
 0x355   : > { %v3320_v10 = vxor.u32 2147483648, %v10830_v40  ;;  %v3337_v1 = vadd.s32 1, %v10160_v43  ;;  %v3208_v11 = vsel %vm3123_vm11, %v3207_v13, %v14270_v31  ;;  %v3489_v53 = vsel %vm3487_vm14, %v3488_v23, %v14322_v19 }
 0x356   : > { %v3324_v0 = vsel %vm3322_vm9, %v3323_v57, %v10830_v40  ;;  %v6650_v7 = vsel %vm6648_vm12, %v3323_v57, %v10830_v40  ;;  %v3196_v39 = vor.u32 %v3195_v2, %v3194_v59  ;;  %v3199_v27 = vshll.u32 %v3198_v8, 23 }
 0x357   : > { %v3321_v34 = vsel %vm3319_vm7, %v10828_v16, %v3320_v10  ;;  %v6647_v21 = vsel %vm6645_vm13, %v10828_v16, %v3320_v10  ;;  %v16901_v36 = vand.u32 2147483647, %v14071_v37  ;;  %v3490_v31 = vadd.s32 %v3489_v53, %v3485_v38 }
 0x358   : > { %v3325_v58 = vsel %vm3318_vm4, %v3321_v34, %v3324_v0  ;;  %v6651_v3 = vsel %vm6644_vm10, %v6647_v21, %v6650_v7  ;;  %v3200_v43 = vor.u32 4788187, %v3199_v27  ;;  %v3203_v16 = vcvt.s32.f32 %v3196_v39 }
 0x359   : > { %v14353_v5 = vsel %vm3316_vm5, nan, %v3325_v58  ;;  %v6652_v20 = vsel %vm3316_vm5, nan, %v6651_v3  ;;  %vm14362_vm6 = vcmp.le.f32.partialorder %v16901_v36, 0.7853982  ;;  %vm3338_vm15 = vcmp.gt.s32.totalorder %v3337_v1, 0 }
 0x35a   : > { %16899 = vst [vmem:[#allocation51_spill] sm:$0xff] %v14353_v5  ;;  %v14358_v63 = vsub.f32 %v6652_v20, %v14353_v5  ;;  %v3201_v19 = vand.u32 2147483647, %v3200_v43  ;;  %v3327_v59 = vand.u32 2147483647, %v14272_v33  ;;  %v3339_v56 = vsel %vm3338_vm15, %v3337_v1, 0 }
 0x35b   : > { %v3210_v61 = vsel %vm14362_vm6, 0, %v3208_v11  ;;  %v3491_v40 = vadd.s32 536870912, %v3490_v31  ;;  %v3341_v57 = vand.u32 31, %v3339_v56  ;;  %v3340_v0 = vshrl.u32 %v3339_v56, 5 }
 0x35c   : > { %16900 = vst [vmem:[#allocation52_spill] sm:$0xff] %v14358_v63  ;;  %7045 = vperm.xlu1 %10645, %v14358_v63   ;;  %v3204_v13 = vmul.f32 %v3203_v16, %v3201_v19  ;;  %v6538_v23 = vadd.s32 3, %v3210_v61  ;;  %v3334_v38 = vand.u32 8388607, %v3327_v59  ;;  %v14390_v16 = vand.u32 3, %v3210_v61 }
 0x35d   : > { %v14370_v10 = vshrl.u32 %v3491_v40, 30  ;;  %v3342_v2 = vsub.s32 32, %v3341_v57  ;;  %v3344_v1 = vshll.u32 %v16820_v54, %v3341_v57  ;;  %v3347_v34 = vshll.u32 %v16811_v46, %v3341_v57 }
 0x35e   : > { %v3205_v8 = vxor.u32 2147483648, %v3204_v13  ;;  %v3350_v21 = vshll.u32 %v16806_v6, %v3341_v57  ;;  %v3353_v3 = vshll.u32 %v16812_v48, %v3341_v57  ;;  %v3356_v36 = vshll.u32 %v16821_v25, %v3341_v57 }
 0x35f   : > { %v3493_v7 = vshll.u32 %v14370_v10, 30  ;;  %v3345_v27 = vshrl.u32 %v16811_v46, %v3342_v2  ;;  %v3348_v58 = vshrl.u32 %v16806_v6, %v3342_v2  ;;  %v3351_v20 = vshrl.u32 %v16812_v48, %v3342_v2 }
 0x360   : > { %v3206_v39 = vsel %vm3123_vm11, %v3205_v8, %v3204_v13  ;;  %v3354_v43 = vshrl.u32 %v16821_v25, %v3342_v2  ;;  %v6539_v46 = vand.u32 3, %v6538_v23  ;;  %v3335_v19 = vor.u32 8388608, %v3334_v38 }
 0x361   : > { %v3209_v11 = vsel %vm14362_vm6, %v14071_v37, %v3206_v39  ;;  %v14386_v53 = vsub.s32 %v3490_v31, %v3493_v7  ;;  %v3343_v56 = vshrl.u32 %v16820_v54, %v3342_v2  ;;  %v3346_v41 = vor.u32 %v3345_v27, %v3344_v1 }
 0x362   : > { %10831 = vcosq.f32 %v3209_v11  ;;  %v3349_v40 = vor.u32 %v3348_v58, %v3347_v34  ;;  %v3357_v31 = vshrl.u32 %v16822_v51, %v3342_v2  ;;  %v3352_v13 = vor.u32 %v3351_v20, %v3350_v21 }
 0x363   : > { %10833 = vsinq.f32 %v3209_v11  ;;  %v3496_v6 = vsub.s32 0, %v14386_v53  ;;  %v3355_v8 = vor.u32 %v3354_v43, %v3353_v3  ;;  %vm3359_vm0 = vcmp.lt.s32.totalorder %v3340_v0, 1 }
 0x364   : > { %vm3215_vm1 = vcmp.lt.s32.totalorder %v14390_v16, 2  ;;  %vm3216_vm2 = vcmp.eq.s32.totalorder %v14390_v16, 0  ;;  %vm3219_vm3 = vcmp.eq.s32.totalorder %v14390_v16, 2  ;;  %v3358_v25 = vor.u32 %v3357_v31, %v3356_v36 }
 0x365   : > { %v10165_v48 = vmin.u32 %v3496_v6, %v14386_v53  ;;  %vm3362_vm4 = vcmp.lt.s32.totalorder %v3340_v0, 4  ;;  %vm3213_vm5 = vweird.f32 %v14071_v37  ;;  %vm3361_vm7 = vcmp.lt.s32.totalorder %v3340_v0, 3 }
 0x366   : > { %v3364_v61 = vsel %vm3362_vm4, %v3352_v13, 2102212464  ;;  %v3375_v51 = vshll.u32 %v3335_v19, 8  ;;  %vm3360_vm9 = vcmp.lt.s32.totalorder %v3340_v0, 2  ;;  %v3363_v57 = vsel %vm3359_vm0, %v3343_v56, %v3346_v41 }
 0x367   : > { %v3498_v54 = vclz %v10165_v48  ;;  %v3365_v2 = vsel %vm3361_vm7, %v3349_v40, %v3364_v61  ;;  %v3367_v23 = vsel %vm3359_vm0, %v3346_v41, %v3349_v40  ;;  %vm6541_vm10 = vcmp.eq.s32.totalorder %v6539_v46, 0 }
 0x368   : > { %v3368_v7 = vsel %vm3362_vm4, %v3355_v8, 920167782  ;;  %v3371_v1 = vsel %vm3359_vm0, %v3349_v40, %v3352_v13  ;;  %vm6544_vm11 = vcmp.eq.s32.totalorder %v6539_v46, 2  ;;  %v3486_v34 = vadd.s32 %v14321_v17, %v14327_v22 }
 0x369   : > { %v10166_v38 = vadd.s32 4294967294, %v3498_v54  ;;  %v3369_v21 = vsel %vm3361_vm7, %v3352_v13, %v3368_v7  ;;  %v3372_v39 = vsel %vm3362_vm4, %v3358_v25, 1326507024  ;;  %v3366_v27 = vsel %vm3360_vm9, %v3363_v57, %v3365_v2 }
 0x36a   : > { %v3370_v58 = vsel %vm3360_vm9, %v3367_v23, %v3369_v21  ;;  %v3373_v3 = vsel %vm3361_vm7, %v3355_v8, %v3372_v39  ;;  %vm6540_vm12 = vcmp.lt.s32.totalorder %v6539_v46, 2  ;;  %v3382_v57 = vmul.u32 %v3375_v51, %v3366_v27 }
 0x36b   : > { %vm10167_vm8 = vcmp.lt.s32.totalorder %v10166_v38, 0  ;;  %v3374_v43 = vsel %vm3360_vm9, %v3371_v1, %v3373_v3  ;;  %v14415_v36 = vmul.u32.u64.low %v3375_v51, %v3370_v58  ;;  %v14416_v6 = vmul.u32.u64.high %v3375_v51, %v3370_v58, %v14415_v36 }
 0x36c   : > { %v10832_v11 = vpop.eup %10831  ;;  %v3501_v20 = vsel %vm10167_vm8, 0, %v10166_v38  ;;  %v14419_v31 = vmul.u32.u64.low %v3375_v51, %v3374_v43  ;;  %v14420_v48 = vmul.u32.u64.high %v3375_v51, %v3374_v43, %v14419_v31  ;;  %v3516_v58 = vsub.s32 4, %v14370_v10 }
 0x36d   : > { %v10834_v19 = vpop.eup %10833  ;;  %v3220_v17 = vxor.u32 2147483648, %v10832_v11  ;;  %v3502_v22 = vsub.s32 32, %v3501_v20  ;;  %v3503_v56 = vshll.u32 %v14386_v53, %v3501_v20  ;;  %v3506_v41 = vsub.s32 4294967266, %v3501_v20 }
 0x36e   : > { %v3217_v40 = vxor.u32 2147483648, %v10834_v19  ;;  %v3385_v53 = vadd.s32 1, %v14416_v6  ;;  %vm3384_vm13 = vc.u32 %v14420_v48, %v14415_v36  ;;  %vm3432_vm14 = vcmp.lt.s32.totalorder %v14186_v26, 0 }
 0x36f   : > { %v3221_v13 = vsel %vm3219_vm3, %v3220_v17, %v10834_v19  ;;  %v6546_v0 = vsel %vm6544_vm11, %v3220_v17, %v10834_v19  ;;  %v3504_v8 = vshrl.u32 %v3486_v34, %v3502_v22  ;;  %v3507_v25 = vadd.s32 127, %v3506_v41 }
 0x370   : > { %v3218_v54 = vsel %vm3216_vm2, %v10832_v11, %v3217_v40  ;;  %v6543_v61 = vsel %vm6541_vm10, %v10832_v11, %v3217_v40  ;;  %v3386_v16 = vsel %vm3384_vm13, %v3385_v53, %v14416_v6  ;;  %v16905_v20 = vand.u32 2147483647, %v14186_v26 }
 0x371   : > { %v3222_v2 = vsel %vm3215_vm1, %v3218_v54, %v3221_v13  ;;  %v6547_v23 = vsel %vm6540_vm12, %v6543_v61, %v6546_v0  ;;  %v3505_v38 = vor.u32 %v3504_v8, %v3503_v56  ;;  %v3508_v7 = vshll.u32 %v3507_v25, 23  ;;  %v14449_v61 = vpop.permute.xlu1 %7097 }
 0x372   : > { %v14433_v1 = vsel %vm3213_vm5, nan, %v3222_v2  ;;  %v6548_v34 = vsel %vm3213_vm5, nan, %v6547_v23  ;;  %v3387_v39 = vadd.s32 %v3386_v16, %v3382_v57  ;;  %vm3431_vm6 = vcmp.le.f32.partialorder %v16905_v20, 0.7853982  ;;  %16906 = vst [vmem:[#allocation54_spill] sm:$0xff] %v14449_v61 }
 0x373   : > { %v14439_v46 = vsub.f32 %v6548_v34, %v14433_v1  ;;  %v3509_v51 = vor.u32 4788187, %v3508_v7  ;;  %v3512_v21 = vcvt.s32.f32 %v3505_v38  ;;  %v3517_v19 = vsel %vm3432_vm14, %v3516_v58, %v14370_v10 }
 0x374   : > { %v3388_v3 = vadd.s32 536870912, %v3387_v39  ;;  %v3519_v56 = vsel %vm3431_vm6, 0, %v3517_v19  ;;  %v3383_v10 = vadd.s32 %v14415_v36, %v14420_v48  ;;  %vm3522_vm4 = vweird.f32 %v14186_v26 }
 0x375   : > { %16904 = vst [vmem:[#allocation53_spill] sm:$0xff] %v14439_v46  ;;  %7040 = vperm.xlu0 %10644, %v14439_v46   ;;  %v3510_v27 = vand.u32 2147483647, %v3509_v51  ;;  %v6850_v31 = vadd.s32 3, %v3519_v56  ;;  %v3523_v0 = vand.u32 3, %v3519_v56  ;;  %v14455_v58 = vpop.permute.xlu1 %7107  ;;  %vm3329_vm9 = vcmp.lt.s32.totalorder %v14272_v33, 0 }
 0x376   : > { %v3389_v37 = vshrl.u32 %v3388_v3, 30  ;;  %16907 = vst [vmem:[#allocation55_spill] sm:$0xff] %v14455_v58  ;;  %vm3328_vm10 = vcmp.le.f32.partialorder %v3327_v59, 0.7853982  ;;  %v16963_v58 = vld [vmem:[#allocation10_spill] sm:$0xff] }
 0x377   : > { %v3513_v11 = vmul.f32 %v3512_v21, %v3510_v27  ;;  %v6851_v25 = vand.u32 3, %v6850_v31  ;;  %vm3525_vm15 = vcmp.eq.s32.totalorder %v3523_v0, 0  ;;  %vm3528_vm1 = vcmp.eq.s32.totalorder %v3523_v0, 2 }
 0x378   : > { %v3390_v17 = vshll.u32 %v3389_v37, 30  ;;  %vm3524_vm5 = vcmp.lt.s32.totalorder %v3523_v0, 2 }
 0x379   : > { %v3514_v43 = vxor.u32 2147483648, %v3513_v11  ;;  %vm6853_vm2 = vcmp.eq.s32.totalorder %v6851_v25, 0  ;;  %vm6856_vm3 = vcmp.eq.s32.totalorder %v6851_v25, 2  ;;  %vm6852_vm7 = vcmp.lt.s32.totalorder %v6851_v25, 2  ;;  %v14467_v31 = vpop.permute.xlu1 %7117 }
 0x37a   : > { %v3391_v41 = vsub.s32 %v3387_v39, %v3390_v17  ;;  %16909 = vst [vmem:[#allocation57_spill] sm:$0xff] %v14467_v31 }
 0x37b   : > { %v3515_v22 = vsel %vm3432_vm14, %v3514_v43, %v3513_v11 }
 0x37c   : > { %v3518_v6 = vsel %vm3431_vm6, %v14186_v26, %v3515_v22  ;;  %v3393_v40 = vsub.s32 0, %v3391_v41 }
 0x37d   : > { %10835 = vcosq.f32 %v3518_v6 }
 0x37e   : > { %10837 = vsinq.f32 %v3518_v6  ;;  %v10161_v13 = vmin.u32 %v3393_v40, %v3391_v41  ;;  %v3413_v40 = vsub.s32 4, %v3389_v37 }
 0x380   : > { %v3395_v8 = vclz %v10161_v13  ;;  %v3414_v26 = vsel %vm3329_vm9, %v3413_v40, %v3389_v37  ;;  %v14481_v37 = vpop.permute.xlu0 %7092 }
 0x381   : > { %16912 = vst [vmem:[#allocation60_spill] sm:$0xff] %v14481_v37 }
 0x382   : > { %v10162_v54 = vadd.s32 4294967294, %v3395_v8 }
 0x384   : > { %vm10163_vm0 = vcmp.lt.s32.totalorder %v10162_v54, 0 }
 0x385   : > { %v3398_v53 = vsel %vm10163_vm0, 0, %v10162_v54  ;;  %v3416_v54 = vsel %vm3328_vm10, 0, %v3414_v26 }
 0x386   : > { %v3399_v38 = vsub.s32 32, %v3398_v53  ;;  %v3400_v7 = vshll.u32 %v3391_v41, %v3398_v53  ;;  %v3403_v34 = vsub.s32 4294967266, %v3398_v53  ;;  %v3420_v59 = vand.u32 3, %v3416_v54 }
 0x387   : > { %v10836_v57 = vpop.eup %10835 }
 0x388   : > { %v10838_v2 = vpop.eup %10837  ;;  %v3529_v23 = vxor.u32 2147483648, %v10836_v57  ;;  %v3401_v39 = vshrl.u32 %v3383_v10, %v3399_v38  ;;  %v3404_v36 = vadd.s32 127, %v3403_v34  ;;  %v14474_v10 = vpop.permute.xlu1 %7127  ;;  %vm3425_vm11 = vcmp.eq.s32.totalorder %v3420_v59, 2 }
 0x389   : > { %v3526_v51 = vxor.u32 2147483648, %v10838_v2  ;;  %16910 = vst [vmem:[#allocation58_spill] sm:$0xff] %v14474_v10  ;;  %vm3422_vm12 = vcmp.eq.s32.totalorder %v3420_v59, 0  ;;  %vm3421_vm14 = vcmp.lt.s32.totalorder %v3420_v59, 2 }
 0x38a   : > { %v3530_v21 = vsel %vm3528_vm1, %v3529_v23, %v10838_v2  ;;  %v6858_v16 = vsel %vm6856_vm3, %v3529_v23, %v10838_v2  ;;  %v3402_v20 = vor.u32 %v3401_v39, %v3400_v7  ;;  %v3405_v43 = vshll.u32 %v3404_v36, 23 }
 0x38b   : > { %v3527_v48 = vsel %vm3525_vm15, %v10836_v57, %v3526_v51  ;;  %v6855_v27 = vsel %vm6853_vm2, %v10836_v57, %v3526_v51  ;;  %v6746_v57 = vadd.s32 3, %v3416_v54  ;;  %vm3419_vm15 = vweird.f32 %v14272_v33 }
 0x38c   : > { %v3531_v3 = vsel %vm3524_vm5, %v3527_v48, %v3530_v21  ;;  %v6859_v11 = vsel %vm6852_vm7, %v6855_v27, %v6858_v16  ;;  %v3406_v6 = vor.u32 4788187, %v3405_v43  ;;  %v3409_v56 = vcvt.s32.f32 %v3402_v20  ;;  %v14478_v53 = vpop.permute.xlu1 %7137  ;;  %v14487_v48 = vpop.permute.xlu0 %7102 }
 0x38d   : > { %v14459_v19 = vsel %vm3522_vm4, nan, %v3531_v3  ;;  %v6860_v17 = vsel %vm3522_vm4, nan, %v6859_v11  ;;  %16911 = vst [vmem:[#allocation59_spill] sm:$0xff] %v14478_v53  ;;  %v6747_v2 = vand.u32 3, %v6746_v57  ;;  %16914 = vst [vmem:[#allocation62_spill] sm:$0xff] %v14487_v48  ;;  %v16970_v48 = vld [vmem:[#allocation14_spill] sm:$0xff] }
 0x38e   : > { %v14464_v22 = vsub.f32 %v6860_v17, %v14459_v19  ;;  %v3407_v41 = vand.u32 2147483647, %v3406_v6 }
 0x38f   : > { %vm6752_vm8 = vcmp.eq.s32.totalorder %v6747_v2, 2  ;;  %vm6749_vm13 = vcmp.eq.s32.totalorder %v6747_v2, 0  ;;  %vm6748_vm6 = vcmp.lt.s32.totalorder %v6747_v2, 2 }
 0x390   : > { %16908 = vst [vmem:[#allocation56_spill] sm:$0xff] %v14464_v22  ;;  %7055 = vperm.xlu1 %10645, %v14464_v22   ;;  %v3410_v13 = vmul.f32 %v3409_v56, %v3407_v41  ;;  %v14483_v34 = vpop.permute.xlu1 %7147  ;;  %v10914_v41 = vmov 1  }
 0x391   : > { %16913 = vst [vmem:[#allocation61_spill] sm:$0xff] %v14483_v34 }
 0x392   : > { %v3411_v0 = vxor.u32 2147483648, %v3410_v13 }
 0x394   : > { %7177 = vperm.xlu1 %10645, %v13087_v32   ;;  %v3412_v8 = vsel %vm3329_vm9, %v3411_v0, %v3410_v13  ;;  %v14495_v17 = vpop.permute.xlu1 %7157 }
 0x395   : > { %v3415_v25 = vsel %vm3328_vm10, %v14272_v33, %v3412_v8  ;;  %16917 = vst [vmem:[#allocation65_spill] sm:$0xff] %v14495_v17  ;;  %v14499_v33 = vpop.permute.xlu0 %7112 }
 0x396   : > { %10839 = vcosq.f32 %v3415_v25  ;;  %16918 = vst [vmem:[#allocation66_spill] sm:$0xff] %v14499_v33  ;;  %v16957_v33 = vld [vmem:[#allocation6_spill] sm:$0xff] }
 0x397   : > { %10841 = vsinq.f32 %v3415_v25 }
 0x398   : > { %7187 = vperm.xlu1 %10645, %v13302_v52   ;;  %v14502_v6 = vpop.permute.xlu1 %7167 }
 0x399   : > { %16919 = vst [vmem:[#allocation67_spill] sm:$0xff] %v14502_v6  ;;  %v14505_v56 = vpop.permute.xlu0 %7122  ;;  %v16944_v6 = vld [vmem:[#allocation23_spill] sm:$0xff] }
 0x39a   : > { %16920 = vst [vmem:[#allocation68_spill] sm:$0xff] %v14505_v56 }
 0x39c   : > { %7197 = vperm.xlu1 %10645, %v13515_v14   ;;  %v14509_v40 = vpop.permute.xlu1 %6910 }
 0x39d   : > { %16921 = vst [vmem:[#allocation69_spill] sm:$0xff] %v14509_v40  ;;  %v14512_v13 = vpop.permute.xlu0 %7132  ;;  %v16983_v40 = vld [vmem:[#allocation9_spill] sm:$0xff] }
 0x39e   : > { %16922 = vst [vmem:[#allocation70_spill] sm:$0xff] %v14512_v13  ;;  %v16949_v13 = vld [vmem:[#allocation50_spill] sm:$0xff] }
 0x3a0   : > { %7207 = vperm.xlu1 %10645, %v13725_v62   ;;  %v10840_v23 = vpop.eup %10839  ;;  %v14516_v0 = vpop.permute.xlu1 %6915 }
 0x3a1   : > { %v10842_v38 = vpop.eup %10841  ;;  %v3426_v7 = vxor.u32 2147483648, %v10840_v23  ;;  %16923 = vst [vmem:[#allocation71_spill] sm:$0xff] %v14516_v0  ;;  %v14519_v26 = vpop.permute.xlu0 %7142 }
 0x3a2   : > { %v3423_v51 = vxor.u32 2147483648, %v10842_v38  ;;  %16924 = vst [vmem:[#allocation72_spill] sm:$0xff] %v14519_v26  ;;  %v16947_v26 = vld [vmem:[#allocation25_spill] sm:$0xff] }
 0x3a3   : > { %v3427_v21 = vsel %vm3425_vm11, %v3426_v7, %v10842_v38  ;;  %v6754_v16 = vsel %vm6752_vm8, %v3426_v7, %v10842_v38  ;;  %v16932_v38 = vld [vmem:[#allocation30_spill] sm:$0xff] }
 0x3a4   : > { %7217 = vperm.xlu1 %10645, %v13938_v50   ;;  %v3424_v39 = vsel %vm3422_vm12, %v10840_v23, %v3423_v51  ;;  %v6751_v36 = vsel %vm6749_vm13, %v10840_v23, %v3423_v51  ;;  %v14523_v8 = vpop.permute.xlu1 %6925  ;;  %v16934_v51 = vld [vmem:[#allocation20_spill] sm:$0xff] }
 0x3a5   : > { %v3428_v27 = vsel %vm3421_vm14, %v3424_v39, %v3427_v21  ;;  %v6755_v3 = vsel %vm6748_vm6, %v6751_v36, %v6754_v16  ;;  %16925 = vst [vmem:[#allocation73_spill] sm:$0xff] %v14523_v8  ;;  %v14526_v25 = vpop.permute.xlu0 %7152  ;;  %v16935_v21 = vld [vmem:[#allocation34_spill] sm:$0xff]  ;;  %v16937_v39 = vld [vmem:[#allocation21_spill] sm:$0xff] }
 0x3a6   : > { %v14489_v11 = vsel %vm3419_vm15, nan, %v3428_v27  ;;  %v6756_v20 = vsel %vm3419_vm15, nan, %v6755_v3  ;;  %16926 = vst [vmem:[#allocation74_spill] sm:$0xff] %v14526_v25  ;;  %v16939_v27 = vld [vmem:[#allocation38_spill] sm:$0xff] }
 0x3a7   : > { %16915 = vst [vmem:[#allocation63_spill] sm:$0xff] %v14489_v11  ;;  %v14493_v43 = vsub.f32 %v6756_v20, %v14489_v11  ;;  %v16941_v20 = vld [vmem:[#allocation22_spill] sm:$0xff] }
 0x3a8   : > { %7227 = vperm.xlu1 %10645, %v14148_v4   ;;  %v14530_v54 = vpop.permute.xlu1 %6935  ;;  %v16945_v25 = vld [vmem:[#allocation46_spill] sm:$0xff] }
 0x3a9   : > { %16916 = vst [vmem:[#allocation64_spill] sm:$0xff] %v14493_v43  ;;  %7050 = vperm.xlu0 %10644, %v14493_v43   ;;  %16927 = vst [vmem:[#allocation75_spill] sm:$0xff] %v14530_v54  ;;  %v14533_v57 = vpop.permute.xlu0 %7162 }
 0x3aa   : > { %16928 = vst [vmem:[#allocation76_spill] sm:$0xff] %v14533_v57 }
 0x3ac   : > { %7237 = vperm.xlu1 %10645, %v14353_v5   ;;  %v14537_v59 = vpop.permute.xlu1 %6945 }
 0x3ad   : > { %7172 = vperm.xlu0 %10644, %v13199_v60   ;;  %16929 = vst [vmem:[#allocation77_spill] sm:$0xff] %v14537_v59  ;;  %v14540_v2 = vpop.permute.xlu0 %6900 }
 0x3ae   : > { %16930 = vst [vmem:[#allocation78_spill] sm:$0xff] %v14540_v2  ;;  %v16981_v2 = vld [vmem:[#allocation7_spill] sm:$0xff] }
 0x3b0   : > { %7247 = vperm.xlu1 %10645, %v14459_v19   ;;  %v14543_v23 = vpop.permute.xlu1 %6955 }
 0x3b1   : > { %7182 = vperm.xlu0 %10644, %v13407_v28   ;;  %16931 = vst [vmem:[#allocation79_spill] sm:$0xff] %v14543_v23  ;;  %v14547_v7 = vpop.permute.xlu0 %6905 }
 0x3b2   : > { %16933 = vst [vmem:[#allocation30_spill] sm:$0xff] %v14547_v7  ;;  %v16978_v7 = vld [vmem:[#allocation27_spill] sm:$0xff] }
 0x3b4   : > { %10647 = vset.pattern.permute.xlu1 %v10914_v41  ;;  %v14551_v16 = vpop.permute.xlu1 %6965 }
 0x3b5   : > { %7290 = vperm.xlu1 %10647, %v12640_v49   ;;  %7192 = vperm.xlu0 %10644, %v13622_v47   ;;  %16936 = vst [vmem:[#allocation20_spill] sm:$0xff] %v14551_v16  ;;  %v14554_v36 = vpop.permute.xlu0 %6920  ;;  %v16953_v16 = vld [vmem:[#allocation28_spill] sm:$0xff] }
 0x3b6   : > { %16938 = vst [vmem:[#allocation34_spill] sm:$0xff] %v14554_v36 }
 0x3b8   : > { %v14557_v3 = vpop.permute.xlu1 %6975 }
 0x3b9   : > { %7294 = vperm.xlu1 %10647, %v12672_v44   ;;  %7202 = vperm.xlu0 %10644, %v13830_v29   ;;  %16940 = vst [vmem:[#allocation21_spill] sm:$0xff] %v14557_v3  ;;  %v14561_v57 = vpop.permute.xlu0 %6930  ;;  %v16951_v3 = vld [vmem:[#allocation26_spill] sm:$0xff] }
 0x3ba   : > { %16943 = vst [vmem:[#allocation38_spill] sm:$0xff] %v14561_v57 }
 0x3bc   : > { %v14565_v17 = vpop.permute.xlu1 %6985 }
 0x3bd   : > { %7302 = vperm.xlu1 %10647, %v12680_v42   ;;  %7212 = vperm.xlu0 %10644, %v14045_v55   ;;  %16946 = vst [vmem:[#allocation22_spill] sm:$0xff] %v14565_v17  ;;  %v14568_v34 = vpop.permute.xlu0 %6940  ;;  %v16955_v17 = vld [vmem:[#allocation32_spill] sm:$0xff] }
 0x3c0   : > { %v14571_v53 = vpop.permute.xlu1 %6995 }
 0x3c1   : > { %7310 = vperm.xlu1 %10647, %v12953_v24   ;;  %7222 = vperm.xlu0 %10644, %v14253_v18   ;;  %16950 = vst [vmem:[#allocation23_spill] sm:$0xff] %v14571_v53  ;;  %v14575_v56 = vpop.permute.xlu0 %6950  ;;  %v16959_v53 = vld [vmem:[#allocation36_spill] sm:$0xff] }
 0x3c2   : > { %16952 = vst [vmem:[#allocation25_spill] sm:$0xff] %v14575_v56  ;;  %v16962_v56 = vld [vmem:[#allocation40_spill] sm:$0xff] }
 0x3c4   : > { %v14579_v10 = vpop.permute.xlu1 %7005 }
 0x3c5   : > { %7318 = vperm.xlu1 %10647, %v12957_v45   ;;  %7232 = vperm.xlu0 %10644, %v14433_v1   ;;  %16954 = vst [vmem:[#allocation50_spill] sm:$0xff] %v14579_v10  ;;  %v14582_v23 = vpop.permute.xlu0 %6960  ;;  %v16965_v10 = vld [vmem:[#allocation44_spill] sm:$0xff] }
 0x3c6   : > { %16956 = vst [vmem:[#allocation26_spill] sm:$0xff] %v14582_v23  ;;  %v16967_v23 = vld [vmem:[#allocation12_spill] sm:$0xff] }
 0x3c8   : > { %v14585_v31 = vpop.permute.xlu1 %7015 }
 0x3c9   : > { %7326 = vperm.xlu1 %10647, %v12961_v12   ;;  %7242 = vperm.xlu0 %10644, %v14489_v11   ;;  %16958 = vst [vmem:[#allocation28_spill] sm:$0xff] %v14585_v31  ;;  %v14589_v61 = vpop.permute.xlu0 %6970  ;;  %v16969_v31 = vld [vmem:[#allocation48_spill] sm:$0xff] }
 0x3ca   : > { %16961 = vst [vmem:[#allocation32_spill] sm:$0xff] %v14589_v61  ;;  %v16972_v61 = vld [vmem:[#allocation16_spill] sm:$0xff] }
 0x3cc   : > { %v14593_v59 = vpop.permute.xlu1 %7025 }
 0x3cd   : > { %7334 = vperm.xlu1 %10647, %v12966_v30   ;;  %10646 = vset.pattern.permute.xlu0 %v10914_v41  ;;  %v16942_v41 = vld [vmem:[#allocation42_spill] sm:$0xff]  ;;  %16964 = vst [vmem:[#allocation6_spill] sm:$0xff] %v14593_v59  ;;  %v14596_v57 = vpop.permute.xlu0 %6980 }
 0x3ce   : > { %7286 = vperm.xlu0 %10646, %v12654_v15   ;;  %16948 = vst [vmem:[#allocation42_spill] sm:$0xff] %v14568_v34  ;;  %v16960_v34 = vld [vmem:[#allocation8_spill] sm:$0xff]  ;;  %16966 = vst [vmem:[#allocation36_spill] sm:$0xff] %v14596_v57  ;;  %v16975_v57 = vld [vmem:[#allocation19_spill] sm:$0xff] }
 0x3d0   : > { %v14599_v37 = vpop.permute.xlu1 %7035 }
 0x3d1   : > { %7342 = vperm.xlu1 %10647, %v13092_v9   ;;  %16968 = vst [vmem:[#allocation8_spill] sm:$0xff] %v14599_v37  ;;  %v14603_v54 = vpop.permute.xlu0 %6990  ;;  %v16977_v37 = vld [vmem:[#allocation5_spill] sm:$0xff] }
 0x3d2   : > { %7298 = vperm.xlu0 %10646, %v12664_v35   ;;  %16971 = vst [vmem:[#allocation40_spill] sm:$0xff] %v14603_v54 }
 0x3d5   : > { %7350 = vperm.xlu1 %10647, %v16932_v38   ;;  %v14610_v59 = vpop.permute.xlu0 %7000 }
 0x3d6   : > { %7306 = vperm.xlu0 %10646, %v16934_v51   ;;  %16974 = vst [vmem:[#allocation12_spill] sm:$0xff] %v14610_v59 }
 0x3d9   : > { %7358 = vperm.xlu1 %10647, %v16935_v21   ;;  %v14617_v0 = vpop.permute.xlu0 %7010 }
 0x3da   : > { %7314 = vperm.xlu0 %10646, %v16937_v39   ;;  %16979 = vst [vmem:[#allocation16_spill] sm:$0xff] %v14617_v0 }
 0x3db   : > { %v14607_v36 = vpop.permute.xlu1 %7045 }
 0x3dc   : > { %16973 = vst [vmem:[#allocation10_spill] sm:$0xff] %v14607_v36 }
 0x3dd   : > { %7366 = vperm.xlu1 %10647, %v16939_v27   ;;  %v14626_v59 = vpop.permute.xlu0 %7020 }
 0x3de   : > { %7322 = vperm.xlu0 %10646, %v16941_v20   ;;  %16984 = vst [vmem:[#allocation9_spill] sm:$0xff] %v14626_v59 }
 0x3e1   : > { %7374 = vperm.xlu1 %10647, %v16942_v41   ;;  %v14633_v0 = vpop.permute.xlu0 %7030 }
 0x3e2   : > { %7330 = vperm.xlu0 %10646, %v16944_v6  }
 0x3e5   : > { %7382 = vperm.xlu1 %10647, %v16945_v25  }
 0x3e6   : > { %7338 = vperm.xlu0 %10646, %v16947_v26  }
 0x3e9   : > { %7390 = vperm.xlu1 %10647, %v16949_v13  }
 0x3ea   : > { %7346 = vperm.xlu0 %10646, %v16951_v3  }
 0x3ed   : > { %7398 = vperm.xlu1 %10647, %v14439_v46  }
 0x3ee   : > { %7354 = vperm.xlu0 %10646, %v16953_v16  }
 0x3f1   : > { %7406 = vperm.xlu1 %10647, %v14493_v43  }
 0x3f2   : > { %7362 = vperm.xlu0 %10646, %v16955_v17  }
 0x3f4   : > { %v14642_v59 = vpop.permute.xlu0 %7040 }
 0x3f5   : > { %7446 = vperm.xlu1 %10647, %v16957_v33  }
 0x3f6   : > { %7370 = vperm.xlu0 %10646, %v16959_v53  }
 0x3f9   : > { %7454 = vperm.xlu1 %10647, %v16960_v34  }
 0x3fa   : > { %7378 = vperm.xlu0 %10646, %v16962_v56  }
 0x3fd   : > { %7462 = vperm.xlu1 %10647, %v16963_v58  }
 0x3fe   : > { %7386 = vperm.xlu0 %10646, %v16965_v10  }
 0x401   : > { %7470 = vperm.xlu1 %10647, %v16967_v23  }
 0x402   : > { %7394 = vperm.xlu0 %10646, %v16969_v31  }
 0x405   : > { %7478 = vperm.xlu1 %10647, %v16970_v48  }
 0x406   : > { %7402 = vperm.xlu0 %10646, %v14358_v63  }
 0x409   : > { %7486 = vperm.xlu1 %10647, %v16972_v61  }
 0x40a   : > { %7410 = vperm.xlu0 %10646, %v14464_v22  }
 0x40d   : > { %7494 = vperm.xlu1 %10647, %v16975_v57   ;;  %v16986_v57 = vld [vmem:[#allocation11_spill] sm:$0xff] }
 0x40e   : > { %7450 = vperm.xlu0 %10646, %v16977_v37   ;;  %16987 = vst [vmem:[#allocation11_spill] sm:$0xff] %v14633_v0 }
 0x40f   : > { %v14613_v8 = vpop.permute.xlu1 %7055 }
 0x410   : > { %16976 = vst [vmem:[#allocation14_spill] sm:$0xff] %v14613_v8 }
 0x411   : > { %7502 = vperm.xlu1 %10647, %v16978_v7   ;;  %v16989_v7 = vld [vmem:[#allocation13_spill] sm:$0xff] }
 0x412   : > { %7458 = vperm.xlu0 %10646, %v16981_v2  }
 0x413   : > { %v14619_v54 = vpop.permute.xlu1 %7177 }
 0x414   : > { %16980 = vst [vmem:[#allocation5_spill] sm:$0xff] %v14619_v54 }
 0x415   : > { %7510 = vperm.xlu1 %10647, %v13199_v60   ;;  %v16991_v60 = vld [vmem:[#allocation15_spill] sm:$0xff] }
 0x416   : > { %7466 = vperm.xlu0 %10646, %v16983_v40   ;;  %16992 = vst [vmem:[#allocation15_spill] sm:$0xff] %v14642_v59 }
 0x417   : > { %v14623_v36 = vpop.permute.xlu1 %7187 }
 0x418   : > { %16982 = vst [vmem:[#allocation7_spill] sm:$0xff] %v14623_v36 }
 0x419   : > { %7518 = vperm.xlu1 %10647, %v13407_v28   ;;  %v16994_v28 = vld [vmem:[#allocation17_spill] sm:$0xff] }
 0x41a   : > { %7474 = vperm.xlu0 %10646, %v16986_v57  }
 0x41b   : > { %v14629_v8 = vpop.permute.xlu1 %7197 }
 0x41c   : > { %16985 = vst [vmem:[#allocation80_spill] sm:$0xff] %v14629_v8 }
 0x41d   : > { %7526 = vperm.xlu1 %10647, %v13622_v47   ;;  %v16997_v47 = vld [vmem:[#allocation24_spill] sm:$0xff] }
 0x41e   : > { %7482 = vperm.xlu0 %10646, %v16989_v7  }
 0x41f   : > { %v14635_v54 = vpop.permute.xlu1 %7207 }
 0x420   : > { %16988 = vst [vmem:[#allocation81_spill] sm:$0xff] %v14635_v54 }
 0x421   : > { %7534 = vperm.xlu1 %10647, %v13830_v29  }
 0x422   : > { %7490 = vperm.xlu0 %10646, %v16991_v60  }
 0x423   : > { %v14639_v36 = vpop.permute.xlu1 %7217 }
 0x424   : > { %16990 = vst [vmem:[#allocation13_spill] sm:$0xff] %v14639_v36 }
 0x425   : > { %7542 = vperm.xlu1 %10647, %v14045_v55  }
 0x426   : > { %7498 = vperm.xlu0 %10646, %v16994_v28  }
 0x427   : > { %v14645_v8 = vpop.permute.xlu1 %7227 }
 0x428   : > { %16993 = vst [vmem:[#allocation82_spill] sm:$0xff] %v14645_v8  ;;  %v14649_v0 = vpop.permute.xlu0 %7050 }
 0x429   : > { %7550 = vperm.xlu1 %10647, %v14253_v18   ;;  %16995 = vst [vmem:[#allocation17_spill] sm:$0xff] %v14649_v0  ;;  %v10915_v0 = vmov 2  }
 0x42a   : > { %7506 = vperm.xlu0 %10646, %v16997_v47  }
 0x42b   : > { %v14651_v54 = vpop.permute.xlu1 %7237 }
 0x42c   : > { %16996 = vst [vmem:[#allocation83_spill] sm:$0xff] %v14651_v54  ;;  %v14655_v36 = vpop.permute.xlu0 %7172 }
 0x42d   : > { %7558 = vperm.xlu1 %10647, %v14433_v1   ;;  %16998 = vst [vmem:[#allocation24_spill] sm:$0xff] %v14655_v36 }
 0x42e   : > { %7514 = vperm.xlu0 %10646, %v13087_v32  }
 0x42f   : > { %v14657_v29 = vpop.permute.xlu1 %7247 }
 0x430   : > { %16999 = vst [vmem:[#allocation84_spill] sm:$0xff] %v14657_v29  ;;  %v14661_v59 = vpop.permute.xlu0 %7182 }
 0x431   : > { %7566 = vperm.xlu1 %10647, %v14489_v11   ;;  %17000 = vst [vmem:[#allocation85_spill] sm:$0xff] %v14661_v59 }
 0x432   : > { %7522 = vperm.xlu0 %10646, %v13302_v52  }
 0x434   : > { %v14664_v8 = vpop.permute.xlu1 %7290  ;;  %v14666_v54 = vpop.permute.xlu0 %7192 }
 0x435   : > { %17001 = vst [vmem:[#allocation86_spill] sm:$0xff] %v14664_v8  ;;  %10648 = vset.pattern.permute.xlu1 %v10915_v0  ;;  %17002 = vst [vmem:[#allocation87_spill] sm:$0xff] %v14666_v54 }
 0x436   : > { %7641 = vperm.xlu1 %10648, %v12654_v15   ;;  %7530 = vperm.xlu0 %10646, %v13515_v14  }
 0x438   : > { %v14670_v36 = vpop.permute.xlu1 %7294  ;;  %v14672_v29 = vpop.permute.xlu0 %7202 }
 0x439   : > { %17003 = vst [vmem:[#allocation88_spill] sm:$0xff] %v14670_v36  ;;  %17004 = vst [vmem:[#allocation89_spill] sm:$0xff] %v14672_v29 }
 0x43a   : > { %7649 = vperm.xlu1 %10648, %v12672_v44   ;;  %7538 = vperm.xlu0 %10646, %v13725_v62  }
 0x43c   : > { %v14676_v59 = vpop.permute.xlu1 %7302  ;;  %v14678_v11 = vpop.permute.xlu0 %7212 }
 0x43d   : > { %17005 = vst [vmem:[#allocation90_spill] sm:$0xff] %v14676_v59  ;;  %17006 = vst [vmem:[#allocation91_spill] sm:$0xff] %v14678_v11 }
 0x43e   : > { %7653 = vperm.xlu1 %10648, %v12664_v35   ;;  %7546 = vperm.xlu0 %10646, %v13938_v50  }
 0x440   : > { %v14682_v54 = vpop.permute.xlu1 %7310  ;;  %v14684_v8 = vpop.permute.xlu0 %7222 }
 0x441   : > { %17007 = vst [vmem:[#allocation92_spill] sm:$0xff] %v14682_v54  ;;  %17008 = vst [vmem:[#allocation93_spill] sm:$0xff] %v14684_v8 }
 0x442   : > { %7661 = vperm.xlu1 %10648, %v16934_v51   ;;  %7554 = vperm.xlu0 %10646, %v14148_v4  }
 0x444   : > { %v14688_v29 = vpop.permute.xlu1 %7318  ;;  %v14690_v36 = vpop.permute.xlu0 %7232 }
 0x445   : > { %17009 = vst [vmem:[#allocation94_spill] sm:$0xff] %v14688_v29  ;;  %17010 = vst [vmem:[#allocation95_spill] sm:$0xff] %v14690_v36 }
 0x446   : > { %7669 = vperm.xlu1 %10648, %v16937_v39   ;;  %7562 = vperm.xlu0 %10646, %v14353_v5  }
 0x448   : > { %v14694_v11 = vpop.permute.xlu1 %7326  ;;  %v14696_v59 = vpop.permute.xlu0 %7242 }
 0x449   : > { %17011 = vst [vmem:[#allocation96_spill] sm:$0xff] %v14694_v11  ;;  %17012 = vst [vmem:[#allocation97_spill] sm:$0xff] %v14696_v59 }
 0x44a   : > { %7677 = vperm.xlu1 %10648, %v16941_v20   ;;  %7570 = vperm.xlu0 %10646, %v14459_v19  }
 0x44c   : > { %v14700_v8 = vpop.permute.xlu1 %7334 }
 0x44d   : > { %17013 = vst [vmem:[#allocation98_spill] sm:$0xff] %v14700_v8  ;;  %v14703_v54 = vpop.permute.xlu0 %7286 }
 0x44e   : > { %7685 = vperm.xlu1 %10648, %v16944_v6   ;;  %17014 = vst [vmem:[#allocation99_spill] sm:$0xff] %v14703_v54  ;;  %10649 = vset.pattern.permute.xlu0 %v10915_v0  ;;  %v17058_v54 = vld [vmem:[#allocation19_spill] sm:$0xff] }
 0x44f   : > { %7645 = vperm.xlu0 %10649, %v12640_v49  }
 0x450   : > { %v14705_v36 = vpop.permute.xlu1 %7342 }
 0x451   : > { %17015 = vst [vmem:[#allocation100_spill] sm:$0xff] %v14705_v36  ;;  %v14709_v11 = vpop.permute.xlu0 %7298 }
 0x452   : > { %7693 = vperm.xlu1 %10648, %v16947_v26   ;;  %17016 = vst [vmem:[#allocation101_spill] sm:$0xff] %v14709_v11 }
 0x453   : > { %7657 = vperm.xlu0 %10649, %v12680_v42  }
 0x454   : > { %v14711_v59 = vpop.permute.xlu1 %7350 }
 0x455   : > { %17017 = vst [vmem:[#allocation102_spill] sm:$0xff] %v14711_v59  ;;  %v14715_v8 = vpop.permute.xlu0 %7306 }
 0x456   : > { %7701 = vperm.xlu1 %10648, %v16951_v3   ;;  %17018 = vst [vmem:[#allocation103_spill] sm:$0xff] %v14715_v8 }
 0x457   : > { %7665 = vperm.xlu0 %10649, %v12953_v24  }
 0x458   : > { %v14717_v29 = vpop.permute.xlu1 %7358 }
 0x459   : > { %17019 = vst [vmem:[#allocation104_spill] sm:$0xff] %v14717_v29  ;;  %v14721_v0 = vpop.permute.xlu0 %7314 }
 0x45a   : > { %7709 = vperm.xlu1 %10648, %v16953_v16   ;;  %17020 = vst [vmem:[#allocation105_spill] sm:$0xff] %v14721_v0 }
 0x45b   : > { %7673 = vperm.xlu0 %10649, %v12957_v45  }
 0x45c   : > { %v14723_v36 = vpop.permute.xlu1 %7366 }
 0x45d   : > { %17021 = vst [vmem:[#allocation106_spill] sm:$0xff] %v14723_v36  ;;  %v14727_v59 = vpop.permute.xlu0 %7322 }
 0x45e   : > { %7717 = vperm.xlu1 %10648, %v16955_v17   ;;  %17022 = vst [vmem:[#allocation107_spill] sm:$0xff] %v14727_v59 }
 0x45f   : > { %7681 = vperm.xlu0 %10649, %v12961_v12  }
 0x460   : > { %v14729_v11 = vpop.permute.xlu1 %7374 }
 0x461   : > { %17023 = vst [vmem:[#allocation108_spill] sm:$0xff] %v14729_v11  ;;  %v14733_v29 = vpop.permute.xlu0 %7330 }
 0x462   : > { %7725 = vperm.xlu1 %10648, %v16959_v53   ;;  %17024 = vst [vmem:[#allocation109_spill] sm:$0xff] %v14733_v29 }
 0x463   : > { %7689 = vperm.xlu0 %10649, %v12966_v30  }
 0x464   : > { %v14735_v8 = vpop.permute.xlu1 %7382 }
 0x465   : > { %17025 = vst [vmem:[#allocation110_spill] sm:$0xff] %v14735_v8  ;;  %v14739_v36 = vpop.permute.xlu0 %7338 }
 0x466   : > { %7733 = vperm.xlu1 %10648, %v16962_v56   ;;  %17026 = vst [vmem:[#allocation111_spill] sm:$0xff] %v14739_v36 }
 0x467   : > { %7697 = vperm.xlu0 %10649, %v13092_v9  }
 0x468   : > { %v14741_v0 = vpop.permute.xlu1 %7390 }
 0x469   : > { %17027 = vst [vmem:[#allocation112_spill] sm:$0xff] %v14741_v0  ;;  %v14745_v11 = vpop.permute.xlu0 %7346 }
 0x46a   : > { %7741 = vperm.xlu1 %10648, %v16965_v10   ;;  %17028 = vst [vmem:[#allocation113_spill] sm:$0xff] %v14745_v11 }
 0x46b   : > { %7705 = vperm.xlu0 %10649, %v16932_v38  }
 0x46c   : > { %v14747_v59 = vpop.permute.xlu1 %7398 }
 0x46d   : > { %17029 = vst [vmem:[#allocation114_spill] sm:$0xff] %v14747_v59  ;;  %v14751_v8 = vpop.permute.xlu0 %7354 }
 0x46e   : > { %7749 = vperm.xlu1 %10648, %v16969_v31   ;;  %17030 = vst [vmem:[#allocation115_spill] sm:$0xff] %v14751_v8 }
 0x46f   : > { %7713 = vperm.xlu0 %10649, %v16935_v21  }
 0x470   : > { %v14753_v29 = vpop.permute.xlu1 %7406 }
 0x471   : > { %17031 = vst [vmem:[#allocation116_spill] sm:$0xff] %v14753_v29  ;;  %v14757_v0 = vpop.permute.xlu0 %7362 }
 0x472   : > { %7757 = vperm.xlu1 %10648, %v14358_v63   ;;  %17032 = vst [vmem:[#allocation117_spill] sm:$0xff] %v14757_v0 }
 0x473   : > { %7721 = vperm.xlu0 %10649, %v16939_v27  }
 0x474   : > { %v14759_v36 = vpop.permute.xlu1 %7446 }
 0x475   : > { %17033 = vst [vmem:[#allocation118_spill] sm:$0xff] %v14759_v36  ;;  %v14763_v59 = vpop.permute.xlu0 %7370 }
 0x476   : > { %7765 = vperm.xlu1 %10648, %v14464_v22   ;;  %17034 = vst [vmem:[#allocation119_spill] sm:$0xff] %v14763_v59 }
 0x477   : > { %7729 = vperm.xlu0 %10649, %v16942_v41  }
 0x478   : > { %v14765_v11 = vpop.permute.xlu1 %7454 }
 0x479   : > { %17035 = vst [vmem:[#allocation120_spill] sm:$0xff] %v14765_v11  ;;  %v14769_v29 = vpop.permute.xlu0 %7378 }
 0x47a   : > { %7805 = vperm.xlu1 %10648, %v16977_v37   ;;  %17036 = vst [vmem:[#allocation121_spill] sm:$0xff] %v14769_v29 }
 0x47b   : > { %7737 = vperm.xlu0 %10649, %v16945_v25  }
 0x47c   : > { %v14771_v8 = vpop.permute.xlu1 %7462 }
 0x47d   : > { %17037 = vst [vmem:[#allocation122_spill] sm:$0xff] %v14771_v8  ;;  %v14775_v0 = vpop.permute.xlu0 %7386 }
 0x47e   : > { %7813 = vperm.xlu1 %10648, %v16981_v2   ;;  %17038 = vst [vmem:[#allocation123_spill] sm:$0xff] %v14775_v0 }
 0x47f   : > { %7745 = vperm.xlu0 %10649, %v16949_v13  }
 0x480   : > { %v14777_v36 = vpop.permute.xlu1 %7470 }
 0x481   : > { %17039 = vst [vmem:[#allocation124_spill] sm:$0xff] %v14777_v36  ;;  %v14781_v59 = vpop.permute.xlu0 %7394 }
 0x482   : > { %7821 = vperm.xlu1 %10648, %v16983_v40   ;;  %17040 = vst [vmem:[#allocation125_spill] sm:$0xff] %v14781_v59 }
 0x483   : > { %7753 = vperm.xlu0 %10649, %v14439_v46  }
 0x484   : > { %v14783_v11 = vpop.permute.xlu1 %7478 }
 0x485   : > { %17041 = vst [vmem:[#allocation126_spill] sm:$0xff] %v14783_v11  ;;  %v14787_v29 = vpop.permute.xlu0 %7402 }
 0x486   : > { %7829 = vperm.xlu1 %10648, %v16986_v57   ;;  %17042 = vst [vmem:[#allocation127_spill] sm:$0xff] %v14787_v29 }
 0x487   : > { %7761 = vperm.xlu0 %10649, %v14493_v43  }
 0x488   : > { %v14789_v8 = vpop.permute.xlu1 %7486 }
 0x489   : > { %17043 = vst [vmem:[#allocation128_spill] sm:$0xff] %v14789_v8  ;;  %v14793_v0 = vpop.permute.xlu0 %7410 }
 0x48a   : > { %7837 = vperm.xlu1 %10648, %v16989_v7   ;;  %17044 = vst [vmem:[#allocation129_spill] sm:$0xff] %v14793_v0 }
 0x48b   : > { %7801 = vperm.xlu0 %10649, %v16957_v33  }
 0x48c   : > { %v14795_v36 = vpop.permute.xlu1 %7494 }
 0x48d   : > { %17045 = vst [vmem:[#allocation130_spill] sm:$0xff] %v14795_v36  ;;  %v14799_v59 = vpop.permute.xlu0 %7450 }
 0x48e   : > { %7845 = vperm.xlu1 %10648, %v16991_v60   ;;  %17046 = vst [vmem:[#allocation131_spill] sm:$0xff] %v14799_v59 }
 0x48f   : > { %7809 = vperm.xlu0 %10649, %v16960_v34  }
 0x490   : > { %v14801_v11 = vpop.permute.xlu1 %7502 }
 0x491   : > { %17047 = vst [vmem:[#allocation132_spill] sm:$0xff] %v14801_v11  ;;  %v14805_v29 = vpop.permute.xlu0 %7458 }
 0x492   : > { %7853 = vperm.xlu1 %10648, %v16994_v28   ;;  %17048 = vst [vmem:[#allocation133_spill] sm:$0xff] %v14805_v29 }
 0x493   : > { %7817 = vperm.xlu0 %10649, %v16963_v58  }
 0x494   : > { %v14807_v8 = vpop.permute.xlu1 %7510 }
 0x495   : > { %17049 = vst [vmem:[#allocation134_spill] sm:$0xff] %v14807_v8  ;;  %v14811_v0 = vpop.permute.xlu0 %7466 }
 0x496   : > { %7861 = vperm.xlu1 %10648, %v16997_v47   ;;  %17050 = vst [vmem:[#allocation135_spill] sm:$0xff] %v14811_v0 }
 0x497   : > { %7825 = vperm.xlu0 %10649, %v16967_v23  }
 0x498   : > { %v14813_v36 = vpop.permute.xlu1 %7518 }
 0x499   : > { %17051 = vst [vmem:[#allocation136_spill] sm:$0xff] %v14813_v36  ;;  %v14817_v11 = vpop.permute.xlu0 %7474 }
 0x49a   : > { %7869 = vperm.xlu1 %10648, %v13087_v32   ;;  %17052 = vst [vmem:[#allocation137_spill] sm:$0xff] %v14817_v11 }
 0x49b   : > { %7833 = vperm.xlu0 %10649, %v16970_v48  }
 0x49c   : > { %v14819_v59 = vpop.permute.xlu1 %7526 }
 0x49d   : > { %17053 = vst [vmem:[#allocation138_spill] sm:$0xff] %v14819_v59  ;;  %v14823_v8 = vpop.permute.xlu0 %7482 }
 0x49e   : > { %7877 = vperm.xlu1 %10648, %v13302_v52   ;;  %17054 = vst [vmem:[#allocation139_spill] sm:$0xff] %v14823_v8  ;;  %v17061_v52 = vld [vmem:[#allocation27_spill] sm:$0xff] }
 0x49f   : > { %7841 = vperm.xlu0 %10649, %v16972_v61  }
 0x4a0   : > { %v14825_v29 = vpop.permute.xlu1 %7534 }
 0x4a1   : > { %17055 = vst [vmem:[#allocation140_spill] sm:$0xff] %v14825_v29  ;;  %v14829_v36 = vpop.permute.xlu0 %7490 }
 0x4a2   : > { %7885 = vperm.xlu1 %10648, %v13515_v14   ;;  %17056 = vst [vmem:[#allocation141_spill] sm:$0xff] %v14829_v36  ;;  %v17064_v14 = vld [vmem:[#allocation29_spill] sm:$0xff] }
 0x4a3   : > { %7849 = vperm.xlu0 %10649, %v17058_v54  }
 0x4a4   : > { %v14831_v0 = vpop.permute.xlu1 %7542 }
 0x4a5   : > { %17057 = vst [vmem:[#allocation142_spill] sm:$0xff] %v14831_v0  ;;  %v14835_v59 = vpop.permute.xlu0 %7498 }
 0x4a6   : > { %7893 = vperm.xlu1 %10648, %v13725_v62   ;;  %17059 = vst [vmem:[#allocation19_spill] sm:$0xff] %v14835_v59  ;;  %v17067_v62 = vld [vmem:[#allocation33_spill] sm:$0xff] }
 0x4a7   : > { %7857 = vperm.xlu0 %10649, %v17061_v52   ;;  %v17069_v59 = vld [vmem:[#allocation37_spill] sm:$0xff] }
 0x4a8   : > { %v14837_v11 = vpop.permute.xlu1 %7550 }
 0x4a9   : > { %17060 = vst [vmem:[#allocation143_spill] sm:$0xff] %v14837_v11  ;;  %v14841_v29 = vpop.permute.xlu0 %7506 }
 0x4aa   : > { %7901 = vperm.xlu1 %10648, %v13938_v50   ;;  %17062 = vst [vmem:[#allocation27_spill] sm:$0xff] %v14841_v29  ;;  %v17072_v29 = vld [vmem:[#allocation41_spill] sm:$0xff] }
 0x4ab   : > { %7865 = vperm.xlu0 %10649, %v17064_v14  }
 0x4ac   : > { %v14843_v8 = vpop.permute.xlu1 %7558 }
 0x4ad   : > { %17063 = vst [vmem:[#allocation144_spill] sm:$0xff] %v14843_v8  ;;  %v14847_v0 = vpop.permute.xlu0 %7514 }
 0x4ae   : > { %7909 = vperm.xlu1 %10648, %v14148_v4   ;;  %17065 = vst [vmem:[#allocation29_spill] sm:$0xff] %v14847_v0  ;;  %v10916_v0 = vmov 3  }
 0x4af   : > { %7873 = vperm.xlu0 %10649, %v17067_v62  }
 0x4b0   : > { %v14849_v36 = vpop.permute.xlu1 %7566 }
 0x4b1   : > { %17066 = vst [vmem:[#allocation145_spill] sm:$0xff] %v14849_v36  ;;  %v14853_v11 = vpop.permute.xlu0 %7522 }
 0x4b2   : > { %7917 = vperm.xlu1 %10648, %v14353_v5   ;;  %17068 = vst [vmem:[#allocation146_spill] sm:$0xff] %v14853_v11 }
 0x4b3   : > { %7881 = vperm.xlu0 %10649, %v17069_v59  }
 0x4b5   : > { %v14856_v50 = vpop.permute.xlu1 %7641  ;;  %v14859_v8 = vpop.permute.xlu0 %7530 }
 0x4b6   : > { %17070 = vst [vmem:[#allocation37_spill] sm:$0xff] %v14856_v50  ;;  %7925 = vperm.xlu1 %10648, %v14459_v19   ;;  %17071 = vst [vmem:[#allocation147_spill] sm:$0xff] %v14859_v8 }
 0x4b7   : > { %7889 = vperm.xlu0 %10649, %v17072_v29  }
 0x4b9   : > { %v14862_v4 = vpop.permute.xlu1 %7649  ;;  %v14864_v36 = vpop.permute.xlu0 %7538 }
 0x4ba   : > { %17073 = vst [vmem:[#allocation148_spill] sm:$0xff] %v14862_v4  ;;  %10651 = vset.pattern.permute.xlu1 %v10916_v0  ;;  %17074 = vst [vmem:[#allocation149_spill] sm:$0xff] %v14864_v36 }
 0x4bb   : > { %8000 = vperm.xlu1 %10651, %v12640_v49   ;;  %7897 = vperm.xlu0 %10649, %v14045_v55  }
 0x4bd   : > { %v14868_v11 = vpop.permute.xlu1 %7653  ;;  %v14870_v5 = vpop.permute.xlu0 %7546 }
 0x4be   : > { %17075 = vst [vmem:[#allocation150_spill] sm:$0xff] %v14868_v11  ;;  %17076 = vst [vmem:[#allocation151_spill] sm:$0xff] %v14870_v5  ;;  %v17081_v11 = vld [vmem:[#allocation63_spill] sm:$0xff] }
 0x4bf   : > { %8004 = vperm.xlu1 %10651, %v12672_v44   ;;  %7905 = vperm.xlu0 %10649, %v14253_v18  }
 0x4c1   : > { %v14874_v8 = vpop.permute.xlu1 %7661  ;;  %v14876_v50 = vpop.permute.xlu0 %7554 }
 0x4c2   : > { %17077 = vst [vmem:[#allocation152_spill] sm:$0xff] %v14874_v8  ;;  %17078 = vst [vmem:[#allocation153_spill] sm:$0xff] %v14876_v50 }
 0x4c3   : > { %8012 = vperm.xlu1 %10651, %v12680_v42   ;;  %7913 = vperm.xlu0 %10649, %v14433_v1  }
 0x4c5   : > { %v14880_v36 = vpop.permute.xlu1 %7669  ;;  %v14882_v4 = vpop.permute.xlu0 %7562 }
 0x4c6   : > { %17079 = vst [vmem:[#allocation154_spill] sm:$0xff] %v14880_v36  ;;  %17080 = vst [vmem:[#allocation155_spill] sm:$0xff] %v14882_v4 }
 0x4c7   : > { %8020 = vperm.xlu1 %10651, %v12953_v24   ;;  %7921 = vperm.xlu0 %10649, %v17081_v11  }
 0x4c9   : > { %v14886_v5 = vpop.permute.xlu1 %7677  ;;  %v14888_v49 = vpop.permute.xlu0 %7570 }
 0x4ca   : > { %17082 = vst [vmem:[#allocation156_spill] sm:$0xff] %v14886_v5  ;;  %17083 = vst [vmem:[#allocation157_spill] sm:$0xff] %v14888_v49 }
 0x4cb   : > { %8028 = vperm.xlu1 %10651, %v12957_v45   ;;  %10650 = vset.pattern.permute.xlu0 %v10916_v0 }
 0x4cc   : > { %7996 = vperm.xlu0 %10650, %v12654_v15  }
 0x4cd   : > { %v14891_v50 = vpop.permute.xlu1 %7685 }
 0x4ce   : > { %17084 = vst [vmem:[#allocation158_spill] sm:$0xff] %v14891_v50  ;;  %v14895_v36 = vpop.permute.xlu0 %7645 }
 0x4cf   : > { %8036 = vperm.xlu1 %10651, %v12961_v12   ;;  %17085 = vst [vmem:[#allocation159_spill] sm:$0xff] %v14895_v36  ;;  %v17135_v36 = vld [vmem:[#allocation31_spill] sm:$0xff] }
 0x4d0   : > { %8008 = vperm.xlu0 %10650, %v12664_v35  }
 0x4d1   : > { %v14897_v4 = vpop.permute.xlu1 %7693 }
 0x4d2   : > { %17086 = vst [vmem:[#allocation160_spill] sm:$0xff] %v14897_v4  ;;  %v14901_v5 = vpop.permute.xlu0 %7657 }
 0x4d3   : > { %8044 = vperm.xlu1 %10651, %v12966_v30   ;;  %17087 = vst [vmem:[#allocation161_spill] sm:$0xff] %v14901_v5 }
 0x4d4   : > { %8016 = vperm.xlu0 %10650, %v16934_v51  }
 0x4d5   : > { %v14903_v49 = vpop.permute.xlu1 %7701 }
 0x4d6   : > { %17088 = vst [vmem:[#allocation162_spill] sm:$0xff] %v14903_v49  ;;  %v14907_v0 = vpop.permute.xlu0 %7665 }
 0x4d7   : > { %8052 = vperm.xlu1 %10651, %v13092_v9   ;;  %17089 = vst [vmem:[#allocation163_spill] sm:$0xff] %v14907_v0 }
 0x4d8   : > { %8024 = vperm.xlu0 %10650, %v16937_v39  }
 0x4d9   : > { %v14909_v50 = vpop.permute.xlu1 %7709 }
 0x4da   : > { %17090 = vst [vmem:[#allocation164_spill] sm:$0xff] %v14909_v50  ;;  %v14913_v4 = vpop.permute.xlu0 %7673 }
 0x4db   : > { %8060 = vperm.xlu1 %10651, %v16932_v38   ;;  %17091 = vst [vmem:[#allocation165_spill] sm:$0xff] %v14913_v4 }
 0x4dc   : > { %8032 = vperm.xlu0 %10650, %v16941_v20  }
 0x4dd   : > { %v14915_v8 = vpop.permute.xlu1 %7717 }
 0x4de   : > { %17092 = vst [vmem:[#allocation166_spill] sm:$0xff] %v14915_v8  ;;  %v14919_v49 = vpop.permute.xlu0 %7681 }
 0x4df   : > { %8068 = vperm.xlu1 %10651, %v16935_v21   ;;  %17093 = vst [vmem:[#allocation167_spill] sm:$0xff] %v14919_v49 }
 0x4e0   : > { %8040 = vperm.xlu0 %10650, %v16944_v6  }
 0x4e1   : > { %v14921_v5 = vpop.permute.xlu1 %7725 }
 0x4e2   : > { %17094 = vst [vmem:[#allocation168_spill] sm:$0xff] %v14921_v5  ;;  %v14925_v50 = vpop.permute.xlu0 %7689 }
 0x4e3   : > { %8076 = vperm.xlu1 %10651, %v16939_v27   ;;  %17095 = vst [vmem:[#allocation169_spill] sm:$0xff] %v14925_v50 }
 0x4e4   : > { %8048 = vperm.xlu0 %10650, %v16947_v26  }
 0x4e5   : > { %v14927_v0 = vpop.permute.xlu1 %7733 }
 0x4e6   : > { %17096 = vst [vmem:[#allocation170_spill] sm:$0xff] %v14927_v0  ;;  %v14931_v8 = vpop.permute.xlu0 %7697 }
 0x4e7   : > { %8084 = vperm.xlu1 %10651, %v16942_v41   ;;  %17097 = vst [vmem:[#allocation171_spill] sm:$0xff] %v14931_v8 }
 0x4e8   : > { %8056 = vperm.xlu0 %10650, %v16951_v3  }
 0x4e9   : > { %v14933_v4 = vpop.permute.xlu1 %7741 }
 0x4ea   : > { %17098 = vst [vmem:[#allocation172_spill] sm:$0xff] %v14933_v4  ;;  %v14937_v5 = vpop.permute.xlu0 %7705 }
 0x4eb   : > { %8092 = vperm.xlu1 %10651, %v16945_v25   ;;  %17099 = vst [vmem:[#allocation173_spill] sm:$0xff] %v14937_v5 }
 0x4ec   : > { %8064 = vperm.xlu0 %10650, %v16953_v16  }
 0x4ed   : > { %v14939_v49 = vpop.permute.xlu1 %7749 }
 0x4ee   : > { %17100 = vst [vmem:[#allocation174_spill] sm:$0xff] %v14939_v49  ;;  %v14943_v0 = vpop.permute.xlu0 %7713 }
 0x4ef   : > { %8100 = vperm.xlu1 %10651, %v16949_v13   ;;  %17101 = vst [vmem:[#allocation175_spill] sm:$0xff] %v14943_v0 }
 0x4f0   : > { %8072 = vperm.xlu0 %10650, %v16955_v17  }
 0x4f1   : > { %v14945_v50 = vpop.permute.xlu1 %7757 }
 0x4f2   : > { %17102 = vst [vmem:[#allocation176_spill] sm:$0xff] %v14945_v50  ;;  %v14949_v4 = vpop.permute.xlu0 %7721 }
 0x4f3   : > { %8108 = vperm.xlu1 %10651, %v14439_v46   ;;  %17103 = vst [vmem:[#allocation177_spill] sm:$0xff] %v14949_v4 }
 0x4f4   : > { %8080 = vperm.xlu0 %10650, %v16959_v53  }
 0x4f5   : > { %v14951_v8 = vpop.permute.xlu1 %7765 }
 0x4f6   : > { %17104 = vst [vmem:[#allocation178_spill] sm:$0xff] %v14951_v8  ;;  %v14955_v49 = vpop.permute.xlu0 %7729 }
 0x4f7   : > { %8116 = vperm.xlu1 %10651, %v14493_v43   ;;  %17105 = vst [vmem:[#allocation179_spill] sm:$0xff] %v14955_v49 }
 0x4f8   : > { %8088 = vperm.xlu0 %10650, %v16962_v56  }
 0x4f9   : > { %v14957_v5 = vpop.permute.xlu1 %7805 }
 0x4fa   : > { %17106 = vst [vmem:[#allocation180_spill] sm:$0xff] %v14957_v5  ;;  %v14961_v50 = vpop.permute.xlu0 %7737 }
 0x4fb   : > { %8156 = vperm.xlu1 %10651, %v16957_v33   ;;  %17107 = vst [vmem:[#allocation181_spill] sm:$0xff] %v14961_v50 }
 0x4fc   : > { %8096 = vperm.xlu0 %10650, %v16965_v10  }
 0x4fd   : > { %v14963_v0 = vpop.permute.xlu1 %7813 }
 0x4fe   : > { %17108 = vst [vmem:[#allocation182_spill] sm:$0xff] %v14963_v0  ;;  %v14967_v8 = vpop.permute.xlu0 %7745 }
 0x4ff   : > { %8164 = vperm.xlu1 %10651, %v16960_v34   ;;  %17109 = vst [vmem:[#allocation183_spill] sm:$0xff] %v14967_v8 }
 0x500   : > { %8104 = vperm.xlu0 %10650, %v16969_v31  }
 0x501   : > { %v14969_v4 = vpop.permute.xlu1 %7821 }
 0x502   : > { %17110 = vst [vmem:[#allocation184_spill] sm:$0xff] %v14969_v4  ;;  %v14973_v49 = vpop.permute.xlu0 %7753 }
 0x503   : > { %8172 = vperm.xlu1 %10651, %v16963_v58   ;;  %17111 = vst [vmem:[#allocation185_spill] sm:$0xff] %v14973_v49 }
 0x504   : > { %8112 = vperm.xlu0 %10650, %v14358_v63  }
 0x505   : > { %v14975_v5 = vpop.permute.xlu1 %7829 }
 0x506   : > { %17112 = vst [vmem:[#allocation186_spill] sm:$0xff] %v14975_v5  ;;  %v14979_v50 = vpop.permute.xlu0 %7761 }
 0x507   : > { %8180 = vperm.xlu1 %10651, %v16967_v23   ;;  %17113 = vst [vmem:[#allocation187_spill] sm:$0xff] %v14979_v50 }
 0x508   : > { %8120 = vperm.xlu0 %10650, %v14464_v22  }
 0x509   : > { %v14981_v0 = vpop.permute.xlu1 %7837 }
 0x50a   : > { %17114 = vst [vmem:[#allocation188_spill] sm:$0xff] %v14981_v0  ;;  %v14985_v8 = vpop.permute.xlu0 %7801 }
 0x50b   : > { %8188 = vperm.xlu1 %10651, %v16970_v48   ;;  %17115 = vst [vmem:[#allocation189_spill] sm:$0xff] %v14985_v8 }
 0x50c   : > { %8160 = vperm.xlu0 %10650, %v16977_v37  }
 0x50d   : > { %v14987_v4 = vpop.permute.xlu1 %7845 }
 0x50e   : > { %17116 = vst [vmem:[#allocation190_spill] sm:$0xff] %v14987_v4  ;;  %v14991_v49 = vpop.permute.xlu0 %7809 }
 0x50f   : > { %8196 = vperm.xlu1 %10651, %v16972_v61   ;;  %17117 = vst [vmem:[#allocation191_spill] sm:$0xff] %v14991_v49 }
 0x510   : > { %8168 = vperm.xlu0 %10650, %v16981_v2  }
 0x511   : > { %v14993_v5 = vpop.permute.xlu1 %7853 }
 0x512   : > { %17118 = vst [vmem:[#allocation192_spill] sm:$0xff] %v14993_v5  ;;  %v14997_v50 = vpop.permute.xlu0 %7817 }
 0x513   : > { %8204 = vperm.xlu1 %10651, %v17058_v54   ;;  %17119 = vst [vmem:[#allocation193_spill] sm:$0xff] %v14997_v50 }
 0x514   : > { %8176 = vperm.xlu0 %10650, %v16983_v40  }
 0x515   : > { %v14999_v0 = vpop.permute.xlu1 %7861 }
 0x516   : > { %17120 = vst [vmem:[#allocation194_spill] sm:$0xff] %v14999_v0  ;;  %v15003_v4 = vpop.permute.xlu0 %7825 }
 0x517   : > { %8212 = vperm.xlu1 %10651, %v17061_v52   ;;  %17121 = vst [vmem:[#allocation195_spill] sm:$0xff] %v15003_v4 }
 0x518   : > { %8184 = vperm.xlu0 %10650, %v16986_v57  }
 0x519   : > { %v15005_v8 = vpop.permute.xlu1 %7869 }
 0x51a   : > { %17122 = vst [vmem:[#allocation196_spill] sm:$0xff] %v15005_v8  ;;  %v15009_v5 = vpop.permute.xlu0 %7833 }
 0x51b   : > { %8220 = vperm.xlu1 %10651, %v17064_v14   ;;  %17123 = vst [vmem:[#allocation197_spill] sm:$0xff] %v15009_v5 }
 0x51c   : > { %8192 = vperm.xlu0 %10650, %v16989_v7  }
 0x51d   : > { %v15011_v49 = vpop.permute.xlu1 %7877 }
 0x51e   : > { %17124 = vst [vmem:[#allocation198_spill] sm:$0xff] %v15011_v49  ;;  %v15015_v0 = vpop.permute.xlu0 %7841 }
 0x51f   : > { %8228 = vperm.xlu1 %10651, %v17067_v62   ;;  %17125 = vst [vmem:[#allocation199_spill] sm:$0xff] %v15015_v0 }
 0x520   : > { %8200 = vperm.xlu0 %10650, %v16991_v60  }
 0x521   : > { %v15017_v50 = vpop.permute.xlu1 %7885 }
 0x522   : > { %17126 = vst [vmem:[#allocation200_spill] sm:$0xff] %v15017_v50  ;;  %v15021_v8 = vpop.permute.xlu0 %7849 }
 0x523   : > { %8236 = vperm.xlu1 %10651, %v17069_v59   ;;  %17127 = vst [vmem:[#allocation201_spill] sm:$0xff] %v15021_v8 }
 0x524   : > { %8208 = vperm.xlu0 %10650, %v16994_v28  }
 0x525   : > { %v15023_v4 = vpop.permute.xlu1 %7893 }
 0x526   : > { %17128 = vst [vmem:[#allocation202_spill] sm:$0xff] %v15023_v4  ;;  %v15027_v49 = vpop.permute.xlu0 %7857 }
 0x527   : > { %8244 = vperm.xlu1 %10651, %v17072_v29   ;;  %17129 = vst [vmem:[#allocation203_spill] sm:$0xff] %v15027_v49 }
 0x528   : > { %8216 = vperm.xlu0 %10650, %v16997_v47  }
 0x529   : > { %v15029_v5 = vpop.permute.xlu1 %7901 }
 0x52a   : > { %17130 = vst [vmem:[#allocation204_spill] sm:$0xff] %v15029_v5  ;;  %v15033_v50 = vpop.permute.xlu0 %7865 }
 0x52b   : > { %8252 = vperm.xlu1 %10651, %v14045_v55   ;;  %17131 = vst [vmem:[#allocation205_spill] sm:$0xff] %v15033_v50  ;;  %v17138_v55 = vld [vmem:[#allocation35_spill] sm:$0xff] }
 0x52c   : > { %8224 = vperm.xlu0 %10650, %v13087_v32   ;;  %v17140_v50 = vld [vmem:[#allocation39_spill] sm:$0xff] }
 0x52d   : > { %v15035_v0 = vpop.permute.xlu1 %7909 }
 0x52e   : > { %17132 = vst [vmem:[#allocation206_spill] sm:$0xff] %v15035_v0  ;;  %v15039_v4 = vpop.permute.xlu0 %7873 }
 0x52f   : > { %8260 = vperm.xlu1 %10651, %v14253_v18   ;;  %17133 = vst [vmem:[#allocation207_spill] sm:$0xff] %v15039_v4  ;;  %v16741_v4 = vmov 4  }
 0x530   : > { %8232 = vperm.xlu0 %10650, %v17135_v36  }
 0x531   : > { %v15041_v8 = vpop.permute.xlu1 %7917 }
 0x532   : > { %17134 = vst [vmem:[#allocation208_spill] sm:$0xff] %v15041_v8  ;;  %v15045_v5 = vpop.permute.xlu0 %7881 }
 0x533   : > { %8268 = vperm.xlu1 %10651, %v14433_v1   ;;  %17136 = vst [vmem:[#allocation31_spill] sm:$0xff] %v15045_v5  ;;  %v17143_v5 = vld [vmem:[#allocation43_spill] sm:$0xff] }
 0x534   : > { %8240 = vperm.xlu0 %10650, %v17138_v55  }
 0x535   : > { %v15047_v49 = vpop.permute.xlu1 %7925 }
 0x536   : > { %17137 = vst [vmem:[#allocation209_spill] sm:$0xff] %v15047_v49  ;;  %v15051_v0 = vpop.permute.xlu0 %7889 }
 0x537   : > { %8276 = vperm.xlu1 %10651, %v17081_v11   ;;  %17139 = vst [vmem:[#allocation210_spill] sm:$0xff] %v15051_v0  ;;  %v17146_v0 = vld [vmem:[#allocation47_spill] sm:$0xff] }
 0x538   : > { %8248 = vperm.xlu0 %10650, %v17140_v50  }
 0x53a   : > { %v15054_v29 = vpop.permute.xlu1 %8000  ;;  %v15057_v8 = vpop.permute.xlu0 %7897 }
 0x53b   : > { %17141 = vst [vmem:[#allocation39_spill] sm:$0xff] %v15054_v29  ;;  %10652 = vset.pattern.permute.xlu1 %v16741_v4  ;;  %17142 = vst [vmem:[#allocation211_spill] sm:$0xff] %v15057_v8  ;;  %v17149_v4 = vld [vmem:[#allocation51_spill] sm:$0xff] }
 0x53c   : > { %8351 = vperm.xlu1 %10652, %v12654_v15   ;;  %8256 = vperm.xlu0 %10650, %v17143_v5  }
 0x53e   : > { %v15061_v49 = vpop.permute.xlu1 %8004  ;;  %v15063_v55 = vpop.permute.xlu0 %7905 }
 0x53f   : > { %17144 = vst [vmem:[#allocation212_spill] sm:$0xff] %v15061_v49  ;;  %17145 = vst [vmem:[#allocation213_spill] sm:$0xff] %v15063_v55  ;;  %v17156_v49 = vld [vmem:[#allocation18_spill] sm:$0xff] }
 0x540   : > { %8359 = vperm.xlu1 %10652, %v12672_v44   ;;  %8264 = vperm.xlu0 %10650, %v17146_v0  }
 0x542   : > { %v15067_v11 = vpop.permute.xlu1 %8012  ;;  %v15069_v29 = vpop.permute.xlu0 %7913 }
 0x543   : > { %17147 = vst [vmem:[#allocation214_spill] sm:$0xff] %v15067_v11  ;;  %17148 = vst [vmem:[#allocation215_spill] sm:$0xff] %v15069_v29  ;;  %v17154_v11 = vmov 4  }
 0x544   : > { %8363 = vperm.xlu1 %10652, %v12664_v35   ;;  %8272 = vperm.xlu0 %10650, %v17149_v4  }
 0x546   : > { %v15073_v8 = vpop.permute.xlu1 %8020  ;;  %v15075_v62 = vpop.permute.xlu0 %7921 }
 0x547   : > { %17150 = vst [vmem:[#allocation216_spill] sm:$0xff] %v15073_v8  ;;  %17151 = vst [vmem:[#allocation217_spill] sm:$0xff] %v15075_v62 }
 0x548   : > { %8371 = vperm.xlu1 %10652, %v16934_v51   ;;  %8280 = vperm.xlu0 %10650, %v14459_v19  }
 0x54a   : > { %v15079_v55 = vpop.permute.xlu1 %8028 }
 0x54b   : > { %17152 = vst [vmem:[#allocation218_spill] sm:$0xff] %v15079_v55  ;;  %v15082_v0 = vpop.permute.xlu0 %7996 }
 0x54c   : > { %8379 = vperm.xlu1 %10652, %v16937_v39   ;;  %17153 = vst [vmem:[#allocation219_spill] sm:$0xff] %v15082_v0  ;;  %10653 = vset.pattern.permute.xlu0 %v17154_v11 }
 0x54d   : > { %8355 = vperm.xlu0 %10653, %v17156_v49  }
 0x54e   : > { %v15085_v29 = vpop.permute.xlu1 %8036 }
 0x54f   : > { %17155 = vst [vmem:[#allocation220_spill] sm:$0xff] %v15085_v29  ;;  %v15089_v4 = vpop.permute.xlu0 %8008 }
 0x550   : > { %8387 = vperm.xlu1 %10652, %v16941_v20   ;;  %17157 = vst [vmem:[#allocation18_spill] sm:$0xff] %v15089_v4 }
 0x551   : > { %8367 = vperm.xlu0 %10653, %v12680_v42  }
 0x552   : > { %v15091_v62 = vpop.permute.xlu1 %8044 }
 0x553   : > { %17158 = vst [vmem:[#allocation221_spill] sm:$0xff] %v15091_v62  ;;  %v15095_v55 = vpop.permute.xlu0 %8016 }
 0x554   : > { %8395 = vperm.xlu1 %10652, %v16944_v6   ;;  %17159 = vst [vmem:[#allocation222_spill] sm:$0xff] %v15095_v55 }
 0x555   : > { %8375 = vperm.xlu0 %10653, %v12953_v24  }
 0x556   : > { %v15097_v8 = vpop.permute.xlu1 %8052 }
 0x557   : > { %17160 = vst [vmem:[#allocation223_spill] sm:$0xff] %v15097_v8  ;;  %v15101_v29 = vpop.permute.xlu0 %8024 }
 0x558   : > { %8403 = vperm.xlu1 %10652, %v16947_v26   ;;  %17161 = vst [vmem:[#allocation224_spill] sm:$0xff] %v15101_v29 }
 0x559   : > { %8383 = vperm.xlu0 %10653, %v12957_v45  }
 0x55a   : > { %v15103_v0 = vpop.permute.xlu1 %8060 }
 0x55b   : > { %17162 = vst [vmem:[#allocation225_spill] sm:$0xff] %v15103_v0  ;;  %v15107_v62 = vpop.permute.xlu0 %8032 }
 0x55c   : > { %8411 = vperm.xlu1 %10652, %v16951_v3   ;;  %17163 = vst [vmem:[#allocation226_spill] sm:$0xff] %v15107_v62 }
 0x55d   : > { %8391 = vperm.xlu0 %10653, %v12961_v12  }
 0x55e   : > { %v15109_v4 = vpop.permute.xlu1 %8068 }
 0x55f   : > { %17164 = vst [vmem:[#allocation227_spill] sm:$0xff] %v15109_v4  ;;  %v15113_v8 = vpop.permute.xlu0 %8040 }
 0x560   : > { %8419 = vperm.xlu1 %10652, %v16953_v16   ;;  %17165 = vst [vmem:[#allocation228_spill] sm:$0xff] %v15113_v8 }
 0x561   : > { %8399 = vperm.xlu0 %10653, %v12966_v30  }
 0x562   : > { %v15115_v55 = vpop.permute.xlu1 %8076 }
 0x563   : > { %17166 = vst [vmem:[#allocation229_spill] sm:$0xff] %v15115_v55  ;;  %v15119_v0 = vpop.permute.xlu0 %8048 }
 0x564   : > { %8427 = vperm.xlu1 %10652, %v16955_v17   ;;  %17167 = vst [vmem:[#allocation230_spill] sm:$0xff] %v15119_v0 }
 0x565   : > { %8407 = vperm.xlu0 %10653, %v13092_v9  }
 0x566   : > { %v15121_v29 = vpop.permute.xlu1 %8084 }
 0x567   : > { %17168 = vst [vmem:[#allocation231_spill] sm:$0xff] %v15121_v29  ;;  %v15125_v4 = vpop.permute.xlu0 %8056 }
 0x568   : > { %8435 = vperm.xlu1 %10652, %v16959_v53   ;;  %17169 = vst [vmem:[#allocation232_spill] sm:$0xff] %v15125_v4 }
 0x569   : > { %8415 = vperm.xlu0 %10653, %v16932_v38  }
 0x56a   : > { %v15127_v62 = vpop.permute.xlu1 %8092 }
 0x56b   : > { %17170 = vst [vmem:[#allocation233_spill] sm:$0xff] %v15127_v62  ;;  %v15131_v55 = vpop.permute.xlu0 %8064 }
 0x56c   : > { %8443 = vperm.xlu1 %10652, %v16962_v56   ;;  %17171 = vst [vmem:[#allocation234_spill] sm:$0xff] %v15131_v55 }
 0x56d   : > { %8423 = vperm.xlu0 %10653, %v16935_v21  }
 0x56e   : > { %v15133_v8 = vpop.permute.xlu1 %8100 }
 0x56f   : > { %17172 = vst [vmem:[#allocation235_spill] sm:$0xff] %v15133_v8  ;;  %v15137_v29 = vpop.permute.xlu0 %8072 }
 0x570   : > { %8451 = vperm.xlu1 %10652, %v16965_v10   ;;  %17173 = vst [vmem:[#allocation236_spill] sm:$0xff] %v15137_v29 }
 0x571   : > { %8431 = vperm.xlu0 %10653, %v16939_v27  }
 0x572   : > { %v15139_v0 = vpop.permute.xlu1 %8108 }
 0x573   : > { %17174 = vst [vmem:[#allocation237_spill] sm:$0xff] %v15139_v0  ;;  %v15143_v62 = vpop.permute.xlu0 %8080 }
 0x574   : > { %8459 = vperm.xlu1 %10652, %v16969_v31   ;;  %17175 = vst [vmem:[#allocation238_spill] sm:$0xff] %v15143_v62 }
 0x575   : > { %8439 = vperm.xlu0 %10653, %v16942_v41  }
 0x576   : > { %v15145_v4 = vpop.permute.xlu1 %8116 }
 0x577   : > { %17176 = vst [vmem:[#allocation239_spill] sm:$0xff] %v15145_v4  ;;  %v15149_v8 = vpop.permute.xlu0 %8088 }
 0x578   : > { %8467 = vperm.xlu1 %10652, %v14358_v63   ;;  %17177 = vst [vmem:[#allocation240_spill] sm:$0xff] %v15149_v8 }
 0x579   : > { %8447 = vperm.xlu0 %10653, %v16945_v25  }
 0x57a   : > { %v15151_v55 = vpop.permute.xlu1 %8156 }
 0x57b   : > { %v15155_v0 = vpop.permute.xlu0 %8096 }
 0x57c   : > { %8475 = vperm.xlu1 %10652, %v14464_v22   ;;  %17178 = vst [vmem:[#allocation241_spill] sm:$0xff] %v15155_v0 }
 0x57d   : > { %8455 = vperm.xlu0 %10653, %v16949_v13  }
 0x57e   : > { %v15157_v29 = vpop.permute.xlu1 %8164 }
 0x57f   : > { %17179 = vst [vmem:[#allocation242_spill] sm:$0xff] %v15157_v29  ;;  %v15161_v4 = vpop.permute.xlu0 %8104 }
 0x580   : > { %8515 = vperm.xlu1 %10652, %v16977_v37   ;;  %17180 = vst [vmem:[#allocation243_spill] sm:$0xff] %v15161_v4 }
 0x581   : > { %8463 = vperm.xlu0 %10653, %v14439_v46  }
 0x582   : > { %v15163_v62 = vpop.permute.xlu1 %8172 }
 0x583   : > { %17181 = vst [vmem:[#allocation244_spill] sm:$0xff] %v15163_v62  ;;  %v15167_v8 = vpop.permute.xlu0 %8112 }
 0x584   : > { %8523 = vperm.xlu1 %10652, %v16981_v2   ;;  %17182 = vst [vmem:[#allocation245_spill] sm:$0xff] %v15167_v8 }
 0x585   : > { %8471 = vperm.xlu0 %10653, %v14493_v43  }
 0x586   : > { %v15169_v31 = vpop.permute.xlu1 %8180 }
 0x587   : > { %17183 = vst [vmem:[#allocation246_spill] sm:$0xff] %v15169_v31  ;;  %v15173_v0 = vpop.permute.xlu0 %8120 }
 0x588   : > { %8531 = vperm.xlu1 %10652, %v16983_v40   ;;  %17184 = vst [vmem:[#allocation247_spill] sm:$0xff] %v15173_v0 }
 0x589   : > { %8511 = vperm.xlu0 %10653, %v16957_v33  }
 0x58a   : > { %v15175_v22 = vpop.permute.xlu1 %8188 }
 0x58b   : > { %17185 = vst [vmem:[#allocation248_spill] sm:$0xff] %v15175_v22  ;;  %v15179_v4 = vpop.permute.xlu0 %8160 }
 0x58c   : > { %8539 = vperm.xlu1 %10652, %v16986_v57   ;;  %17186 = vst [vmem:[#allocation249_spill] sm:$0xff] %v15179_v4 }
 0x58d   : > { %8519 = vperm.xlu0 %10653, %v16960_v34  }
 0x58e   : > { %v15181_v25 = vpop.permute.xlu1 %8196 }
 0x58f   : > { %17187 = vst [vmem:[#allocation250_spill] sm:$0xff] %v15181_v25  ;;  %v15185_v8 = vpop.permute.xlu0 %8168 }
 0x590   : > { %8547 = vperm.xlu1 %10652, %v16989_v7   ;;  %17188 = vst [vmem:[#allocation251_spill] sm:$0xff] %v15185_v8 }
 0x591   : > { %8527 = vperm.xlu0 %10653, %v16963_v58  }
 0x592   : > { %v15187_v31 = vpop.permute.xlu1 %8204 }
 0x593   : > { %17189 = vst [vmem:[#allocation252_spill] sm:$0xff] %v15187_v31  ;;  %v15191_v0 = vpop.permute.xlu0 %8176 }
 0x594   : > { %8555 = vperm.xlu1 %10652, %v16991_v60   ;;  %17190 = vst [vmem:[#allocation253_spill] sm:$0xff] %v15191_v0 }
 0x595   : > { %8535 = vperm.xlu0 %10653, %v16967_v23  }
 0x596   : > { %v15193_v22 = vpop.permute.xlu1 %8212 }
 0x597   : > { %17191 = vst [vmem:[#allocation254_spill] sm:$0xff] %v15193_v22  ;;  %v15197_v25 = vpop.permute.xlu0 %8184 }
 0x598   : > { %8563 = vperm.xlu1 %10652, %v16994_v28   ;;  %17192 = vst [vmem:[#allocation255_spill] sm:$0xff] %v15197_v25  ;;  %v16748_v25 = vmov 5  }
 0x599   : > { %8543 = vperm.xlu0 %10653, %v16970_v48  }
 0x59a   : > { %v15199_v62 = vpop.permute.xlu1 %8220 }
 0x59b   : > { %17193 = vst [vmem:[#allocation256_spill] sm:$0xff] %v15199_v62  ;;  %v15203_v31 = vpop.permute.xlu0 %8192 }
 0x59c   : > { %8571 = vperm.xlu1 %10652, %v16997_v47   ;;  %17194 = vst [vmem:[#allocation257_spill] sm:$0xff] %v15203_v31 }
 0x59d   : > { %8551 = vperm.xlu0 %10653, %v16972_v61  }
 0x59e   : > { %v15205_v8 = vpop.permute.xlu1 %8228 }
 0x59f   : > { %17195 = vst [vmem:[#allocation258_spill] sm:$0xff] %v15205_v8  ;;  %v15209_v22 = vpop.permute.xlu0 %8200 }
 0x5a0   : > { %8579 = vperm.xlu1 %10652, %v13087_v32   ;;  %17196 = vst [vmem:[#allocation259_spill] sm:$0xff] %v15209_v22 }
 0x5a1   : > { %8559 = vperm.xlu0 %10653, %v17058_v54  }
 0x5a2   : > { %v15211_v0 = vpop.permute.xlu1 %8236 }
 0x5a3   : > { %17197 = vst [vmem:[#allocation260_spill] sm:$0xff] %v15211_v0  ;;  %v15215_v62 = vpop.permute.xlu0 %8208 }
 0x5a4   : > { %10654 = vset.pattern.permute.xlu1 %v16748_v25  ;;  %17198 = vst [vmem:[#allocation261_spill] sm:$0xff] %v15215_v62 }
 0x5a5   : > { %8710 = vperm.xlu1 %10654, %v17156_v49   ;;  %8567 = vperm.xlu0 %10653, %v17061_v52  }
 0x5a6   : > { %v15218_v31 = vpop.permute.xlu1 %8244 }
 0x5a7   : > { %17199 = vst [vmem:[#allocation262_spill] sm:$0xff] %v15218_v31  ;;  %v15221_v8 = vpop.permute.xlu0 %8216  ;;  %v16750_v31 = vmov 6  }
 0x5a8   : > { %17200 = vst [vmem:[#allocation263_spill] sm:$0xff] %v15221_v8 }
 0x5a9   : > { %8714 = vperm.xlu1 %10654, %v12672_v44   ;;  %8575 = vperm.xlu0 %10653, %v17064_v14  }
 0x5aa   : > { %v15224_v22 = vpop.permute.xlu1 %8252 }
 0x5ab   : > { %17201 = vst [vmem:[#allocation264_spill] sm:$0xff] %v15224_v22  ;;  %v15227_v0 = vpop.permute.xlu0 %8224 }
 0x5ac   : > { %17202 = vst [vmem:[#allocation265_spill] sm:$0xff] %v15227_v0  ;;  %v17207_v0 = vmov 5  }
 0x5ad   : > { %8866 = vperm.xlu1 %10654, %v16957_v33   ;;  %8587 = vperm.xlu0 %10653, %v17135_v36  }
 0x5ae   : > { %v15230_v25 = vpop.permute.xlu1 %8260 }
 0x5af   : > { %17203 = vst [vmem:[#allocation266_spill] sm:$0xff] %v15230_v25  ;;  %v15233_v62 = vpop.permute.xlu0 %8232 }
 0x5b0   : > { %17204 = vst [vmem:[#allocation267_spill] sm:$0xff] %v15233_v62 }
 0x5b1   : > { %10655 = vset.pattern.permute.xlu1 %v16750_v31  ;;  %8591 = vperm.xlu0 %10653, %v17069_v59  }
 0x5b2   : > { %9060 = vperm.xlu1 %10655, %v12654_v15   ;;  %v15237_v8 = vpop.permute.xlu1 %8268 }
 0x5b3   : > { %17205 = vst [vmem:[#allocation268_spill] sm:$0xff] %v15237_v8  ;;  %v15240_v22 = vpop.permute.xlu0 %8240 }
 0x5b4   : > { %17206 = vst [vmem:[#allocation269_spill] sm:$0xff] %v15240_v22  ;;  %v17212_v22 = vmov 6  }
 0x5b5   : > { %8611 = vperm.xlu0 %10653, %v17143_v5  }
 0x5b6   : > { %10656 = vset.pattern.permute.xlu1 %v17207_v0  ;;  %v15243_v29 = vpop.permute.xlu1 %8276 }
 0x5b7   : > { %17208 = vst [vmem:[#allocation270_spill] sm:$0xff] %v15243_v29  ;;  %8874 = vperm.xlu1 %10656, %v16960_v34   ;;  %v15247_v25 = vpop.permute.xlu0 %8248 }
 0x5b8   : > { %17209 = vst [vmem:[#allocation271_spill] sm:$0xff] %v15247_v25 }
 0x5b9   : > { %8615 = vperm.xlu0 %10653, %v14253_v18  }
 0x5bb   : > { %8878 = vperm.xlu1 %10656, %v16981_v2   ;;  %v15251_v31 = vpop.permute.xlu1 %8351  ;;  %v15253_v8 = vpop.permute.xlu0 %8256 }
 0x5bc   : > { %17210 = vst [vmem:[#allocation272_spill] sm:$0xff] %v15251_v31  ;;  %17211 = vst [vmem:[#allocation273_spill] sm:$0xff] %v15253_v8 }
 0x5bd   : > { %8623 = vperm.xlu0 %10653, %v14433_v1  }
 0x5bf   : > { %10657 = vset.pattern.permute.xlu1 %v17212_v22  ;;  %v15257_v62 = vpop.permute.xlu1 %8359  ;;  %v15260_v29 = vpop.permute.xlu0 %8264 }
 0x5c0   : > { %17213 = vst [vmem:[#allocation274_spill] sm:$0xff] %v15257_v62  ;;  %9072 = vperm.xlu1 %10657, %v12664_v35   ;;  %17214 = vst [vmem:[#allocation275_spill] sm:$0xff] %v15260_v29 }
 0x5c1   : > { %10690 = vset.pattern.permute.xlu0 %v17207_v0 }
 0x5c2   : > { %8706 = vperm.xlu0 %10690, %v12654_v15  }
 0x5c3   : > { %v15263_v25 = vpop.permute.xlu1 %8363  ;;  %v15267_v4 = vpop.permute.xlu0 %8272 }
 0x5c4   : > { %17215 = vst [vmem:[#allocation276_spill] sm:$0xff] %v15263_v25  ;;  %9224 = vperm.xlu1 %10657, %v16977_v37   ;;  %17216 = vst [vmem:[#allocation277_spill] sm:$0xff] %v15267_v4 }
 0x5c6   : > { %8718 = vperm.xlu0 %10690, %v12664_v35  }
 0x5c7   : > { %v15269_v8 = vpop.permute.xlu1 %8371  ;;  %v15273_v62 = vpop.permute.xlu0 %8280 }
 0x5c8   : > { %17217 = vst [vmem:[#allocation278_spill] sm:$0xff] %v15269_v8  ;;  %9232 = vperm.xlu1 %10657, %v16981_v2   ;;  %17218 = vst [vmem:[#allocation279_spill] sm:$0xff] %v15273_v62 }
 0x5ca   : > { %8870 = vperm.xlu0 %10690, %v16977_v37  }
 0x5cb   : > { %v15275_v31 = vpop.permute.xlu1 %8379 }
 0x5cc   : > { %17219 = vst [vmem:[#allocation280_spill] sm:$0xff] %v15275_v31  ;;  %10658 = vset.pattern.permute.xlu1 %v17207_v0  ;;  %v15280_v15 = vpop.permute.xlu0 %8355 }
 0x5cd   : > { %8726 = vperm.xlu1 %10658, %v16934_v51  }
 0x5ce   : > { %8722 = vperm.xlu0 %10690, %v12680_v42  }
 0x5cf   : > { %v15282_v29 = vpop.permute.xlu1 %8387 }
 0x5d0   : > { %17220 = vst [vmem:[#allocation281_spill] sm:$0xff] %v15282_v29  ;;  %v15286_v35 = vpop.permute.xlu0 %8367 }
 0x5d1   : > { %8730 = vperm.xlu1 %10658, %v12953_v24   ;;  %17221 = vst [vmem:[#allocation282_spill] sm:$0xff] %v15286_v35 }
 0x5d2   : > { %8734 = vperm.xlu0 %10690, %v16937_v39  }
 0x5d3   : > { %v15288_v2 = vpop.permute.xlu1 %8395 }
 0x5d4   : > { %17222 = vst [vmem:[#allocation283_spill] sm:$0xff] %v15288_v2  ;;  %v15292_v37 = vpop.permute.xlu0 %8375 }
 0x5d5   : > { %8882 = vperm.xlu1 %10658, %v16963_v58   ;;  %17223 = vst [vmem:[#allocation284_spill] sm:$0xff] %v15292_v37  ;;  %v17331_v37 = vld [vmem:[#allocation20_spill] sm:$0xff] }
 0x5d6   : > { %8886 = vperm.xlu0 %10690, %v16983_v40  }
 0x5d7   : > { %v15294_v62 = vpop.permute.xlu1 %8403 }
 0x5d8   : > { %17224 = vst [vmem:[#allocation285_spill] sm:$0xff] %v15294_v62  ;;  %v15298_v4 = vpop.permute.xlu0 %8383 }
 0x5d9   : > { %10659 = vset.pattern.permute.xlu1 %v17212_v22  ;;  %17225 = vst [vmem:[#allocation286_spill] sm:$0xff] %v15298_v4 }
 0x5da   : > { %9076 = vperm.xlu1 %10659, %v12680_v42   ;;  %8738 = vperm.xlu0 %10690, %v12957_v45  }
 0x5db   : > { %v15301_v29 = vpop.permute.xlu1 %8411 }
 0x5dc   : > { %17226 = vst [vmem:[#allocation287_spill] sm:$0xff] %v15301_v29  ;;  %v15304_v2 = vpop.permute.xlu0 %8391 }
 0x5dd   : > { %17227 = vst [vmem:[#allocation288_spill] sm:$0xff] %v15304_v2 }
 0x5de   : > { %10660 = vset.pattern.permute.xlu1 %v17207_v0  ;;  %8750 = vperm.xlu0 %10690, %v16944_v6  }
 0x5df   : > { %8890 = vperm.xlu1 %10660, %v16967_v23   ;;  %v15308_v31 = vpop.permute.xlu1 %8419 }
 0x5e0   : > { %17228 = vst [vmem:[#allocation289_spill] sm:$0xff] %v15308_v31  ;;  %v15311_v62 = vpop.permute.xlu0 %8399 }
 0x5e1   : > { %17229 = vst [vmem:[#allocation290_spill] sm:$0xff] %v15311_v62 }
 0x5e2   : > { %8902 = vperm.xlu0 %10690, %v16989_v7  }
 0x5e3   : > { %8894 = vperm.xlu1 %10660, %v16986_v57   ;;  %v15314_v4 = vpop.permute.xlu1 %8427 }
 0x5e4   : > { %17230 = vst [vmem:[#allocation291_spill] sm:$0xff] %v15314_v4  ;;  %v15317_v42 = vpop.permute.xlu0 %8407 }
 0x5e5   : > { %17231 = vst [vmem:[#allocation292_spill] sm:$0xff] %v15317_v42 }
 0x5e6   : > { %8754 = vperm.xlu0 %10690, %v12966_v30  }
 0x5e7   : > { %10661 = vset.pattern.permute.xlu1 %v17212_v22  ;;  %v15320_v29 = vpop.permute.xlu1 %8435 }
 0x5e8   : > { %17232 = vst [vmem:[#allocation293_spill] sm:$0xff] %v15320_v29  ;;  %9088 = vperm.xlu1 %10661, %v16937_v39   ;;  %v15324_v31 = vpop.permute.xlu0 %8415 }
 0x5e9   : > { %17233 = vst [vmem:[#allocation294_spill] sm:$0xff] %v15324_v31  ;;  %v10699_v31 = vld [vmem:[%s16611_s1] sm:$0xff]  }
 0x5ea   : > { %8766 = vperm.xlu0 %10690, %v16951_v3   ;;  %10366 = vmatprep.subr.bf16.mxu0 %v10699_v31 }
 0x5eb   : > { %v15326_v2 = vpop.permute.xlu1 %8443  ;;  %10367 = vmatpush3.bf16.msra.mxu0 %v10699_v31 }
 0x5ec   : > { %17234 = vst [vmem:[#allocation295_spill] sm:$0xff] %v15326_v2  ;;  %9240 = vperm.xlu1 %10661, %v16983_v40   ;;  %v15330_v4 = vpop.permute.xlu0 %8423 }
 0x5ed   : > { %17235 = vst [vmem:[#allocation296_spill] sm:$0xff] %v15330_v4 }
 0x5ee   : > { %8918 = vperm.xlu0 %10690, %v16994_v28  }
 0x5ef   : > { %v15332_v62 = vpop.permute.xlu1 %8451 }
 0x5f0   : > { %17236 = vst [vmem:[#allocation297_spill] sm:$0xff] %v15332_v62  ;;  %9248 = vperm.xlu1 %10661, %v16986_v57   ;;  %v15336_v29 = vpop.permute.xlu0 %8431 }
 0x5f1   : > { %17237 = vst [vmem:[#allocation298_spill] sm:$0xff] %v15336_v29 }
 0x5f2   : > { %8770 = vperm.xlu0 %10690, %v16932_v38  }
 0x5f3   : > { %v15338_v42 = vpop.permute.xlu1 %8459 }
 0x5f4   : > { %17238 = vst [vmem:[#allocation299_spill] sm:$0xff] %v15338_v42  ;;  %10662 = vset.pattern.permute.xlu1 %v17207_v0  ;;  %v15343_v39 = vpop.permute.xlu0 %8439 }
 0x5f5   : > { %8742 = vperm.xlu1 %10662, %v16941_v20   ;;  %17239 = vst [vmem:[#allocation300_spill] sm:$0xff] %v15343_v39 }
 0x5f6   : > { %8930 = vperm.xlu0 %10690, %v17064_v14  }
 0x5f7   : > { %v15345_v40 = vpop.permute.xlu1 %8467 }
 0x5f8   : > { %17240 = vst [vmem:[#allocation301_spill] sm:$0xff] %v15345_v40  ;;  %v15349_v62 = vpop.permute.xlu0 %8447 }
 0x5f9   : > { %8746 = vperm.xlu1 %10662, %v12961_v12   ;;  %17241 = vst [vmem:[#allocation302_spill] sm:$0xff] %v15349_v62 }
 0x5fa   : > { %8790 = vperm.xlu0 %10690, %v16959_v53  }
 0x5fb   : > { %v15351_v57 = vpop.permute.xlu1 %8475 }
 0x5fc   : > { %17242 = vst [vmem:[#allocation303_spill] sm:$0xff] %v15351_v57  ;;  %v15355_v42 = vpop.permute.xlu0 %8455 }
 0x5fd   : > { %8898 = vperm.xlu1 %10662, %v16970_v48   ;;  %17243 = vst [vmem:[#allocation304_spill] sm:$0xff] %v15355_v42 }
 0x5fe   : > { %8794 = vperm.xlu0 %10690, %v16942_v41  }
 0x5ff   : > { %v15357_v2 = vpop.permute.xlu1 %8515 }
 0x600   : > { %v15361_v40 = vpop.permute.xlu0 %8463 }
 0x601   : > { %10663 = vset.pattern.permute.xlu1 %v17212_v22  ;;  %17244 = vst [vmem:[#allocation305_spill] sm:$0xff] %v15361_v40 }
 0x602   : > { %9092 = vperm.xlu1 %10663, %v12957_v45   ;;  %8946 = vperm.xlu0 %10690, %v17069_v59  }
 0x603   : > { %v15364_v39 = vpop.permute.xlu1 %8523 }
 0x604   : > { %17245 = vst [vmem:[#allocation306_spill] sm:$0xff] %v15364_v39  ;;  %v15367_v57 = vpop.permute.xlu0 %8471 }
 0x605   : > { %17246 = vst [vmem:[#allocation307_spill] sm:$0xff] %v15367_v57 }
 0x606   : > { %10664 = vset.pattern.permute.xlu1 %v17207_v0  ;;  %8958 = vperm.xlu0 %10690, %v17140_v50  }
 0x607   : > { %8906 = vperm.xlu1 %10664, %v16972_v61   ;;  %v15371_v62 = vpop.permute.xlu1 %8531 }
 0x608   : > { %17247 = vst [vmem:[#allocation308_spill] sm:$0xff] %v15371_v62  ;;  %v15374_v42 = vpop.permute.xlu0 %8511 }
 0x60a   : > { %8810 = vperm.xlu0 %10690, %v16949_v13  }
 0x60b   : > { %8910 = vperm.xlu1 %10664, %v16991_v60   ;;  %v15377_v40 = vpop.permute.xlu1 %8539 }
 0x60c   : > { %17248 = vst [vmem:[#allocation309_spill] sm:$0xff] %v15377_v40  ;;  %v15380_v45 = vpop.permute.xlu0 %8519 }
 0x60d   : > { %17249 = vst [vmem:[#allocation310_spill] sm:$0xff] %v15380_v45 }
 0x60e   : > { %8966 = vperm.xlu0 %10690, %v17143_v5   ;;  %v10701_v5 = vld [vmem:[%s16611_s1 + $0x10] sm:$0xff]  }
 0x60f   : > { %10665 = vset.pattern.permute.xlu1 %v17212_v22  ;;  %v15383_v57 = vpop.permute.xlu1 %8547 }
 0x610   : > { %17250 = vst [vmem:[#allocation311_spill] sm:$0xff] %v15383_v57  ;;  %9104 = vperm.xlu1 %10665, %v16944_v6   ;;  %v15387_v29 = vpop.permute.xlu0 %8527  ;;  %v10700_v6 = vld [vmem:[%s16611_s1 + $0x8] sm:$0xff]  }
 0x611   : > { %17251 = vst [vmem:[#allocation312_spill] sm:$0xff] %v15387_v29  ;;  %10368 = vmatprep.subr.bf16.mxu0 %v10700_v6 }
 0x612   : > { %8822 = vperm.xlu0 %10690, %v14358_v63   ;;  %10369 = vmatpush3.bf16.msra.mxu0 %v10700_v6  ;;  %v10702_v6 = vld [vmem:[%s16611_s1 + $0x18] sm:$0xff]  }
 0x613   : > { %v15389_v4 = vpop.permute.xlu1 %8555  ;;  %10370 = vmatprep.subr.bf16.mxu0 %v10701_v5 }
 0x614   : > { %17252 = vst [vmem:[#allocation313_spill] sm:$0xff] %v15389_v4  ;;  %9256 = vperm.xlu1 %10665, %v16989_v7   ;;  %v15396_v40 = vpop.permute.xlu0 %8535  ;;  %v6861_v4 = vlaneseq }
 0x615   : > { %17253 = vst [vmem:[#allocation314_spill] sm:$0xff] %v15396_v40  ;;  %v17318_v40 = vld [vmem:[#allocation60_spill] sm:$0xff] }
 0x616   : > { %8826 = vperm.xlu0 %10690, %v14493_v43   ;;  %10371 = vmatpush3.bf16.msra.mxu0 %v10701_v5  ;;  %v10703_v5 = vld [vmem:[%s16611_s1 + $0x20] sm:$0xff]  }
 0x617   : > { %v15398_v57 = vpop.permute.xlu1 %8563  ;;  %10372 = vmatprep.subr.bf16.mxu0 %v10702_v6 }
 0x618   : > { %17254 = vst [vmem:[#allocation315_spill] sm:$0xff] %v15398_v57  ;;  %9264 = vperm.xlu1 %10665, %v16991_v60   ;;  %v15405_v63 = vpop.permute.xlu0 %8543 }
 0x619   : > { %17255 = vst [vmem:[#allocation316_spill] sm:$0xff] %v15405_v63 }
 0x61a   : > { %8978 = vperm.xlu0 %10690, %v14433_v1   ;;  %10373 = vmatpush3.bf16.msra.mxu0 %v10702_v6 }
 0x61b   : > { %v15407_v7 = vpop.permute.xlu1 %8571  ;;  %10374 = vmatprep.subr.bf16.mxu0 %v10703_v5 }
 0x61c   : > { %17256 = vst [vmem:[#allocation317_spill] sm:$0xff] %v15407_v7  ;;  %10666 = vset.pattern.permute.xlu1 %v17207_v0  ;;  %v15415_v60 = vpop.permute.xlu0 %8551 }
 0x61d   : > { %8758 = vperm.xlu1 %10666, %v16947_v26   ;;  %17257 = vst [vmem:[#allocation318_spill] sm:$0xff] %v15415_v60 }
 0x61e   : > { %8990 = vperm.xlu0 %10690, %v14459_v19   ;;  %10375 = vmatpush3.bf16.msra.mxu0 %v10703_v5 }
 0x61f   : > { %v15417_v31 = vpop.permute.xlu1 %8579 }
 0x620   : > { %17258 = vst [vmem:[#allocation319_spill] sm:$0xff] %v15417_v31  ;;  %v15424_v43 = vpop.permute.xlu0 %8559 }
 0x621   : > { %8762 = vperm.xlu1 %10666, %v13092_v9   ;;  %17259 = vst [vmem:[#allocation320_spill] sm:$0xff] %v15424_v43 }
 0x622   : > { %10697 = vset.pattern.permute.xlu0 %v17212_v22 }
 0x623   : > { %9064 = vperm.xlu0 %10697, %v17156_v49   ;;  %v10704_v49 = vld [vmem:[%s16611_s1 + $0x28] sm:$0xff]  }
 0x624   : > { %v15427_v7 = vpop.permute.xlu1 %8710  ;;  %v15434_v31 = vpop.permute.xlu0 %8567  ;;  %10376 = vmatprep.subr.bf16.mxu0 %v10704_v49 }
 0x625   : > { %17260 = vst [vmem:[#allocation321_spill] sm:$0xff] %v15427_v7  ;;  %8914 = vperm.xlu1 %10666, %v17058_v54   ;;  %17261 = vst [vmem:[#allocation322_spill] sm:$0xff] %v15434_v31  ;;  %10377 = vmatpush3.bf16.msra.mxu0 %v10704_v49  ;;  %v17400_v7 = vld [vmem:[#allocation139_spill] sm:$0xff] }
 0x627   : > { %9068 = vperm.xlu0 %10697, %v12672_v44   ;;  %v10705_v44 = vld [vmem:[%s16611_s1 + $0x30] sm:$0xff]  }
 0x628   : > { %v15436_v57 = vpop.permute.xlu1 %8714  ;;  %v15443_v6 = vpop.permute.xlu0 %8575  ;;  %10378 = vmatprep.subr.bf16.mxu0 %v10705_v44 }
 0x629   : > { %17262 = vst [vmem:[#allocation323_spill] sm:$0xff] %v15436_v57  ;;  %10667 = vset.pattern.permute.xlu1 %v17212_v22  ;;  %17263 = vst [vmem:[#allocation324_spill] sm:$0xff] %v15443_v6  ;;  %10379 = vmatpush3.bf16.msra.mxu0 %v10705_v44 }
 0x62a   : > { %9108 = vperm.xlu1 %10667, %v12966_v30  }
 0x62b   : > { %9220 = vperm.xlu0 %10697, %v16957_v33   ;;  %v10706_v33 = vld [vmem:[%s16611_s1 + $0x38] sm:$0xff]  }
 0x62c   : > { %v15446_v43 = vpop.permute.xlu1 %8866  ;;  %v15452_v5 = vpop.permute.xlu0 %8587  ;;  %10380 = vmatprep.subr.bf16.mxu0 %v10706_v33 }
 0x62d   : > { %17264 = vst [vmem:[#allocation325_spill] sm:$0xff] %v15446_v43  ;;  %17265 = vst [vmem:[#allocation326_spill] sm:$0xff] %v15452_v5  ;;  %10381 = vmatpush3.bf16.msra.mxu0 %v10706_v33  ;;  %v17391_v43 = vld [vmem:[#allocation128_spill] sm:$0xff] }
 0x62e   : > { %10668 = vset.pattern.permute.xlu1 %v17207_v0 }
 0x62f   : > { %8922 = vperm.xlu1 %10668, %v17061_v52   ;;  %9228 = vperm.xlu0 %10697, %v16960_v34  }
 0x630   : > { %v15462_v49 = vpop.permute.xlu0 %8591 }
 0x631   : > { %v15457_v30 = vpop.permute.xlu1 %9060  ;;  %17267 = vst [vmem:[#allocation328_spill] sm:$0xff] %v15462_v49 }
 0x632   : > { %17266 = vst [vmem:[#allocation327_spill] sm:$0xff] %v15457_v30  ;;  %v17379_v30 = vld [vmem:[#allocation122_spill] sm:$0xff] }
 0x633   : > { %8926 = vperm.xlu1 %10668, %v16997_v47   ;;  %9080 = vperm.xlu0 %10697, %v16934_v51  }
 0x634   : > { %v15466_v5 = vpop.permute.xlu0 %8611 }
 0x635   : > { %17268 = vst [vmem:[#allocation329_spill] sm:$0xff] %v15466_v5 }
 0x636   : > { %v15468_v6 = vpop.permute.xlu1 %8874 }
 0x637   : > { %17269 = vst [vmem:[#allocation330_spill] sm:$0xff] %v15468_v6  ;;  %10669 = vset.pattern.permute.xlu1 %v17212_v22  ;;  %9084 = vperm.xlu0 %10697, %v12953_v24  }
 0x638   : > { %9120 = vperm.xlu1 %10669, %v16951_v3   ;;  %v15473_v34 = vpop.permute.xlu0 %8615 }
 0x639   : > { %17270 = vst [vmem:[#allocation331_spill] sm:$0xff] %v15473_v34 }
 0x63a   : > { %v15475_v44 = vpop.permute.xlu1 %8878 }
 0x63b   : > { %17271 = vst [vmem:[#allocation332_spill] sm:$0xff] %v15475_v44  ;;  %9236 = vperm.xlu0 %10697, %v16963_v58  }
 0x63c   : > { %9272 = vperm.xlu1 %10669, %v16994_v28   ;;  %v15479_v33 = vpop.permute.xlu0 %8623 }
 0x63d   : > { %17272 = vst [vmem:[#allocation333_spill] sm:$0xff] %v15479_v33 }
 0x63f   : > { %v15481_v51 = vpop.permute.xlu1 %9072  ;;  %9244 = vperm.xlu0 %10697, %v16967_v23  }
 0x640   : > { %17273 = vst [vmem:[#allocation334_spill] sm:$0xff] %v15481_v51  ;;  %9280 = vperm.xlu1 %10669, %v16997_v47   ;;  %v17277_v47 = vld [vmem:[#allocation33_spill] sm:$0xff] }
 0x641   : > { %v15485_v5 = vpop.permute.xlu0 %8706  ;;  %v17355_v51 = vld [vmem:[#allocation5_spill] sm:$0xff] }
 0x643   : > { %v15487_v3 = vpop.permute.xlu1 %9224  ;;  %9096 = vperm.xlu0 %10697, %v16941_v20  }
 0x644   : > { %17274 = vst [vmem:[#allocation335_spill] sm:$0xff] %v15487_v3  ;;  %10670 = vset.pattern.permute.xlu1 %v17207_v0 }
 0x645   : > { %8774 = vperm.xlu1 %10670, %v16953_v16   ;;  %v15492_v24 = vpop.permute.xlu0 %8718 }
 0x646   : > { %17275 = vst [vmem:[#allocation336_spill] sm:$0xff] %v15492_v24 }
 0x647   : > { %v15494_v28 = vpop.permute.xlu1 %9232  ;;  %9100 = vperm.xlu0 %10697, %v12961_v12  }
 0x648   : > { %17276 = vst [vmem:[#allocation337_spill] sm:$0xff] %v15494_v28 }
 0x649   : > { %10671 = vset.pattern.permute.xlu1 %v17154_v11  ;;  %v15499_v58 = vpop.permute.xlu0 %8870 }
 0x64a   : > { %8583 = vperm.xlu1 %10671, %v17277_v47   ;;  %17278 = vst [vmem:[#allocation33_spill] sm:$0xff] %v15499_v58 }
 0x64b   : > { %9252 = vperm.xlu0 %10697, %v16970_v48  }
 0x64c   : > { %v15501_v23 = vpop.permute.xlu1 %8726 }
 0x64d   : > { %17279 = vst [vmem:[#allocation338_spill] sm:$0xff] %v15501_v23  ;;  %v15505_v20 = vpop.permute.xlu0 %8722 }
 0x64e   : > { %10672 = vset.pattern.permute.xlu1 %v17207_v0  ;;  %17280 = vst [vmem:[#allocation339_spill] sm:$0xff] %v15505_v20 }
 0x64f   : > { %8778 = vperm.xlu1 %10672, %v16935_v21   ;;  %9260 = vperm.xlu0 %10697, %v16972_v61  }
 0x650   : > { %v15508_v33 = vpop.permute.xlu1 %8730 }
 0x651   : > { %17281 = vst [vmem:[#allocation340_spill] sm:$0xff] %v15508_v33  ;;  %v15511_v12 = vpop.permute.xlu0 %8734 }
 0x652   : > { %17282 = vst [vmem:[#allocation341_spill] sm:$0xff] %v15511_v12 }
 0x653   : > { %8782 = vperm.xlu1 %10672, %v16955_v17   ;;  %9112 = vperm.xlu0 %10697, %v16947_v26  }
 0x654   : > { %v15514_v34 = vpop.permute.xlu1 %8882 }
 0x655   : > { %17283 = vst [vmem:[#allocation342_spill] sm:$0xff] %v15514_v34  ;;  %v15517_v49 = vpop.permute.xlu0 %8886 }
 0x656   : > { %17284 = vst [vmem:[#allocation343_spill] sm:$0xff] %v15517_v49 }
 0x657   : > { %8934 = vperm.xlu1 %10672, %v13087_v32   ;;  %9116 = vperm.xlu0 %10697, %v13092_v9  }
 0x659   : > { %v15521_v48 = vpop.permute.xlu1 %9076  ;;  %v15523_v31 = vpop.permute.xlu0 %8738 }
 0x65a   : > { %17285 = vst [vmem:[#allocation344_spill] sm:$0xff] %v15521_v48  ;;  %17286 = vst [vmem:[#allocation345_spill] sm:$0xff] %v15523_v31 }
 0x65b   : > { %10673 = vset.pattern.permute.xlu1 %v17212_v22  ;;  %9268 = vperm.xlu0 %10697, %v17058_v54  }
 0x65c   : > { %9124 = vperm.xlu1 %10673, %v16932_v38  }
 0x65d   : > { %v15530_v60 = vpop.permute.xlu0 %8750 }
 0x65e   : > { %v15528_v61 = vpop.permute.xlu1 %8890  ;;  %17288 = vst [vmem:[#allocation347_spill] sm:$0xff] %v15530_v60  ;;  %v15545_v60 = vand.u32 127, %v6861_v4 }
 0x65f   : > { %17287 = vst [vmem:[#allocation346_spill] sm:$0xff] %v15528_v61  ;;  %9276 = vperm.xlu0 %10697, %v17061_v52  }
 0x660   : > { %10674 = vset.pattern.permute.xlu1 %v17207_v0  ;;  %v8702_v52 = vshra.s32 %v15545_v60, 1 }
 0x661   : > { %8938 = vperm.xlu1 %10674, %v17277_v47   ;;  %v15537_v26 = vpop.permute.xlu0 %8902 }
 0x662   : > { %v15535_v9 = vpop.permute.xlu1 %8894  ;;  %17290 = vst [vmem:[#allocation349_spill] sm:$0xff] %v15537_v26 }
 0x663   : > { %17289 = vst [vmem:[#allocation348_spill] sm:$0xff] %v15535_v9  ;;  %9128 = vperm.xlu0 %10697, %v16953_v16   ;;  %v8703_v16 = vand.u32 1, %v8702_v52  ;;  %v6863_v52 = vshra.s32 %v15545_v60, 6 }
 0x665   : > { %8942 = vperm.xlu1 %10674, %v17135_v36   ;;  %v15541_v54 = vpop.permute.xlu0 %8754 }
 0x666   : > { %17291 = vst [vmem:[#allocation350_spill] sm:$0xff] %v15541_v54 }
 0x667   : > { %v15543_v38 = vpop.permute.xlu1 %9088  ;;  %9132 = vperm.xlu0 %10697, %v16935_v21   ;;  %v15562_v21 = vcvt.s32.f32 %v8703_v16  ;;  %v6864_v16 = vand.u32 1, %v6863_v52 }
 0x668   : > { %17292 = vst [vmem:[#allocation351_spill] sm:$0xff] %v15543_v38  ;;  %v7282_v38 = vshra.s32 %v15545_v60, 5 }
 0x669   : > { %10675 = vset.pattern.permute.xlu1 %v17212_v22  ;;  %v15551_v26 = vpop.permute.xlu0 %8766 }
 0x66a   : > { %9136 = vperm.xlu1 %10675, %v16955_v17   ;;  %17293 = vst [vmem:[#allocation352_spill] sm:$0xff] %v15551_v26 }
 0x66b   : > { %v15553_v63 = vpop.permute.xlu1 %9240  ;;  %9284 = vperm.xlu0 %10697, %v17064_v14   ;;  %v17298_v14 = vld [vmem:[#allocation35_spill] sm:$0xff] }
 0x66c   : > { %17294 = vst [vmem:[#allocation353_spill] sm:$0xff] %v15553_v63 }
 0x66d   : > { %v15557_v54 = vpop.permute.xlu0 %8918 }
 0x66e   : > { %9288 = vperm.xlu1 %10675, %v13087_v32   ;;  %17295 = vst [vmem:[#allocation354_spill] sm:$0xff] %v15557_v54 }
 0x66f   : > { %v15559_v4 = vpop.permute.xlu1 %9248  ;;  %9292 = vperm.xlu0 %10697, %v17277_v47  }
 0x670   : > { %17296 = vst [vmem:[#allocation355_spill] sm:$0xff] %v15559_v4  ;;  %v15586_v4 = vcvt.s32.f32 %v6864_v16 }
 0x671   : > { %v8771_v17 = vpop.permute.xlu0 %8770 }
 0x672   : > { %9296 = vperm.xlu1 %10675, %v17135_v36   ;;  %v8849_v26 = vmul.f32 %v8771_v17, %v15562_v21  ;;  %17304 = vst [vmem:[#allocation361_spill] sm:$0xff] %v15586_v4 }
 0x673   : > { %9140 = vperm.xlu0 %10697, %v16939_v27  }
 0x674   : > { %v15566_v31 = vpop.permute.xlu1 %8742 }
 0x675   : > { %17297 = vst [vmem:[#allocation356_spill] sm:$0xff] %v15566_v31  ;;  %v8931_v32 = vpop.permute.xlu0 %8930 }
 0x676   : > { %10676 = vset.pattern.permute.xlu1 %v17154_v11  ;;  %v15572_v54 = vadd.f32 %v8931_v32, %v8849_v26  ;;  %v17305_v26 = vld [vmem:[#allocation41_spill] sm:$0xff] }
 0x677   : > { %8595 = vperm.xlu1 %10676, %v17298_v14   ;;  %9300 = vperm.xlu0 %10697, %v17069_v59  }
 0x678   : > { %17299 = vst [vmem:[#allocation35_spill] sm:$0xff] %v15572_v54  ;;  %v15574_v47 = vpop.permute.xlu1 %8746 }
 0x679   : > { %17300 = vst [vmem:[#allocation357_spill] sm:$0xff] %v15574_v47  ;;  %v15577_v36 = vpop.permute.xlu0 %8790  ;;  %v17311_v47 = vld [vmem:[#allocation30_spill] sm:$0xff] }
 0x67a   : > { %17301 = vst [vmem:[#allocation358_spill] sm:$0xff] %v15577_v36  ;;  %v17309_v36 = vld [vmem:[#allocation78_spill] sm:$0xff] }
 0x67b   : > { %10677 = vset.pattern.permute.xlu1 %v17207_v0  ;;  %9312 = vperm.xlu0 %10697, %v17140_v50   ;;  %v7058_v54 = vmul.f32 %v17309_v36, %v15586_v4  ;;  %v17315_v36 = vld [vmem:[#allocation75_spill] sm:$0xff] }
 0x67c   : > { %8786 = vperm.xlu1 %10677, %v16939_v27   ;;  %v15581_v17 = vpop.permute.xlu1 %8898  ;;  %v17308_v27 = vld [vmem:[#allocation69_spill] sm:$0xff] }
 0x67d   : > { %17302 = vst [vmem:[#allocation359_spill] sm:$0xff] %v15581_v17  ;;  %v15584_v31 = vpop.permute.xlu0 %8794  ;;  %v7060_v52 = vmul.f32 %v17308_v27, %v15586_v4  ;;  %v7059_v17 = vmul.f32 %v17311_v47, %v15586_v4  ;;  %v17313_v27 = vld [vmem:[#allocation34_spill] sm:$0xff] }
 0x67e   : > { %17303 = vst [vmem:[#allocation360_spill] sm:$0xff] %v15584_v31  ;;  %v17310_v31 = vld [vmem:[#allocation71_spill] sm:$0xff]  ;;  %v7062_v9 = vmul.f32 %v17313_v27, %v15586_v4  ;;  %v17317_v47 = vld [vmem:[#allocation62_spill] sm:$0xff] }
 0x67f   : > { %9160 = vperm.xlu0 %10697, %v16965_v10   ;;  %v7061_v16 = vmul.f32 %v17310_v31, %v15586_v4  ;;  %v7065_v31 = vmul.f32 %v17315_v36, %v15586_v4  ;;  %v15617_v48 = vadd.f32 %v17317_v47, %v7060_v52  ;;  %v17321_v27 = vld [vmem:[#allocation55_spill] sm:$0xff]  ;;  %v17323_v36 = vld [vmem:[#allocation42_spill] sm:$0xff]  ;;  %v7283_v52 = vand.u32 1, %v7282_v38 }
 0x680   : > { %10678 = vset.pattern.permute.xlu1 %v17154_v11  ;;  %v17330_v38 = vld [vmem:[#allocation58_spill] sm:$0xff] }
 0x681   : > { %8599 = vperm.xlu1 %10678, %v17305_v26   ;;  %v15590_v59 = vpop.permute.xlu1 %9092  ;;  %v15593_v32 = vpop.permute.xlu0 %8946  ;;  %v15627_v34 = vadd.f32 %v17321_v27, %v7061_v16  ;;  %v17327_v16 = vld [vmem:[#allocation79_spill] sm:$0xff] }
 0x682   : > { %17306 = vst [vmem:[#allocation362_spill] sm:$0xff] %v15590_v59  ;;  %17307 = vst [vmem:[#allocation363_spill] sm:$0xff] %v15593_v32  ;;  %v17312_v32 = vld [vmem:[#allocation73_spill] sm:$0xff] }
 0x683   : > { %9164 = vperm.xlu0 %10697, %v16949_v13   ;;  %v7063_v59 = vmul.f32 %v17312_v32, %v15586_v4  ;;  %v17319_v13 = vld [vmem:[#allocation38_spill] sm:$0xff]  ;;  %v17320_v32 = vld [vmem:[#allocation77_spill] sm:$0xff] }
 0x684   : > { %v7064_v33 = vmul.f32 %v17319_v13, %v15586_v4  ;;  %v7067_v12 = vmul.f32 %v17320_v32, %v15586_v4  ;;  %v17326_v13 = vld [vmem:[#allocation66_spill] sm:$0xff]  ;;  %v7069_v32 = vmul.f32 %v17327_v16, %v15586_v4  ;;  %v17334_v16 = vld [vmem:[#allocation68_spill] sm:$0xff] }
 0x685   : > { %8603 = vperm.xlu1 %10678, %v17140_v50   ;;  %v15614_v63 = vpop.permute.xlu0 %8958  ;;  %v15620_v50 = vadd.f32 %v17318_v40, %v7058_v54  ;;  %v17324_v40 = vld [vmem:[#allocation45_spill] sm:$0xff]  ;;  %v15640_v10 = vadd.f32 %v17326_v13, %v7062_v9  ;;  %v7637_v13 = vshra.s32 %v15545_v60, 4 }
 0x686   : > { %v15610_v61 = vpop.permute.xlu1 %8906  ;;  %17316 = vst [vmem:[#allocation78_spill] sm:$0xff] %v15614_v63  ;;  %v7066_v63 = vmul.f32 %v17323_v36, %v15586_v4  ;;  %v17325_v54 = vld [vmem:[#allocation57_spill] sm:$0xff]  ;;  %v15650_v36 = vadd.f32 %v17330_v38, %v7065_v31  ;;  %v15660_v29 = vadd.f32 %v17334_v16, %v7064_v33  ;;  %v17337_v38 = vld [vmem:[#allocation32_spill] sm:$0xff]  ;;  %v15676_v33 = vcvt.s32.f32 %v7283_v52  ;;  %v17348_v52 = vld [vmem:[#allocation74_spill] sm:$0xff] }
 0x687   : > { %17314 = vst [vmem:[#allocation69_spill] sm:$0xff] %v15610_v61  ;;  %v17322_v61 = vld [vmem:[#allocation54_spill] sm:$0xff]  ;;  %9316 = vperm.xlu0 %10697, %v17324_v40   ;;  %v15637_v47 = vadd.f32 %v17325_v54, %v7063_v59  ;;  %v7071_v59 = vmul.f32 %v17331_v37, %v15586_v4  ;;  %v7072_v20 = vmul.f32 %v17337_v38, %v15586_v4 }
 0x688   : > { %v15630_v49 = vadd.f32 %v17322_v61, %v7059_v17  ;;  %v17328_v61 = vld [vmem:[#allocation25_spill] sm:$0xff]  ;;  %v17332_v54 = vld [vmem:[#allocation26_spill] sm:$0xff]  ;;  %17341 = vst [vmem:[#allocation73_spill] sm:$0xff] %v15676_v33 }
 0x689   : > { %10679 = vset.pattern.permute.xlu1 %v17207_v0  ;;  %v7068_v17 = vmul.f32 %v17328_v61, %v15586_v4  ;;  %v7070_v9 = vmul.f32 %v17332_v54, %v15586_v4  ;;  %v15657_v62 = vpop.permute.xlu0 %8810  ;;  %v17335_v61 = vld [vmem:[#allocation59_spill] sm:$0xff]  ;;  %v17338_v37 = vld [vmem:[#allocation70_spill] sm:$0xff]  ;;  %v17339_v54 = vld [vmem:[#allocation36_spill] sm:$0xff] }
 0x68a   : > { %8798 = vperm.xlu1 %10679, %v16962_v56   ;;  %v15647_v27 = vpop.permute.xlu1 %8910  ;;  %17333 = vst [vmem:[#allocation30_spill] sm:$0xff] %v15657_v62  ;;  %v15663_v23 = vadd.f32 %v17335_v61, %v7067_v12  ;;  %v15670_v8 = vadd.f32 %v17338_v37, %v7066_v63  ;;  %v7074_v35 = vmul.f32 %v17339_v54, %v15586_v4  ;;  %v17340_v62 = vld [vmem:[#allocation40_spill] sm:$0xff]  ;;  %v17342_v12 = vld [vmem:[#allocation61_spill] sm:$0xff]  ;;  %v17344_v38 = vld [vmem:[#allocation22_spill] sm:$0xff] }
 0x68b   : > { %17329 = vst [vmem:[#allocation71_spill] sm:$0xff] %v15647_v27  ;;  %v17336_v27 = vld [vmem:[#allocation21_spill] sm:$0xff]  ;;  %v7076_v28 = vmul.f32 %v17340_v62, %v15586_v4  ;;  %9324 = vperm.xlu0 %10697, %v14253_v18   ;;  %v15680_v16 = vadd.f32 %v17342_v12, %v7069_v32  ;;  %v7075_v63 = vmul.f32 %v17344_v38, %v15586_v4  ;;  %v17345_v37 = vld [vmem:[#allocation23_spill] sm:$0xff]  ;;  %v7638_v18 = vand.u32 1, %v7637_v13 }
 0x68c   : > { %v7073_v31 = vmul.f32 %v17336_v27, %v15586_v4  ;;  %v17343_v27 = vld [vmem:[#allocation72_spill] sm:$0xff]  ;;  %v7077_v40 = vmul.f32 %v17345_v37, %v15586_v4  ;;  %v17346_v54 = vld [vmem:[#allocation65_spill] sm:$0xff]  ;;  %v15694_v11 = vadd.f32 %v17348_v52, %v7070_v9  ;;  %v17349_v32 = vld [vmem:[#allocation99_spill] sm:$0xff] }
 0x68d   : > { %v15683_v61 = vadd.f32 %v17343_v27, %v7068_v17  ;;  %v15691_v62 = vadd.f32 %v17346_v54, %v7071_v59  ;;  %v7413_v12 = vmul.f32 %v17349_v32, %v15676_v33  ;;  %v15698_v17 = vpop.permute.xlu0 %8966  ;;  %v17352_v38 = vld [vmem:[#allocation67_spill] sm:$0xff]  ;;  %v17354_v37 = vld [vmem:[#allocation76_spill] sm:$0xff]  ;;  %v15709_v59 = vadd.f32 %v17355_v51, %v7075_v63  ;;  %v17360_v13 = vld [vmem:[#allocation85_spill] sm:$0xff] }
 0x68e   : > { %8950 = vperm.xlu1 %10679, %v17298_v14   ;;  %17350 = vst [vmem:[#allocation75_spill] sm:$0xff] %v15698_v17  ;;  %v15703_v44 = vadd.f32 %v17352_v38, %v7073_v31  ;;  %v15706_v4 = vadd.f32 %v17354_v37, %v7072_v20  ;;  %v17357_v54 = vld [vmem:[#allocation7_spill] sm:$0xff]  ;;  %v17359_v52 = vld [vmem:[#allocation24_spill] sm:$0xff]  ;;  %v15718_v32 = vadd.f32 %v17360_v13, %v7076_v28  ;;  %v17361_v17 = vld [vmem:[#allocation86_spill] sm:$0xff] }
 0x68f   : > { %17347 = vst [vmem:[#allocation34_spill] sm:$0xff] %v15691_v62  ;;  %v15700_v27 = vpop.permute.xlu1 %9104  ;;  %17356 = vst [vmem:[#allocation38_spill] sm:$0xff] %v15709_v59  ;;  %v15712_v9 = vadd.f32 %v17357_v54, %v7077_v40  ;;  %v15715_v62 = vadd.f32 %v17359_v52, %v7074_v35  ;;  %v17362_v31 = vld [vmem:[#allocation88_spill] sm:$0xff]  ;;  %9172 = vperm.xlu0 %10697, %v14439_v46   ;;  %v17363_v51 = vld [vmem:[#allocation90_spill] sm:$0xff]  ;;  %v15738_v59 = vcvt.s32.f32 %v7638_v18 }
 0x690   : > { %17351 = vst [vmem:[#allocation62_spill] sm:$0xff] %v15700_v27  ;;  %17353 = vst [vmem:[#allocation60_spill] sm:$0xff] %v15703_v44  ;;  %v7414_v27 = vmul.f32 %v17361_v17, %v15676_v33  ;;  %v7415_v38 = vmul.f32 %v17362_v31, %v15676_v33  ;;  %v7417_v20 = vmul.f32 %v17363_v51, %v15676_v33  ;;  %v17364_v40 = vld [vmem:[#allocation92_spill] sm:$0xff]  ;;  %v17365_v35 = vld [vmem:[#allocation94_spill] sm:$0xff] }
 0x691   : > { %17358 = vst [vmem:[#allocation77_spill] sm:$0xff] %v15712_v9  ;;  %v7419_v63 = vmul.f32 %v17364_v40, %v15676_v33  ;;  %v7421_v37 = vmul.f32 %v17365_v35, %v15676_v33  ;;  %v17366_v28 = vld [vmem:[#allocation96_spill] sm:$0xff]  ;;  %v17367_v17 = vld [vmem:[#allocation98_spill] sm:$0xff]  ;;  %v15740_v51 = vpop.permute.xlu0 %8822  ;;  %v17372_v35 = vld [vmem:[#allocation101_spill] sm:$0xff] }
 0x692   : > { %v7423_v54 = vmul.f32 %v17366_v28, %v15676_v33  ;;  %10680 = vset.pattern.permute.xlu1 %v17212_v22  ;;  %v7425_v52 = vmul.f32 %v17367_v17, %v15676_v33  ;;  %v17368_v13 = vld [vmem:[#allocation118_spill] sm:$0xff]  ;;  %v17369_v46 = vld [vmem:[#allocation120_spill] sm:$0xff]  ;;  %17370 = vst [vmem:[#allocation55_spill] sm:$0xff] %v15740_v51  ;;  %v7416_v28 = vmul.f32 %v17372_v35, %v15676_v33  ;;  %v17373_v44 = vld [vmem:[#allocation103_spill] sm:$0xff] }
 0x693   : > { %v7573_v31 = vadd.f32 %v17368_v13, %v7413_v12  ;;  %v7575_v9 = vadd.f32 %v17369_v46, %v7415_v38  ;;  %9144 = vperm.xlu1 %10680, %v16959_v53   ;;  %v15743_v40 = vpop.permute.xlu1 %9256  ;;  %v7418_v6 = vmul.f32 %v17373_v44, %v15676_v33  ;;  %v17374_v17 = vld [vmem:[#allocation100_spill] sm:$0xff]  ;;  %v17375_v12 = vld [vmem:[#allocation102_spill] sm:$0xff]  ;;  %v17376_v18 = vld [vmem:[#allocation105_spill] sm:$0xff]  ;;  %v7577_v35 = vadd.f32 %v17379_v30, %v7417_v20 }
 0x694   : > { %17371 = vst [vmem:[#allocation54_spill] sm:$0xff] %v15743_v40  ;;  %v7427_v3 = vmul.f32 %v17374_v17, %v15676_v33  ;;  %v7429_v46 = vmul.f32 %v17375_v12, %v15676_v33  ;;  %v7420_v38 = vmul.f32 %v17376_v18, %v15676_v33  ;;  %v17377_v13 = vld [vmem:[#allocation107_spill] sm:$0xff]  ;;  %v17378_v51 = vld [vmem:[#allocation104_spill] sm:$0xff]  ;;  %9332 = vperm.xlu0 %10697, %v14433_v1   ;;  %v17380_v44 = vld [vmem:[#allocation109_spill] sm:$0xff]  ;;  %v7992_v18 = vshra.s32 %v15545_v60, 3 }
 0x695   : > { %v7422_v53 = vmul.f32 %v17377_v13, %v15676_v33  ;;  %v7431_v40 = vmul.f32 %v17378_v51, %v15676_v33  ;;  %v7424_v45 = vmul.f32 %v17380_v44, %v15676_v33  ;;  %v17381_v17 = vld [vmem:[#allocation111_spill] sm:$0xff]  ;;  %v17382_v12 = vld [vmem:[#allocation113_spill] sm:$0xff]  ;;  %v15777_v1 = vmul.f32 %v7573_v31, %v15620_v50  ;;  %v15782_v44 = vpop.permute.xlu0 %8826 }
 0x696   : > { %v7426_v57 = vmul.f32 %v17381_v17, %v15676_v33  ;;  %v7428_v39 = vmul.f32 %v17382_v12, %v15676_v33  ;;  %v17383_v13 = vld [vmem:[#allocation115_spill] sm:$0xff]  ;;  %v17385_v51 = vld [vmem:[#allocation117_spill] sm:$0xff]  ;;  %v15780_v20 = vmul.f32 %v7575_v9, %v15617_v48  ;;  %17387 = vst [vmem:[#allocation66_spill] sm:$0xff] %v15782_v44  ;;  %v17389_v12 = vld [vmem:[#allocation124_spill] sm:$0xff]  ;;  %v7583_v25 = vadd.f32 %v17391_v43, %v7423_v54 }
 0x697   : > { %v15770_v58 = vmul.f32 %v17383_v13, %v15676_v33  ;;  %v15774_v30 = vmul.f32 %v17385_v51, %v15676_v33  ;;  %10681 = vset.pattern.permute.xlu1 %v17207_v0  ;;  %v15785_v17 = vpop.permute.xlu1 %9264  ;;  %v7579_v24 = vadd.f32 %v17389_v12, %v7419_v63  ;;  %v17390_v13 = vld [vmem:[#allocation126_spill] sm:$0xff]  ;;  %v8347_v51 = vshra.s32 %v15545_v60, 2  ;;  %v17392_v50 = vld [vmem:[#allocation131_spill] sm:$0xff]  ;;  %v17395_v33 = vld [vmem:[#allocation132_spill] sm:$0xff] }
 0x698   : > { %17388 = vst [vmem:[#allocation79_spill] sm:$0xff] %v15785_v17  ;;  %8954 = vperm.xlu1 %10681, %v17305_v26   ;;  %v7574_v31 = vadd.f32 %v17392_v50, %v7414_v27  ;;  %v15794_v48 = vmul.f32 %v7577_v35, %v15640_v10  ;;  %v17394_v9 = vld [vmem:[#allocation130_spill] sm:$0xff]  ;;  %9344 = vperm.xlu0 %10697, %v14459_v19   ;;  %v17396_v63 = vld [vmem:[#allocation133_spill] sm:$0xff]  ;;  %v7993_v17 = vand.u32 1, %v7992_v18  ;;  %v17402_v35 = vld [vmem:[#allocation136_spill] sm:$0xff] }
 0x699   : > { %17384 = vst [vmem:[#allocation42_spill] sm:$0xff] %v15770_v58  ;;  %17386 = vst [vmem:[#allocation57_spill] sm:$0xff] %v15774_v30  ;;  %v7581_v58 = vadd.f32 %v17390_v13, %v7421_v37  ;;  %v7585_v44 = vadd.f32 %v17394_v9, %v7425_v52  ;;  %v7587_v30 = vadd.f32 %v17395_v33, %v7427_v3  ;;  %v17397_v37 = vld [vmem:[#allocation135_spill] sm:$0xff]  ;;  %v17398_v43 = vld [vmem:[#allocation134_spill] sm:$0xff]  ;;  %v15806_v52 = vpop.permute.xlu0 %8978 }
 0x69a   : > { %17393 = vst [vmem:[#allocation25_spill] sm:$0xff] %v15794_v48  ;;  %v7576_v12 = vadd.f32 %v17396_v63, %v7416_v28  ;;  %v7578_v13 = vadd.f32 %v17397_v37, %v7418_v6  ;;  %v7589_v54 = vadd.f32 %v17398_v43, %v7429_v46  ;;  %v17399_v0 = vld [vmem:[#allocation137_spill] sm:$0xff]  ;;  %v7582_v27 = vadd.f32 %v17400_v7, %v7422_v53  ;;  %v17406_v46 = vld [vmem:[#allocation150_spill] sm:$0xff]  ;;  %v17412_v9 = vld [vmem:[#allocation152_spill] sm:$0xff] }
 0x69b   : > { %v7580_v26 = vadd.f32 %v17399_v0, %v7420_v38  ;;  %v17401_v50 = vld [vmem:[#allocation141_spill] sm:$0xff]  ;;  %v7591_v48 = vadd.f32 %v17402_v35, %v7431_v40  ;;  %v15809_v3 = vmul.f32 %v7579_v24, %v15660_v29  ;;  %v15812_v33 = vmul.f32 %v7581_v58, %v15670_v8  ;;  %v17403_v29 = vld [vmem:[#allocation159_spill] sm:$0xff] }
 0x69c   : > { %v7584_v10 = vadd.f32 %v17401_v50, %v7424_v45  ;;  %v15815_v6 = vmul.f32 %v7583_v25, %v15683_v61  ;;  %v8348_v28 = vand.u32 1, %v8347_v51  ;;  %10682 = vset.pattern.permute.xlu1 %v17212_v22  ;;  %v15818_v0 = vpop.permute.xlu1 %8758  ;;  %v7606_v45 = vmul.f32 %v7574_v31, %v15630_v49  ;;  %v17411_v31 = vld [vmem:[#allocation27_spill] sm:$0xff] }
 0x69d   : > { %v15822_v7 = vmul.f32 %v7585_v44, %v15694_v11  ;;  %v15825_v40 = vmul.f32 %v7587_v30, %v15706_v4  ;;  %v7769_v8 = vmul.f32 %v17403_v29, %v15738_v59  ;;  %9148 = vperm.xlu1 %10682, %v16942_v41   ;;  %v7608_v25 = vmul.f32 %v7576_v12, %v15627_v34  ;;  %v15851_v34 = vpop.permute.xlu0 %8990  ;;  %v17410_v44 = vld [vmem:[#allocation180_spill] sm:$0xff]  ;;  %v17413_v12 = vld [vmem:[#allocation189_spill] sm:$0xff]  ;;  %v17415_v43 = vld [vmem:[#allocation191_spill] sm:$0xff] }
 0x69e   : > { %v15832_v24 = vmul.f32 %v7578_v13, %v15637_v47  ;;  %v15835_v58 = vmul.f32 %v7589_v54, %v15715_v62  ;;  %v15837_v49 = vcvt.s32.f32 %v7993_v17  ;;  %v15840_v11 = vmul.f32 %v7580_v26, %v15650_v36  ;;  %17404 = vst [vmem:[#allocation58_spill] sm:$0xff] %v15851_v34  ;;  %v17405_v47 = vld [vmem:[#allocation37_spill] sm:$0xff]  ;;  %v17407_v26 = vld [vmem:[#allocation219_spill] sm:$0xff]  ;;  %v17419_v29 = vld [vmem:[#allocation272_spill] sm:$0xff] }
 0x69f   : > { %v15843_v4 = vmul.f32 %v7582_v27, %v15663_v23  ;;  %v15846_v61 = vmul.f32 %v7584_v10, %v15680_v16  ;;  %v15849_v41 = vmul.f32 %v7591_v48, %v15718_v32  ;;  %v7768_v62 = vmul.f32 %v17405_v47, %v15738_v59  ;;  %v17408_v16 = vld [vmem:[#allocation19_spill] sm:$0xff]  ;;  %v17409_v32 = vld [vmem:[#allocation148_spill] sm:$0xff] }
 0x6a0   : > { %v7771_v38 = vmul.f32 %v17406_v46, %v15738_v59  ;;  %v8123_v36 = vmul.f32 %v17407_v26, %v15837_v49  ;;  %v15859_v53 = vcvt.s32.f32 %v8348_v28  ;;  %v15861_v23 = vpop.permute.xlu1 %8762  ;;  %v15864_v18 = vadd.f32 %v17408_v16, %v7426_v57  ;;  %v17414_v57 = vld [vmem:[#allocation182_spill] sm:$0xff]  ;;  %v17416_v27 = vld [vmem:[#allocation39_spill] sm:$0xff] }
 0x6a1   : > { %v7770_v30 = vmul.f32 %v17409_v32, %v15738_v59  ;;  %v7929_v17 = vadd.f32 %v17410_v44, %v7769_v8  ;;  %v9057_v51 = vand.u32 1, %v15545_v60  ;;  %9152 = vperm.xlu1 %10682, %v16962_v56   ;;  %v15872_v48 = vadd.f32 %v17411_v31, %v7428_v39  ;;  %v17417_v60 = vld [vmem:[#allocation212_spill] sm:$0xff]  ;;  %v17418_v39 = vld [vmem:[#allocation18_spill] sm:$0xff]  ;;  %v17421_v32 = vld [vmem:[#allocation249_spill] sm:$0xff] }
 0x6a2   : > { %v15876_v63 = vmul.f32 %v17412_v9, %v15738_v59  ;;  %v7928_v37 = vadd.f32 %v17413_v12, %v7768_v62  ;;  %v7931_v13 = vadd.f32 %v17414_v57, %v7771_v38  ;;  %v8124_v50 = vmul.f32 %v17416_v27, %v15837_v49  ;;  %v9065_v62 = vpop.permute.xlu0 %9064  ;;  %v17420_v38 = vld [vmem:[#allocation161_spill] sm:$0xff]  ;;  %v17422_v44 = vld [vmem:[#allocation242_spill] sm:$0xff] }
 0x6a3   : > { %v7930_v54 = vadd.f32 %v17415_v43, %v7770_v30  ;;  %v8125_v10 = vmul.f32 %v17417_v60, %v15837_v49  ;;  %v8479_v56 = vmul.f32 %v15280_v15, %v15859_v53  ;;  %v8126_v35 = vmul.f32 %v17418_v39, %v15837_v49  ;;  %v17423_v57 = vld [vmem:[#allocation321_spill] sm:$0xff] }
 0x6a4   : > { %v8283_v28 = vadd.f32 %v15151_v55, %v8123_v36  ;;  %v8478_v8 = vmul.f32 %v17419_v29, %v15859_v53  ;;  %v8833_v47 = vmul.f32 %v15485_v5, %v15562_v21  ;;  %v15894_v46 = vpop.permute.xlu1 %8914  ;;  %v7772_v26 = vmul.f32 %v17420_v38, %v15738_v59  ;;  %v17429_v60 = vld [vmem:[#allocation33_spill] sm:$0xff]  ;;  %v17431_v29 = vld [vmem:[#allocation306_spill] sm:$0xff] }
 0x6a5   : > { %v7961_v16 = vmul.f32 %v7929_v17, %v7606_v45  ;;  %v8284_v15 = vadd.f32 %v17421_v32, %v8124_v50  ;;  %v15899_v30 = vcvt.s32.f32 %v9057_v51  ;;  %9304 = vperm.xlu1 %10682, %v17298_v14   ;;  %v7960_v55 = vmul.f32 %v7928_v37, %v15777_v1  ;;  %v17424_v51 = vld [vmem:[#allocation251_spill] sm:$0xff]  ;;  %v17425_v14 = vld [vmem:[#allocation276_spill] sm:$0xff]  ;;  %v17433_v38 = vld [vmem:[#allocation310_spill] sm:$0xff] }
 0x6a6   : > { %v7963_v36 = vmul.f32 %v7931_v13, %v7608_v25  ;;  %v8285_v31 = vadd.f32 %v17422_v44, %v8125_v10  ;;  %v8638_v5 = vadd.f32 %v15374_v42, %v8478_v8  ;;  %v7962_v9 = vmul.f32 %v7930_v54, %v15780_v20  ;;  %v17426_v25 = vld [vmem:[#allocation325_spill] sm:$0xff]  ;;  %v9069_v13 = vpop.permute.xlu0 %9068  ;;  %v17427_v42 = vld [vmem:[#allocation274_spill] sm:$0xff]  ;;  %v17435_v44 = vld [vmem:[#allocation335_spill] sm:$0xff] }
 0x6a7   : > { %v8639_v12 = vadd.f32 %v15357_v2, %v8479_v56  ;;  %v8834_v45 = vmul.f32 %v17423_v57, %v15562_v21  ;;  %v9188_v17 = vmul.f32 %v9065_v62, %v15899_v30  ;;  %v8286_v43 = vadd.f32 %v17424_v51, %v8126_v35  ;;  %v17428_v2 = vld [vmem:[#allocation336_spill] sm:$0xff]  ;;  %v17430_v56 = vld [vmem:[#allocation41_spill] sm:$0xff] }
 0x6a8   : > { %v8315_v27 = vmul.f32 %v8283_v28, %v7960_v55  ;;  %v8481_v1 = vmul.f32 %v17425_v14, %v15859_v53  ;;  %v8993_v37 = vadd.f32 %v17426_v25, %v8833_v47  ;;  %v8316_v50 = vmul.f32 %v8284_v15, %v7961_v16  ;;  %v17432_v47 = vld [vmem:[#allocation323_spill] sm:$0xff]  ;;  %v17436_v14 = vld [vmem:[#allocation330_spill] sm:$0xff] }
 0x6a9   : > { %v8480_v20 = vmul.f32 %v17427_v42, %v15859_v53  ;;  %v8836_v54 = vmul.f32 %v17428_v2, %v15562_v21  ;;  %v8994_v10 = vadd.f32 %v17429_v60, %v8834_v45  ;;  %9308 = vperm.xlu1 %10682, %v17430_v56   ;;  %v15920_v39 = vpop.permute.xlu1 %9108  ;;  %v8317_v35 = vmul.f32 %v8285_v31, %v7962_v9  ;;  %v17434_v15 = vld [vmem:[#allocation327_spill] sm:$0xff]  ;;  %v17437_v31 = vld [vmem:[#allocation334_spill] sm:$0xff] }
 0x6aa   : > { %v8670_v28 = vmul.f32 %v8638_v5, %v8315_v27  ;;  %v8641_v8 = vadd.f32 %v17431_v29, %v8481_v1  ;;  %v8835_v62 = vmul.f32 %v17432_v47, %v15562_v21  ;;  %v8671_v32 = vmul.f32 %v8639_v12, %v8316_v50  ;;  %v9221_v9 = vpop.permute.xlu0 %9220  ;;  %v17438_v1 = vld [vmem:[#allocation332_spill] sm:$0xff]  ;;  %v17440_v50 = vld [vmem:[#allocation154_spill] sm:$0xff] }
 0x6ab   : > { %v8640_v16 = vadd.f32 %v17433_v38, %v8480_v20  ;;  %v9187_v55 = vmul.f32 %v17434_v15, %v15899_v30  ;;  %v9348_v57 = vadd.f32 %v17435_v44, %v9188_v17  ;;  %v8318_v45 = vmul.f32 %v8286_v43, %v7963_v36  ;;  %v17441_v17 = vld [vmem:[#allocation193_spill] sm:$0xff]  ;;  %v17442_v43 = vld [vmem:[#allocation222_spill] sm:$0xff]  ;;  %v17445_v38 = vld [vmem:[#allocation163_spill] sm:$0xff] }
 0x6ac   : > { %v9025_v51 = vmul.f32 %v8993_v37, %v8670_v28  ;;  %v8995_v25 = vadd.f32 %v17436_v14, %v8835_v62  ;;  %v9190_v5 = vmul.f32 %v17437_v31, %v15899_v30  ;;  %v9026_v27 = vmul.f32 %v8994_v10, %v8671_v32  ;;  %v17443_v28 = vld [vmem:[#allocation45_spill] sm:$0xff]  ;;  %v17446_v15 = vld [vmem:[#allocation156_spill] sm:$0xff] }
 0x6ad   : > { %v8996_v42 = vadd.f32 %v17438_v1, %v8836_v54  ;;  %v9189_v2 = vmul.f32 %v9069_v13, %v15899_v30  ;;  %v9347_v20 = vadd.f32 %v9221_v9, %v9187_v55  ;;  %v17439_v12 = vmov 4   ;;  %v17444_v54 = vld [vmem:[#allocation337_spill] sm:$0xff]  ;;  %v17450_v9 = vld [vmem:[#allocation216_spill] sm:$0xff] }
 0x6ae   : > { %10683 = vset.pattern.permute.xlu1 %v17439_v12  ;;  %v7775_v60 = vmul.f32 %v17440_v50, %v15738_v59  ;;  %v7932_v36 = vadd.f32 %v17441_v17, %v7772_v26  ;;  %v8128_v37 = vmul.f32 %v17442_v43, %v15837_v49  ;;  %v8673_v56 = vmul.f32 %v8641_v8, %v8318_v45  ;;  %v15941_v29 = vpop.permute.xlu1 %8922  ;;  %v17447_v26 = vld [vmem:[#allocation184_spill] sm:$0xff]  ;;  %v17448_v8 = vld [vmem:[#allocation214_spill] sm:$0xff]  ;;  %v9229_v14 = vpop.permute.xlu0 %9228 }
 0x6af   : > { %8607 = vperm.xlu1 %10683, %v17443_v28   ;;  %v8672_v10 = vmul.f32 %v8640_v16, %v8317_v35  ;;  %v9350_v47 = vadd.f32 %v17444_v54, %v9190_v5  ;;  %v9379_v13 = vmul.f32 %v9347_v20, %v9025_v51  ;;  %v9380_v62 = vmul.f32 %v9348_v57, %v9026_v27  ;;  %v17449_v51 = vld [vmem:[#allocation25_spill] sm:$0xff]  ;;  %v17451_v1 = vld [vmem:[#allocation244_spill] sm:$0xff]  ;;  %v17452_v50 = vld [vmem:[#allocation282_spill] sm:$0xff] }
 0x6b0   : > { %v7774_v32 = vmul.f32 %v17445_v38, %v15738_v59  ;;  %v15948_v55 = vmul.f32 %v17446_v15, %v15738_v59  ;;  %v7933_v44 = vadd.f32 %v17447_v26, %v15876_v63  ;;  %v8127_v45 = vmul.f32 %v17448_v8, %v15837_v49  ;;  %v17454_v54 = vld [vmem:[#allocation253_spill] sm:$0xff]  ;;  %v17459_v26 = vld [vmem:[#allocation338_spill] sm:$0xff] }
 0x6b1   : > { %v9027_v31 = vmul.f32 %v8995_v25, %v8672_v10  ;;  %v9028_v35 = vmul.f32 %v8996_v42, %v8673_v56  ;;  %v9349_v16 = vadd.f32 %v9229_v14, %v9189_v2  ;;  %v9411_v5 = vpack.c.bf16 %v9380_v62, %v9379_v13  ;;  %v17455_v2 = vld [vmem:[#allocation46_spill] sm:$0xff]  ;;  %v17458_v62 = vld [vmem:[#allocation339_spill] sm:$0xff] }
 0x6b2   : > { %v7964_v57 = vmul.f32 %v7932_v36, %v17449_v51  ;;  %v8129_v27 = vmul.f32 %v17450_v9, %v15837_v49  ;;  %v8287_v20 = vadd.f32 %v17451_v1, %v8127_v45  ;;  %v8482_v17 = vmul.f32 %v17452_v50, %v15859_v53  ;;  %v15961_v63 = vpop.permute.xlu1 %8926  ;;  %v17456_v36 = vld [vmem:[#allocation224_spill] sm:$0xff]  ;;  %v17457_v10 = vld [vmem:[#allocation278_spill] sm:$0xff]  ;;  %v9081_v45 = vpop.permute.xlu0 %9080  ;;  %v17460_v14 = vld [vmem:[#allocation195_spill] sm:$0xff] }
 0x6b3   : > { %v17453_v43 = vmov 5   ;;  %v8288_v38 = vadd.f32 %v17454_v54, %v8128_v37  ;;  %v9382_v25 = vmul.f32 %v9350_v47, %v9028_v35  ;;  %v9381_v42 = vmul.f32 %v9349_v16, %v9027_v31  ;;  %10382 = vmatprep.mubr.bf16.mxu0 %v9411_v5  ;;  %v17461_v31 = vld [vmem:[#allocation186_spill] sm:$0xff]  ;;  %v17463_v1 = vld [vmem:[#allocation312_spill] sm:$0xff] }
 0x6b4   : > { %10684 = vset.pattern.permute.xlu1 %v17453_v43  ;;  %v8130_v56 = vmul.f32 %v17456_v36, %v15837_v49  ;;  %v8483_v13 = vmul.f32 %v17457_v10, %v15859_v53  ;;  %v8837_v15 = vmul.f32 %v17458_v62, %v15562_v21  ;;  %v8838_v8 = vmul.f32 %v17459_v26, %v15562_v21  ;;  %v17462_v51 = vld [vmem:[#allocation246_spill] sm:$0xff]  ;;  %v17464_v54 = vld [vmem:[#allocation308_spill] sm:$0xff] }
 0x6b5   : > { %8802 = vperm.xlu1 %10684, %v17455_v2   ;;  %v7934_v37 = vadd.f32 %v17460_v14, %v7774_v32  ;;  %v7965_v47 = vmul.f32 %v7933_v44, %v15832_v24  ;;  %v7935_v35 = vadd.f32 %v17461_v31, %v7775_v60  ;;  %v9412_v16 = vpack.c.bf16 %v9382_v25, %v9381_v42  ;;  %v17465_v62 = vld [vmem:[#allocation284_spill] sm:$0xff]  ;;  %v17467_v60 = vld [vmem:[#allocation255_spill] sm:$0xff]  ;;  %v17470_v25 = vld [vmem:[#allocation342_spill] sm:$0xff] }
 0x6b6   : > { %v8319_v5 = vmul.f32 %v8287_v20, %v7964_v57  ;;  %v8289_v9 = vadd.f32 %v17462_v51, %v8129_v27  ;;  %v8642_v50 = vadd.f32 %v17463_v1, %v8482_v17  ;;  %v8643_v36 = vadd.f32 %v17464_v54, %v8483_v13  ;;  %v17466_v32 = vld [vmem:[#allocation44_spill] sm:$0xff]  ;;  %v17469_v20 = vld [vmem:[#allocation343_spill] sm:$0xff]  ;;  %v17471_v13 = vld [vmem:[#allocation165_spill] sm:$0xff] }
 0x6b7   : > { %v8320_v10 = vmul.f32 %v8288_v38, %v7965_v47  ;;  %v8484_v34 = vmul.f32 %v17465_v62, %v15859_v53  ;;  %v9192_v26 = vmul.f32 %v9081_v45, %v15899_v30  ;;  %10383 = vmatmul.mubr.bf16.vlgmr.msra.gmra.mrb[0].mxu0 %v9412_v16  ;;  %v15983_v24 = vpop.permute.xlu1 %9120  ;;  %v8290_v44 = vadd.f32 %v17467_v60, %v8130_v56  ;;  %v17468_v57 = vld [vmem:[#allocation280_spill] sm:$0xff]  ;;  %v9085_v38 = vpop.permute.xlu0 %9084  ;;  %v17472_v31 = vld [vmem:[#allocation341_spill] sm:$0xff] }
 0x6b8   : > { %v8485_v27 = vmul.f32 %v17468_v57, %v15859_v53  ;;  %v8998_v17 = vadd.f32 %v17469_v20, %v8838_v8  ;;  %v8997_v42 = vadd.f32 %v17470_v25, %v8837_v15  ;;  %v7776_v14 = vmul.f32 %v17471_v13, %v15738_v59  ;;  %v17473_v1 = vld [vmem:[#allocation309_spill] sm:$0xff]  ;;  %v17474_v62 = vld [vmem:[#allocation340_spill] sm:$0xff]  ;;  %v17475_v15 = vld [vmem:[#allocation314_spill] sm:$0xff] }
 0x6b9   : > { %8806 = vperm.xlu1 %10684, %v17466_v32   ;;  %v7966_v45 = vmul.f32 %v7934_v37, %v15809_v3  ;;  %v7967_v47 = vmul.f32 %v7935_v35, %v15840_v11  ;;  %v8840_v16 = vmul.f32 %v17472_v31, %v15562_v21  ;;  %v8674_v51 = vmul.f32 %v8642_v50, %v8319_v5  ;;  %v17476_v57 = vld [vmem:[#allocation344_spill] sm:$0xff]  ;;  %v17477_v25 = vld [vmem:[#allocation353_spill] sm:$0xff]  ;;  %v17478_v50 = vld [vmem:[#allocation346_spill] sm:$0xff] }
 0x6ba   : > { %v8675_v56 = vmul.f32 %v8643_v36, %v8320_v10  ;;  %v8645_v54 = vadd.f32 %v17473_v1, %v8485_v27  ;;  %v8839_v8 = vmul.f32 %v17474_v62, %v15562_v21  ;;  %v8644_v60 = vadd.f32 %v17475_v15, %v8484_v34  ;;  %v17479_v27 = vld [vmem:[#allocation47_spill] sm:$0xff]  ;;  %v17482_v1 = vld [vmem:[#allocation197_spill] sm:$0xff]  ;;  %v17483_v15 = vld [vmem:[#allocation188_spill] sm:$0xff] }
 0x6bb   : > { %v8321_v32 = vmul.f32 %v8289_v9, %v7966_v45  ;;  %v9191_v20 = vmul.f32 %v17476_v57, %v15899_v30  ;;  %v9352_v3 = vadd.f32 %v17477_v25, %v9192_v26  ;;  %v16004_v11 = vpop.permute.xlu1 %9272  ;;  %v8322_v37 = vmul.f32 %v8290_v44, %v7967_v47  ;;  %v9237_v10 = vpop.permute.xlu0 %9236  ;;  %v17480_v9 = vld [vmem:[#allocation348_spill] sm:$0xff]  ;;  %v17481_v34 = vld [vmem:[#allocation351_spill] sm:$0xff] }
 0x6bc   : > { %v9030_v35 = vmul.f32 %v8998_v17, %v8675_v56  ;;  %v9029_v5 = vmul.f32 %v8997_v42, %v8674_v51  ;;  %v8999_v36 = vadd.f32 %v17478_v50, %v8839_v8  ;;  %v9000_v13 = vadd.f32 %v17480_v9, %v8840_v16  ;;  %v17484_v17 = vld [vmem:[#allocation226_spill] sm:$0xff]  ;;  %v17485_v56 = vld [vmem:[#allocation355_spill] sm:$0xff]  ;;  %v17490_v9 = vld [vmem:[#allocation48_spill] sm:$0xff] }
 0x6bd   : > { %10685 = vset.pattern.permute.xlu1 %v17439_v12  ;;  %v9194_v45 = vmul.f32 %v17481_v34, %v15899_v30  ;;  %v9193_v31 = vmul.f32 %v9085_v38, %v15899_v30  ;;  %v9351_v26 = vadd.f32 %v9237_v10, %v9191_v20  ;;  %v7936_v62 = vadd.f32 %v17482_v1, %v7776_v14  ;;  %v17486_v50 = vld [vmem:[#allocation34_spill] sm:$0xff]  ;;  %v17487_v20 = vld [vmem:[#allocation60_spill] sm:$0xff] }
 0x6be   : > { %8619 = vperm.xlu1 %10685, %v17479_v27   ;;  %v7937_v44 = vadd.f32 %v17483_v15, %v15948_v55  ;;  %v8132_v42 = vmul.f32 %v17484_v17, %v15837_v49  ;;  %v8677_v47 = vmul.f32 %v8645_v54, %v8322_v37  ;;  %v8676_v51 = vmul.f32 %v8644_v60, %v8321_v32  ;;  %v17488_v55 = vld [vmem:[#allocation167_spill] sm:$0xff]  ;;  %v17489_v54 = vld [vmem:[#allocation218_spill] sm:$0xff] }
 0x6bf   : > { %v9354_v8 = vadd.f32 %v17485_v56, %v9194_v45  ;;  %v9384_v57 = vmul.f32 %v9352_v3, %v9030_v35  ;;  %v9383_v16 = vmul.f32 %v9351_v26, %v9029_v5  ;;  %v16018_v25 = vpop.permute.xlu1 %9280  ;;  %v16022_v38 = vmul.f32 %v15864_v18, %v17486_v50  ;;  %v9245_v60 = vpop.permute.xlu0 %9244  ;;  %v17491_v18 = vld [vmem:[#allocation158_spill] sm:$0xff]  ;;  %v17492_v45 = vld [vmem:[#allocation248_spill] sm:$0xff]  ;;  %v17494_v56 = vld [vmem:[#allocation257_spill] sm:$0xff] }
 0x6c0   : > { %v16026_v14 = vmul.f32 %v15872_v48, %v17487_v20  ;;  %v7778_v10 = vmul.f32 %v17488_v55, %v15738_v59  ;;  %v8131_v32 = vmul.f32 %v17489_v54, %v15837_v49  ;;  %v9031_v3 = vmul.f32 %v8999_v36, %v8676_v51  ;;  %v17493_v1 = vld [vmem:[#allocation286_spill] sm:$0xff]  ;;  %v17496_v51 = vld [vmem:[#allocation281_spill] sm:$0xff] }
 0x6c1   : > { %v9032_v37 = vmul.f32 %v9000_v13, %v8677_v47  ;;  %v9353_v35 = vadd.f32 %v9245_v60, %v9193_v31  ;;  %v9413_v5 = vpack.c.bf16 %v9384_v57, %v9383_v16  ;;  %v7779_v34 = vmul.f32 %v17491_v18, %v15738_v59  ;;  %v17495_v31 = vld [vmem:[#allocation228_spill] sm:$0xff] }
 0x6c2   : > { %10686 = vset.pattern.permute.xlu1 %v17453_v43  ;;  %v7969_v48 = vmul.f32 %v7937_v44, %v15843_v4  ;;  %v8291_v26 = vadd.f32 %v17492_v45, %v8131_v32  ;;  %v8486_v15 = vmul.f32 %v17493_v1, %v15859_v53  ;;  %v7968_v17 = vmul.f32 %v7936_v62, %v15812_v33  ;;  %v17497_v4 = vld [vmem:[#allocation345_spill] sm:$0xff]  ;;  %v17498_v16 = vld [vmem:[#allocation356_spill] sm:$0xff]  ;;  %v17499_v33 = vld [vmem:[#allocation199_spill] sm:$0xff] }
 0x6c3   : > { %8814 = vperm.xlu1 %10686, %v17490_v9   ;;  %v8292_v50 = vadd.f32 %v17494_v56, %v8132_v42  ;;  %v9386_v36 = vmul.f32 %v9354_v8, %v9032_v37  ;;  %v9385_v13 = vmul.f32 %v9353_v35, %v9031_v3  ;;  %10386 = vmatprep.mubr.bf16.mxu0 %v9413_v5  ;;  %v9097_v55 = vpop.permute.xlu0 %9096  ;;  %v17500_v42 = vld [vmem:[#allocation190_spill] sm:$0xff]  ;;  %v17501_v32 = vld [vmem:[#allocation220_spill] sm:$0xff]  ;;  %v17503_v35 = vld [vmem:[#allocation29_spill] sm:$0xff] }
 0x6c4   : > { %v8134_v47 = vmul.f32 %v17495_v31, %v15837_v49  ;;  %v8487_v57 = vmul.f32 %v17496_v51, %v15859_v53  ;;  %v8841_v44 = vmul.f32 %v17497_v4, %v15562_v21  ;;  %v8842_v20 = vmul.f32 %v17498_v16, %v15562_v21  ;;  %v16050_v54 = vpop.permute.xlu1 %8774  ;;  %v17502_v37 = vld [vmem:[#allocation42_spill] sm:$0xff]  ;;  %v17504_v45 = vld [vmem:[#allocation316_spill] sm:$0xff]  ;;  %v17505_v56 = vld [vmem:[#allocation311_spill] sm:$0xff] }
 0x6c5   : > { %v7938_v62 = vadd.f32 %v17499_v33, %v7778_v10  ;;  %v7939_v8 = vadd.f32 %v17500_v42, %v7779_v34  ;;  %v8133_v60 = vmul.f32 %v17501_v32, %v15837_v49  ;;  %v9414_v3 = vpack.c.bf16 %v9386_v36, %v9385_v13  ;;  %v17506_v4 = vld [vmem:[#allocation250_spill] sm:$0xff]  ;;  %v17507_v34 = vld [vmem:[#allocation288_spill] sm:$0xff]  ;;  %v17508_v36 = vld [vmem:[#allocation259_spill] sm:$0xff] }
 0x6c6   : > { %v16059_v5 = vadd.f32 %v17503_v35, %v17502_v37  ;;  %v8323_v18 = vmul.f32 %v8291_v26, %v7968_v17  ;;  %v8646_v1 = vadd.f32 %v17504_v45, %v8486_v15  ;;  %v8647_v31 = vadd.f32 %v17505_v56, %v8487_v57  ;;  %v17509_v13 = vld [vmem:[#allocation283_spill] sm:$0xff]  ;;  %v17510_v32 = vld [vmem:[#allocation349_spill] sm:$0xff] }
 0x6c7   : > { %8962 = vperm.xlu1 %10686, %v17443_v28   ;;  %v8324_v51 = vmul.f32 %v8292_v50, %v7969_v48  ;;  %v8293_v10 = vadd.f32 %v17506_v4, %v8133_v60  ;;  %v8488_v16 = vmul.f32 %v17507_v34, %v15859_v53  ;;  %v9196_v33 = vmul.f32 %v9097_v55, %v15899_v30  ;;  %v17511_v17 = vld [vmem:[#allocation359_spill] sm:$0xff]  ;;  %v9101_v37 = vpop.permute.xlu0 %9100  ;;  %v17512_v48 = vld [vmem:[#allocation169_spill] sm:$0xff] }
 0x6c8   : > { %10387 = vmatmul.mubr.bf16.gmra.mrb[4].mxu0 %v9414_v3  ;;  %v8294_v28 = vadd.f32 %v17508_v36, %v8134_v47  ;;  %v8489_v42 = vmul.f32 %v17509_v13, %v15859_v53  ;;  %v9002_v26 = vadd.f32 %v17510_v32, %v8842_v20  ;;  %v9001_v15 = vadd.f32 %v17511_v17, %v8841_v44  ;;  %v17513_v55 = vld [vmem:[#allocation347_spill] sm:$0xff]  ;;  %v17514_v20 = vld [vmem:[#allocation313_spill] sm:$0xff]  ;;  %v17518_v36 = vld [vmem:[#allocation54_spill] sm:$0xff] }
 0x6c9   : > { %v7780_v50 = vmul.f32 %v17512_v48, %v15738_v59  ;;  %v7970_v57 = vmul.f32 %v7938_v62, %v15815_v6  ;;  %v7971_v60 = vmul.f32 %v7939_v8, %v15846_v61  ;;  %v8844_v3 = vmul.f32 %v17513_v55, %v15562_v21  ;;  %v16079_v47 = vpop.permute.xlu1 %8583  ;;  %v17515_v44 = vld [vmem:[#allocation357_spill] sm:$0xff]  ;;  %v17516_v6 = vld [vmem:[#allocation318_spill] sm:$0xff] }
 0x6ca   : > { %v8678_v35 = vmul.f32 %v8646_v1, %v8323_v18  ;;  %v8679_v45 = vmul.f32 %v8647_v31, %v8324_v51  ;;  %v8649_v56 = vadd.f32 %v17514_v20, %v8489_v42  ;;  %v8843_v4 = vmul.f32 %v17515_v44, %v15562_v21  ;;  %v17517_v61 = vld [vmem:[#allocation362_spill] sm:$0xff]  ;;  %v17519_v18 = vld [vmem:[#allocation69_spill] sm:$0xff]  ;;  %v17520_v51 = vld [vmem:[#allocation71_spill] sm:$0xff] }
 0x6cb   : > { %10687 = vset.pattern.permute.xlu1 %v17212_v22  ;;  %v8325_v34 = vmul.f32 %v8293_v10, %v7970_v57  ;;  %v8648_v62 = vadd.f32 %v17516_v6, %v8488_v16  ;;  %v9195_v8 = vmul.f32 %v17517_v61, %v15899_v30  ;;  %v9356_v13 = vadd.f32 %v17518_v36, %v9196_v33  ;;  %v9253_v31 = vpop.permute.xlu0 %9252  ;;  %v17521_v55 = vld [vmem:[#allocation62_spill] sm:$0xff]  ;;  %v17522_v16 = vld [vmem:[#allocation160_spill] sm:$0xff]  ;;  %v17523_v44 = vld [vmem:[#allocation201_spill] sm:$0xff] }
 0x6cc   : > { %9156 = vperm.xlu1 %10687, %v17455_v2   ;;  %v8326_v32 = vmul.f32 %v8294_v28, %v7971_v60  ;;  %v9034_v17 = vmul.f32 %v9002_v26, %v8679_v45  ;;  %v9033_v48 = vmul.f32 %v9001_v15, %v8678_v35  ;;  %v9003_v1 = vadd.f32 %v17519_v18, %v8843_v4  ;;  %v17524_v33 = vld [vmem:[#allocation230_spill] sm:$0xff]  ;;  %v17527_v61 = vld [vmem:[#allocation171_spill] sm:$0xff]  ;;  %v17529_v18 = vld [vmem:[#allocation192_spill] sm:$0xff] }
 0x6cd   : > { %v9004_v42 = vadd.f32 %v17520_v51, %v8844_v3  ;;  %v9198_v20 = vmul.f32 %v17521_v55, %v15899_v30  ;;  %v9197_v2 = vmul.f32 %v9101_v37, %v15899_v30  ;;  %v9355_v10 = vadd.f32 %v9253_v31, %v9195_v8  ;;  %v17525_v3 = vld [vmem:[#allocation79_spill] sm:$0xff]  ;;  %v17526_v37 = vld [vmem:[#allocation49_spill] sm:$0xff] }
 0x6ce   : > { %v7781_v57 = vmul.f32 %v17522_v16, %v15738_v59  ;;  %v7940_v6 = vadd.f32 %v17523_v44, %v7780_v50  ;;  %v8136_v28 = vmul.f32 %v17524_v33, %v15837_v49  ;;  %v8681_v26 = vmul.f32 %v8649_v56, %v8326_v32  ;;  %v16100_v15 = vpop.permute.xlu1 %8778  ;;  %v17528_v50 = vld [vmem:[#allocation162_spill] sm:$0xff]  ;;  %v17530_v56 = vld [vmem:[#allocation221_spill] sm:$0xff] }
 0x6cf   : > { %v8680_v60 = vmul.f32 %v8648_v62, %v8325_v34  ;;  %v9358_v35 = vadd.f32 %v17525_v3, %v9198_v20  ;;  %v9388_v45 = vmul.f32 %v9356_v13, %v9034_v17  ;;  %v9387_v4 = vmul.f32 %v9355_v10, %v9033_v48  ;;  %v9261_v51 = vpop.permute.xlu0 %9260  ;;  %v17531_v17 = vld [vmem:[#allocation223_spill] sm:$0xff]  ;;  %v17532_v10 = vld [vmem:[#allocation252_spill] sm:$0xff]  ;;  %v17533_v44 = vld [vmem:[#allocation290_spill] sm:$0xff] }
 0x6d0   : > { %10688 = vset.pattern.permute.xlu1 %v17453_v43  ;;  %v7782_v8 = vmul.f32 %v17527_v61, %v15738_v59  ;;  %v7783_v36 = vmul.f32 %v17528_v50, %v15738_v59  ;;  %v7941_v31 = vadd.f32 %v17529_v18, %v7781_v57  ;;  %v8135_v32 = vmul.f32 %v17530_v56, %v15837_v49  ;;  %v17534_v57 = vld [vmem:[#allocation261_spill] sm:$0xff]  ;;  %v17539_v18 = vld [vmem:[#allocation194_spill] sm:$0xff] }
 0x6d1   : > { %8970 = vperm.xlu1 %10688, %v17526_v37   ;;  %v9035_v55 = vmul.f32 %v9003_v1, %v8680_v60  ;;  %v9036_v34 = vmul.f32 %v9004_v42, %v8681_v26  ;;  %v9357_v62 = vadd.f32 %v9261_v51, %v9197_v2  ;;  %v9415_v20 = vpack.c.bf16 %v9388_v45, %v9387_v4  ;;  %v17535_v1 = vld [vmem:[#allocation232_spill] sm:$0xff]  ;;  %v17536_v42 = vld [vmem:[#allocation285_spill] sm:$0xff]  ;;  %v17538_v4 = vld [vmem:[#allocation203_spill] sm:$0xff] }
 0x6d2   : > { %v7972_v13 = vmul.f32 %v7940_v6, %v15822_v7  ;;  %v8137_v48 = vmul.f32 %v17531_v17, %v15837_v49  ;;  %v8295_v16 = vadd.f32 %v17532_v10, %v8135_v32  ;;  %v8490_v33 = vmul.f32 %v17533_v44, %v15859_v53  ;;  %v16117_v3 = vpop.permute.xlu1 %8782  ;;  %v17537_v6 = vld [vmem:[#allocation350_spill] sm:$0xff]  ;;  %v17542_v17 = vld [vmem:[#allocation315_spill] sm:$0xff] }
 0x6d3   : > { %v8296_v37 = vadd.f32 %v17534_v57, %v8136_v28  ;;  %v9390_v61 = vmul.f32 %v9358_v35, %v9036_v34  ;;  %v9389_v50 = vmul.f32 %v9357_v62, %v9035_v55  ;;  %10390 = vmatprep.mubr.bf16.mxu0 %v9415_v20  ;;  %v8138_v7 = vmul.f32 %v17535_v1, %v15837_v49  ;;  %v9113_v45 = vpop.permute.xlu0 %9112  ;;  %v17540_v55 = vld [vmem:[#allocation254_spill] sm:$0xff]  ;;  %v17541_v62 = vld [vmem:[#allocation320_spill] sm:$0xff] }
 0x6d4   : > { %v8491_v2 = vmul.f32 %v17536_v42, %v15859_v53  ;;  %v8845_v26 = vmul.f32 %v17537_v6, %v15562_v21  ;;  %v8846_v60 = vmul.f32 %v15818_v0, %v15562_v21  ;;  %v7942_v28 = vadd.f32 %v17538_v4, %v7782_v8  ;;  %v17543_v0 = vld [vmem:[#allocation292_spill] sm:$0xff] }
 0x6d5   : > { %8974 = vperm.xlu1 %10688, %v17479_v27   ;;  %v7973_v35 = vmul.f32 %v7941_v31, %v16022_v38  ;;  %v7943_v56 = vadd.f32 %v17539_v18, %v7783_v36  ;;  %v9416_v32 = vpack.c.bf16 %v9390_v61, %v9389_v50  ;;  %v8327_v51 = vmul.f32 %v8295_v16, %v7972_v13  ;;  %v17544_v38 = vld [vmem:[#allocation263_spill] sm:$0xff]  ;;  %v17547_v50 = vld [vmem:[#allocation173_spill] sm:$0xff]  ;;  %v17548_v6 = vld [vmem:[#allocation352_spill] sm:$0xff] }
 0x6d6   : > { %v8297_v34 = vadd.f32 %v17540_v55, %v8137_v48  ;;  %v8650_v20 = vadd.f32 %v17541_v62, %v8490_v33  ;;  %v8651_v10 = vadd.f32 %v17542_v17, %v8491_v2  ;;  %v16135_v44 = vpop.permute.xlu1 %8934  ;;  %v8492_v1 = vmul.f32 %v17543_v0, %v15859_v53  ;;  %v17545_v31 = vld [vmem:[#allocation287_spill] sm:$0xff]  ;;  %v17546_v48 = vld [vmem:[#allocation354_spill] sm:$0xff] }
 0x6d7   : > { %v8328_v57 = vmul.f32 %v8296_v37, %v7973_v35  ;;  %v9200_v8 = vmul.f32 %v9113_v45, %v15899_v30  ;;  %10391 = vmatmul.mubr.bf16.gmra.mrb[8].mxu0 %v9416_v32  ;;  %v8298_v36 = vadd.f32 %v17544_v38, %v8138_v7  ;;  %v8493_v13 = vmul.f32 %v17545_v31, %v15859_v53  ;;  %v9117_v61 = vpop.permute.xlu0 %9116  ;;  %v10707_v37 = vld [vmem:[%s16612_s2] sm:$0xff]   ;;  %v17550_v18 = vld [vmem:[#allocation322_spill] sm:$0xff]  ;;  %v17551_v17 = vld [vmem:[#allocation43_spill] sm:$0xff] }
 0x6d8   : > { %v9006_v16 = vadd.f32 %v17546_v48, %v8846_v60  ;;  %v9005_v33 = vadd.f32 %v15894_v46, %v8845_v26  ;;  %v7784_v42 = vmul.f32 %v17547_v50, %v15738_v59  ;;  %v7974_v2 = vmul.f32 %v7942_v28, %v15825_v40  ;;  %v17549_v46 = vld [vmem:[#allocation317_spill] sm:$0xff]  ;;  %10414 = vmatprep.subr.bf16.mxu1 %v10707_v37 }
 0x6d9   : > { %10689 = vset.pattern.permute.xlu1 %v17212_v22  ;;  %v7975_v7 = vmul.f32 %v7943_v56, %v16026_v14  ;;  %v8848_v45 = vmul.f32 %v17548_v6, %v15562_v21  ;;  %v8682_v60 = vmul.f32 %v8650_v20, %v8327_v51  ;;  %v8683_v4 = vmul.f32 %v8651_v10, %v8328_v57  ;;  %v17553_v57 = vld [vmem:[#allocation146_spill] sm:$0xff]  ;;  %v17558_v50 = vld [vmem:[#allocation225_spill] sm:$0xff] }
 0x6da   : > { %9168 = vperm.xlu1 %10689, %v17490_v9   ;;  %v8653_v26 = vadd.f32 %v17549_v46, %v8493_v13  ;;  %v8847_v9 = vmul.f32 %v15861_v23, %v15562_v21  ;;  %v8329_v35 = vmul.f32 %v8297_v34, %v7974_v2  ;;  %v8652_v32 = vadd.f32 %v17550_v18, %v8492_v1  ;;  %v17554_v1 = vld [vmem:[#allocation175_spill] sm:$0xff] }
 0x6db   : > { %v9199_v55 = vmul.f32 %v15920_v39, %v15899_v30  ;;  %v9360_v40 = vadd.f32 %v16004_v11, %v9200_v8  ;;  %v16163_v14 = vpop.permute.xlu1 %9124  ;;  %10415 = vmatpush3.bf16.msra.mxu1 %v10707_v37  ;;  %v8330_v28 = vmul.f32 %v8298_v36, %v7975_v7  ;;  %v9037_v56 = vmul.f32 %v9005_v33, %v8682_v60  ;;  %v9269_v20 = vpop.permute.xlu0 %9268  ;;  %v17552_v11 = vld [vmem:[#allocation57_spill] sm:$0xff] }
 0x6dc   : > { %v9007_v51 = vadd.f32 %v15941_v29, %v8847_v9  ;;  %v9038_v62 = vmul.f32 %v9006_v16, %v8683_v4  ;;  %v9008_v23 = vadd.f32 %v15961_v63, %v8848_v45  ;;  %v9202_v34 = vmul.f32 %v15983_v24, %v15899_v30  ;;  %v17555_v29 = vld [vmem:[#allocation164_spill] sm:$0xff]  ;;  %v10708_v63 = vld [vmem:[%s16612_s2 + $0x8] sm:$0xff]   ;;  %v17556_v16 = vld [vmem:[#allocation205_spill] sm:$0xff] }
 0x6dd   : > { %v9201_v39 = vmul.f32 %v9117_v61, %v15899_v30  ;;  %v9359_v10 = vadd.f32 %v9269_v20, %v9199_v55  ;;  %v7592_v0 = vadd.f32 %v17553_v57, %v17552_v11  ;;  %v7786_v8 = vmul.f32 %v17554_v1, %v15738_v59  ;;  %v17557_v61 = vld [vmem:[#allocation234_spill] sm:$0xff]  ;;  %10416 = vmatprep.subr.bf16.mxu1 %v10708_v63 }
 0x6de   : > { %9320 = vperm.xlu1 %10689, %v17551_v17   ;;  %v7785_v38 = vmul.f32 %v17555_v29, %v15738_v59  ;;  %v8685_v36 = vmul.f32 %v8653_v26, %v8330_v28  ;;  %v8684_v31 = vmul.f32 %v8652_v32, %v8329_v35  ;;  %v9392_v13 = vmul.f32 %v9360_v40, %v9038_v62  ;;  %v17560_v26 = vld [vmem:[#allocation77_spill] sm:$0xff]  ;;  %v17561_v35 = vld [vmem:[#allocation207_spill] sm:$0xff]  ;;  %v17562_v32 = vld [vmem:[#allocation196_spill] sm:$0xff] }
 0x6df   : > { %v9362_v24 = vadd.f32 %v16018_v25, %v9202_v34  ;;  %v9391_v48 = vmul.f32 %v9359_v10, %v9037_v56  ;;  %v7944_v33 = vadd.f32 %v17556_v16, %v7784_v42  ;;  %v8140_v37 = vmul.f32 %v17557_v61, %v15837_v49  ;;  %v9277_v7 = vpop.permute.xlu0 %9276  ;;  %10417 = vmatpush3.bf16.msra.mxu1 %v10708_v63  ;;  %v17559_v25 = vld [vmem:[#allocation38_spill] sm:$0xff]  ;;  %v10710_v40 = vld [vmem:[%s16612_s2 + $0x18] sm:$0xff]   ;;  %v17567_v10 = vld [vmem:[#allocation265_spill] sm:$0xff] }
 0x6e0   : > { %v8139_v2 = vmul.f32 %v17558_v50, %v15837_v49  ;;  %v16187_v6 = vpop.permute.xlu1 %8938  ;;  %v9039_v45 = vmul.f32 %v9007_v51, %v8684_v31  ;;  %v9040_v60 = vmul.f32 %v9008_v23, %v8685_v36  ;;  %v9361_v4 = vadd.f32 %v9277_v7, %v9201_v39  ;;  %v17563_v28 = vld [vmem:[#allocation256_spill] sm:$0xff]  ;;  %v17564_v51 = vld [vmem:[#allocation294_spill] sm:$0xff]  ;;  %v17569_v36 = vld [vmem:[#allocation51_spill] sm:$0xff] }
 0x6e1   : > { %v9417_v46 = vpack.c.bf16 %v9392_v13, %v9391_v48  ;;  %v7622_v42 = vmul.f32 %v16059_v5, %v17559_v25  ;;  %v7624_v9 = vmul.f32 %v7592_v0, %v17560_v26  ;;  %v7946_v18 = vadd.f32 %v17561_v35, %v7786_v8  ;;  %v17565_v17 = vld [vmem:[#allocation166_spill] sm:$0xff]  ;;  %v17566_v34 = vld [vmem:[#allocation236_spill] sm:$0xff]  ;;  %v17568_v8 = vld [vmem:[#allocation227_spill] sm:$0xff] }
 0x6e2   : > { %9328 = vperm.xlu1 %10689, %v17479_v27   ;;  %v7945_v55 = vadd.f32 %v17562_v32, %v7785_v38  ;;  %v10709_v27 = vld [vmem:[%s16612_s2 + $0x10] sm:$0xff]   ;;  %v8299_v56 = vadd.f32 %v17563_v28, %v8139_v2  ;;  %v8494_v62 = vmul.f32 %v17564_v51, %v15859_v53  ;;  %v9394_v5 = vmul.f32 %v9362_v24, %v9040_v60  ;;  %v17570_v13 = vld [vmem:[#allocation198_spill] sm:$0xff]  ;;  %v17571_v48 = vld [vmem:[#allocation289_spill] sm:$0xff] }
 0x6e3   : > { %v9393_v20 = vmul.f32 %v9361_v4, %v9039_v45  ;;  %10394 = vmatprep.mubr.bf16.mxu0 %v9417_v46  ;;  %v7787_v23 = vmul.f32 %v17565_v17, %v15738_v59  ;;  %v8142_v39 = vmul.f32 %v17566_v34, %v15837_v49  ;;  %v8300_v11 = vadd.f32 %v17567_v10, %v8140_v37  ;;  %v9129_v57 = vpop.permute.xlu0 %9128  ;;  %v17572_v37 = vld [vmem:[#allocation258_spill] sm:$0xff]  ;;  %v17574_v2 = vld [vmem:[#allocation324_spill] sm:$0xff]  ;;  %v17575_v60 = vld [vmem:[#allocation267_spill] sm:$0xff] }
 0x6e4   : > { %v8943_v0 = vpop.permute.xlu1 %8942  ;;  %10418 = vmatprep.subr.bf16.mxu1 %v10709_v27  ;;  %v7976_v1 = vmul.f32 %v7944_v33, %v15835_v58  ;;  %v8141_v29 = vmul.f32 %v17568_v8, %v15837_v49  ;;  %v7978_v63 = vmul.f32 %v7946_v18, %v15849_v41  ;;  %v7977_v31 = vmul.f32 %v7945_v55, %v7622_v42  ;;  %v17573_v58 = vld [vmem:[#allocation296_spill] sm:$0xff]  ;;  %v10711_v41 = vld [vmem:[%s16612_s2 + $0x20] sm:$0xff]   ;;  %v17576_v46 = vld [vmem:[#allocation319_spill] sm:$0xff] }
 0x6e5   : > { %v9418_v38 = vpack.c.bf16 %v9394_v5, %v9393_v20  ;;  %10419 = vmatpush3.bf16.msra.mxu1 %v10709_v27  ;;  %v7947_v24 = vadd.f32 %v17570_v13, %v7787_v23  ;;  %v8495_v16 = vmul.f32 %v17571_v48, %v15859_v53  ;;  %v8496_v33 = vmul.f32 %v17573_v58, %v15859_v53  ;;  %v17577_v35 = vld [vmem:[#allocation291_spill] sm:$0xff]  ;;  %v17578_v51 = vld [vmem:[#allocation53_spill] sm:$0xff] }
 0x6e6   : > { %10691 = vset.pattern.permute.xlu1 %v17439_v12  ;;  %10420 = vmatprep.subr.bf16.mxu1 %v10710_v40  ;;  %v8331_v61 = vmul.f32 %v8299_v56, %v7976_v1  ;;  %v8301_v50 = vadd.f32 %v17572_v37, %v8141_v29  ;;  %v8654_v7 = vadd.f32 %v17574_v2, %v8494_v62 }
 0x6e7   : > { %8627 = vperm.xlu1 %10691, %v17569_v36   ;;  %10395 = vmatmul.mubr.bf16.gmra.mrb[12].mxu0 %v9418_v38  ;;  %v8332_v45 = vmul.f32 %v8300_v11, %v7977_v31  ;;  %v8302_v4 = vadd.f32 %v17575_v60, %v8142_v39  ;;  %v8655_v25 = vadd.f32 %v17576_v46, %v8495_v16  ;;  %v9133_v26 = vpop.permute.xlu0 %9132  ;;  %v17580_v39 = vld [vmem:[#allocation35_spill] sm:$0xff]  ;;  %v17583_v60 = vld [vmem:[#allocation52_spill] sm:$0xff] }
 0x6e8   : > { %v8850_v42 = vmul.f32 %v16050_v54, %v15562_v21  ;;  %v8497_v18 = vmul.f32 %v17577_v35, %v15859_v53  ;;  %v8656_v32 = vadd.f32 %v16079_v47, %v8496_v33  ;;  %v9203_v55 = vmul.f32 %v16163_v14, %v15899_v30  ;;  %v17579_v47 = vld [vmem:[#allocation326_spill] sm:$0xff]  ;;  %v10713_v46 = vld [vmem:[%s16612_s2 + $0x30] sm:$0xff]   ;;  %v17585_v35 = vld [vmem:[#allocation361_spill] sm:$0xff] }
 0x6e9   : > { %v9137_v27 = vpop.permute.xlu1 %9136  ;;  %10421 = vmatpush3.bf16.msra.mxu1 %v10710_v40  ;;  %v8851_v28 = vmul.f32 %v16100_v15, %v15562_v21  ;;  %v9204_v56 = vmul.f32 %v9129_v57, %v15899_v30  ;;  %v7979_v62 = vmul.f32 %v7947_v24, %v7624_v9  ;;  %v8686_v5 = vmul.f32 %v8654_v7, %v8331_v61  ;;  %v17582_v7 = vld [vmem:[#allocation56_spill] sm:$0xff] }
 0x6ea   : > { %v9010_v54 = vadd.f32 %v16135_v44, %v8850_v42  ;;  %10422 = vmatprep.subr.bf16.mxu1 %v10711_v41  ;;  %v8657_v20 = vadd.f32 %v17579_v47, %v8497_v18  ;;  %v8333_v17 = vmul.f32 %v8301_v50, %v7978_v63  ;;  %v8687_v14 = vmul.f32 %v8655_v25, %v8332_v45  ;;  %v17584_v25 = vld [vmem:[#allocation64_spill] sm:$0xff] }
 0x6eb   : > { %10692 = vset.pattern.permute.xlu1 %v17453_v43  ;;  %v8852_v23 = vmul.f32 %v16117_v3, %v15562_v21  ;;  %v9285_v40 = vpop.permute.xlu0 %9284  ;;  %v9011_v34 = vadd.f32 %v16187_v6, %v8851_v28  ;;  %v8334_v15 = vmul.f32 %v8302_v4, %v7979_v62  ;;  %v9041_v10 = vmul.f32 %v17580_v39, %v8686_v5  ;;  %v10712_v3 = vld [vmem:[%s16612_s2 + $0x28] sm:$0xff]   ;;  %v17581_v6 = vld [vmem:[#allocation63_spill] sm:$0xff]  ;;  %v17586_v18 = vld [vmem:[#allocation12_spill] sm:$0xff] }
 0x6ec   : > { %8818 = vperm.xlu1 %10692, %v17578_v51   ;;  %v9205_v44 = vmul.f32 %v9133_v26, %v15899_v30  ;;  %v9363_v11 = vadd.f32 %v9285_v40, %v9203_v55  ;;  %v8688_v9 = vmul.f32 %v8656_v32, %v8333_v17  ;;  %v9042_v1 = vmul.f32 %v9010_v54, %v8687_v14  ;;  %v17588_v55 = vld [vmem:[#allocation119_spill] sm:$0xff]  ;;  %v17589_v28 = vld [vmem:[#allocation50_spill] sm:$0xff]  ;;  %v17591_v62 = vld [vmem:[#allocation177_spill] sm:$0xff] }
 0x6ed   : > { %v9289_v57 = vpop.permute.xlu1 %9288  ;;  %10423 = vmatpush3.bf16.msra.mxu1 %v10711_v41  ;;  %v9012_v8 = vadd.f32 %v8943_v0, %v8852_v23  ;;  %v8689_v38 = vmul.f32 %v8657_v20, %v8334_v15  ;;  %v9206_v24 = vmul.f32 %v9137_v27, %v15899_v30  ;;  %v7078_v32 = vmul.f32 %v17586_v18, %v17585_v35  ;;  %v17590_v54 = vld [vmem:[#allocation106_spill] sm:$0xff]  ;;  %v17592_v47 = vld [vmem:[#allocation28_spill] sm:$0xff]  ;;  %v17593_v17 = vld [vmem:[#allocation121_spill] sm:$0xff] }
 0x6ee   : > { %v9364_v29 = vadd.f32 %v9289_v57, %v9204_v56  ;;  %v9395_v63 = vmul.f32 %v9363_v11, %v9041_v10  ;;  %v9043_v31 = vmul.f32 %v9011_v34, %v8688_v9  ;;  %10424 = vmatprep.subr.bf16.mxu1 %v10712_v3  ;;  %v7079_v56 = vmul.f32 %v17589_v28, %v17585_v35  ;;  %v17594_v23 = vld [vmem:[#allocation16_spill] sm:$0xff]  ;;  %v17597_v10 = vld [vmem:[#allocation138_spill] sm:$0xff]  ;;  %v17598_v11 = vld [vmem:[#allocation87_spill] sm:$0xff] }
 0x6ef   : > { %v9293_v13 = vpop.permute.xlu0 %9292  ;;  %v9044_v0 = vmul.f32 %v9012_v8, %v8689_v38  ;;  %v7788_v5 = vmul.f32 %v17591_v62, %v15738_v59  ;;  %v7081_v20 = vmul.f32 %v17592_v47, %v17585_v35  ;;  %v7080_v40 = vmul.f32 %v17594_v23, %v17585_v35  ;;  %v17595_v34 = vld [vmem:[#allocation80_spill] sm:$0xff]  ;;  %v17599_v9 = vld [vmem:[#allocation147_spill] sm:$0xff]  ;;  %v17613_v62 = vld [vmem:[#allocation210_spill] sm:$0xff] }
 0x6f0   : > { %10693 = vset.pattern.permute.xlu1 %v17439_v12  ;;  %v9396_v48 = vmul.f32 %v9364_v29, %v9042_v1  ;;  %v9365_v16 = vadd.f32 %v9293_v13, %v9205_v44  ;;  %v17596_v15 = vld [vmem:[#allocation108_spill] sm:$0xff]  ;;  %v7270_v57 = vadd.f32 %v17598_v11, %v7078_v32  ;;  %v17600_v8 = vld [vmem:[#allocation179_spill] sm:$0xff]  ;;  %v17614_v47 = vld [vmem:[#allocation202_spill] sm:$0xff] }
 0x6f1   : > { %8631 = vperm.xlu1 %10693, %v17581_v6   ;;  %v9297_v61 = vpop.permute.xlu1 %9296  ;;  %10425 = vmatpush3.bf16.msra.mxu1 %v10712_v3  ;;  %v7790_v29 = vmul.f32 %v17600_v8, %v15738_v59  ;;  %v17601_v3 = vld [vmem:[#allocation168_spill] sm:$0xff] }
 0x6f2   : > { %v9366_v37 = vadd.f32 %v9297_v61, %v9206_v24  ;;  %v9419_v12 = vpack.c.bf16 %v9396_v48, %v9395_v63  ;;  %v9397_v50 = vmul.f32 %v9365_v16, %v9043_v31  ;;  %10426 = vmatprep.subr.bf16.mxu1 %v10713_v46  ;;  %v7789_v38 = vmul.f32 %v17601_v3, %v15738_v59  ;;  %v17602_v31 = vld [vmem:[#allocation140_spill] sm:$0xff]  ;;  %v17603_v24 = vld [vmem:[#allocation31_spill] sm:$0xff]  ;;  %v17604_v16 = vld [vmem:[#allocation229_spill] sm:$0xff] }
 0x6f3   : > { %v7948_v48 = vadd.f32 %v17603_v24, %v7788_v5  ;;  %v8143_v61 = vmul.f32 %v17604_v16, %v15837_v49  ;;  %v7950_v5 = vadd.f32 %v17613_v62, %v7790_v29  ;;  %v17620_v29 = vld [vmem:[#allocation363_spill] sm:$0xff]  ;;  %v17621_v24 = vld [vmem:[#allocation358_spill] sm:$0xff] }
 0x6f4   : > { %v9398_v58 = vmul.f32 %v9366_v37, %v9044_v0  ;;  %10398 = vmatprep.mubr.bf16.mxu0 %v9419_v12  ;;  %v17605_v0 = vld [vmem:[#allocation298_spill] sm:$0xff]  ;;  %v17606_v12 = vld [vmem:[#allocation149_spill] sm:$0xff] }
 0x6f5   : > { %8635 = vperm.xlu1 %10693, %v14459_v19   ;;  %10427 = vmatpush3.bf16.msra.mxu1 %v10713_v46  ;;  %v8498_v37 = vmul.f32 %v17605_v0, %v15859_v53  ;;  %v17622_v0 = vld [vmem:[#allocation271_spill] sm:$0xff] }
 0x6f6   : > { %v16252_v33 = vpop.permute.xlu1 %8595  ;;  %v9420_v2 = vpack.c.bf16 %v9398_v58, %v9397_v50  ;;  %v17607_v58 = vld [vmem:[#allocation170_spill] sm:$0xff] }
 0x6f8   : > { %10399 = vmatmul.mubr.bf16.gmra.mrb[16].mxu0 %v9420_v2  ;;  %v7791_v2 = vmul.f32 %v17607_v58, %v15738_v59  ;;  %v17624_v58 = vld [vmem:[#allocation300_spill] sm:$0xff] }
 0x6f9   : > { %10694 = vset.pattern.permute.xlu1 %v17453_v43 }
 0x6fa   : > { %8830 = vperm.xlu1 %10694, %v17582_v7  }
 0x6fb   : > { %v8787_v41 = vpop.permute.xlu1 %8786 }
 0x6fc   : > { %v8853_v28 = vmul.f32 %v8787_v41, %v15562_v21  ;;  %v17618_v41 = vld [vmem:[#allocation293_spill] sm:$0xff] }
 0x6fe   : > { %8982 = vperm.xlu1 %10694, %v17569_v36   ;;  %v9013_v3 = vadd.f32 %v17620_v29, %v8853_v28 }
 0x700   : > { %v16258_v45 = vpop.permute.xlu1 %8599 }
 0x702   : > { %10695 = vset.pattern.permute.xlu1 %v17212_v22 }
 0x703   : > { %9176 = vperm.xlu1 %10695, %v17583_v60  }
 0x704   : > { %v16261_v19 = vpop.permute.xlu1 %8603 }
 0x707   : > { %10696 = vset.pattern.permute.xlu1 %v17453_v43  ;;  %v10714_v43 = vld [vmem:[%s16612_s2 + $0x38] sm:$0xff]  }
 0x708   : > { %8986 = vperm.xlu1 %10696, %v17581_v6   ;;  %10428 = vmatprep.subr.bf16.mxu1 %v10714_v43 }
 0x709   : > { %v16265_v4 = vpop.permute.xlu1 %8798  ;;  %10429 = vmatpush3.bf16.msra.mxu1 %v10714_v43  ;;  %v17610_v43 = vld [vmem:[#allocation89_spill] sm:$0xff] }
 0x70a   : > { %v7272_v18 = vadd.f32 %v17610_v43, %v7080_v40  ;;  %v8856_v43 = vmul.f32 %v16265_v4, %v15562_v21 }
 0x70c   : > { %10698 = vset.pattern.permute.xlu1 %v17212_v22  ;;  %v17587_v22 = vld [vmem:[#allocation73_spill] sm:$0xff] }
 0x70d   : > { %9180 = vperm.xlu1 %10698, %v17584_v25   ;;  %v16272_v42 = vpop.permute.xlu1 %8950  ;;  %v7434_v27 = vmul.f32 %v17588_v55, %v17587_v22  ;;  %v7433_v51 = vmul.f32 %v17590_v54, %v17587_v22  ;;  %v7436_v14 = vmul.f32 %v17593_v17, %v17587_v22  ;;  %v7435_v39 = vmul.f32 %v17596_v15, %v17587_v22  ;;  %v9141_v25 = vpop.permute.xlu0 %9140  ;;  %v17611_v55 = vld [vmem:[#allocation260_spill] sm:$0xff] }
 0x70e   : > { %v7951_v17 = vadd.f32 %v17614_v47, %v7791_v2  ;;  %v8500_v2 = vmul.f32 %v17624_v58, %v15859_v53  ;;  %v17632_v58 = vld [vmem:[#allocation11_spill] sm:$0xff] }
 0x70f   : > { %v7593_v44 = vadd.f32 %v17597_v10, %v7433_v51  ;;  %v7594_v1 = vadd.f32 %v17599_v9, %v7434_v27  ;;  %v7595_v13 = vadd.f32 %v17602_v31, %v7435_v39  ;;  %v7596_v50 = vadd.f32 %v17606_v12, %v7436_v14  ;;  %v17616_v39 = vld [vmem:[#allocation328_spill] sm:$0xff]  ;;  %v17623_v12 = vld [vmem:[#allocation262_spill] sm:$0xff] }
 0x710   : > { %v8303_v27 = vadd.f32 %v17611_v55, %v8143_v61  ;;  %v8658_v10 = vadd.f32 %v17616_v39, %v8498_v37  ;;  %v8660_v28 = vadd.f32 %v16258_v45, %v8500_v2  ;;  %v7084_v2 = vmul.f32 %v17632_v58, %v17585_v35 }
 0x711   : > { %9184 = vperm.xlu1 %10698, %v17582_v7   ;;  %v17608_v7 = vld [vmem:[#allocation200_spill] sm:$0xff]  ;;  %v7625_v32 = vmul.f32 %v7593_v44, %v7270_v57  ;;  %v7627_v14 = vmul.f32 %v7595_v13, %v7272_v18  ;;  %v17617_v57 = vld [vmem:[#allocation269_spill] sm:$0xff]  ;;  %v9301_v61 = vpop.permute.xlu0 %9300 }
 0x712   : > { %v16278_v26 = vpop.permute.xlu1 %9144  ;;  %v7949_v60 = vadd.f32 %v17608_v7, %v7789_v38  ;;  %v9207_v38 = vmul.f32 %v9141_v25, %v15899_v30 }
 0x713   : > { %v7980_v23 = vmul.f32 %v7948_v48, %v7625_v32  ;;  %v7982_v31 = vmul.f32 %v7950_v5, %v7627_v14  ;;  %v8854_v48 = vmul.f32 %v17621_v24, %v15562_v21 }
 0x715   : > { %9336 = vperm.xlu1 %10698, %v17569_v36   ;;  %v7271_v36 = vadd.f32 %v17595_v34, %v7079_v56  ;;  %v17612_v56 = vld [vmem:[#allocation81_spill] sm:$0xff]  ;;  %v17615_v34 = vld [vmem:[#allocation240_spill] sm:$0xff]  ;;  %v8335_v8 = vmul.f32 %v8303_v27, %v7980_v23  ;;  %v9014_v18 = vadd.f32 %v16272_v42, %v8854_v48  ;;  %v9367_v27 = vadd.f32 %v9301_v61, %v9207_v38 }
 0x716   : > { %v7273_v54 = vadd.f32 %v17612_v56, %v7081_v20  ;;  %v8146_v15 = vmul.f32 %v17615_v34, %v15837_v49  ;;  %v8499_v20 = vmul.f32 %v17618_v41, %v15859_v53 }
 0x717   : > { %v8955_v63 = vpop.permute.xlu1 %8954  ;;  %v7626_v51 = vmul.f32 %v7594_v1, %v7271_v36  ;;  %v17619_v36 = vld [vmem:[#allocation231_spill] sm:$0xff]  ;;  %v8690_v7 = vmul.f32 %v8658_v10, %v8335_v8  ;;  %v9313_v10 = vpop.permute.xlu0 %9312 }
 0x718   : > { %v7628_v44 = vmul.f32 %v7596_v50, %v7273_v54  ;;  %v8145_v1 = vmul.f32 %v17619_v36, %v15837_v49  ;;  %v8659_v16 = vadd.f32 %v16252_v33, %v8499_v20  ;;  %v8306_v37 = vadd.f32 %v17622_v0, %v8146_v15  ;;  %v17626_v33 = vld [vmem:[#allocation360_spill] sm:$0xff]  ;;  %v17630_v0 = vld [vmem:[#allocation110_spill] sm:$0xff] }
 0x719   : > { %9340 = vperm.xlu1 %10698, %v17581_v6   ;;  %v17609_v6 = vld [vmem:[#allocation238_spill] sm:$0xff]  ;;  %v7981_v11 = vmul.f32 %v7949_v60, %v7626_v51  ;;  %v8855_v32 = vmul.f32 %v17626_v33, %v15562_v21  ;;  %v9045_v55 = vmul.f32 %v9013_v3, %v8690_v7  ;;  %v9208_v51 = vmul.f32 %v16278_v26, %v15899_v30  ;;  %v17633_v7 = vld [vmem:[#allocation112_spill] sm:$0xff] }
 0x71a   : > { %v8144_v46 = vmul.f32 %v17609_v6, %v15837_v49  ;;  %v7983_v13 = vmul.f32 %v7951_v17, %v7628_v44  ;;  %v8305_v50 = vadd.f32 %v17623_v12, %v8145_v1  ;;  %v17627_v17 = vld [vmem:[#allocation78_spill] sm:$0xff]  ;;  %v17631_v12 = vld [vmem:[#allocation125_spill] sm:$0xff] }
 0x71b   : > { %v9016_v42 = vadd.f32 %v17627_v17, %v8856_v43  ;;  %v9015_v23 = vadd.f32 %v8955_v63, %v8855_v32  ;;  %v9399_v15 = vmul.f32 %v9367_v27, %v9045_v55  ;;  %v17637_v32 = vld [vmem:[#allocation151_spill] sm:$0xff] }
 0x71c   : > { %v9149_v40 = vpop.permute.xlu1 %9148  ;;  %v8304_v9 = vadd.f32 %v17617_v57, %v8144_v46  ;;  %v17625_v46 = vld [vmem:[#allocation295_spill] sm:$0xff]  ;;  %v8338_v5 = vmul.f32 %v8306_v37, %v7983_v13  ;;  %v8337_v47 = vmul.f32 %v8305_v50, %v7982_v31  ;;  %v7437_v37 = vmul.f32 %v17630_v0, %v17587_v22 }
 0x71d   : > { %v8501_v25 = vmul.f32 %v17625_v46, %v15859_v53  ;;  %v9209_v44 = vmul.f32 %v9149_v40, %v15899_v30  ;;  %v17628_v13 = vld [vmem:[#allocation123_spill] sm:$0xff]  ;;  %v7440_v50 = vmul.f32 %v17631_v12, %v17587_v22 }
 0x71e   : > { %v8336_v6 = vmul.f32 %v8304_v9, %v7981_v11  ;;  %v8692_v39 = vmul.f32 %v8660_v28, %v8337_v47  ;;  %v7438_v24 = vmul.f32 %v17628_v13, %v17587_v22  ;;  %v17638_v27 = vld [vmem:[#allocation143_spill] sm:$0xff]  ;;  %v17641_v47 = vld [vmem:[#allocation153_spill] sm:$0xff] }
 0x71f   : > { %v8661_v54 = vadd.f32 %v16261_v19, %v8501_v25  ;;  %v17635_v25 = vld [vmem:[#allocation142_spill] sm:$0xff]  ;;  %v17642_v17 = vld [vmem:[#allocation183_spill] sm:$0xff] }
 0x720   : > { %v9153_v60 = vpop.permute.xlu1 %9152  ;;  %v8691_v56 = vmul.f32 %v8659_v16, %v8336_v6  ;;  %v9047_v9 = vmul.f32 %v9015_v23, %v8692_v39  ;;  %v17629_v16 = vld [vmem:[#allocation9_spill] sm:$0xff]  ;;  %v17634_v6 = vld [vmem:[#allocation6_spill] sm:$0xff]  ;;  %v7597_v43 = vadd.f32 %v17635_v25, %v7437_v37  ;;  %v7598_v55 = vadd.f32 %v17637_v32, %v7438_v24  ;;  %v17650_v13 = vld [vmem:[#allocation211_spill] sm:$0xff] }
 0x721   : > { %v9210_v62 = vmul.f32 %v9153_v60, %v15899_v30  ;;  %v8693_v45 = vmul.f32 %v8661_v54, %v8338_v5  ;;  %v7082_v61 = vmul.f32 %v17629_v16, %v17585_v35  ;;  %v7439_v60 = vmul.f32 %v17633_v7, %v17587_v22  ;;  %v17651_v16 = vld [vmem:[#allocation206_spill] sm:$0xff]  ;;  %v17652_v37 = vld [vmem:[#allocation213_spill] sm:$0xff] }
 0x722   : > { %v9046_v14 = vmul.f32 %v9014_v18, %v8691_v56  ;;  %v7083_v46 = vmul.f32 %v17634_v6, %v17585_v35  ;;  %v17636_v18 = vld [vmem:[#allocation8_spill] sm:$0xff]  ;;  %v17639_v56 = vld [vmem:[#allocation181_spill] sm:$0xff]  ;;  %v17655_v6 = vld [vmem:[#allocation243_spill] sm:$0xff] }
 0x723   : > { %v9370_v19 = vadd.f32 %v9313_v10, %v9210_v62  ;;  %v9048_v26 = vmul.f32 %v9016_v42, %v8693_v45  ;;  %v7085_v33 = vmul.f32 %v17636_v18, %v17585_v35  ;;  %v7599_v28 = vadd.f32 %v17638_v27, %v7439_v60  ;;  %v17640_v62 = vld [vmem:[#allocation91_spill] sm:$0xff]  ;;  %v17645_v10 = vld [vmem:[#allocation93_spill] sm:$0xff]  ;;  %v17657_v18 = vld [vmem:[#allocation304_spill] sm:$0xff] }
 0x724   : > { %v9305_v4 = vpop.permute.xlu1 %9304  ;;  %v7792_v54 = vmul.f32 %v17639_v56, %v15738_v59  ;;  %v7274_v5 = vadd.f32 %v17640_v62, %v7082_v61  ;;  %v7794_v42 = vmul.f32 %v17642_v17, %v15738_v59  ;;  %v7276_v45 = vadd.f32 %v17645_v10, %v7084_v2  ;;  %v17654_v2 = vld [vmem:[#allocation235_spill] sm:$0xff]  ;;  %v17656_v25 = vld [vmem:[#allocation273_spill] sm:$0xff]  ;;  %v17659_v56 = vld [vmem:[#allocation264_spill] sm:$0xff] }
 0x725   : > { %v9368_v34 = vadd.f32 %v9305_v4, %v9208_v51  ;;  %v9402_v36 = vmul.f32 %v9370_v19, %v9048_v26  ;;  %v9161_v51 = vpop.permute.xlu0 %9160  ;;  %v7600_v4 = vadd.f32 %v17641_v47, %v7440_v50  ;;  %v17648_v26 = vld [vmem:[#allocation82_spill] sm:$0xff]  ;;  %v17653_v50 = vld [vmem:[#allocation233_spill] sm:$0xff]  ;;  %v8149_v7 = vmul.f32 %v17654_v2, %v15837_v49 }
 0x726   : > { %v7952_v24 = vadd.f32 %v17650_v13, %v7792_v54  ;;  %v7954_v12 = vadd.f32 %v17652_v37, %v7794_v42  ;;  %v8147_v58 = vmul.f32 %v17653_v50, %v15837_v49  ;;  %v17658_v32 = vld [vmem:[#allocation297_spill] sm:$0xff]  ;;  %v17660_v62 = vld [vmem:[#allocation302_spill] sm:$0xff] }
 0x727   : > { %v9400_v11 = vmul.f32 %v9368_v34, %v9046_v14  ;;  %v17643_v14 = vld [vmem:[#allocation172_spill] sm:$0xff]  ;;  %v17661_v42 = vld [vmem:[#allocation266_spill] sm:$0xff] }
 0x728   : > { %v9309_v57 = vpop.permute.xlu1 %9308  ;;  %v7793_v23 = vmul.f32 %v17643_v14, %v15738_v59  ;;  %v8307_v54 = vadd.f32 %v17659_v56, %v8147_v58  ;;  %v8309_v14 = vadd.f32 %v17661_v42, %v8149_v7 }
 0x729   : > { %v9369_v41 = vadd.f32 %v9309_v57, %v9209_v44  ;;  %v9421_v20 = vpack.c.bf16 %v9400_v11, %v9399_v15  ;;  %v17644_v15 = vld [vmem:[#allocation13_spill] sm:$0xff]  ;;  %v17646_v44 = vld [vmem:[#allocation174_spill] sm:$0xff]  ;;  %v9165_v27 = vpop.permute.xlu0 %9164 }
 0x72a   : > { %v7275_v39 = vadd.f32 %v17644_v15, %v7083_v46  ;;  %v7795_v19 = vmul.f32 %v17646_v44, %v15738_v59  ;;  %v17647_v11 = vld [vmem:[#allocation241_spill] sm:$0xff]  ;;  %v8150_v46 = vmul.f32 %v17655_v6, %v15837_v49  ;;  %v9213_v6 = vmul.f32 %v9165_v27, %v15899_v30 }
 0x72b   : > { %v9401_v1 = vmul.f32 %v9369_v41, %v9047_v9  ;;  %10402 = vmatprep.mubr.bf16.mxu0 %v9421_v20  ;;  %v8148_v57 = vmul.f32 %v17647_v11, %v15837_v49  ;;  %v7277_v9 = vadd.f32 %v17648_v26, %v7085_v33  ;;  %v7629_v41 = vmul.f32 %v7597_v43, %v7274_v5  ;;  %v17649_v20 = vld [vmem:[#allocation204_spill] sm:$0xff]  ;;  %v17663_v11 = vld [vmem:[#allocation275_spill] sm:$0xff] }
 0x72c   : > { %v7955_v61 = vadd.f32 %v17651_v16, %v7795_v19  ;;  %v8504_v33 = vmul.f32 %v17657_v18, %v15859_v53  ;;  %v8502_v5 = vmul.f32 %v17660_v62, %v15859_v53  ;;  %v17664_v26 = vld [vmem:[#allocation299_spill] sm:$0xff] }
 0x72d   : > { %v9422_v29 = vpack.c.bf16 %v9402_v36, %v9401_v1  ;;  %v7953_v36 = vadd.f32 %v17649_v20, %v7793_v23  ;;  %v7630_v1 = vmul.f32 %v7598_v55, %v7275_v39  ;;  %v7632_v0 = vmul.f32 %v7600_v4, %v7277_v9  ;;  %v17662_v23 = vld [vmem:[#allocation329_spill] sm:$0xff]  ;;  %v17665_v20 = vld [vmem:[#allocation331_spill] sm:$0xff] }
 0x72e   : > { %v8608_v8 = vpop.permute.xlu1 %8607  ;;  %v8308_v43 = vadd.f32 %v17656_v25, %v8148_v57  ;;  %v8503_v55 = vmul.f32 %v17658_v32, %v15859_v53  ;;  %v7984_v4 = vmul.f32 %v7952_v24, %v7629_v41  ;;  %v8310_v57 = vadd.f32 %v17663_v11, %v8150_v46  ;;  %v17667_v24 = vld [vmem:[#allocation75_spill] sm:$0xff]  ;;  %v17671_v11 = vld [vmem:[#allocation129_spill] sm:$0xff] }
 0x72f   : > { %10403 = vmatmul.mubr.bf16.gmra.mrb[20].mxu0 %v9422_v29  ;;  %v7631_v29 = vmul.f32 %v7599_v28, %v7276_v45  ;;  %v7985_v28 = vmul.f32 %v7953_v36, %v7630_v1  ;;  %v7987_v17 = vmul.f32 %v7955_v61, %v7632_v0  ;;  %v8662_v10 = vadd.f32 %v8608_v8, %v8502_v5  ;;  %v17666_v1 = vld [vmem:[#allocation30_spill] sm:$0xff]  ;;  %v9317_v61 = vpop.permute.xlu0 %9316 }
 0x730   : > { %v8663_v15 = vadd.f32 %v17662_v23, %v8503_v55  ;;  %v8505_v9 = vmul.f32 %v17664_v26, %v15859_v53  ;;  %v8339_v36 = vmul.f32 %v8307_v54, %v7984_v4  ;;  %v8859_v13 = vmul.f32 %v17666_v1, %v15562_v21 }
 0x731   : > { %v7986_v39 = vmul.f32 %v7954_v12, %v7631_v29  ;;  %v8340_v19 = vmul.f32 %v8308_v43, %v7985_v28  ;;  %v8342_v2 = vmul.f32 %v8310_v57, %v7987_v17  ;;  %v7444_v57 = vmul.f32 %v17671_v11, %v17587_v22 }
 0x732   : > { %v8694_v37 = vmul.f32 %v8662_v10, %v8339_v36  ;;  %v17669_v10 = vld [vmem:[#allocation10_spill] sm:$0xff]  ;;  %v17674_v36 = vld [vmem:[#allocation185_spill] sm:$0xff] }
 0x733   : > { %v8341_v16 = vmul.f32 %v8309_v14, %v7986_v39  ;;  %v9325_v28 = vpop.permute.xlu0 %9324  ;;  %v7796_v1 = vmul.f32 %v17674_v36, %v15738_v59 }
 0x734   : > { %v8803_v63 = vpop.permute.xlu1 %8802 }
 0x735   : > { %v8857_v45 = vmul.f32 %v8803_v63, %v15562_v21  ;;  %v8695_v63 = vmul.f32 %v8663_v15, %v8340_v19  ;;  %v17668_v15 = vld [vmem:[#allocation127_spill] sm:$0xff] }
 0x736   : > { %v7442_v39 = vmul.f32 %v17668_v15, %v17587_v22 }
 0x737   : > { %v9173_v36 = vpop.permute.xlu0 %9172 }
 0x738   : > { %v8807_v3 = vpop.permute.xlu1 %8806 }
 0x739   : > { %v8858_v47 = vmul.f32 %v8807_v3, %v15562_v21  ;;  %v8664_v3 = vadd.f32 %v17665_v20, %v8504_v33 }
 0x73b   : > { %v9018_v29 = vadd.f32 %v17667_v24, %v8858_v47  ;;  %v8696_v7 = vmul.f32 %v8664_v3, %v8341_v16  ;;  %v17673_v3 = vld [vmem:[#allocation114_spill] sm:$0xff]  ;;  %v17677_v16 = vld [vmem:[#allocation84_spill] sm:$0xff] }
 0x73d   : > { %v16357_v38 = vpop.permute.xlu1 %8619  ;;  %v9050_v43 = vmul.f32 %v9018_v29, %v8695_v63  ;;  %v17676_v29 = vld [vmem:[#allocation83_spill] sm:$0xff] }
 0x73e   : > { %v8665_v0 = vadd.f32 %v16357_v38, %v8505_v9  ;;  %v17672_v9 = vld [vmem:[#allocation15_spill] sm:$0xff] }
 0x73f   : > { %v7086_v20 = vmul.f32 %v17672_v9, %v17585_v35  ;;  %v17696_v9 = vld [vmem:[#allocation247_spill] sm:$0xff] }
 0x740   : > { %v8697_v33 = vmul.f32 %v8665_v0, %v8342_v2  ;;  %v17679_v0 = vld [vmem:[#allocation144_spill] sm:$0xff] }
 0x742   : > { %v16359_v31 = vpop.permute.xlu1 %8814 }
 0x743   : > { %v8860_v12 = vmul.f32 %v16359_v31, %v15562_v21  ;;  %v9373_v31 = vadd.f32 %v9325_v28, %v9213_v6  ;;  %v17689_v28 = vld [vmem:[#allocation237_spill] sm:$0xff] }
 0x746   : > { %v8963_v40 = vpop.permute.xlu1 %8962 }
 0x747   : > { %v9017_v8 = vadd.f32 %v8963_v40, %v8857_v45  ;;  %v7087_v45 = vmul.f32 %v17669_v10, %v17585_v35 }
 0x749   : > { %v9049_v25 = vmul.f32 %v9017_v8, %v8694_v37  ;;  %v7279_v8 = vadd.f32 %v17676_v29, %v7087_v45  ;;  %v17694_v45 = vld [vmem:[#allocation217_spill] sm:$0xff]  ;;  %v17698_v29 = vld [vmem:[#allocation239_spill] sm:$0xff] }
 0x74b   : > { %v9157_v48 = vpop.permute.xlu1 %9156 }
 0x74c   : > { %v9211_v44 = vmul.f32 %v9157_v48, %v15899_v30  ;;  %v9212_v48 = vmul.f32 %v9161_v51, %v15899_v30 }
 0x74e   : > { %v9371_v50 = vadd.f32 %v9317_v61, %v9211_v44  ;;  %v17670_v44 = vld [vmem:[#allocation14_spill] sm:$0xff] }
 0x74f   : > { %v7089_v19 = vmul.f32 %v17670_v44, %v17585_v35 }
 0x750   : > { %v8971_v34 = vpop.permute.xlu1 %8970  ;;  %v9403_v51 = vmul.f32 %v9371_v50, %v9049_v25 }
 0x751   : > { %v9019_v58 = vadd.f32 %v8971_v34, %v8859_v13  ;;  %v17675_v13 = vld [vmem:[#allocation17_spill] sm:$0xff]  ;;  %v7281_v63 = vadd.f32 %v17677_v16, %v7089_v19  ;;  %v17695_v19 = vld [vmem:[#allocation268_spill] sm:$0xff]  ;;  %v8153_v16 = vmul.f32 %v17698_v29, %v15837_v49 }
 0x752   : > { %v7088_v24 = vmul.f32 %v17675_v13, %v17585_v35  ;;  %v17684_v35 = vld [vmem:[#allocation178_spill] sm:$0xff] }
 0x753   : > { %v9051_v32 = vmul.f32 %v9019_v58, %v8696_v7  ;;  %v17681_v58 = vld [vmem:[#allocation187_spill] sm:$0xff]  ;;  %v17682_v7 = vld [vmem:[#allocation157_spill] sm:$0xff] }
 0x754   : > { %v8975_v60 = vpop.permute.xlu1 %8974  ;;  %v7798_v2 = vmul.f32 %v17681_v58, %v15738_v59  ;;  %v7604_v6 = vadd.f32 %v17682_v7, %v7444_v57  ;;  %v17700_v58 = vld [vmem:[#allocation270_spill] sm:$0xff]  ;;  %v17701_v7 = vld [vmem:[#allocation301_spill] sm:$0xff] }
 0x755   : > { %v9020_v40 = vadd.f32 %v8975_v60, %v8860_v12  ;;  %v9405_v5 = vmul.f32 %v9373_v31, %v9051_v32  ;;  %v17680_v12 = vld [vmem:[#allocation155_spill] sm:$0xff] }
 0x756   : > { %v7602_v50 = vadd.f32 %v17680_v12, %v7442_v39  ;;  %v7958_v44 = vadd.f32 %v17694_v45, %v7798_v2  ;;  %v7636_v57 = vmul.f32 %v7604_v6, %v7281_v63  ;;  %v8313_v2 = vadd.f32 %v17700_v58, %v8153_v16 }
 0x757   : > { %v9052_v54 = vmul.f32 %v9020_v40, %v8697_v33  ;;  %v7799_v40 = vmul.f32 %v17684_v35, %v15738_v59  ;;  %v17686_v33 = vld [vmem:[#allocation95_spill] sm:$0xff]  ;;  %v8507_v6 = vmul.f32 %v17701_v7, %v15859_v53 }
 0x758   : > { %v7634_v10 = vmul.f32 %v7602_v50, %v7279_v8 }
 0x759   : > { %v9169_v41 = vpop.permute.xlu1 %9168 }
 0x75a   : > { %v9214_v38 = vmul.f32 %v9169_v41, %v15899_v30  ;;  %v7441_v41 = vmul.f32 %v17673_v3, %v17587_v22  ;;  %v17697_v3 = vld [vmem:[#allocation277_spill] sm:$0xff] }
 0x75c   : > { %v7601_v37 = vadd.f32 %v17679_v0, %v7441_v41 }
 0x75d   : > { %v9321_v46 = vpop.permute.xlu1 %9320 }
 0x75e   : > { %v9372_v18 = vadd.f32 %v9321_v46, %v9212_v48  ;;  %v17678_v48 = vld [vmem:[#allocation116_spill] sm:$0xff] }
 0x75f   : > { %v7443_v61 = vmul.f32 %v17678_v48, %v17587_v22  ;;  %v17683_v46 = vld [vmem:[#allocation176_spill] sm:$0xff]  ;;  %v7278_v22 = vadd.f32 %v17686_v33, %v7086_v20  ;;  %v8154_v20 = vmul.f32 %v17696_v9, %v15837_v49  ;;  %v17704_v33 = vld [vmem:[#allocation55_spill] sm:$0xff] }
 0x760   : > { %v9404_v55 = vmul.f32 %v9372_v18, %v9050_v43  ;;  %v7797_v25 = vmul.f32 %v17683_v46, %v15738_v59  ;;  %v17685_v43 = vld [vmem:[#allocation245_spill] sm:$0xff] }
 0x761   : > { %v9329_v56 = vpop.permute.xlu1 %9328  ;;  %v8152_v18 = vmul.f32 %v17685_v43, %v15837_v49  ;;  %v7633_v39 = vmul.f32 %v7601_v37, %v7278_v22  ;;  %v8862_v22 = vmul.f32 %v17704_v33, %v15562_v21 }
 0x762   : > { %v9374_v34 = vadd.f32 %v9329_v56, %v9214_v38  ;;  %v9423_v62 = vpack.c.bf16 %v9404_v55, %v9403_v51  ;;  %v17687_v51 = vld [vmem:[#allocation145_spill] sm:$0xff]  ;;  %v17688_v38 = vld [vmem:[#allocation215_spill] sm:$0xff]  ;;  %v8151_v56 = vmul.f32 %v17689_v28, %v15837_v49 }
 0x763   : > { %v7603_v32 = vadd.f32 %v17687_v51, %v7443_v61  ;;  %v7956_v55 = vadd.f32 %v17688_v38, %v7796_v1  ;;  %v8312_v41 = vadd.f32 %v17697_v3, %v8152_v18  ;;  %v17699_v61 = vld [vmem:[#allocation333_spill] sm:$0xff]  ;;  %v17707_v3 = vld [vmem:[#allocation58_spill] sm:$0xff] }
 0x764   : > { %v9406_v47 = vmul.f32 %v9374_v34, %v9052_v54  ;;  %10406 = vmatprep.mubr.bf16.mxu0 %v9423_v62  ;;  %v17690_v54 = vld [vmem:[#allocation97_spill] sm:$0xff]  ;;  %v17691_v62 = vld [vmem:[#allocation208_spill] sm:$0xff]  ;;  %v8311_v11 = vadd.f32 %v17695_v19, %v8151_v56  ;;  %v9215_v56 = vmul.f32 %v9173_v36, %v15899_v30 }
 0x765   : > { %v7280_v34 = vadd.f32 %v17690_v54, %v7088_v24  ;;  %v7988_v24 = vmul.f32 %v7956_v55, %v7633_v39  ;;  %v9333_v54 = vpop.permute.xlu0 %9332 }
 0x766   : > { %v16431_v27 = vpop.permute.xlu1 %8627  ;;  %v9424_v60 = vpack.c.bf16 %v9406_v47, %v9405_v5  ;;  %v7957_v5 = vadd.f32 %v17691_v62, %v7797_v25  ;;  %v17692_v47 = vld [vmem:[#allocation209_spill] sm:$0xff]  ;;  %v17702_v25 = vld [vmem:[#allocation279_spill] sm:$0xff] }
 0x767   : > { %v7959_v59 = vadd.f32 %v17692_v47, %v7799_v40  ;;  %v7635_v13 = vmul.f32 %v7603_v32, %v7280_v34  ;;  %v8343_v50 = vmul.f32 %v8311_v11, %v7988_v24  ;;  %v8314_v35 = vadd.f32 %v17702_v25, %v8154_v20  ;;  %v17703_v40 = vld [vmem:[#allocation307_spill] sm:$0xff] }
 0x768   : > { %10407 = vmatmul.mubr.bf16.gmra.mrb[24].mxu0 %v9424_v60  ;;  %v17693_v60 = vld [vmem:[#allocation305_spill] sm:$0xff]  ;;  %v7989_v48 = vmul.f32 %v7957_v5, %v7634_v10  ;;  %v8508_v49 = vmul.f32 %v17703_v40, %v15859_v53  ;;  %v8667_v51 = vadd.f32 %v16431_v27, %v8507_v6  ;;  %v17705_v47 = vld [vmem:[#allocation303_spill] sm:$0xff]  ;;  %v17706_v27 = vld [vmem:[#allocation66_spill] sm:$0xff] }
 0x769   : > { %v8506_v15 = vmul.f32 %v17693_v60, %v15859_v53  ;;  %v7991_v8 = vmul.f32 %v7959_v59, %v7636_v57  ;;  %v7990_v63 = vmul.f32 %v7958_v44, %v7635_v13  ;;  %v8509_v59 = vmul.f32 %v17705_v47, %v15859_v53 }
 0x76a   : > { %v8863_v39 = vmul.f32 %v17706_v27, %v15562_v21 }
 0x76b   : > { %v8819_v4 = vpop.permute.xlu1 %8818  ;;  %v8666_v0 = vadd.f32 %v17699_v61, %v8506_v15  ;;  %v8346_v9 = vmul.f32 %v8314_v35, %v7991_v8  ;;  %v8345_v20 = vmul.f32 %v8313_v2, %v7990_v63 }
 0x76c   : > { %v8861_v1 = vmul.f32 %v8819_v4, %v15562_v21  ;;  %v8344_v4 = vmul.f32 %v8312_v41, %v7989_v48 }
 0x76d   : > { %v8698_v28 = vmul.f32 %v8666_v0, %v8343_v50 }
 0x76e   : > { %v9021_v43 = vadd.f32 %v15806_v52, %v8861_v1  ;;  %v8699_v19 = vmul.f32 %v8667_v51, %v8344_v4  ;;  %v9345_v1 = vpop.permute.xlu0 %9344 }
 0x770   : > { %v16433_v17 = vpop.permute.xlu1 %8631  ;;  %v9053_v10 = vmul.f32 %v9021_v43, %v8698_v28 }
 0x771   : > { %v8668_v45 = vadd.f32 %v16433_v17, %v8508_v49 }
 0x773   : > { %v8700_v13 = vmul.f32 %v8668_v45, %v8345_v20 }
 0x774   : > { %v16435_v42 = vpop.permute.xlu1 %8635 }
 0x775   : > { %v8669_v11 = vadd.f32 %v16435_v42, %v8509_v59 }
 0x777   : > { %v8701_v24 = vmul.f32 %v8669_v11, %v8346_v9 }
 0x779   : > { %v16437_v14 = vpop.permute.xlu1 %8830 }
 0x77a   : > { %v8864_v60 = vmul.f32 %v16437_v14, %v15562_v21  ;;  %v9375_v14 = vadd.f32 %v9333_v54, %v9215_v56 }
 0x77c   : > { %v9024_v41 = vadd.f32 %v17707_v3, %v8864_v60  ;;  %v9407_v42 = vmul.f32 %v9375_v14, %v9053_v10 }
 0x77d   : > { %v16439_v23 = vpop.permute.xlu1 %8982 }
 0x77e   : > { %v9022_v15 = vadd.f32 %v16439_v23, %v8862_v22  ;;  %v9056_v8 = vmul.f32 %v9024_v41, %v8701_v24 }
 0x780   : > { %v9054_v21 = vmul.f32 %v9022_v15, %v8699_v19 }
 0x782   : > { %v16449_v26 = vpop.permute.xlu1 %9176 }
 0x783   : > { %v9216_v57 = vmul.f32 %v16449_v26, %v15899_v30 }
 0x787   : > { %v16479_v31 = vpop.permute.xlu1 %8986 }
 0x788   : > { %v9023_v17 = vadd.f32 %v16479_v31, %v8863_v39 }
 0x78a   : > { %v10384_v37 = vpop.f32.mrb[0].mxu0  ;;  %v9055_v61 = vmul.f32 %v9023_v17, %v8700_v13 }
 0x78b   : > { %v9525_v46 = vpop.f32.mrb[1].mxu0  ;;  %v9654_v32 = vmul.f32 %v10384_v37, %v10384_v37 }
 0x78c   : > { %v9181_v12 = vpop.permute.xlu1 %9180  ;;  %v10385_v18 = vpop.f32.mrb[2].mxu0  ;;  %v9652_v34 = vmul.f32 %v9525_v46, %v9525_v46 }
 0x78d   : > { %v9655_v38 = vmul.f32 %v10385_v18, %v10385_v18  ;;  %v9528_v55 = vpop.f32.mrb[3].mxu0  ;;  %v9217_v26 = vmul.f32 %v9181_v12, %v15899_v30 }
 0x78e   : > { %v9653_v62 = vmul.f32 %v9528_v55, %v9528_v55 }
 0x78f   : > { %v9685_v52 = vpack.c.bf16 %v9655_v38, %v9654_v32 }
 0x790   : > { %v9185_v5 = vpop.permute.xlu1 %9184  ;;  %v9684_v44 = vpack.c.bf16 %v9653_v62, %v9652_v34 }
 0x791   : > { %v9218_v53 = vmul.f32 %v9185_v5, %v15899_v30 }
 0x792   : > { %10430 = vmatprep.mubr.bf16.mxu1 %v9684_v44 }
 0x793   : > { %10431 = vmatmul.mubr.bf16.vlgmr.msra.gmra.mrb[0].mxu1 %v9685_v52  ;;  %v9378_v29 = vadd.f32 %v9345_v1, %v9218_v53 }
 0x794   : > { %v9337_v23 = vpop.permute.xlu1 %9336 }
 0x795   : > { %v9376_v36 = vadd.f32 %v9337_v23, %v9216_v57  ;;  %v9410_v63 = vmul.f32 %v9378_v29, %v9056_v8 }
 0x797   : > { %v9408_v16 = vmul.f32 %v9376_v36, %v9054_v21 }
 0x798   : > { %v9341_v48 = vpop.permute.xlu1 %9340 }
 0x799   : > { %v9377_v0 = vadd.f32 %v9341_v48, %v9217_v26  ;;  %v9425_v37 = vpack.c.bf16 %v9408_v16, %v9407_v42 }
 0x79b   : > { %v9409_v50 = vmul.f32 %v9377_v0, %v9055_v61  ;;  %10410 = vmatprep.mubr.bf16.mxu0 %v9425_v37  ;;  %v10388_v58 = vpop.f32.mrb[4].mxu0 }
 0x79c   : > { %v9541_v2 = vpop.f32.mrb[5].mxu0  ;;  %v9658_v6 = vmul.f32 %v10388_v58, %v10388_v58 }
 0x79d   : > { %v9426_v31 = vpack.c.bf16 %v9410_v63, %v9409_v50  ;;  %v10389_v7 = vpop.f32.mrb[6].mxu0  ;;  %v9656_v25 = vmul.f32 %v9541_v2, %v9541_v2 }
 0x79e   : > { %v9659_v46 = vmul.f32 %v10389_v7, %v10389_v7  ;;  %v9544_v4 = vpop.f32.mrb[7].mxu0 }
 0x79f   : > { %10411 = vmatmul.mubr.bf16.gmra.mrb[28].mxu0 %v9426_v31  ;;  %v9657_v30 = vmul.f32 %v9544_v4, %v9544_v4 }
 0x7a0   : > { %v9687_v12 = vpack.c.bf16 %v9659_v46, %v9658_v6 }
 0x7a1   : > { %v9686_v35 = vpack.c.bf16 %v9657_v30, %v9656_v25 }
 0x7a3   : > { %10434 = vmatprep.mubr.bf16.mxu1 %v9686_v35 }
 0x7a4   : > { %10435 = vmatmul.mubr.bf16.gmra.mrb[4].mxu1 %v9687_v12 }
 0x7aa   : > { %v10392_v40 = vpop.f32.mrb[8].mxu0 }
 0x7ab   : > { %v9557_v49 = vpop.f32.mrb[9].mxu0  ;;  %v9662_v18 = vmul.f32 %v10392_v40, %v10392_v40 }
 0x7ac   : > { %v10393_v43 = vpop.f32.mrb[10].mxu0  ;;  %v9660_v51 = vmul.f32 %v9557_v49, %v9557_v49 }
 0x7ad   : > { %v9663_v33 = vmul.f32 %v10393_v43, %v10393_v43  ;;  %v9560_v22 = vpop.f32.mrb[11].mxu0 }
 0x7ae   : > { %v9661_v32 = vmul.f32 %v9560_v22, %v9560_v22 }
 0x7af   : > { %v9689_v38 = vpack.c.bf16 %v9663_v33, %v9662_v18 }
 0x7b0   : > { %v9688_v55 = vpack.c.bf16 %v9661_v32, %v9660_v51 }
 0x7b2   : > { %10438 = vmatprep.mubr.bf16.mxu1 %v9688_v55 }
 0x7b3   : > { %10439 = vmatmul.mubr.bf16.gmra.mrb[8].mxu1 %v9689_v38 }
 0x7ba   : > { %v10396_v28 = vpop.f32.mrb[12].mxu0 }
 0x7bb   : > { %v9573_v56 = vpop.f32.mrb[13].mxu0  ;;  %v9666_v34 = vmul.f32 %v10396_v28, %v10396_v28 }
 0x7bc   : > { %v10397_v54 = vpop.f32.mrb[14].mxu0  ;;  %v9664_v47 = vmul.f32 %v9573_v56, %v9573_v56 }
 0x7bd   : > { %v9667_v62 = vmul.f32 %v10397_v54, %v10397_v54  ;;  %v9576_v5 = vpop.f32.mrb[15].mxu0 }
 0x7be   : > { %v9665_v59 = vmul.f32 %v9576_v5, %v9576_v5 }
 0x7bf   : > { %v9691_v52 = vpack.c.bf16 %v9667_v62, %v9666_v34 }
 0x7c0   : > { %v9690_v60 = vpack.c.bf16 %v9665_v59, %v9664_v47 }
 0x7c2   : > { %10442 = vmatprep.mubr.bf16.mxu1 %v9690_v60 }
 0x7c3   : > { %10443 = vmatmul.mubr.bf16.gmra.mrb[12].mxu1 %v9691_v52 }
 0x7cb   : > { %v10400_v15 = vpop.f32.mrb[16].mxu0 }
 0x7cc   : > { %v9589_v27 = vpop.f32.mrb[17].mxu0  ;;  %v9670_v10 = vmul.f32 %v10400_v15, %v10400_v15 }
 0x7cd   : > { %v10401_v39 = vpop.f32.mrb[18].mxu0  ;;  %v9668_v19 = vmul.f32 %v9589_v27, %v9589_v27 }
 0x7ce   : > { %v9671_v45 = vmul.f32 %v10401_v39, %v10401_v39  ;;  %v9592_v44 = vpop.f32.mrb[19].mxu0 }
 0x7cf   : > { %v9669_v11 = vmul.f32 %v9592_v44, %v9592_v44 }
 0x7d0   : > { %v9693_v57 = vpack.c.bf16 %v9671_v45, %v9670_v10 }
 0x7d1   : > { %v9692_v53 = vpack.c.bf16 %v9669_v11, %v9668_v19 }
 0x7d3   : > { %10446 = vmatprep.mubr.bf16.mxu1 %v9692_v53 }
 0x7d4   : > { %10447 = vmatmul.mubr.bf16.gmra.mrb[16].mxu1 %v9693_v57 }
 0x802   : > { %v10404_v9 = vpop.f32.mrb[20].mxu0 }
 0x803   : > { %v9605_v20 = vpop.f32.mrb[21].mxu0  ;;  %v9674_v23 = vmul.f32 %v10404_v9, %v10404_v9 }
 0x804   : > { %v10405_v14 = vpop.f32.mrb[22].mxu0  ;;  %v9672_v21 = vmul.f32 %v9605_v20, %v9605_v20 }
 0x805   : > { %v9675_v3 = vmul.f32 %v10405_v14, %v10405_v14  ;;  %v9608_v41 = vpop.f32.mrb[23].mxu0 }
 0x806   : > { %v9673_v17 = vmul.f32 %v9608_v41, %v9608_v41 }
 0x807   : > { %v9695_v36 = vpack.c.bf16 %v9675_v3, %v9674_v23 }
 0x808   : > { %v9694_v1 = vpack.c.bf16 %v9673_v17, %v9672_v21 }
 0x80a   : > { %10450 = vmatprep.mubr.bf16.mxu1 %v9694_v1 }
 0x80b   : > { %10451 = vmatmul.mubr.bf16.gmra.mrb[20].mxu1 %v9695_v36 }
 0x83b   : > { %v10408_v13 = vpop.f32.mrb[24].mxu0 }
 0x83c   : > { %v9621_v42 = vpop.f32.mrb[25].mxu0  ;;  %v9678_v26 = vmul.f32 %v10408_v13, %v10408_v13 }
 0x83d   : > { %v10409_v24 = vpop.f32.mrb[26].mxu0  ;;  %v9676_v48 = vmul.f32 %v9621_v42, %v9621_v42 }
 0x83e   : > { %v9679_v29 = vmul.f32 %v10409_v24, %v10409_v24  ;;  %v9624_v16 = vpop.f32.mrb[27].mxu0 }
 0x83f   : > { %v9677_v8 = vmul.f32 %v9624_v16, %v9624_v16 }
 0x840   : > { %v9697_v61 = vpack.c.bf16 %v9679_v29, %v9678_v26 }
 0x841   : > { %v9696_v0 = vpack.c.bf16 %v9677_v8, %v9676_v48 }
 0x843   : > { %10454 = vmatprep.mubr.bf16.mxu1 %v9696_v0 }
 0x844   : > { %10455 = vmatmul.mubr.bf16.gmra.mrb[24].mxu1 %v9697_v61 }
 0x866   : > { %v10432_v37 = vpop.f32.mrb[0].mxu1 }
 0x867   : > { %9927 = vst [vmem:[%s16524_s27 + $0x10] sm:$0xff] %v10432_v37  ;;  %v9798_v63 = vpop.f32.mrb[1].mxu1 }
 0x868   : > { %9925 = vst [vmem:[%s16524_s27] sm:$0xff] %v9798_v63  ;;  %v10433_v50 = vpop.f32.mrb[2].mxu1 }
 0x869   : > { %9928 = vst [vmem:[%s16524_s27 + $0x18] sm:$0xff] %v10433_v50  ;;  %v9801_v58 = vpop.f32.mrb[3].mxu1 }
 0x86a   : > { %9926 = vst [vmem:[%s16524_s27 + $0x8] sm:$0xff] %v9801_v58 }
 0x872   : > { %v10412_v2 = vpop.f32.mrb[28].mxu0 }
 0x873   : > { %v9637_v31 = vpop.f32.mrb[29].mxu0  ;;  %v9682_v6 = vmul.f32 %v10412_v2, %v10412_v2 }
 0x874   : > { %v10413_v7 = vpop.f32.mrb[30].mxu0  ;;  %v9680_v25 = vmul.f32 %v9637_v31, %v9637_v31 }
 0x875   : > { %v9683_v46 = vmul.f32 %v10413_v7, %v10413_v7  ;;  %v9640_v4 = vpop.f32.mrb[31].mxu0 }
 0x876   : > { %v9681_v30 = vmul.f32 %v9640_v4, %v9640_v4 }
 0x877   : > { %v9699_v12 = vpack.c.bf16 %v9683_v46, %v9682_v6  ;;  %v10436_v35 = vpop.f32.mrb[4].mxu1 }
 0x878   : > { %v9698_v40 = vpack.c.bf16 %v9681_v30, %v9680_v25  ;;  %9931 = vst [vmem:[%s16524_s27 + $0x30] sm:$0xff] %v10436_v35  ;;  %v9814_v49 = vpop.f32.mrb[5].mxu1 }
 0x879   : > { %9929 = vst [vmem:[%s16524_s27 + $0x20] sm:$0xff] %v9814_v49  ;;  %v10437_v43 = vpop.f32.mrb[6].mxu1 }
 0x87a   : > { %10458 = vmatprep.mubr.bf16.mxu1 %v9698_v40  ;;  %9932 = vst [vmem:[%s16524_s27 + $0x38] sm:$0xff] %v10437_v43  ;;  %v9817_v18 = vpop.f32.mrb[7].mxu1 }
 0x87b   : > { %10459 = vmatmul.mubr.bf16.gmra.mrb[28].mxu1 %v9699_v12  ;;  %9930 = vst [vmem:[%s16524_s27 + $0x28] sm:$0xff] %v9817_v18 }
 0x886   : > { %v10440_v33 = vpop.f32.mrb[8].mxu1 }
 0x887   : > { %9935 = vst [vmem:[%s16524_s27 + $0x50] sm:$0xff] %v10440_v33  ;;  %v9830_v22 = vpop.f32.mrb[9].mxu1 }
 0x888   : > { %9933 = vst [vmem:[%s16524_s27 + $0x40] sm:$0xff] %v9830_v22  ;;  %v10441_v51 = vpop.f32.mrb[10].mxu1 }
 0x889   : > { %9936 = vst [vmem:[%s16524_s27 + $0x58] sm:$0xff] %v10441_v51  ;;  %v9833_v32 = vpop.f32.mrb[11].mxu1 }
 0x88a   : > { %9934 = vst [vmem:[%s16524_s27 + $0x48] sm:$0xff] %v9833_v32 }
 0x896   : > { %v10444_v38 = vpop.f32.mrb[12].mxu1 }
 0x897   : > { %9939 = vst [vmem:[%s16524_s27 + $0x70] sm:$0xff] %v10444_v38  ;;  %v9846_v55 = vpop.f32.mrb[13].mxu1 }
 0x898   : > { %9937 = vst [vmem:[%s16524_s27 + $0x60] sm:$0xff] %v9846_v55  ;;  %v10445_v28 = vpop.f32.mrb[14].mxu1 }
 0x899   : > { %9940 = vst [vmem:[%s16524_s27 + $0x78] sm:$0xff] %v10445_v28  ;;  %v9849_v56 = vpop.f32.mrb[15].mxu1 }
 0x89a   : > { %9938 = vst [vmem:[%s16524_s27 + $0x68] sm:$0xff] %v9849_v56 }
 0x8a7   : > { %v10448_v54 = vpop.f32.mrb[16].mxu1 }
 0x8a8   : > { %9943 = vst [vmem:[%s16524_s27 + $0x90] sm:$0xff] %v10448_v54  ;;  %v9862_v34 = vpop.f32.mrb[17].mxu1 }
 0x8a9   : > { %9941 = vst [vmem:[%s16524_s27 + $0x80] sm:$0xff] %v9862_v34  ;;  %v10449_v62 = vpop.f32.mrb[18].mxu1 }
 0x8aa   : > { %9944 = vst [vmem:[%s16524_s27 + $0x98] sm:$0xff] %v10449_v62  ;;  %v9865_v5 = vpop.f32.mrb[19].mxu1 }
 0x8ab   : > { %9942 = vst [vmem:[%s16524_s27 + $0x88] sm:$0xff] %v9865_v5 }
 0x8de   : > { %v10452_v47 = vpop.f32.mrb[20].mxu1 }
 0x8df   : > { %9947 = vst [vmem:[%s16524_s27 + $0xb0] sm:$0xff] %v10452_v47  ;;  %v9878_v59 = vpop.f32.mrb[21].mxu1 }
 0x8e0   : > { %9945 = vst [vmem:[%s16524_s27 + $0xa0] sm:$0xff] %v9878_v59  ;;  %v10453_v52 = vpop.f32.mrb[22].mxu1 }
 0x8e1   : > { %9948 = vst [vmem:[%s16524_s27 + $0xb8] sm:$0xff] %v10453_v52  ;;  %v9881_v60 = vpop.f32.mrb[23].mxu1 }
 0x8e2   : > { %9946 = vst [vmem:[%s16524_s27 + $0xa8] sm:$0xff] %v9881_v60 }
 0x917   : > { %v10456_v15 = vpop.f32.mrb[24].mxu1 }
 0x918   : > { %9951 = vst [vmem:[%s16524_s27 + $0xd0] sm:$0xff] %v10456_v15  ;;  %v9894_v27 = vpop.f32.mrb[25].mxu1 }
 0x919   : > { %9949 = vst [vmem:[%s16524_s27 + $0xc0] sm:$0xff] %v9894_v27  ;;  %v10457_v39 = vpop.f32.mrb[26].mxu1 }
 0x91a   : > { %9952 = vst [vmem:[%s16524_s27 + $0xd8] sm:$0xff] %v10457_v39  ;;  %v9897_v10 = vpop.f32.mrb[27].mxu1 }
 0x91b   : > { %9950 = vst [vmem:[%s16524_s27 + $0xc8] sm:$0xff] %v9897_v10 }
 0x94e   : > { %v10460_v45 = vpop.f32.mrb[28].mxu1 }
 0x94f   : > { %9955 = vst [vmem:[%s16524_s27 + $0xf0] sm:$0xff] %v10460_v45  ;;  %v9910_v44 = vpop.f32.mrb[29].mxu1 }
 0x950   : > { %9953 = vst [vmem:[%s16524_s27 + $0xe0] sm:$0xff] %v9910_v44  ;;  %v10461_v19 = vpop.f32.mrb[30].mxu1 }
 0x951   : > { %9956 = vst [vmem:[%s16524_s27 + $0xf8] sm:$0xff] %v10461_v19  ;;  %v9913_v11 = vpop.f32.mrb[31].mxu1 }
 0x952   : > { %9954 = vst [vmem:[%s16524_s27 + $0xe8] sm:$0xff] %v9913_v11 }
 0x953   : > { %10856 = shalt.err (!%p10853_p3)
}
 0x954   : > { %s10857_s10 = scalar_lea.hbm %s16560_s5, 4096  ;;  %s10861_s19 = scalar_lea.hbm %s16613_s3, 8192 }
 0x955   : > { %p10858_p4 = scmp.ne.s32.totalorder %s16560_s5, %s10857_s10  ;;  %p10862_p9 = scmp.lt.u32.totalorder %s16560_s5, %s16613_s3 }
 0x956   : > { %p10863_p10 = scmp.lt.u32.totalorder %s10861_s19, %s10857_s10  ;;  %p10865_p12 = scmp.lt.u32.totalorder %s10857_s10, %s16560_s5 }
 0x957   : > { %p10859_p7 = pnand %p10858_p4, %p10981_p5 }
 0x958   : > { %p10864_p11 = por %p10863_p10, %p10862_p9 }
 0x959   : > { %p10860_p8 = pneg %p10859_p7 }
 0x95a   : > { %p10866_p13 = por %p10865_p12, %p10864_p11 }
 0x95c   : > { %p10867_p0 = pnand %p10866_p13, %p10860_p8 }
 0x95e   : > { %10870 = shalt.err (!%p10867_p0)
}
 0x95f   : > { %s10921_s25 = smov 128   ;;  %s10922_s26 = smov 8  }
 0x960   : > { %10590 = dma.vmem_to_hbm [thread:$0]  (%p10981_p5), %s16562_s29, 4096, %s16560_s5, %s16569_s16, %s10921_s25, %s10921_s25, %s10922_s26  }
 0x961 PF: > { %p10596_p1 = scmp.ge.s32.totalorder %s10905_s15, 2  ;;  %s9986_s27 = sand.u32 1, %s10893_s12  }
 0x962   : > { %s9987_s28 = scalar_lea.sflag [#allocation3], %s9986_s27 }
 0x963   : > { %p10593_p2 = pnand %p10596_p1, %p10985_p6 }
 0x965   : > { %10888 = dma.done.wait (!%p10593_p2), %s9987_s28, 4096  }
 0x966   : > { %10890 = vsyncadd (!%p10593_p2), %s9987_s28, 4294963200  ;;  %p13_p3 = scmp.ge.s32.totalorder %s10968_s18, 4   ;;  %s17708_s12 = smov %s10897_s13 }
 0x967   : > { %s17709_s13 = smov %s10901_s14  ;;  %s17710_s14 = smov %s10979_s21 }
 0x968   : > { %s17711_s15 = smov %s10968_s18  ;;  %15 = sbr.rel (!%p13_p3) target bundleno = 3 (0x3), region = 67 }
 0x96f   :  { %9992 = vsyncpa [#allocation3], 1 }
 0x970   :  { %9994 = vsyncpa [#allocation3 + $0x1], 1 }

</bundles_post_ra>
